<compile_context>
chip_gen: v5e
topology: v5e:2x2
jax: 0.10.0
libtpu: 0.0.40
codegen_flags: <defaults>
</compile_context>

<pallas_src>
import functools
from typing import NamedTuple

import jax
import jax.numpy as jnp
from jax.experimental import pallas as pl
from jax.experimental.pallas import tpu as pltpu

EPS = 1e-5     # nn.InstanceNorm2d default eps
LANE = 128     # TPU lane width; channel dims are zero-padded to a multiple


def _round_up(v, m):
    return (v + m - 1) // m * m


class _Act(NamedTuple):
    """Activation in full-width layout: (N, Ho, Wq, Cp).

    Columns >= wo and channels >= c are exactly zero (maintained by the
    kernels), so the tensor can be consumed as a residual with no re-layout
    and sliced lazily when building the next layer's padded input.
    """
    data: jax.Array
    wo: int
    c: int


# ----------------------------- Pallas kernels ------------------------------
#
# Per-sample layout (one grid step per batch sample):
#   x_ref : (1, P, PQ, Cx) bf16 -- P stride phases (1 for stride-1 / folded),
#           each flattened to PQ rows of width Wq; tap t is the contiguous
#           row-slice [off_t, off_t + PF).
#   w_ref : (T, Cx, Cout_p) bf16 -- one (Cx, Cout_p) matrix per tap.
#   o_ref : (1, PF, Cout_p)      -- PF = Ho*Wq rows; columns wq >= Wo are
#           masked out of the InstanceNorm statistics and written as zero.


def _conv_in_body(x_ref, w_ref, *, taps, Wq, Ho, Wo):
    cout = w_ref.shape[-1]
    PF = Ho * Wq
    acc = jnp.zeros((PF, cout), jnp.float32)
    for t, (ph, off) in enumerate(taps):
        xs = x_ref[0, ph, off:off + PF, :]                    # (PF, Cx) bf16
        acc = acc + jnp.dot(xs, w_ref[t],
                            preferred_element_type=jnp.float32)
    # One-pass masked InstanceNorm statistics over the Ho*Wo valid positions.
    col = jax.lax.broadcasted_iota(jnp.int32, (PF, 1), 0) % Wq
    valid = col < Wo
    inv_cnt = 1.0 / float(Ho * Wo)
    acc_m = jnp.where(valid, acc, 0.0)
    mean = jnp.sum(acc_m, axis=0, keepdims=True) * inv_cnt
    ex2 = jnp.sum(acc_m * acc_m, axis=0, keepdims=True) * inv_cnt
    var = jnp.maximum(ex2 - mean * mean, 0.0)    # clamp (f32 cancellation)
    inv_std = jax.lax.rsqrt(var + EPS)
    # Garbage rows are forced to exactly zero (keeps the layout invariant).
    return jnp.where(valid, (acc - mean) * inv_std, 0.0)


def _conv_in_kernel(x_ref, w_ref, o_ref, *, relu, **kw):
    y = _conv_in_body(x_ref, w_ref, **kw)
    if relu:
        y = jnp.maximum(y, 0.0)
    o_ref[0] = y.astype(o_ref.dtype)


def _conv_in_res_kernel(x_ref, w_ref, r_ref, o_ref, **kw):
    # Second conv of a ResBlk: InstanceNorm output + residual, no ReLU.
    # Residual garbage columns/channels are zero, so the invariant holds.
    y = _conv_in_body(x_ref, w_ref, **kw)
    o_ref[0] = (y + r_ref[0].astype(jnp.float32)).astype(o_ref.dtype)


# ------------------------------ layer wrapper -------------------------------

def conv_instnorm(act, w, *, stride, padding, pad_mode, relu,
                  residual=None, wq_out=None, act_dtype=jnp.bfloat16):
    """Fused Conv2d + InstanceNorm2d (+ReLU / +residual add).

    act      : _Act in full-width layout.
    w        : (Cout, Cin, KH, KW) PyTorch-layout weights.
    residual : optional _Act added after the norm (must share (Ho, Wq, Cp)).
    wq_out   : optional minimum output-row width (for residual layout match).
    returns  : _Act with data shape (N, Ho, Wq, round_up(Cout, 128)).
    """
    data, wo_in, cin = act.data, act.wo, act.c
    N, H, _, _ = data.shape
    Cout, cin_w, KH, KW = w.shape
    assert cin_w == cin, (cin_w, cin)
    Cout_p = _round_up(Cout, LANE)
    s = stride

    # --- valid region, spatial padding (glue; slices fuse into the pad) -----
    xv = data[:, :, :wo_in, :cin].astype(jnp.bfloat16)
    pads = ((0, 0), (padding, padding), (padding, padding), (0, 0))
    if pad_mode == "reflect":
        xp = jnp.pad(xv, pads, mode="reflect")
    else:
        xp = jnp.pad(xv, pads)
    Hp, Wp = H + 2 * padding, wo_in + 2 * padding
    Ho = (Hp - KH) // s + 1
    Wo = (Wp - KW) // s + 1

    # KW-fold: pack the kw taps + Cin into the MXU contraction dim whenever
    # that still fits one lane group (no extra HBM bytes, KWx fewer matmuls).
    fold = (s == 1) and (KW * cin <= LANE)
    wq_min = Wo if fold else -(-Wp // s)
    Wq = _round_up(max(wq_min, wq_out or 0), 8)     # sublane-aligned row width
    PF = Ho * Wq

    if fold:
        Cx = _round_up(KW * cin, LANE)
        # extend width so every kw-shifted slice of width Wq exists
        xp = jnp.pad(xp, ((0, 0), (0, 0), (0, Wq + KW - 1 - Wp), (0, 0)))
        xf = jnp.concatenate([xp[:, :, kw:kw + Wq, :] for kw in range(KW)],
                             axis=-1)                       # (N,Hp,Wq,KW*cin)
        xf = jnp.pad(xf, ((0, 0), (0, 0), (0, 0), (0, Cx - KW * cin)))
        P, PQ = 1, Hp * Wq
        xq = xf.reshape(N, P, PQ, Cx)
        taps = tuple((0, kh * Wq) for kh in range(KH))
        wt = jnp.transpose(w, (2, 3, 1, 0)).reshape(KH, KW * cin, Cout)
        wt = jnp.pad(wt, ((0, 0), (0, Cx - KW * cin), (0, Cout_p - Cout)))
        wt = wt.astype(jnp.bfloat16)
        T = KH
    else:
        Cx = _round_up(cin, LANE)
        Hq = -(-Hp // s)
        xp = jnp.pad(xp, ((0, 0), (0, Hq * s - Hp), (0, Wq * s - Wp),
                          (0, Cx - cin)))
        xq = xp.reshape(N, Hq, s, Wq, s, Cx).transpose(0, 2, 4, 1, 3, 5)
        xq = jnp.pad(xq, ((0, 0), (0, 0), (0, 0), (0, 1), (0, 0), (0, 0)))
        P, PQ = s * s, (Hq + 1) * Wq                        # +1 guard row
        xq = xq.reshape(N, P, PQ, Cx)
        taps = tuple(((kh % s) * s + (kw % s), (kh // s) * Wq + (kw // s))
                     for kh in range(KH) for kw in range(KW))
        wt = jnp.transpose(w, (2, 3, 1, 0))                 # (KH,KW,Cin,Cout)
        wt = jnp.pad(wt, ((0, 0), (0, 0), (0, Cx - cin), (0, Cout_p - Cout)))
        wt = wt.reshape(KH * KW, Cx, Cout_p).astype(jnp.bfloat16)
        T = KH * KW

    kern_kw = dict(taps=taps, Wq=Wq, Ho=Ho, Wo=Wo)
    in_specs = [
        pl.BlockSpec((1, P, PQ, Cx), lambda n: (n, 0, 0, 0)),
        pl.BlockSpec((T, Cx, Cout_p), lambda n: (0, 0, 0)),   # weights resident
    ]
    out_spec = pl.BlockSpec((1, PF, Cout_p), lambda n: (n, 0, 0))
    out_shape = jax.ShapeDtypeStruct((N, PF, Cout_p), act_dtype)

    # explicit scoped-VMEM budget from the actual block sizes (+ headroom)
    vmem = 2 * (P * PQ * Cx * 2 + PF * Cout_p * 2)   # double-buffered in/out
    vmem += 2 * T * Cx * Cout_p * 2                  # weights (double-buffered)
    vmem += PF * Cout_p * 4                          # f32 accumulator
    if residual is not None:
        vmem += 2 * PF * Cout_p * 2
    vmem = int(min(max(vmem + (4 << 20), 16 << 20), 100 << 20))
    cparams = pltpu.CompilerParams(dimension_semantics=("parallel",),
                                   vmem_limit_bytes=vmem)

    if residual is None:
        kernel = functools.partial(_conv_in_kernel, relu=relu, **kern_kw)
        y = pl.pallas_call(
            kernel, grid=(N,), in_specs=in_specs, out_specs=out_spec,
            out_shape=out_shape, compiler_params=cparams,
        )(xq, wt)
    else:
        assert residual.data.shape == (N, Ho, Wq, Cout_p), \
            (residual.data.shape, (N, Ho, Wq, Cout_p))
        r = residual.data.reshape(N, PF, Cout_p).astype(act_dtype)  # free reshape
        kernel = functools.partial(_conv_in_res_kernel, **kern_kw)
        y = pl.pallas_call(
            kernel, grid=(N,),
            in_specs=in_specs + [pl.BlockSpec((1, PF, Cout_p),
                                              lambda n: (n, 0, 0))],
            out_specs=out_spec, out_shape=out_shape, compiler_params=cparams,
        )(xq, wt, r)

    return _Act(y.reshape(N, Ho, Wq, Cout_p), Wo, Cout)


# --------------------------- ContentEncoder forward --------------------------

def content_encoder_forward(x_nchw, params, *, n_blks, n_downsample,
                            act_dtype=jnp.bfloat16):
    x = jnp.transpose(x_nchw, (0, 2, 3, 1))                  # NCHW -> NHWC
    N, H, W, Cin = x.shape
    act = _Act(x, W, Cin)
    cur_w = W

    # bias is a no-op before (non-affine) InstanceNorm -> dropped everywhere
    w, _ = params["stem"]
    hint = (cur_w + 2) if (n_downsample == 0 and n_blks > 0) else None
    act = conv_instnorm(act, w, stride=1, padding=3, pad_mode="reflect",
                        relu=True, wq_out=hint, act_dtype=act_dtype)

    for i in range(n_downsample):
        cur_w //= 2
        hint = (cur_w + 2) if (i == n_downsample - 1 and n_blks > 0) else None
        w, _ = params[f"down{i}"]
        act = conv_instnorm(act, w, stride=2, padding=1, pad_mode="zero",
                            relu=True, wq_out=hint, act_dtype=act_dtype)

    wq_trunk = act.data.shape[2]
    for i in range(n_blks):
        w1, _ = params[f"res{i}_1"]
        w2, _ = params[f"res{i}_2"]
        h = conv_instnorm(act, w1, stride=1, padding=1, pad_mode="reflect",
                          relu=True, wq_out=wq_trunk, act_dtype=act_dtype)
        # residual consumed directly in full-width layout (no crop / re-pad)
        act = conv_instnorm(h, w2, stride=1, padding=1, pad_mode="reflect",
                            relu=False, residual=act, wq_out=wq_trunk,
                            act_dtype=act_dtype)

    y = act.data[:, :, :act.wo, :act.c].astype(jnp.float32)  # single final crop
    return jnp.transpose(y, (0, 3, 1, 2))                    # NHWC -> NCHW


# ------------------------------ pure-JAX reference ---------------------------

def _ref_conv_in(x, w, b, *, stride, padding, pad_mode, relu, residual=None):
    if pad_mode == "reflect":
        xp = jnp.pad(x, ((0, 0), (padding, padding), (padding, padding), (0, 0)),
                     mode="reflect")
    else:
        xp = jnp.pad(x, ((0, 0), (padding, padding), (padding, padding), (0, 0)))
    w_hwio = jnp.transpose(w, (2, 3, 1, 0))
    y = jax.lax.conv_general_dilated(
        xp, w_hwio, (stride, stride), "VALID",
        dimension_numbers=("NHWC", "HWIO", "NHWC"),
        precision=jax.lax.Precision.HIGHEST) + b
    mean = jnp.mean(y, axis=(1, 2), keepdims=True)
    var = jnp.mean(jnp.square(y - mean), axis=(1, 2), keepdims=True)
    y = (y - mean) * jax.lax.rsqrt(var + EPS)
    if relu:
        y = jnp.maximum(y, 0.0)
    if residual is not None:
        y = y + residual
    return y


def content_encoder_reference(x_nchw, params, *, n_blks, n_downsample):
    x = jnp.transpose(x_nchw, (0, 2, 3, 1))
    w, b = params["stem"]
    x = _ref_conv_in(x, w, b, stride=1, padding=3, pad_mode="reflect", relu=True)
    for i in range(n_downsample):
        w, b = params[f"down{i}"]
        x = _ref_conv_in(x, w, b, stride=2, padding=1, pad_mode="zero", relu=True)
    for i in range(n_blks):
        w1, b1 = params[f"res{i}_1"]
        w2, b2 = params[f"res{i}_2"]
        h = _ref_conv_in(x, w1, b1, stride=1, padding=1, pad_mode="reflect",
                         relu=True)
        x = _ref_conv_in(h, w2, b2, stride=1, padding=1, pad_mode="reflect",
                         relu=False, residual=x)
    return jnp.transpose(x, (0, 3, 1, 2))


# ------------------------------ parameter init -------------------------------

def init_params(key, in_ch, nef, n_blks, n_downsample):
    params = {}

    def conv_p(k, cout, cin, ksz):
        kw, kb = jax.random.split(k)
        scale = 1.0 / float(cin * ksz * ksz) ** 0.5
        w = jax.random.normal(kw, (cout, cin, ksz, ksz), jnp.float32) * scale
        b = jax.random.normal(kb, (cout,), jnp.float32) * 0.01
        return w, b

    keys = jax.random.split(key, 1 + n_downsample + 2 * n_blks)
    ki = iter(keys)

    params["stem"] = conv_p(next(ki), nef, in_ch, 7)
    ch = nef
    for i in range(n_downsample):
        params[f"down{i}"] = conv_p(next(ki), ch * 2, ch, 4)
        ch *= 2
    for i in range(n_blks):
        params[f"res{i}_1"] = conv_p(next(ki), ch, ch, 3)
        params[f"res{i}_2"] = conv_p(next(ki), ch, ch, 3)
    return params


# ----------------------------------- main ------------------------------------

if __name__ == "__main__":
    in_ch, nef, n_blks, n_downsample = 4, 8, 3, 2   # small but structure-faithful
    N, H, W = 2, 16, 16

    key = jax.random.PRNGKey(0)
    kp, kx = jax.random.split(key)
    params = init_params(kp, in_ch, nef, n_blks, n_downsample)
    x = jax.random.normal(kx, (N, in_ch, H, W), jnp.float32)

    fwd = jax.jit(functools.partial(content_encoder_forward,
                                    n_blks=n_blks, n_downsample=n_downsample))
    y = jax.block_until_ready(fwd(x, params))

    # shape: spatial /4 (two stride-2 convs), channels nef*4
    assert y.shape == (N, nef * 4, H // 4, W // 4), y.shape
    assert y.dtype == jnp.float32

    y_ref = content_encoder_reference(x, params, n_blks=n_blks,
                                      n_downsample=n_downsample)
    diff = y - y_ref
    rel_l2 = float(jnp.linalg.norm(diff) / jnp.linalg.norm(y_ref))
    max_abs = float(jnp.max(jnp.abs(diff)))
    # bf16 operands / activations through 8 conv+InstanceNorm layers vs. an f32
    # HIGHEST-precision reference: expect ~0.5-1% relative L2 error.
    assert rel_l2 < 5e-2, f"rel l2 error {rel_l2}"
    assert max_abs < 0.5, f"max abs error {max_abs}"

    print("KERNEL_OK")
</pallas_src>

<mosaic_0001>
module attributes {stable_mosaic.version = 11 : i64} {
  func.func @_conv_in_kernel(%arg0: i32, %arg1: memref<1x1x352x128xbf16, #tpu.memory_space<vmem>>, %arg2: memref<7x128x128xbf16, #tpu.memory_space<vmem>>, %arg3: memref<1x256x128xbf16, #tpu.memory_space<vmem>>) attributes {dimension_semantics = [#tpu.dimension_semantics<parallel>], iteration_bounds = array<i64: 2>, scalar_prefetch = 0 : i64, scratch_operands = 0 : i64, tpu.core_type = #tpu.core_type<tc>, window_params = [{transform_indices = @transform_0, window_bounds = array<i64: 1, 1, 352, 128>}, {pipeline_mode = #tpu.pipeline_mode<synchronous>, transform_indices = @transform_1, window_bounds = array<i64: 7, 128, 128>}, {transform_indices = @transform_2, window_bounds = array<i64: 1, 256, 128>}]} {
    %cst = arith.constant 0.000000e+00 : f32
    %0 = vector.broadcast %cst : f32 to vector<256x128xf32>
    %c0 = arith.constant 0 : index
    %c0_0 = arith.constant 0 : index
    %c0_1 = arith.constant 0 : index
    %c0_2 = arith.constant 0 : index
    %1 = vector.load %arg1[%c0, %c0_0, %c0_1, %c0_2] : memref<1x1x352x128xbf16, #tpu.memory_space<vmem>>, vector<1x1x256x128xbf16>
    %2 = vector.shape_cast %1 : vector<1x1x256x128xbf16> to vector<256x128xbf16>
    %c0_3 = arith.constant 0 : index
    %c0_4 = arith.constant 0 : index
    %c0_5 = arith.constant 0 : index
    %3 = vector.load %arg2[%c0_3, %c0_4, %c0_5] : memref<7x128x128xbf16, #tpu.memory_space<vmem>>, vector<1x128x128xbf16>
    %4 = vector.shape_cast %3 : vector<1x128x128xbf16> to vector<128x128xbf16>
    %cst_6 = arith.constant dense<0.000000e+00> : vector<256x128xf32>
    %5 = tpu.matmul %2, %4, %cst_6 {dimension_numbers = #tpu.dot_dimension_numbers<[1], [0], [0], [1], [0, 0, 1, 1], [], []>} : vector<256x128xbf16>, vector<128x128xbf16>, vector<256x128xf32> -> vector<256x128xf32>
    %6 = arith.addf %0, %5 : vector<256x128xf32>
    %c0_7 = arith.constant 0 : index
    %c0_8 = arith.constant 0 : index
    %c16 = arith.constant 16 : index
    %c0_9 = arith.constant 0 : index
    %7 = vector.load %arg1[%c0_7, %c0_8, %c16, %c0_9] : memref<1x1x352x128xbf16, #tpu.memory_space<vmem>>, vector<1x1x256x128xbf16>
    %8 = vector.shape_cast %7 : vector<1x1x256x128xbf16> to vector<256x128xbf16>
    %c1 = arith.constant 1 : index
    %c0_10 = arith.constant 0 : index
    %c0_11 = arith.constant 0 : index
    %9 = vector.load %arg2[%c1, %c0_10, %c0_11] : memref<7x128x128xbf16, #tpu.memory_space<vmem>>, vector<1x128x128xbf16>
    %10 = vector.shape_cast %9 : vector<1x128x128xbf16> to vector<128x128xbf16>
    %cst_12 = arith.constant dense<0.000000e+00> : vector<256x128xf32>
    %11 = tpu.matmul %8, %10, %cst_12 {dimension_numbers = #tpu.dot_dimension_numbers<[1], [0], [0], [1], [0, 0, 1, 1], [], []>} : vector<256x128xbf16>, vector<128x128xbf16>, vector<256x128xf32> -> vector<256x128xf32>
    %12 = arith.addf %6, %11 : vector<256x128xf32>
    %c0_13 = arith.constant 0 : index
    %c0_14 = arith.constant 0 : index
    %c32 = arith.constant 32 : index
    %c0_15 = arith.constant 0 : index
    %13 = vector.load %arg1[%c0_13, %c0_14, %c32, %c0_15] : memref<1x1x352x128xbf16, #tpu.memory_space<vmem>>, vector<1x1x256x128xbf16>
    %14 = vector.shape_cast %13 : vector<1x1x256x128xbf16> to vector<256x128xbf16>
    %c2 = arith.constant 2 : index
    %c0_16 = arith.constant 0 : index
    %c0_17 = arith.constant 0 : index
    %15 = vector.load %arg2[%c2, %c0_16, %c0_17] : memref<7x128x128xbf16, #tpu.memory_space<vmem>>, vector<1x128x128xbf16>
    %16 = vector.shape_cast %15 : vector<1x128x128xbf16> to vector<128x128xbf16>
    %cst_18 = arith.constant dense<0.000000e+00> : vector<256x128xf32>
    %17 = tpu.matmul %14, %16, %cst_18 {dimension_numbers = #tpu.dot_dimension_numbers<[1], [0], [0], [1], [0, 0, 1, 1], [], []>} : vector<256x128xbf16>, vector<128x128xbf16>, vector<256x128xf32> -> vector<256x128xf32>
    %18 = arith.addf %12, %17 : vector<256x128xf32>
    %c0_19 = arith.constant 0 : index
    %c0_20 = arith.constant 0 : index
    %c48 = arith.constant 48 : index
    %c0_21 = arith.constant 0 : index
    %19 = vector.load %arg1[%c0_19, %c0_20, %c48, %c0_21] : memref<1x1x352x128xbf16, #tpu.memory_space<vmem>>, vector<1x1x256x128xbf16>
    %20 = vector.shape_cast %19 : vector<1x1x256x128xbf16> to vector<256x128xbf16>
    %c3 = arith.constant 3 : index
    %c0_22 = arith.constant 0 : index
    %c0_23 = arith.constant 0 : index
    %21 = vector.load %arg2[%c3, %c0_22, %c0_23] : memref<7x128x128xbf16, #tpu.memory_space<vmem>>, vector<1x128x128xbf16>
    %22 = vector.shape_cast %21 : vector<1x128x128xbf16> to vector<128x128xbf16>
    %cst_24 = arith.constant dense<0.000000e+00> : vector<256x128xf32>
    %23 = tpu.matmul %20, %22, %cst_24 {dimension_numbers = #tpu.dot_dimension_numbers<[1], [0], [0], [1], [0, 0, 1, 1], [], []>} : vector<256x128xbf16>, vector<128x128xbf16>, vector<256x128xf32> -> vector<256x128xf32>
    %24 = arith.addf %18, %23 : vector<256x128xf32>
    %c0_25 = arith.constant 0 : index
    %c0_26 = arith.constant 0 : index
    %c64 = arith.constant 64 : index
    %c0_27 = arith.constant 0 : index
    %25 = vector.load %arg1[%c0_25, %c0_26, %c64, %c0_27] : memref<1x1x352x128xbf16, #tpu.memory_space<vmem>>, vector<1x1x256x128xbf16>
    %26 = vector.shape_cast %25 : vector<1x1x256x128xbf16> to vector<256x128xbf16>
    %c4 = arith.constant 4 : index
    %c0_28 = arith.constant 0 : index
    %c0_29 = arith.constant 0 : index
    %27 = vector.load %arg2[%c4, %c0_28, %c0_29] : memref<7x128x128xbf16, #tpu.memory_space<vmem>>, vector<1x128x128xbf16>
    %28 = vector.shape_cast %27 : vector<1x128x128xbf16> to vector<128x128xbf16>
    %cst_30 = arith.constant dense<0.000000e+00> : vector<256x128xf32>
    %29 = tpu.matmul %26, %28, %cst_30 {dimension_numbers = #tpu.dot_dimension_numbers<[1], [0], [0], [1], [0, 0, 1, 1], [], []>} : vector<256x128xbf16>, vector<128x128xbf16>, vector<256x128xf32> -> vector<256x128xf32>
    %30 = arith.addf %24, %29 : vector<256x128xf32>
    %c0_31 = arith.constant 0 : index
    %c0_32 = arith.constant 0 : index
    %c80 = arith.constant 80 : index
    %c0_33 = arith.constant 0 : index
    %31 = vector.load %arg1[%c0_31, %c0_32, %c80, %c0_33] : memref<1x1x352x128xbf16, #tpu.memory_space<vmem>>, vector<1x1x256x128xbf16>
    %32 = vector.shape_cast %31 : vector<1x1x256x128xbf16> to vector<256x128xbf16>
    %c5 = arith.constant 5 : index
    %c0_34 = arith.constant 0 : index
    %c0_35 = arith.constant 0 : index
    %33 = vector.load %arg2[%c5, %c0_34, %c0_35] : memref<7x128x128xbf16, #tpu.memory_space<vmem>>, vector<1x128x128xbf16>
    %34 = vector.shape_cast %33 : vector<1x128x128xbf16> to vector<128x128xbf16>
    %cst_36 = arith.constant dense<0.000000e+00> : vector<256x128xf32>
    %35 = tpu.matmul %32, %34, %cst_36 {dimension_numbers = #tpu.dot_dimension_numbers<[1], [0], [0], [1], [0, 0, 1, 1], [], []>} : vector<256x128xbf16>, vector<128x128xbf16>, vector<256x128xf32> -> vector<256x128xf32>
    %36 = arith.addf %30, %35 : vector<256x128xf32>
    %c0_37 = arith.constant 0 : index
    %c0_38 = arith.constant 0 : index
    %c96 = arith.constant 96 : index
    %c0_39 = arith.constant 0 : index
    %37 = vector.load %arg1[%c0_37, %c0_38, %c96, %c0_39] : memref<1x1x352x128xbf16, #tpu.memory_space<vmem>>, vector<1x1x256x128xbf16>
    %38 = vector.shape_cast %37 : vector<1x1x256x128xbf16> to vector<256x128xbf16>
    %c6 = arith.constant 6 : index
    %c0_40 = arith.constant 0 : index
    %c0_41 = arith.constant 0 : index
    %39 = vector.load %arg2[%c6, %c0_40, %c0_41] : memref<7x128x128xbf16, #tpu.memory_space<vmem>>, vector<1x128x128xbf16>
    %40 = vector.shape_cast %39 : vector<1x128x128xbf16> to vector<128x128xbf16>
    %cst_42 = arith.constant dense<0.000000e+00> : vector<256x128xf32>
    %41 = tpu.matmul %38, %40, %cst_42 {dimension_numbers = #tpu.dot_dimension_numbers<[1], [0], [0], [1], [0, 0, 1, 1], [], []>} : vector<256x128xbf16>, vector<128x128xbf16>, vector<256x128xf32> -> vector<256x128xf32>
    %42 = arith.addf %36, %41 : vector<256x128xf32>
    %43 = tpu.iota {dimensions = array<i32: 0>} : vector<256x1xi32>
    %c16_i32 = arith.constant 16 : i32
    %c0_i32 = arith.constant 0 : i32
    %44 = arith.cmpi eq, %c16_i32, %c0_i32 : i32
    %c1_i32 = arith.constant 1 : i32
    %45 = arith.select %44, %c1_i32, %c16_i32 : i32
    %46 = vector.broadcast %45 : i32 to vector<256x1xi32>
    %47 = arith.remsi %43, %46 : vector<256x1xi32>
    %c0_i32_43 = arith.constant 0 : i32
    %48 = vector.broadcast %c0_i32_43 : i32 to vector<256x1xi32>
    %49 = arith.cmpi ne, %47, %48 : vector<256x1xi32>
    %c0_i32_44 = arith.constant 0 : i32
    %50 = vector.broadcast %c0_i32_44 : i32 to vector<256x1xi32>
    %51 = arith.cmpi slt, %47, %50 : vector<256x1xi32>
    %c0_i32_45 = arith.constant 0 : i32
    %52 = arith.cmpi slt, %45, %c0_i32_45 : i32
    %53 = vector.broadcast %52 : i1 to vector<256x1xi1>
    %54 = vector.broadcast %53 : vector<256x1xi1> to vector<256x1xi1>
    %55 = arith.xori %51, %54 : vector<256x1xi1>
    %56 = arith.andi %55, %49 : vector<256x1xi1>
    %57 = vector.broadcast %45 : i32 to vector<256x1xi32>
    %58 = arith.addi %47, %57 : vector<256x1xi32>
    %59 = arith.select %56, %58, %47 : vector<256x1xi1>, vector<256x1xi32>
    %c16_i32_46 = arith.constant 16 : i32
    %60 = vector.broadcast %c16_i32_46 : i32 to vector<256x1xi32>
    %61 = arith.cmpi slt, %59, %60 : vector<256x1xi32>
    %cst_47 = arith.constant 0.000000e+00 : f32
    %62 = vector.shape_cast %61 : vector<256x1xi1> to vector<256x1xi1>
    %63 = vector.broadcast %62 : vector<256x1xi1> to vector<256x128xi1>
    %64 = vector.broadcast %cst_47 : f32 to vector<256x128xf32>
    %65 = arith.select %63, %42, %64 : vector<256x128xi1>, vector<256x128xf32>
    %cst_48 = arith.constant dense<0.000000e+00> : vector<128xf32>
    %66 = vector.multi_reduction <add>, %65, %cst_48 [0] : vector<256x128xf32> to vector<128xf32>
    %67 = vector.shape_cast %66 : vector<128xf32> to vector<1x128xf32>
    %cst_49 = arith.constant 3.906250e-03 : f32
    %68 = vector.broadcast %cst_49 : f32 to vector<1x128xf32>
    %69 = arith.mulf %67, %68 : vector<1x128xf32>
    %70 = arith.mulf %65, %65 : vector<256x128xf32>
    %cst_50 = arith.constant dense<0.000000e+00> : vector<128xf32>
    %71 = vector.multi_reduction <add>, %70, %cst_50 [0] : vector<256x128xf32> to vector<128xf32>
    %72 = vector.shape_cast %71 : vector<128xf32> to vector<1x128xf32>
    %cst_51 = arith.constant 3.906250e-03 : f32
    %73 = vector.broadcast %cst_51 : f32 to vector<1x128xf32>
    %74 = arith.mulf %72, %73 : vector<1x128xf32>
    %75 = arith.mulf %69, %69 : vector<1x128xf32>
    %76 = arith.subf %74, %75 : vector<1x128xf32>
    %cst_52 = arith.constant 0.000000e+00 : f32
    %77 = vector.broadcast %cst_52 : f32 to vector<1x128xf32>
    %78 = arith.maximumf %76, %77 : vector<1x128xf32>
    %cst_53 = arith.constant 9.99999974E-6 : f32
    %79 = vector.broadcast %cst_53 : f32 to vector<1x128xf32>
    %80 = arith.addf %78, %79 : vector<1x128xf32>
    %81 = math.rsqrt %80 : vector<1x128xf32>
    %82 = vector.broadcast %69 : vector<1x128xf32> to vector<256x128xf32>
    %83 = arith.subf %42, %82 : vector<256x128xf32>
    %84 = vector.broadcast %81 : vector<1x128xf32> to vector<256x128xf32>
    %85 = arith.mulf %83, %84 : vector<256x128xf32>
    %cst_54 = arith.constant 0.000000e+00 : f32
    %86 = vector.shape_cast %61 : vector<256x1xi1> to vector<256x1xi1>
    %87 = vector.broadcast %86 : vector<256x1xi1> to vector<256x128xi1>
    %88 = vector.broadcast %cst_54 : f32 to vector<256x128xf32>
    %89 = arith.select %87, %85, %88 : vector<256x128xi1>, vector<256x128xf32>
    %cst_55 = arith.constant 0.000000e+00 : f32
    %90 = vector.broadcast %cst_55 : f32 to vector<256x128xf32>
    %91 = arith.maximumf %89, %90 : vector<256x128xf32>
    %92 = arith.truncf %91 : vector<256x128xf32> to vector<256x128xbf16>
    %c0_56 = arith.constant 0 : index
    %c0_57 = arith.constant 0 : index
    %c0_58 = arith.constant 0 : index
    %93 = vector.load %arg3[%c0_56, %c0_57, %c0_58] : memref<1x256x128xbf16, #tpu.memory_space<vmem>>, vector<1x256x128xbf16>
    %94 = vector.shape_cast %93 : vector<1x256x128xbf16> to vector<256x128xbf16>
    %95 = vector.shape_cast %92 : vector<256x128xbf16> to vector<1x256x128xbf16>
    tpu.vector_store %arg3[%c0_56, %c0_57, %c0_58], %95 {strides = array<i32>} : memref<1x256x128xbf16, #tpu.memory_space<vmem>>, vector<1x256x128xbf16>,
    return
  }
  func.func @transform_0(%arg0: i32) -> (i32, i32, i32, i32) {
    %c0_i32 = arith.constant 0 : i32
    %c0_i32_0 = arith.constant 0 : i32
    %c0_i32_1 = arith.constant 0 : i32
    %c0_i32_2 = arith.constant 0 : i32
    return %arg0, %c0_i32, %c0_i32_0, %c0_i32_1 : i32, i32, i32, i32
  }
  func.func @transform_1(%arg0: i32) -> (i32, i32, i32) {
    %c0_i32 = arith.constant 0 : i32
    %c0_i32_0 = arith.constant 0 : i32
    %c0_i32_1 = arith.constant 0 : i32
    %c0_i32_2 = arith.constant 0 : i32
    return %c0_i32, %c0_i32_0, %c0_i32_1 : i32, i32, i32
  }
  func.func @transform_2(%arg0: i32) -> (i32, i32, i32) {
    %c0_i32 = arith.constant 0 : i32
    %c0_i32_0 = arith.constant 0 : i32
    %c0_i32_1 = arith.constant 0 : i32
    return %arg0, %c0_i32, %c0_i32_0 : i32, i32, i32
  }
}

module attributes {stable_mosaic.version = 11 : i64} {
  func.func @_conv_in_kernel(%arg0: i32, %arg1: memref<1x4x160x128xbf16, #tpu.memory_space<vmem>>, %arg2: memref<16x128x128xbf16, #tpu.memory_space<vmem>>, %arg3: memref<1x128x128xbf16, #tpu.memory_space<vmem>>) attributes {dimension_semantics = [#tpu.dimension_semantics<parallel>], iteration_bounds = array<i64: 2>, scalar_prefetch = 0 : i64, scratch_operands = 0 : i64, tpu.core_type = #tpu.core_type<tc>, window_params = [{transform_indices = @transform_0, window_bounds = array<i64: 1, 4, 160, 128>}, {pipeline_mode = #tpu.pipeline_mode<synchronous>, transform_indices = @transform_1, window_bounds = array<i64: 16, 128, 128>}, {transform_indices = @transform_2, window_bounds = array<i64: 1, 128, 128>}]} {
    %cst = arith.constant 0.000000e+00 : f32
    %0 = vector.broadcast %cst : f32 to vector<128x128xf32>
    %c0 = arith.constant 0 : index
    %c0_0 = arith.constant 0 : index
    %c0_1 = arith.constant 0 : index
    %c0_2 = arith.constant 0 : index
    %1 = vector.load %arg1[%c0, %c0_0, %c0_1, %c0_2] : memref<1x4x160x128xbf16, #tpu.memory_space<vmem>>, vector<1x1x128x128xbf16>
    %2 = vector.shape_cast %1 : vector<1x1x128x128xbf16> to vector<128x128xbf16>
    %c0_3 = arith.constant 0 : index
    %c0_4 = arith.constant 0 : index
    %c0_5 = arith.constant 0 : index
    %3 = vector.load %arg2[%c0_3, %c0_4, %c0_5] : memref<16x128x128xbf16, #tpu.memory_space<vmem>>, vector<1x128x128xbf16>
    %4 = vector.shape_cast %3 : vector<1x128x128xbf16> to vector<128x128xbf16>
    %cst_6 = arith.constant dense<0.000000e+00> : vector<128x128xf32>
    %5 = tpu.matmul %2, %4, %cst_6 {dimension_numbers = #tpu.dot_dimension_numbers<[1], [0], [0], [1], [0, 0, 1, 1], [], []>} : vector<128x128xbf16>, vector<128x128xbf16>, vector<128x128xf32> -> vector<128x128xf32>
    %6 = arith.addf %0, %5 : vector<128x128xf32>
    %c0_7 = arith.constant 0 : index
    %c1 = arith.constant 1 : index
    %c0_8 = arith.constant 0 : index
    %c0_9 = arith.constant 0 : index
    %7 = vector.load %arg1[%c0_7, %c1, %c0_8, %c0_9] : memref<1x4x160x128xbf16, #tpu.memory_space<vmem>>, vector<1x1x128x128xbf16>
    %8 = vector.shape_cast %7 : vector<1x1x128x128xbf16> to vector<128x128xbf16>
    %c1_10 = arith.constant 1 : index
    %c0_11 = arith.constant 0 : index
    %c0_12 = arith.constant 0 : index
    %9 = vector.load %arg2[%c1_10, %c0_11, %c0_12] : memref<16x128x128xbf16, #tpu.memory_space<vmem>>, vector<1x128x128xbf16>
    %10 = vector.shape_cast %9 : vector<1x128x128xbf16> to vector<128x128xbf16>
    %cst_13 = arith.constant dense<0.000000e+00> : vector<128x128xf32>
    %11 = tpu.matmul %8, %10, %cst_13 {dimension_numbers = #tpu.dot_dimension_numbers<[1], [0], [0], [1], [0, 0, 1, 1], [], []>} : vector<128x128xbf16>, vector<128x128xbf16>, vector<128x128xf32> -> vector<128x128xf32>
    %12 = arith.addf %6, %11 : vector<128x128xf32>
    %c0_14 = arith.constant 0 : index
    %c0_15 = arith.constant 0 : index
    %c1_16 = arith.constant 1 : index
    %c0_17 = arith.constant 0 : index
    %13 = vector.load %arg1[%c0_14, %c0_15, %c1_16, %c0_17] : memref<1x4x160x128xbf16, #tpu.memory_space<vmem>>, vector<1x1x128x128xbf16>
    %14 = vector.shape_cast %13 : vector<1x1x128x128xbf16> to vector<128x128xbf16>
    %c2 = arith.constant 2 : index
    %c0_18 = arith.constant 0 : index
    %c0_19 = arith.constant 0 : index
    %15 = vector.load %arg2[%c2, %c0_18, %c0_19] : memref<16x128x128xbf16, #tpu.memory_space<vmem>>, vector<1x128x128xbf16>
    %16 = vector.shape_cast %15 : vector<1x128x128xbf16> to vector<128x128xbf16>
    %cst_20 = arith.constant dense<0.000000e+00> : vector<128x128xf32>
    %17 = tpu.matmul %14, %16, %cst_20 {dimension_numbers = #tpu.dot_dimension_numbers<[1], [0], [0], [1], [0, 0, 1, 1], [], []>} : vector<128x128xbf16>, vector<128x128xbf16>, vector<128x128xf32> -> vector<128x128xf32>
    %18 = arith.addf %12, %17 : vector<128x128xf32>
    %c0_21 = arith.constant 0 : index
    %c1_22 = arith.constant 1 : index
    %c1_23 = arith.constant 1 : index
    %c0_24 = arith.constant 0 : index
    %19 = vector.load %arg1[%c0_21, %c1_22, %c1_23, %c0_24] : memref<1x4x160x128xbf16, #tpu.memory_space<vmem>>, vector<1x1x128x128xbf16>
    %20 = vector.shape_cast %19 : vector<1x1x128x128xbf16> to vector<128x128xbf16>
    %c3 = arith.constant 3 : index
    %c0_25 = arith.constant 0 : index
    %c0_26 = arith.constant 0 : index
    %21 = vector.load %arg2[%c3, %c0_25, %c0_26] : memref<16x128x128xbf16, #tpu.memory_space<vmem>>, vector<1x128x128xbf16>
    %22 = vector.shape_cast %21 : vector<1x128x128xbf16> to vector<128x128xbf16>
    %cst_27 = arith.constant dense<0.000000e+00> : vector<128x128xf32>
    %23 = tpu.matmul %20, %22, %cst_27 {dimension_numbers = #tpu.dot_dimension_numbers<[1], [0], [0], [1], [0, 0, 1, 1], [], []>} : vector<128x128xbf16>, vector<128x128xbf16>, vector<128x128xf32> -> vector<128x128xf32>
    %24 = arith.addf %18, %23 : vector<128x128xf32>
    %c0_28 = arith.constant 0 : index
    %c2_29 = arith.constant 2 : index
    %c0_30 = arith.constant 0 : index
    %c0_31 = arith.constant 0 : index
    %25 = vector.load %arg1[%c0_28, %c2_29, %c0_30, %c0_31] : memref<1x4x160x128xbf16, #tpu.memory_space<vmem>>, vector<1x1x128x128xbf16>
    %26 = vector.shape_cast %25 : vector<1x1x128x128xbf16> to vector<128x128xbf16>
    %c4 = arith.constant 4 : index
    %c0_32 = arith.constant 0 : index
    %c0_33 = arith.constant 0 : index
    %27 = vector.load %arg2[%c4, %c0_32, %c0_33] : memref<16x128x128xbf16, #tpu.memory_space<vmem>>, vector<1x128x128xbf16>
    %28 = vector.shape_cast %27 : vector<1x128x128xbf16> to vector<128x128xbf16>
    %cst_34 = arith.constant dense<0.000000e+00> : vector<128x128xf32>
    %29 = tpu.matmul %26, %28, %cst_34 {dimension_numbers = #tpu.dot_dimension_numbers<[1], [0], [0], [1], [0, 0, 1, 1], [], []>} : vector<128x128xbf16>, vector<128x128xbf16>, vector<128x128xf32> -> vector<128x128xf32>
    %30 = arith.addf %24, %29 : vector<128x128xf32>
    %c0_35 = arith.constant 0 : index
    %c3_36 = arith.constant 3 : index
    %c0_37 = arith.constant 0 : index
    %c0_38 = arith.constant 0 : index
    %31 = vector.load %arg1[%c0_35, %c3_36, %c0_37, %c0_38] : memref<1x4x160x128xbf16, #tpu.memory_space<vmem>>, vector<1x1x128x128xbf16>
    %32 = vector.shape_cast %31 : vector<1x1x128x128xbf16> to vector<128x128xbf16>
    %c5 = arith.constant 5 : index
    %c0_39 = arith.constant 0 : index
    %c0_40 = arith.constant 0 : index
    %33 = vector.load %arg2[%c5, %c0_39, %c0_40] : memref<16x128x128xbf16, #tpu.memory_space<vmem>>, vector<1x128x128xbf16>
    %34 = vector.shape_cast %33 : vector<1x128x128xbf16> to vector<128x128xbf16>
    %cst_41 = arith.constant dense<0.000000e+00> : vector<128x128xf32>
    %35 = tpu.matmul %32, %34, %cst_41 {dimension_numbers = #tpu.dot_dimension_numbers<[1], [0], [0], [1], [0, 0, 1, 1], [], []>} : vector<128x128xbf16>, vector<128x128xbf16>, vector<128x128xf32> -> vector<128x128xf32>
    %36 = arith.addf %30, %35 : vector<128x128xf32>
    %c0_42 = arith.constant 0 : index
    %c2_43 = arith.constant 2 : index
    %c1_44 = arith.constant 1 : index
    %c0_45 = arith.constant 0 : index
    %37 = vector.load %arg1[%c0_42, %c2_43, %c1_44, %c0_45] : memref<1x4x160x128xbf16, #tpu.memory_space<vmem>>, vector<1x1x128x128xbf16>
    %38 = vector.shape_cast %37 : vector<1x1x128x128xbf16> to vector<128x128xbf16>
    %c6 = arith.constant 6 : index
    %c0_46 = arith.constant 0 : index
    %c0_47 = arith.constant 0 : index
    %39 = vector.load %arg2[%c6, %c0_46, %c0_47] : memref<16x128x128xbf16, #tpu.memory_space<vmem>>, vector<1x128x128xbf16>
    %40 = vector.shape_cast %39 : vector<1x128x128xbf16> to vector<128x128xbf16>
    %cst_48 = arith.constant dense<0.000000e+00> : vector<128x128xf32>
    %41 = tpu.matmul %38, %40, %cst_48 {dimension_numbers = #tpu.dot_dimension_numbers<[1], [0], [0], [1], [0, 0, 1, 1], [], []>} : vector<128x128xbf16>, vector<128x128xbf16>, vector<128x128xf32> -> vector<128x128xf32>
    %42 = arith.addf %36, %41 : vector<128x128xf32>
    %c0_49 = arith.constant 0 : index
    %c3_50 = arith.constant 3 : index
    %c1_51 = arith.constant 1 : index
    %c0_52 = arith.constant 0 : index
    %43 = vector.load %arg1[%c0_49, %c3_50, %c1_51, %c0_52] : memref<1x4x160x128xbf16, #tpu.memory_space<vmem>>, vector<1x1x128x128xbf16>
    %44 = vector.shape_cast %43 : vector<1x1x128x128xbf16> to vector<128x128xbf16>
    %c7 = arith.constant 7 : index
    %c0_53 = arith.constant 0 : index
    %c0_54 = arith.constant 0 : index
    %45 = vector.load %arg2[%c7, %c0_53, %c0_54] : memref<16x128x128xbf16, #tpu.memory_space<vmem>>, vector<1x128x128xbf16>
    %46 = vector.shape_cast %45 : vector<1x128x128xbf16> to vector<128x128xbf16>
    %cst_55 = arith.constant dense<0.000000e+00> : vector<128x128xf32>
    %47 = tpu.matmul %44, %46, %cst_55 {dimension_numbers = #tpu.dot_dimension_numbers<[1], [0], [0], [1], [0, 0, 1, 1], [], []>} : vector<128x128xbf16>, vector<128x128xbf16>, vector<128x128xf32> -> vector<128x128xf32>
    %48 = arith.addf %42, %47 : vector<128x128xf32>
    %c0_56 = arith.constant 0 : index
    %c0_57 = arith.constant 0 : index
    %c16 = arith.constant 16 : index
    %c0_58 = arith.constant 0 : index
    %49 = vector.load %arg1[%c0_56, %c0_57, %c16, %c0_58] : memref<1x4x160x128xbf16, #tpu.memory_space<vmem>>, vector<1x1x128x128xbf16>
    %50 = vector.shape_cast %49 : vector<1x1x128x128xbf16> to vector<128x128xbf16>
    %c8 = arith.constant 8 : index
    %c0_59 = arith.constant 0 : index
    %c0_60 = arith.constant 0 : index
    %51 = vector.load %arg2[%c8, %c0_59, %c0_60] : memref<16x128x128xbf16, #tpu.memory_space<vmem>>, vector<1x128x128xbf16>
    %52 = vector.shape_cast %51 : vector<1x128x128xbf16> to vector<128x128xbf16>
    %cst_61 = arith.constant dense<0.000000e+00> : vector<128x128xf32>
    %53 = tpu.matmul %50, %52, %cst_61 {dimension_numbers = #tpu.dot_dimension_numbers<[1], [0], [0], [1], [0, 0, 1, 1], [], []>} : vector<128x128xbf16>, vector<128x128xbf16>, vector<128x128xf32> -> vector<128x128xf32>
    %54 = arith.addf %48, %53 : vector<128x128xf32>
    %c0_62 = arith.constant 0 : index
    %c1_63 = arith.constant 1 : index
    %c16_64 = arith.constant 16 : index
    %c0_65 = arith.constant 0 : index
    %55 = vector.load %arg1[%c0_62, %c1_63, %c16_64, %c0_65] : memref<1x4x160x128xbf16, #tpu.memory_space<vmem>>, vector<1x1x128x128xbf16>
    %56 = vector.shape_cast %55 : vector<1x1x128x128xbf16> to vector<128x128xbf16>
    %c9 = arith.constant 9 : index
    %c0_66 = arith.constant 0 : index
    %c0_67 = arith.constant 0 : index
    %57 = vector.load %arg2[%c9, %c0_66, %c0_67] : memref<16x128x128xbf16, #tpu.memory_space<vmem>>, vector<1x128x128xbf16>
    %58 = vector.shape_cast %57 : vector<1x128x128xbf16> to vector<128x128xbf16>
    %cst_68 = arith.constant dense<0.000000e+00> : vector<128x128xf32>
    %59 = tpu.matmul %56, %58, %cst_68 {dimension_numbers = #tpu.dot_dimension_numbers<[1], [0], [0], [1], [0, 0, 1, 1], [], []>} : vector<128x128xbf16>, vector<128x128xbf16>, vector<128x128xf32> -> vector<128x128xf32>
    %60 = arith.addf %54, %59 : vector<128x128xf32>
    %c0_69 = arith.constant 0 : index
    %c0_70 = arith.constant 0 : index
    %c17 = arith.constant 17 : index
    %c0_71 = arith.constant 0 : index
    %61 = vector.load %arg1[%c0_69, %c0_70, %c17, %c0_71] : memref<1x4x160x128xbf16, #tpu.memory_space<vmem>>, vector<1x1x128x128xbf16>
    %62 = vector.shape_cast %61 : vector<1x1x128x128xbf16> to vector<128x128xbf16>
    %c10 = arith.constant 10 : index
    %c0_72 = arith.constant 0 : index
    %c0_73 = arith.constant 0 : index
    %63 = vector.load %arg2[%c10, %c0_72, %c0_73] : memref<16x128x128xbf16, #tpu.memory_space<vmem>>, vector<1x128x128xbf16>
    %64 = vector.shape_cast %63 : vector<1x128x128xbf16> to vector<128x128xbf16>
    %cst_74 = arith.constant dense<0.000000e+00> : vector<128x128xf32>
    %65 = tpu.matmul %62, %64, %cst_74 {dimension_numbers = #tpu.dot_dimension_numbers<[1], [0], [0], [1], [0, 0, 1, 1], [], []>} : vector<128x128xbf16>, vector<128x128xbf16>, vector<128x128xf32> -> vector<128x128xf32>
    %66 = arith.addf %60, %65 : vector<128x128xf32>
    %c0_75 = arith.constant 0 : index
    %c1_76 = arith.constant 1 : index
    %c17_77 = arith.constant 17 : index
    %c0_78 = arith.constant 0 : index
    %67 = vector.load %arg1[%c0_75, %c1_76, %c17_77, %c0_78] : memref<1x4x160x128xbf16, #tpu.memory_space<vmem>>, vector<1x1x128x128xbf16>
    %68 = vector.shape_cast %67 : vector<1x1x128x128xbf16> to vector<128x128xbf16>
    %c11 = arith.constant 11 : index
    %c0_79 = arith.constant 0 : index
    %c0_80 = arith.constant 0 : index
    %69 = vector.load %arg2[%c11, %c0_79, %c0_80] : memref<16x128x128xbf16, #tpu.memory_space<vmem>>, vector<1x128x128xbf16>
    %70 = vector.shape_cast %69 : vector<1x128x128xbf16> to vector<128x128xbf16>
    %cst_81 = arith.constant dense<0.000000e+00> : vector<128x128xf32>
    %71 = tpu.matmul %68, %70, %cst_81 {dimension_numbers = #tpu.dot_dimension_numbers<[1], [0], [0], [1], [0, 0, 1, 1], [], []>} : vector<128x128xbf16>, vector<128x128xbf16>, vector<128x128xf32> -> vector<128x128xf32>
    %72 = arith.addf %66, %71 : vector<128x128xf32>
    %c0_82 = arith.constant 0 : index
    %c2_83 = arith.constant 2 : index
    %c16_84 = arith.constant 16 : index
    %c0_85 = arith.constant 0 : index
    %73 = vector.load %arg1[%c0_82, %c2_83, %c16_84, %c0_85] : memref<1x4x160x128xbf16, #tpu.memory_space<vmem>>, vector<1x1x128x128xbf16>
    %74 = vector.shape_cast %73 : vector<1x1x128x128xbf16> to vector<128x128xbf16>
    %c12 = arith.constant 12 : index
    %c0_86 = arith.constant 0 : index
    %c0_87 = arith.constant 0 : index
    %75 = vector.load %arg2[%c12, %c0_86, %c0_87] : memref<16x128x128xbf16, #tpu.memory_space<vmem>>, vector<1x128x128xbf16>
    %76 = vector.shape_cast %75 : vector<1x128x128xbf16> to vector<128x128xbf16>
    %cst_88 = arith.constant dense<0.000000e+00> : vector<128x128xf32>
    %77 = tpu.matmul %74, %76, %cst_88 {dimension_numbers = #tpu.dot_dimension_numbers<[1], [0], [0], [1], [0, 0, 1, 1], [], []>} : vector<128x128xbf16>, vector<128x128xbf16>, vector<128x128xf32> -> vector<128x128xf32>
    %78 = arith.addf %72, %77 : vector<128x128xf32>
    %c0_89 = arith.constant 0 : index
    %c3_90 = arith.constant 3 : index
    %c16_91 = arith.constant 16 : index
    %c0_92 = arith.constant 0 : index
    %79 = vector.load %arg1[%c0_89, %c3_90, %c16_91, %c0_92] : memref<1x4x160x128xbf16, #tpu.memory_space<vmem>>, vector<1x1x128x128xbf16>
    %80 = vector.shape_cast %79 : vector<1x1x128x128xbf16> to vector<128x128xbf16>
    %c13 = arith.constant 13 : index
    %c0_93 = arith.constant 0 : index
    %c0_94 = arith.constant 0 : index
    %81 = vector.load %arg2[%c13, %c0_93, %c0_94] : memref<16x128x128xbf16, #tpu.memory_space<vmem>>, vector<1x128x128xbf16>
    %82 = vector.shape_cast %81 : vector<1x128x128xbf16> to vector<128x128xbf16>
    %cst_95 = arith.constant dense<0.000000e+00> : vector<128x128xf32>
    %83 = tpu.matmul %80, %82, %cst_95 {dimension_numbers = #tpu.dot_dimension_numbers<[1], [0], [0], [1], [0, 0, 1, 1], [], []>} : vector<128x128xbf16>, vector<128x128xbf16>, vector<128x128xf32> -> vector<128x128xf32>
    %84 = arith.addf %78, %83 : vector<128x128xf32>
    %c0_96 = arith.constant 0 : index
    %c2_97 = arith.constant 2 : index
    %c17_98 = arith.constant 17 : index
    %c0_99 = arith.constant 0 : index
    %85 = vector.load %arg1[%c0_96, %c2_97, %c17_98, %c0_99] : memref<1x4x160x128xbf16, #tpu.memory_space<vmem>>, vector<1x1x128x128xbf16>
    %86 = vector.shape_cast %85 : vector<1x1x128x128xbf16> to vector<128x128xbf16>
    %c14 = arith.constant 14 : index
    %c0_100 = arith.constant 0 : index
    %c0_101 = arith.constant 0 : index
    %87 = vector.load %arg2[%c14, %c0_100, %c0_101] : memref<16x128x128xbf16, #tpu.memory_space<vmem>>, vector<1x128x128xbf16>
    %88 = vector.shape_cast %87 : vector<1x128x128xbf16> to vector<128x128xbf16>
    %cst_102 = arith.constant dense<0.000000e+00> : vector<128x128xf32>
    %89 = tpu.matmul %86, %88, %cst_102 {dimension_numbers = #tpu.dot_dimension_numbers<[1], [0], [0], [1], [0, 0, 1, 1], [], []>} : vector<128x128xbf16>, vector<128x128xbf16>, vector<128x128xf32> -> vector<128x128xf32>
    %90 = arith.addf %84, %89 : vector<128x128xf32>
    %c0_103 = arith.constant 0 : index
    %c3_104 = arith.constant 3 : index
    %c17_105 = arith.constant 17 : index
    %c0_106 = arith.constant 0 : index
    %91 = vector.load %arg1[%c0_103, %c3_104, %c17_105, %c0_106] : memref<1x4x160x128xbf16, #tpu.memory_space<vmem>>, vector<1x1x128x128xbf16>
    %92 = vector.shape_cast %91 : vector<1x1x128x128xbf16> to vector<128x128xbf16>
    %c15 = arith.constant 15 : index
    %c0_107 = arith.constant 0 : index
    %c0_108 = arith.constant 0 : index
    %93 = vector.load %arg2[%c15, %c0_107, %c0_108] : memref<16x128x128xbf16, #tpu.memory_space<vmem>>, vector<1x128x128xbf16>
    %94 = vector.shape_cast %93 : vector<1x128x128xbf16> to vector<128x128xbf16>
    %cst_109 = arith.constant dense<0.000000e+00> : vector<128x128xf32>
    %95 = tpu.matmul %92, %94, %cst_109 {dimension_numbers = #tpu.dot_dimension_numbers<[1], [0], [0], [1], [0, 0, 1, 1], [], []>} : vector<128x128xbf16>, vector<128x128xbf16>, vector<128x128xf32> -> vector<128x128xf32>
    %96 = arith.addf %90, %95 : vector<128x128xf32>
    %97 = tpu.iota {dimensions = array<i32: 0>} : vector<128x1xi32>
    %c16_i32 = arith.constant 16 : i32
    %c0_i32 = arith.constant 0 : i32
    %98 = arith.cmpi eq, %c16_i32, %c0_i32 : i32
    %c1_i32 = arith.constant 1 : i32
    %99 = arith.select %98, %c1_i32, %c16_i32 : i32
    %100 = vector.broadcast %99 : i32 to vector<128x1xi32>
    %101 = arith.remsi %97, %100 : vector<128x1xi32>
    %c0_i32_110 = arith.constant 0 : i32
    %102 = vector.broadcast %c0_i32_110 : i32 to vector<128x1xi32>
    %103 = arith.cmpi ne, %101, %102 : vector<128x1xi32>
    %c0_i32_111 = arith.constant 0 : i32
    %104 = vector.broadcast %c0_i32_111 : i32 to vector<128x1xi32>
    %105 = arith.cmpi slt, %101, %104 : vector<128x1xi32>
    %c0_i32_112 = arith.constant 0 : i32
    %106 = arith.cmpi slt, %99, %c0_i32_112 : i32
    %107 = vector.broadcast %106 : i1 to vector<128x1xi1>
    %108 = vector.broadcast %107 : vector<128x1xi1> to vector<128x1xi1>
    %109 = arith.xori %105, %108 : vector<128x1xi1>
    %110 = arith.andi %109, %103 : vector<128x1xi1>
    %111 = vector.broadcast %99 : i32 to vector<128x1xi32>
    %112 = arith.addi %101, %111 : vector<128x1xi32>
    %113 = arith.select %110, %112, %101 : vector<128x1xi1>, vector<128x1xi32>
    %c8_i32 = arith.constant 8 : i32
    %114 = vector.broadcast %c8_i32 : i32 to vector<128x1xi32>
    %115 = arith.cmpi slt, %113, %114 : vector<128x1xi32>
    %cst_113 = arith.constant 0.000000e+00 : f32
    %116 = vector.shape_cast %115 : vector<128x1xi1> to vector<128x1xi1>
    %117 = vector.broadcast %116 : vector<128x1xi1> to vector<128x128xi1>
    %118 = vector.broadcast %cst_113 : f32 to vector<128x128xf32>
    %119 = arith.select %117, %96, %118 : vector<128x128xi1>, vector<128x128xf32>
    %cst_114 = arith.constant dense<0.000000e+00> : vector<128xf32>
    %120 = vector.multi_reduction <add>, %119, %cst_114 [0] : vector<128x128xf32> to vector<128xf32>
    %121 = vector.shape_cast %120 : vector<128xf32> to vector<1x128xf32>
    %cst_115 = arith.constant 1.562500e-02 : f32
    %122 = vector.broadcast %cst_115 : f32 to vector<1x128xf32>
    %123 = arith.mulf %121, %122 : vector<1x128xf32>
    %124 = arith.mulf %119, %119 : vector<128x128xf32>
    %cst_116 = arith.constant dense<0.000000e+00> : vector<128xf32>
    %125 = vector.multi_reduction <add>, %124, %cst_116 [0] : vector<128x128xf32> to vector<128xf32>
    %126 = vector.shape_cast %125 : vector<128xf32> to vector<1x128xf32>
    %cst_117 = arith.constant 1.562500e-02 : f32
    %127 = vector.broadcast %cst_117 : f32 to vector<1x128xf32>
    %128 = arith.mulf %126, %127 : vector<1x128xf32>
    %129 = arith.mulf %123, %123 : vector<1x128xf32>
    %130 = arith.subf %128, %129 : vector<1x128xf32>
    %cst_118 = arith.constant 0.000000e+00 : f32
    %131 = vector.broadcast %cst_118 : f32 to vector<1x128xf32>
    %132 = arith.maximumf %130, %131 : vector<1x128xf32>
    %cst_119 = arith.constant 9.99999974E-6 : f32
    %133 = vector.broadcast %cst_119 : f32 to vector<1x128xf32>
    %134 = arith.addf %132, %133 : vector<1x128xf32>
    %135 = math.rsqrt %134 : vector<1x128xf32>
    %136 = vector.broadcast %123 : vector<1x128xf32> to vector<128x128xf32>
    %137 = arith.subf %96, %136 : vector<128x128xf32>
    %138 = vector.broadcast %135 : vector<1x128xf32> to vector<128x128xf32>
    %139 = arith.mulf %137, %138 : vector<128x128xf32>
    %cst_120 = arith.constant 0.000000e+00 : f32
    %140 = vector.shape_cast %115 : vector<128x1xi1> to vector<128x1xi1>
    %141 = vector.broadcast %140 : vector<128x1xi1> to vector<128x128xi1>
    %142 = vector.broadcast %cst_120 : f32 to vector<128x128xf32>
    %143 = arith.select %141, %139, %142 : vector<128x128xi1>, vector<128x128xf32>
    %cst_121 = arith.constant 0.000000e+00 : f32
    %144 = vector.broadcast %cst_121 : f32 to vector<128x128xf32>
    %145 = arith.maximumf %143, %144 : vector<128x128xf32>
    %146 = arith.truncf %145 : vector<128x128xf32> to vector<128x128xbf16>
    %c0_122 = arith.constant 0 : index
    %c0_123 = arith.constant 0 : index
    %c0_124 = arith.constant 0 : index
    %147 = vector.load %arg3[%c0_122, %c0_123, %c0_124] : memref<1x128x128xbf16, #tpu.memory_space<vmem>>, vector<1x128x128xbf16>
    %148 = vector.shape_cast %147 : vector<1x128x128xbf16> to vector<128x128xbf16>
    %149 = vector.shape_cast %146 : vector<128x128xbf16> to vector<1x128x128xbf16>
    tpu.vector_store %arg3[%c0_122, %c0_123, %c0_124], %149 {strides = array<i32>} : memref<1x128x128xbf16, #tpu.memory_space<vmem>>, vector<1x128x128xbf16>,
    return
  }
  func.func @transform_0(%arg0: i32) -> (i32, i32, i32, i32) {
    %c0_i32 = arith.constant 0 : i32
    %c0_i32_0 = arith.constant 0 : i32
    %c0_i32_1 = arith.constant 0 : i32
    %c0_i32_2 = arith.constant 0 : i32
    return %arg0, %c0_i32, %c0_i32_0, %c0_i32_1 : i32, i32, i32, i32
  }
  func.func @transform_1(%arg0: i32) -> (i32, i32, i32) {
    %c0_i32 = arith.constant 0 : i32
    %c0_i32_0 = arith.constant 0 : i32
    %c0_i32_1 = arith.constant 0 : i32
    %c0_i32_2 = arith.constant 0 : i32
    return %c0_i32, %c0_i32_0, %c0_i32_1 : i32, i32, i32
  }
  func.func @transform_2(%arg0: i32) -> (i32, i32, i32) {
    %c0_i32 = arith.constant 0 : i32
    %c0_i32_0 = arith.constant 0 : i32
    %c0_i32_1 = arith.constant 0 : i32
    return %arg0, %c0_i32, %c0_i32_0 : i32, i32, i32
  }
}

module attributes {stable_mosaic.version = 11 : i64} {
  func.func @_conv_in_kernel(%arg0: i32, %arg1: memref<1x4x48x128xbf16, #tpu.memory_space<vmem>>, %arg2: memref<16x128x128xbf16, #tpu.memory_space<vmem>>, %arg3: memref<1x32x128xbf16, #tpu.memory_space<vmem>>) attributes {dimension_semantics = [#tpu.dimension_semantics<parallel>], iteration_bounds = array<i64: 2>, scalar_prefetch = 0 : i64, scratch_operands = 0 : i64, tpu.core_type = #tpu.core_type<tc>, window_params = [{transform_indices = @transform_0, window_bounds = array<i64: 1, 4, 48, 128>}, {pipeline_mode = #tpu.pipeline_mode<synchronous>, transform_indices = @transform_1, window_bounds = array<i64: 16, 128, 128>}, {transform_indices = @transform_2, window_bounds = array<i64: 1, 32, 128>}]} {
    %cst = arith.constant 0.000000e+00 : f32
    %0 = vector.broadcast %cst : f32 to vector<32x128xf32>
    %c0 = arith.constant 0 : index
    %c0_0 = arith.constant 0 : index
    %c0_1 = arith.constant 0 : index
    %c0_2 = arith.constant 0 : index
    %1 = vector.load %arg1[%c0, %c0_0, %c0_1, %c0_2] : memref<1x4x48x128xbf16, #tpu.memory_space<vmem>>, vector<1x1x32x128xbf16>
    %2 = vector.shape_cast %1 : vector<1x1x32x128xbf16> to vector<32x128xbf16>
    %c0_3 = arith.constant 0 : index
    %c0_4 = arith.constant 0 : index
    %c0_5 = arith.constant 0 : index
    %3 = vector.load %arg2[%c0_3, %c0_4, %c0_5] : memref<16x128x128xbf16, #tpu.memory_space<vmem>>, vector<1x128x128xbf16>
    %4 = vector.shape_cast %3 : vector<1x128x128xbf16> to vector<128x128xbf16>
    %cst_6 = arith.constant dense<0.000000e+00> : vector<32x128xf32>
    %5 = tpu.matmul %2, %4, %cst_6 {dimension_numbers = #tpu.dot_dimension_numbers<[1], [0], [0], [1], [0, 0, 1, 1], [], []>} : vector<32x128xbf16>, vector<128x128xbf16>, vector<32x128xf32> -> vector<32x128xf32>
    %6 = arith.addf %0, %5 : vector<32x128xf32>
    %c0_7 = arith.constant 0 : index
    %c1 = arith.constant 1 : index
    %c0_8 = arith.constant 0 : index
    %c0_9 = arith.constant 0 : index
    %7 = vector.load %arg1[%c0_7, %c1, %c0_8, %c0_9] : memref<1x4x48x128xbf16, #tpu.memory_space<vmem>>, vector<1x1x32x128xbf16>
    %8 = vector.shape_cast %7 : vector<1x1x32x128xbf16> to vector<32x128xbf16>
    %c1_10 = arith.constant 1 : index
    %c0_11 = arith.constant 0 : index
    %c0_12 = arith.constant 0 : index
    %9 = vector.load %arg2[%c1_10, %c0_11, %c0_12] : memref<16x128x128xbf16, #tpu.memory_space<vmem>>, vector<1x128x128xbf16>
    %10 = vector.shape_cast %9 : vector<1x128x128xbf16> to vector<128x128xbf16>
    %cst_13 = arith.constant dense<0.000000e+00> : vector<32x128xf32>
    %11 = tpu.matmul %8, %10, %cst_13 {dimension_numbers = #tpu.dot_dimension_numbers<[1], [0], [0], [1], [0, 0, 1, 1], [], []>} : vector<32x128xbf16>, vector<128x128xbf16>, vector<32x128xf32> -> vector<32x128xf32>
    %12 = arith.addf %6, %11 : vector<32x128xf32>
    %c0_14 = arith.constant 0 : index
    %c0_15 = arith.constant 0 : index
    %c1_16 = arith.constant 1 : index
    %c0_17 = arith.constant 0 : index
    %13 = vector.load %arg1[%c0_14, %c0_15, %c1_16, %c0_17] : memref<1x4x48x128xbf16, #tpu.memory_space<vmem>>, vector<1x1x32x128xbf16>
    %14 = vector.shape_cast %13 : vector<1x1x32x128xbf16> to vector<32x128xbf16>
    %c2 = arith.constant 2 : index
    %c0_18 = arith.constant 0 : index
    %c0_19 = arith.constant 0 : index
    %15 = vector.load %arg2[%c2, %c0_18, %c0_19] : memref<16x128x128xbf16, #tpu.memory_space<vmem>>, vector<1x128x128xbf16>
    %16 = vector.shape_cast %15 : vector<1x128x128xbf16> to vector<128x128xbf16>
    %cst_20 = arith.constant dense<0.000000e+00> : vector<32x128xf32>
    %17 = tpu.matmul %14, %16, %cst_20 {dimension_numbers = #tpu.dot_dimension_numbers<[1], [0], [0], [1], [0, 0, 1, 1], [], []>} : vector<32x128xbf16>, vector<128x128xbf16>, vector<32x128xf32> -> vector<32x128xf32>
    %18 = arith.addf %12, %17 : vector<32x128xf32>
    %c0_21 = arith.constant 0 : index
    %c1_22 = arith.constant 1 : index
    %c1_23 = arith.constant 1 : index
    %c0_24 = arith.constant 0 : index
    %19 = vector.load %arg1[%c0_21, %c1_22, %c1_23, %c0_24] : memref<1x4x48x128xbf16, #tpu.memory_space<vmem>>, vector<1x1x32x128xbf16>
    %20 = vector.shape_cast %19 : vector<1x1x32x128xbf16> to vector<32x128xbf16>
    %c3 = arith.constant 3 : index
    %c0_25 = arith.constant 0 : index
    %c0_26 = arith.constant 0 : index
    %21 = vector.load %arg2[%c3, %c0_25, %c0_26] : memref<16x128x128xbf16, #tpu.memory_space<vmem>>, vector<1x128x128xbf16>
    %22 = vector.shape_cast %21 : vector<1x128x128xbf16> to vector<128x128xbf16>
    %cst_27 = arith.constant dense<0.000000e+00> : vector<32x128xf32>
    %23 = tpu.matmul %20, %22, %cst_27 {dimension_numbers = #tpu.dot_dimension_numbers<[1], [0], [0], [1], [0, 0, 1, 1], [], []>} : vector<32x128xbf16>, vector<128x128xbf16>, vector<32x128xf32> -> vector<32x128xf32>
    %24 = arith.addf %18, %23 : vector<32x128xf32>
    %c0_28 = arith.constant 0 : index
    %c2_29 = arith.constant 2 : index
    %c0_30 = arith.constant 0 : index
    %c0_31 = arith.constant 0 : index
    %25 = vector.load %arg1[%c0_28, %c2_29, %c0_30, %c0_31] : memref<1x4x48x128xbf16, #tpu.memory_space<vmem>>, vector<1x1x32x128xbf16>
    %26 = vector.shape_cast %25 : vector<1x1x32x128xbf16> to vector<32x128xbf16>
    %c4 = arith.constant 4 : index
    %c0_32 = arith.constant 0 : index
    %c0_33 = arith.constant 0 : index
    %27 = vector.load %arg2[%c4, %c0_32, %c0_33] : memref<16x128x128xbf16, #tpu.memory_space<vmem>>, vector<1x128x128xbf16>
    %28 = vector.shape_cast %27 : vector<1x128x128xbf16> to vector<128x128xbf16>
    %cst_34 = arith.constant dense<0.000000e+00> : vector<32x128xf32>
    %29 = tpu.matmul %26, %28, %cst_34 {dimension_numbers = #tpu.dot_dimension_numbers<[1], [0], [0], [1], [0, 0, 1, 1], [], []>} : vector<32x128xbf16>, vector<128x128xbf16>, vector<32x128xf32> -> vector<32x128xf32>
    %30 = arith.addf %24, %29 : vector<32x128xf32>
    %c0_35 = arith.constant 0 : index
    %c3_36 = arith.constant 3 : index
    %c0_37 = arith.constant 0 : index
    %c0_38 = arith.constant 0 : index
    %31 = vector.load %arg1[%c0_35, %c3_36, %c0_37, %c0_38] : memref<1x4x48x128xbf16, #tpu.memory_space<vmem>>, vector<1x1x32x128xbf16>
    %32 = vector.shape_cast %31 : vector<1x1x32x128xbf16> to vector<32x128xbf16>
    %c5 = arith.constant 5 : index
    %c0_39 = arith.constant 0 : index
    %c0_40 = arith.constant 0 : index
    %33 = vector.load %arg2[%c5, %c0_39, %c0_40] : memref<16x128x128xbf16, #tpu.memory_space<vmem>>, vector<1x128x128xbf16>
    %34 = vector.shape_cast %33 : vector<1x128x128xbf16> to vector<128x128xbf16>
    %cst_41 = arith.constant dense<0.000000e+00> : vector<32x128xf32>
    %35 = tpu.matmul %32, %34, %cst_41 {dimension_numbers = #tpu.dot_dimension_numbers<[1], [0], [0], [1], [0, 0, 1, 1], [], []>} : vector<32x128xbf16>, vector<128x128xbf16>, vector<32x128xf32> -> vector<32x128xf32>
    %36 = arith.addf %30, %35 : vector<32x128xf32>
    %c0_42 = arith.constant 0 : index
    %c2_43 = arith.constant 2 : index
    %c1_44 = arith.constant 1 : index
    %c0_45 = arith.constant 0 : index
    %37 = vector.load %arg1[%c0_42, %c2_43, %c1_44, %c0_45] : memref<1x4x48x128xbf16, #tpu.memory_space<vmem>>, vector<1x1x32x128xbf16>
    %38 = vector.shape_cast %37 : vector<1x1x32x128xbf16> to vector<32x128xbf16>
    %c6 = arith.constant 6 : index
    %c0_46 = arith.constant 0 : index
    %c0_47 = arith.constant 0 : index
    %39 = vector.load %arg2[%c6, %c0_46, %c0_47] : memref<16x128x128xbf16, #tpu.memory_space<vmem>>, vector<1x128x128xbf16>
    %40 = vector.shape_cast %39 : vector<1x128x128xbf16> to vector<128x128xbf16>
    %cst_48 = arith.constant dense<0.000000e+00> : vector<32x128xf32>
    %41 = tpu.matmul %38, %40, %cst_48 {dimension_numbers = #tpu.dot_dimension_numbers<[1], [0], [0], [1], [0, 0, 1, 1], [], []>} : vector<32x128xbf16>, vector<128x128xbf16>, vector<32x128xf32> -> vector<32x128xf32>
    %42 = arith.addf %36, %41 : vector<32x128xf32>
    %c0_49 = arith.constant 0 : index
    %c3_50 = arith.constant 3 : index
    %c1_51 = arith.constant 1 : index
    %c0_52 = arith.constant 0 : index
    %43 = vector.load %arg1[%c0_49, %c3_50, %c1_51, %c0_52] : memref<1x4x48x128xbf16, #tpu.memory_space<vmem>>, vector<1x1x32x128xbf16>
    %44 = vector.shape_cast %43 : vector<1x1x32x128xbf16> to vector<32x128xbf16>
    %c7 = arith.constant 7 : index
    %c0_53 = arith.constant 0 : index
    %c0_54 = arith.constant 0 : index
    %45 = vector.load %arg2[%c7, %c0_53, %c0_54] : memref<16x128x128xbf16, #tpu.memory_space<vmem>>, vector<1x128x128xbf16>
    %46 = vector.shape_cast %45 : vector<1x128x128xbf16> to vector<128x128xbf16>
    %cst_55 = arith.constant dense<0.000000e+00> : vector<32x128xf32>
    %47 = tpu.matmul %44, %46, %cst_55 {dimension_numbers = #tpu.dot_dimension_numbers<[1], [0], [0], [1], [0, 0, 1, 1], [], []>} : vector<32x128xbf16>, vector<128x128xbf16>, vector<32x128xf32> -> vector<32x128xf32>
    %48 = arith.addf %42, %47 : vector<32x128xf32>
    %c0_56 = arith.constant 0 : index
    %c0_57 = arith.constant 0 : index
    %c8 = arith.constant 8 : index
    %c0_58 = arith.constant 0 : index
    %49 = vector.load %arg1[%c0_56, %c0_57, %c8, %c0_58] : memref<1x4x48x128xbf16, #tpu.memory_space<vmem>>, vector<1x1x32x128xbf16>
    %50 = vector.shape_cast %49 : vector<1x1x32x128xbf16> to vector<32x128xbf16>
    %c8_59 = arith.constant 8 : index
    %c0_60 = arith.constant 0 : index
    %c0_61 = arith.constant 0 : index
    %51 = vector.load %arg2[%c8_59, %c0_60, %c0_61] : memref<16x128x128xbf16, #tpu.memory_space<vmem>>, vector<1x128x128xbf16>
    %52 = vector.shape_cast %51 : vector<1x128x128xbf16> to vector<128x128xbf16>
    %cst_62 = arith.constant dense<0.000000e+00> : vector<32x128xf32>
    %53 = tpu.matmul %50, %52, %cst_62 {dimension_numbers = #tpu.dot_dimension_numbers<[1], [0], [0], [1], [0, 0, 1, 1], [], []>} : vector<32x128xbf16>, vector<128x128xbf16>, vector<32x128xf32> -> vector<32x128xf32>
    %54 = arith.addf %48, %53 : vector<32x128xf32>
    %c0_63 = arith.constant 0 : index
    %c1_64 = arith.constant 1 : index
    %c8_65 = arith.constant 8 : index
    %c0_66 = arith.constant 0 : index
    %55 = vector.load %arg1[%c0_63, %c1_64, %c8_65, %c0_66] : memref<1x4x48x128xbf16, #tpu.memory_space<vmem>>, vector<1x1x32x128xbf16>
    %56 = vector.shape_cast %55 : vector<1x1x32x128xbf16> to vector<32x128xbf16>
    %c9 = arith.constant 9 : index
    %c0_67 = arith.constant 0 : index
    %c0_68 = arith.constant 0 : index
    %57 = vector.load %arg2[%c9, %c0_67, %c0_68] : memref<16x128x128xbf16, #tpu.memory_space<vmem>>, vector<1x128x128xbf16>
    %58 = vector.shape_cast %57 : vector<1x128x128xbf16> to vector<128x128xbf16>
    %cst_69 = arith.constant dense<0.000000e+00> : vector<32x128xf32>
    %59 = tpu.matmul %56, %58, %cst_69 {dimension_numbers = #tpu.dot_dimension_numbers<[1], [0], [0], [1], [0, 0, 1, 1], [], []>} : vector<32x128xbf16>, vector<128x128xbf16>, vector<32x128xf32> -> vector<32x128xf32>
    %60 = arith.addf %54, %59 : vector<32x128xf32>
    %c0_70 = arith.constant 0 : index
    %c0_71 = arith.constant 0 : index
    %c9_72 = arith.constant 9 : index
    %c0_73 = arith.constant 0 : index
    %61 = vector.load %arg1[%c0_70, %c0_71, %c9_72, %c0_73] : memref<1x4x48x128xbf16, #tpu.memory_space<vmem>>, vector<1x1x32x128xbf16>
    %62 = vector.shape_cast %61 : vector<1x1x32x128xbf16> to vector<32x128xbf16>
    %c10 = arith.constant 10 : index
    %c0_74 = arith.constant 0 : index
    %c0_75 = arith.constant 0 : index
    %63 = vector.load %arg2[%c10, %c0_74, %c0_75] : memref<16x128x128xbf16, #tpu.memory_space<vmem>>, vector<1x128x128xbf16>
    %64 = vector.shape_cast %63 : vector<1x128x128xbf16> to vector<128x128xbf16>
    %cst_76 = arith.constant dense<0.000000e+00> : vector<32x128xf32>
    %65 = tpu.matmul %62, %64, %cst_76 {dimension_numbers = #tpu.dot_dimension_numbers<[1], [0], [0], [1], [0, 0, 1, 1], [], []>} : vector<32x128xbf16>, vector<128x128xbf16>, vector<32x128xf32> -> vector<32x128xf32>
    %66 = arith.addf %60, %65 : vector<32x128xf32>
    %c0_77 = arith.constant 0 : index
    %c1_78 = arith.constant 1 : index
    %c9_79 = arith.constant 9 : index
    %c0_80 = arith.constant 0 : index
    %67 = vector.load %arg1[%c0_77, %c1_78, %c9_79, %c0_80] : memref<1x4x48x128xbf16, #tpu.memory_space<vmem>>, vector<1x1x32x128xbf16>
    %68 = vector.shape_cast %67 : vector<1x1x32x128xbf16> to vector<32x128xbf16>
    %c11 = arith.constant 11 : index
    %c0_81 = arith.constant 0 : index
    %c0_82 = arith.constant 0 : index
    %69 = vector.load %arg2[%c11, %c0_81, %c0_82] : memref<16x128x128xbf16, #tpu.memory_space<vmem>>, vector<1x128x128xbf16>
    %70 = vector.shape_cast %69 : vector<1x128x128xbf16> to vector<128x128xbf16>
    %cst_83 = arith.constant dense<0.000000e+00> : vector<32x128xf32>
    %71 = tpu.matmul %68, %70, %cst_83 {dimension_numbers = #tpu.dot_dimension_numbers<[1], [0], [0], [1], [0, 0, 1, 1], [], []>} : vector<32x128xbf16>, vector<128x128xbf16>, vector<32x128xf32> -> vector<32x128xf32>
    %72 = arith.addf %66, %71 : vector<32x128xf32>
    %c0_84 = arith.constant 0 : index
    %c2_85 = arith.constant 2 : index
    %c8_86 = arith.constant 8 : index
    %c0_87 = arith.constant 0 : index
    %73 = vector.load %arg1[%c0_84, %c2_85, %c8_86, %c0_87] : memref<1x4x48x128xbf16, #tpu.memory_space<vmem>>, vector<1x1x32x128xbf16>
    %74 = vector.shape_cast %73 : vector<1x1x32x128xbf16> to vector<32x128xbf16>
    %c12 = arith.constant 12 : index
    %c0_88 = arith.constant 0 : index
    %c0_89 = arith.constant 0 : index
    %75 = vector.load %arg2[%c12, %c0_88, %c0_89] : memref<16x128x128xbf16, #tpu.memory_space<vmem>>, vector<1x128x128xbf16>
    %76 = vector.shape_cast %75 : vector<1x128x128xbf16> to vector<128x128xbf16>
    %cst_90 = arith.constant dense<0.000000e+00> : vector<32x128xf32>
    %77 = tpu.matmul %74, %76, %cst_90 {dimension_numbers = #tpu.dot_dimension_numbers<[1], [0], [0], [1], [0, 0, 1, 1], [], []>} : vector<32x128xbf16>, vector<128x128xbf16>, vector<32x128xf32> -> vector<32x128xf32>
    %78 = arith.addf %72, %77 : vector<32x128xf32>
    %c0_91 = arith.constant 0 : index
    %c3_92 = arith.constant 3 : index
    %c8_93 = arith.constant 8 : index
    %c0_94 = arith.constant 0 : index
    %79 = vector.load %arg1[%c0_91, %c3_92, %c8_93, %c0_94] : memref<1x4x48x128xbf16, #tpu.memory_space<vmem>>, vector<1x1x32x128xbf16>
    %80 = vector.shape_cast %79 : vector<1x1x32x128xbf16> to vector<32x128xbf16>
    %c13 = arith.constant 13 : index
    %c0_95 = arith.constant 0 : index
    %c0_96 = arith.constant 0 : index
    %81 = vector.load %arg2[%c13, %c0_95, %c0_96] : memref<16x128x128xbf16, #tpu.memory_space<vmem>>, vector<1x128x128xbf16>
    %82 = vector.shape_cast %81 : vector<1x128x128xbf16> to vector<128x128xbf16>
    %cst_97 = arith.constant dense<0.000000e+00> : vector<32x128xf32>
    %83 = tpu.matmul %80, %82, %cst_97 {dimension_numbers = #tpu.dot_dimension_numbers<[1], [0], [0], [1], [0, 0, 1, 1], [], []>} : vector<32x128xbf16>, vector<128x128xbf16>, vector<32x128xf32> -> vector<32x128xf32>
    %84 = arith.addf %78, %83 : vector<32x128xf32>
    %c0_98 = arith.constant 0 : index
    %c2_99 = arith.constant 2 : index
    %c9_100 = arith.constant 9 : index
    %c0_101 = arith.constant 0 : index
    %85 = vector.load %arg1[%c0_98, %c2_99, %c9_100, %c0_101] : memref<1x4x48x128xbf16, #tpu.memory_space<vmem>>, vector<1x1x32x128xbf16>
    %86 = vector.shape_cast %85 : vector<1x1x32x128xbf16> to vector<32x128xbf16>
    %c14 = arith.constant 14 : index
    %c0_102 = arith.constant 0 : index
    %c0_103 = arith.constant 0 : index
    %87 = vector.load %arg2[%c14, %c0_102, %c0_103] : memref<16x128x128xbf16, #tpu.memory_space<vmem>>, vector<1x128x128xbf16>
    %88 = vector.shape_cast %87 : vector<1x128x128xbf16> to vector<128x128xbf16>
    %cst_104 = arith.constant dense<0.000000e+00> : vector<32x128xf32>
    %89 = tpu.matmul %86, %88, %cst_104 {dimension_numbers = #tpu.dot_dimension_numbers<[1], [0], [0], [1], [0, 0, 1, 1], [], []>} : vector<32x128xbf16>, vector<128x128xbf16>, vector<32x128xf32> -> vector<32x128xf32>
    %90 = arith.addf %84, %89 : vector<32x128xf32>
    %c0_105 = arith.constant 0 : index
    %c3_106 = arith.constant 3 : index
    %c9_107 = arith.constant 9 : index
    %c0_108 = arith.constant 0 : index
    %91 = vector.load %arg1[%c0_105, %c3_106, %c9_107, %c0_108] : memref<1x4x48x128xbf16, #tpu.memory_space<vmem>>, vector<1x1x32x128xbf16>
    %92 = vector.shape_cast %91 : vector<1x1x32x128xbf16> to vector<32x128xbf16>
    %c15 = arith.constant 15 : index
    %c0_109 = arith.constant 0 : index
    %c0_110 = arith.constant 0 : index
    %93 = vector.load %arg2[%c15, %c0_109, %c0_110] : memref<16x128x128xbf16, #tpu.memory_space<vmem>>, vector<1x128x128xbf16>
    %94 = vector.shape_cast %93 : vector<1x128x128xbf16> to vector<128x128xbf16>
    %cst_111 = arith.constant dense<0.000000e+00> : vector<32x128xf32>
    %95 = tpu.matmul %92, %94, %cst_111 {dimension_numbers = #tpu.dot_dimension_numbers<[1], [0], [0], [1], [0, 0, 1, 1], [], []>} : vector<32x128xbf16>, vector<128x128xbf16>, vector<32x128xf32> -> vector<32x128xf32>
    %96 = arith.addf %90, %95 : vector<32x128xf32>
    %97 = tpu.iota {dimensions = array<i32: 0>} : vector<32x1xi32>
    %c8_i32 = arith.constant 8 : i32
    %c0_i32 = arith.constant 0 : i32
    %98 = arith.cmpi eq, %c8_i32, %c0_i32 : i32
    %c1_i32 = arith.constant 1 : i32
    %99 = arith.select %98, %c1_i32, %c8_i32 : i32
    %100 = vector.broadcast %99 : i32 to vector<32x1xi32>
    %101 = arith.remsi %97, %100 : vector<32x1xi32>
    %c0_i32_112 = arith.constant 0 : i32
    %102 = vector.broadcast %c0_i32_112 : i32 to vector<32x1xi32>
    %103 = arith.cmpi ne, %101, %102 : vector<32x1xi32>
    %c0_i32_113 = arith.constant 0 : i32
    %104 = vector.broadcast %c0_i32_113 : i32 to vector<32x1xi32>
    %105 = arith.cmpi slt, %101, %104 : vector<32x1xi32>
    %c0_i32_114 = arith.constant 0 : i32
    %106 = arith.cmpi slt, %99, %c0_i32_114 : i32
    %107 = vector.broadcast %106 : i1 to vector<32x1xi1>
    %108 = vector.broadcast %107 : vector<32x1xi1> to vector<32x1xi1>
    %109 = arith.xori %105, %108 : vector<32x1xi1>
    %110 = arith.andi %109, %103 : vector<32x1xi1>
    %111 = vector.broadcast %99 : i32 to vector<32x1xi32>
    %112 = arith.addi %101, %111 : vector<32x1xi32>
    %113 = arith.select %110, %112, %101 : vector<32x1xi1>, vector<32x1xi32>
    %c4_i32 = arith.constant 4 : i32
    %114 = vector.broadcast %c4_i32 : i32 to vector<32x1xi32>
    %115 = arith.cmpi slt, %113, %114 : vector<32x1xi32>
    %cst_115 = arith.constant 0.000000e+00 : f32
    %116 = vector.shape_cast %115 : vector<32x1xi1> to vector<32x1xi1>
    %117 = vector.broadcast %116 : vector<32x1xi1> to vector<32x128xi1>
    %118 = vector.broadcast %cst_115 : f32 to vector<32x128xf32>
    %119 = arith.select %117, %96, %118 : vector<32x128xi1>, vector<32x128xf32>
    %cst_116 = arith.constant dense<0.000000e+00> : vector<128xf32>
    %120 = vector.multi_reduction <add>, %119, %cst_116 [0] : vector<32x128xf32> to vector<128xf32>
    %121 = vector.shape_cast %120 : vector<128xf32> to vector<1x128xf32>
    %cst_117 = arith.constant 6.250000e-02 : f32
    %122 = vector.broadcast %cst_117 : f32 to vector<1x128xf32>
    %123 = arith.mulf %121, %122 : vector<1x128xf32>
    %124 = arith.mulf %119, %119 : vector<32x128xf32>
    %cst_118 = arith.constant dense<0.000000e+00> : vector<128xf32>
    %125 = vector.multi_reduction <add>, %124, %cst_118 [0] : vector<32x128xf32> to vector<128xf32>
    %126 = vector.shape_cast %125 : vector<128xf32> to vector<1x128xf32>
    %cst_119 = arith.constant 6.250000e-02 : f32
    %127 = vector.broadcast %cst_119 : f32 to vector<1x128xf32>
    %128 = arith.mulf %126, %127 : vector<1x128xf32>
    %129 = arith.mulf %123, %123 : vector<1x128xf32>
    %130 = arith.subf %128, %129 : vector<1x128xf32>
    %cst_120 = arith.constant 0.000000e+00 : f32
    %131 = vector.broadcast %cst_120 : f32 to vector<1x128xf32>
    %132 = arith.maximumf %130, %131 : vector<1x128xf32>
    %cst_121 = arith.constant 9.99999974E-6 : f32
    %133 = vector.broadcast %cst_121 : f32 to vector<1x128xf32>
    %134 = arith.addf %132, %133 : vector<1x128xf32>
    %135 = math.rsqrt %134 : vector<1x128xf32>
    %136 = vector.broadcast %123 : vector<1x128xf32> to vector<32x128xf32>
    %137 = arith.subf %96, %136 : vector<32x128xf32>
    %138 = vector.broadcast %135 : vector<1x128xf32> to vector<32x128xf32>
    %139 = arith.mulf %137, %138 : vector<32x128xf32>
    %cst_122 = arith.constant 0.000000e+00 : f32
    %140 = vector.shape_cast %115 : vector<32x1xi1> to vector<32x1xi1>
    %141 = vector.broadcast %140 : vector<32x1xi1> to vector<32x128xi1>
    %142 = vector.broadcast %cst_122 : f32 to vector<32x128xf32>
    %143 = arith.select %141, %139, %142 : vector<32x128xi1>, vector<32x128xf32>
    %cst_123 = arith.constant 0.000000e+00 : f32
    %144 = vector.broadcast %cst_123 : f32 to vector<32x128xf32>
    %145 = arith.maximumf %143, %144 : vector<32x128xf32>
    %146 = arith.truncf %145 : vector<32x128xf32> to vector<32x128xbf16>
    %c0_124 = arith.constant 0 : index
    %c0_125 = arith.constant 0 : index
    %c0_126 = arith.constant 0 : index
    %147 = vector.load %arg3[%c0_124, %c0_125, %c0_126] : memref<1x32x128xbf16, #tpu.memory_space<vmem>>, vector<1x32x128xbf16>
    %148 = vector.shape_cast %147 : vector<1x32x128xbf16> to vector<32x128xbf16>
    %149 = vector.shape_cast %146 : vector<32x128xbf16> to vector<1x32x128xbf16>
    tpu.vector_store %arg3[%c0_124, %c0_125, %c0_126], %149 {strides = array<i32>} : memref<1x32x128xbf16, #tpu.memory_space<vmem>>, vector<1x32x128xbf16>,
    return
  }
  func.func @transform_0(%arg0: i32) -> (i32, i32, i32, i32) {
    %c0_i32 = arith.constant 0 : i32
    %c0_i32_0 = arith.constant 0 : i32
    %c0_i32_1 = arith.constant 0 : i32
    %c0_i32_2 = arith.constant 0 : i32
    return %arg0, %c0_i32, %c0_i32_0, %c0_i32_1 : i32, i32, i32, i32
  }
  func.func @transform_1(%arg0: i32) -> (i32, i32, i32) {
    %c0_i32 = arith.constant 0 : i32
    %c0_i32_0 = arith.constant 0 : i32
    %c0_i32_1 = arith.constant 0 : i32
    %c0_i32_2 = arith.constant 0 : i32
    return %c0_i32, %c0_i32_0, %c0_i32_1 : i32, i32, i32
  }
  func.func @transform_2(%arg0: i32) -> (i32, i32, i32) {
    %c0_i32 = arith.constant 0 : i32
    %c0_i32_0 = arith.constant 0 : i32
    %c0_i32_1 = arith.constant 0 : i32
    return %arg0, %c0_i32, %c0_i32_0 : i32, i32, i32
  }
}

module attributes {stable_mosaic.version = 11 : i64} {
  func.func @_conv_in_res_kernel(%arg0: i32, %arg1: memref<1x1x48x128xbf16, #tpu.memory_space<vmem>>, %arg2: memref<3x128x128xbf16, #tpu.memory_space<vmem>>, %arg3: memref<1x32x128xbf16, #tpu.memory_space<vmem>>, %arg4: memref<1x32x128xbf16, #tpu.memory_space<vmem>>) attributes {dimension_semantics = [#tpu.dimension_semantics<parallel>], iteration_bounds = array<i64: 2>, scalar_prefetch = 0 : i64, scratch_operands = 0 : i64, tpu.core_type = #tpu.core_type<tc>, window_params = [{transform_indices = @transform_0, window_bounds = array<i64: 1, 1, 48, 128>}, {pipeline_mode = #tpu.pipeline_mode<synchronous>, transform_indices = @transform_1, window_bounds = array<i64: 3, 128, 128>}, {transform_indices = @transform_2, window_bounds = array<i64: 1, 32, 128>}, {transform_indices = @transform_3, window_bounds = array<i64: 1, 32, 128>}]} {
    %cst = arith.constant 0.000000e+00 : f32
    %0 = vector.broadcast %cst : f32 to vector<32x128xf32>
    %c0 = arith.constant 0 : index
    %c0_0 = arith.constant 0 : index
    %c0_1 = arith.constant 0 : index
    %c0_2 = arith.constant 0 : index
    %1 = vector.load %arg1[%c0, %c0_0, %c0_1, %c0_2] : memref<1x1x48x128xbf16, #tpu.memory_space<vmem>>, vector<1x1x32x128xbf16>
    %2 = vector.shape_cast %1 : vector<1x1x32x128xbf16> to vector<32x128xbf16>
    %c0_3 = arith.constant 0 : index
    %c0_4 = arith.constant 0 : index
    %c0_5 = arith.constant 0 : index
    %3 = vector.load %arg2[%c0_3, %c0_4, %c0_5] : memref<3x128x128xbf16, #tpu.memory_space<vmem>>, vector<1x128x128xbf16>
    %4 = vector.shape_cast %3 : vector<1x128x128xbf16> to vector<128x128xbf16>
    %cst_6 = arith.constant dense<0.000000e+00> : vector<32x128xf32>
    %5 = tpu.matmul %2, %4, %cst_6 {dimension_numbers = #tpu.dot_dimension_numbers<[1], [0], [0], [1], [0, 0, 1, 1], [], []>} : vector<32x128xbf16>, vector<128x128xbf16>, vector<32x128xf32> -> vector<32x128xf32>
    %6 = arith.addf %0, %5 : vector<32x128xf32>
    %c0_7 = arith.constant 0 : index
    %c0_8 = arith.constant 0 : index
    %c8 = arith.constant 8 : index
    %c0_9 = arith.constant 0 : index
    %7 = vector.load %arg1[%c0_7, %c0_8, %c8, %c0_9] : memref<1x1x48x128xbf16, #tpu.memory_space<vmem>>, vector<1x1x32x128xbf16>
    %8 = vector.shape_cast %7 : vector<1x1x32x128xbf16> to vector<32x128xbf16>
    %c1 = arith.constant 1 : index
    %c0_10 = arith.constant 0 : index
    %c0_11 = arith.constant 0 : index
    %9 = vector.load %arg2[%c1, %c0_10, %c0_11] : memref<3x128x128xbf16, #tpu.memory_space<vmem>>, vector<1x128x128xbf16>
    %10 = vector.shape_cast %9 : vector<1x128x128xbf16> to vector<128x128xbf16>
    %cst_12 = arith.constant dense<0.000000e+00> : vector<32x128xf32>
    %11 = tpu.matmul %8, %10, %cst_12 {dimension_numbers = #tpu.dot_dimension_numbers<[1], [0], [0], [1], [0, 0, 1, 1], [], []>} : vector<32x128xbf16>, vector<128x128xbf16>, vector<32x128xf32> -> vector<32x128xf32>
    %12 = arith.addf %6, %11 : vector<32x128xf32>
    %c0_13 = arith.constant 0 : index
    %c0_14 = arith.constant 0 : index
    %c16 = arith.constant 16 : index
    %c0_15 = arith.constant 0 : index
    %13 = vector.load %arg1[%c0_13, %c0_14, %c16, %c0_15] : memref<1x1x48x128xbf16, #tpu.memory_space<vmem>>, vector<1x1x32x128xbf16>
    %14 = vector.shape_cast %13 : vector<1x1x32x128xbf16> to vector<32x128xbf16>
    %c2 = arith.constant 2 : index
    %c0_16 = arith.constant 0 : index
    %c0_17 = arith.constant 0 : index
    %15 = vector.load %arg2[%c2, %c0_16, %c0_17] : memref<3x128x128xbf16, #tpu.memory_space<vmem>>, vector<1x128x128xbf16>
    %16 = vector.shape_cast %15 : vector<1x128x128xbf16> to vector<128x128xbf16>
    %cst_18 = arith.constant dense<0.000000e+00> : vector<32x128xf32>
    %17 = tpu.matmul %14, %16, %cst_18 {dimension_numbers = #tpu.dot_dimension_numbers<[1], [0], [0], [1], [0, 0, 1, 1], [], []>} : vector<32x128xbf16>, vector<128x128xbf16>, vector<32x128xf32> -> vector<32x128xf32>
    %18 = arith.addf %12, %17 : vector<32x128xf32>
    %19 = tpu.iota {dimensions = array<i32: 0>} : vector<32x1xi32>
    %c8_i32 = arith.constant 8 : i32
    %c0_i32 = arith.constant 0 : i32
    %20 = arith.cmpi eq, %c8_i32, %c0_i32 : i32
    %c1_i32 = arith.constant 1 : i32
    %21 = arith.select %20, %c1_i32, %c8_i32 : i32
    %22 = vector.broadcast %21 : i32 to vector<32x1xi32>
    %23 = arith.remsi %19, %22 : vector<32x1xi32>
    %c0_i32_19 = arith.constant 0 : i32
    %24 = vector.broadcast %c0_i32_19 : i32 to vector<32x1xi32>
    %25 = arith.cmpi ne, %23, %24 : vector<32x1xi32>
    %c0_i32_20 = arith.constant 0 : i32
    %26 = vector.broadcast %c0_i32_20 : i32 to vector<32x1xi32>
    %27 = arith.cmpi slt, %23, %26 : vector<32x1xi32>
    %c0_i32_21 = arith.constant 0 : i32
    %28 = arith.cmpi slt, %21, %c0_i32_21 : i32
    %29 = vector.broadcast %28 : i1 to vector<32x1xi1>
    %30 = vector.broadcast %29 : vector<32x1xi1> to vector<32x1xi1>
    %31 = arith.xori %27, %30 : vector<32x1xi1>
    %32 = arith.andi %31, %25 : vector<32x1xi1>
    %33 = vector.broadcast %21 : i32 to vector<32x1xi32>
    %34 = arith.addi %23, %33 : vector<32x1xi32>
    %35 = arith.select %32, %34, %23 : vector<32x1xi1>, vector<32x1xi32>
    %c4_i32 = arith.constant 4 : i32
    %36 = vector.broadcast %c4_i32 : i32 to vector<32x1xi32>
    %37 = arith.cmpi slt, %35, %36 : vector<32x1xi32>
    %cst_22 = arith.constant 0.000000e+00 : f32
    %38 = vector.shape_cast %37 : vector<32x1xi1> to vector<32x1xi1>
    %39 = vector.broadcast %38 : vector<32x1xi1> to vector<32x128xi1>
    %40 = vector.broadcast %cst_22 : f32 to vector<32x128xf32>
    %41 = arith.select %39, %18, %40 : vector<32x128xi1>, vector<32x128xf32>
    %cst_23 = arith.constant dense<0.000000e+00> : vector<128xf32>
    %42 = vector.multi_reduction <add>, %41, %cst_23 [0] : vector<32x128xf32> to vector<128xf32>
    %43 = vector.shape_cast %42 : vector<128xf32> to vector<1x128xf32>
    %cst_24 = arith.constant 6.250000e-02 : f32
    %44 = vector.broadcast %cst_24 : f32 to vector<1x128xf32>
    %45 = arith.mulf %43, %44 : vector<1x128xf32>
    %46 = arith.mulf %41, %41 : vector<32x128xf32>
    %cst_25 = arith.constant dense<0.000000e+00> : vector<128xf32>
    %47 = vector.multi_reduction <add>, %46, %cst_25 [0] : vector<32x128xf32> to vector<128xf32>
    %48 = vector.shape_cast %47 : vector<128xf32> to vector<1x128xf32>
    %cst_26 = arith.constant 6.250000e-02 : f32
    %49 = vector.broadcast %cst_26 : f32 to vector<1x128xf32>
    %50 = arith.mulf %48, %49 : vector<1x128xf32>
    %51 = arith.mulf %45, %45 : vector<1x128xf32>
    %52 = arith.subf %50, %51 : vector<1x128xf32>
    %cst_27 = arith.constant 0.000000e+00 : f32
    %53 = vector.broadcast %cst_27 : f32 to vector<1x128xf32>
    %54 = arith.maximumf %52, %53 : vector<1x128xf32>
    %cst_28 = arith.constant 9.99999974E-6 : f32
    %55 = vector.broadcast %cst_28 : f32 to vector<1x128xf32>
    %56 = arith.addf %54, %55 : vector<1x128xf32>
    %57 = math.rsqrt %56 : vector<1x128xf32>
    %58 = vector.broadcast %45 : vector<1x128xf32> to vector<32x128xf32>
    %59 = arith.subf %18, %58 : vector<32x128xf32>
    %60 = vector.broadcast %57 : vector<1x128xf32> to vector<32x128xf32>
    %61 = arith.mulf %59, %60 : vector<32x128xf32>
    %cst_29 = arith.constant 0.000000e+00 : f32
    %62 = vector.shape_cast %37 : vector<32x1xi1> to vector<32x1xi1>
    %63 = vector.broadcast %62 : vector<32x1xi1> to vector<32x128xi1>
    %64 = vector.broadcast %cst_29 : f32 to vector<32x128xf32>
    %65 = arith.select %63, %61, %64 : vector<32x128xi1>, vector<32x128xf32>
    %c0_30 = arith.constant 0 : index
    %c0_31 = arith.constant 0 : index
    %c0_32 = arith.constant 0 : index
    %66 = vector.load %arg3[%c0_30, %c0_31, %c0_32] : memref<1x32x128xbf16, #tpu.memory_space<vmem>>, vector<1x32x128xbf16>
    %67 = vector.shape_cast %66 : vector<1x32x128xbf16> to vector<32x128xbf16>
    %68 = arith.extf %67 : vector<32x128xbf16> to vector<32x128xf32>
    %69 = arith.addf %65, %68 : vector<32x128xf32>
    %70 = arith.truncf %69 : vector<32x128xf32> to vector<32x128xbf16>
    %c0_33 = arith.constant 0 : index
    %c0_34 = arith.constant 0 : index
    %c0_35 = arith.constant 0 : index
    %71 = vector.load %arg4[%c0_33, %c0_34, %c0_35] : memref<1x32x128xbf16, #tpu.memory_space<vmem>>, vector<1x32x128xbf16>
    %72 = vector.shape_cast %71 : vector<1x32x128xbf16> to vector<32x128xbf16>
    %73 = vector.shape_cast %70 : vector<32x128xbf16> to vector<1x32x128xbf16>
    tpu.vector_store %arg4[%c0_33, %c0_34, %c0_35], %73 {strides = array<i32>} : memref<1x32x128xbf16, #tpu.memory_space<vmem>>, vector<1x32x128xbf16>,
    return
  }
  func.func @transform_0(%arg0: i32) -> (i32, i32, i32, i32) {
    %c0_i32 = arith.constant 0 : i32
    %c0_i32_0 = arith.constant 0 : i32
    %c0_i32_1 = arith.constant 0 : i32
    %c0_i32_2 = arith.constant 0 : i32
    return %arg0, %c0_i32, %c0_i32_0, %c0_i32_1 : i32, i32, i32, i32
  }
  func.func @transform_1(%arg0: i32) -> (i32, i32, i32) {
    %c0_i32 = arith.constant 0 : i32
    %c0_i32_0 = arith.constant 0 : i32
    %c0_i32_1 = arith.constant 0 : i32
    %c0_i32_2 = arith.constant 0 : i32
    return %c0_i32, %c0_i32_0, %c0_i32_1 : i32, i32, i32
  }
  func.func @transform_2(%arg0: i32) -> (i32, i32, i32) {
    %c0_i32 = arith.constant 0 : i32
    %c0_i32_0 = arith.constant 0 : i32
    %c0_i32_1 = arith.constant 0 : i32
    return %arg0, %c0_i32, %c0_i32_0 : i32, i32, i32
  }
  func.func @transform_3(%arg0: i32) -> (i32, i32, i32) {
    %c0_i32 = arith.constant 0 : i32
    %c0_i32_0 = arith.constant 0 : i32
    %c0_i32_1 = arith.constant 0 : i32
    return %arg0, %c0_i32, %c0_i32_0 : i32, i32, i32
  }
}

module attributes {stable_mosaic.version = 11 : i64} {
  func.func @_conv_in_kernel(%arg0: i32, %arg1: memref<1x1x48x128xbf16, #tpu.memory_space<vmem>>, %arg2: memref<3x128x128xbf16, #tpu.memory_space<vmem>>, %arg3: memref<1x32x128xbf16, #tpu.memory_space<vmem>>) attributes {dimension_semantics = [#tpu.dimension_semantics<parallel>], iteration_bounds = array<i64: 2>, scalar_prefetch = 0 : i64, scratch_operands = 0 : i64, tpu.core_type = #tpu.core_type<tc>, window_params = [{transform_indices = @transform_0, window_bounds = array<i64: 1, 1, 48, 128>}, {pipeline_mode = #tpu.pipeline_mode<synchronous>, transform_indices = @transform_1, window_bounds = array<i64: 3, 128, 128>}, {transform_indices = @transform_2, window_bounds = array<i64: 1, 32, 128>}]} {
    %cst = arith.constant 0.000000e+00 : f32
    %0 = vector.broadcast %cst : f32 to vector<32x128xf32>
    %c0 = arith.constant 0 : index
    %c0_0 = arith.constant 0 : index
    %c0_1 = arith.constant 0 : index
    %c0_2 = arith.constant 0 : index
    %1 = vector.load %arg1[%c0, %c0_0, %c0_1, %c0_2] : memref<1x1x48x128xbf16, #tpu.memory_space<vmem>>, vector<1x1x32x128xbf16>
    %2 = vector.shape_cast %1 : vector<1x1x32x128xbf16> to vector<32x128xbf16>
    %c0_3 = arith.constant 0 : index
    %c0_4 = arith.constant 0 : index
    %c0_5 = arith.constant 0 : index
    %3 = vector.load %arg2[%c0_3, %c0_4, %c0_5] : memref<3x128x128xbf16, #tpu.memory_space<vmem>>, vector<1x128x128xbf16>
    %4 = vector.shape_cast %3 : vector<1x128x128xbf16> to vector<128x128xbf16>
    %cst_6 = arith.constant dense<0.000000e+00> : vector<32x128xf32>
    %5 = tpu.matmul %2, %4, %cst_6 {dimension_numbers = #tpu.dot_dimension_numbers<[1], [0], [0], [1], [0, 0, 1, 1], [], []>} : vector<32x128xbf16>, vector<128x128xbf16>, vector<32x128xf32> -> vector<32x128xf32>
    %6 = arith.addf %0, %5 : vector<32x128xf32>
    %c0_7 = arith.constant 0 : index
    %c0_8 = arith.constant 0 : index
    %c8 = arith.constant 8 : index
    %c0_9 = arith.constant 0 : index
    %7 = vector.load %arg1[%c0_7, %c0_8, %c8, %c0_9] : memref<1x1x48x128xbf16, #tpu.memory_space<vmem>>, vector<1x1x32x128xbf16>
    %8 = vector.shape_cast %7 : vector<1x1x32x128xbf16> to vector<32x128xbf16>
    %c1 = arith.constant 1 : index
    %c0_10 = arith.constant 0 : index
    %c0_11 = arith.constant 0 : index
    %9 = vector.load %arg2[%c1, %c0_10, %c0_11] : memref<3x128x128xbf16, #tpu.memory_space<vmem>>, vector<1x128x128xbf16>
    %10 = vector.shape_cast %9 : vector<1x128x128xbf16> to vector<128x128xbf16>
    %cst_12 = arith.constant dense<0.000000e+00> : vector<32x128xf32>
    %11 = tpu.matmul %8, %10, %cst_12 {dimension_numbers = #tpu.dot_dimension_numbers<[1], [0], [0], [1], [0, 0, 1, 1], [], []>} : vector<32x128xbf16>, vector<128x128xbf16>, vector<32x128xf32> -> vector<32x128xf32>
    %12 = arith.addf %6, %11 : vector<32x128xf32>
    %c0_13 = arith.constant 0 : index
    %c0_14 = arith.constant 0 : index
    %c16 = arith.constant 16 : index
    %c0_15 = arith.constant 0 : index
    %13 = vector.load %arg1[%c0_13, %c0_14, %c16, %c0_15] : memref<1x1x48x128xbf16, #tpu.memory_space<vmem>>, vector<1x1x32x128xbf16>
    %14 = vector.shape_cast %13 : vector<1x1x32x128xbf16> to vector<32x128xbf16>
    %c2 = arith.constant 2 : index
    %c0_16 = arith.constant 0 : index
    %c0_17 = arith.constant 0 : index
    %15 = vector.load %arg2[%c2, %c0_16, %c0_17] : memref<3x128x128xbf16, #tpu.memory_space<vmem>>, vector<1x128x128xbf16>
    %16 = vector.shape_cast %15 : vector<1x128x128xbf16> to vector<128x128xbf16>
    %cst_18 = arith.constant dense<0.000000e+00> : vector<32x128xf32>
    %17 = tpu.matmul %14, %16, %cst_18 {dimension_numbers = #tpu.dot_dimension_numbers<[1], [0], [0], [1], [0, 0, 1, 1], [], []>} : vector<32x128xbf16>, vector<128x128xbf16>, vector<32x128xf32> -> vector<32x128xf32>
    %18 = arith.addf %12, %17 : vector<32x128xf32>
    %19 = tpu.iota {dimensions = array<i32: 0>} : vector<32x1xi32>
    %c8_i32 = arith.constant 8 : i32
    %c0_i32 = arith.constant 0 : i32
    %20 = arith.cmpi eq, %c8_i32, %c0_i32 : i32
    %c1_i32 = arith.constant 1 : i32
    %21 = arith.select %20, %c1_i32, %c8_i32 : i32
    %22 = vector.broadcast %21 : i32 to vector<32x1xi32>
    %23 = arith.remsi %19, %22 : vector<32x1xi32>
    %c0_i32_19 = arith.constant 0 : i32
    %24 = vector.broadcast %c0_i32_19 : i32 to vector<32x1xi32>
    %25 = arith.cmpi ne, %23, %24 : vector<32x1xi32>
    %c0_i32_20 = arith.constant 0 : i32
    %26 = vector.broadcast %c0_i32_20 : i32 to vector<32x1xi32>
    %27 = arith.cmpi slt, %23, %26 : vector<32x1xi32>
    %c0_i32_21 = arith.constant 0 : i32
    %28 = arith.cmpi slt, %21, %c0_i32_21 : i32
    %29 = vector.broadcast %28 : i1 to vector<32x1xi1>
    %30 = vector.broadcast %29 : vector<32x1xi1> to vector<32x1xi1>
    %31 = arith.xori %27, %30 : vector<32x1xi1>
    %32 = arith.andi %31, %25 : vector<32x1xi1>
    %33 = vector.broadcast %21 : i32 to vector<32x1xi32>
    %34 = arith.addi %23, %33 : vector<32x1xi32>
    %35 = arith.select %32, %34, %23 : vector<32x1xi1>, vector<32x1xi32>
    %c4_i32 = arith.constant 4 : i32
    %36 = vector.broadcast %c4_i32 : i32 to vector<32x1xi32>
    %37 = arith.cmpi slt, %35, %36 : vector<32x1xi32>
    %cst_22 = arith.constant 0.000000e+00 : f32
    %38 = vector.shape_cast %37 : vector<32x1xi1> to vector<32x1xi1>
    %39 = vector.broadcast %38 : vector<32x1xi1> to vector<32x128xi1>
    %40 = vector.broadcast %cst_22 : f32 to vector<32x128xf32>
    %41 = arith.select %39, %18, %40 : vector<32x128xi1>, vector<32x128xf32>
    %cst_23 = arith.constant dense<0.000000e+00> : vector<128xf32>
    %42 = vector.multi_reduction <add>, %41, %cst_23 [0] : vector<32x128xf32> to vector<128xf32>
    %43 = vector.shape_cast %42 : vector<128xf32> to vector<1x128xf32>
    %cst_24 = arith.constant 6.250000e-02 : f32
    %44 = vector.broadcast %cst_24 : f32 to vector<1x128xf32>
    %45 = arith.mulf %43, %44 : vector<1x128xf32>
    %46 = arith.mulf %41, %41 : vector<32x128xf32>
    %cst_25 = arith.constant dense<0.000000e+00> : vector<128xf32>
    %47 = vector.multi_reduction <add>, %46, %cst_25 [0] : vector<32x128xf32> to vector<128xf32>
    %48 = vector.shape_cast %47 : vector<128xf32> to vector<1x128xf32>
    %cst_26 = arith.constant 6.250000e-02 : f32
    %49 = vector.broadcast %cst_26 : f32 to vector<1x128xf32>
    %50 = arith.mulf %48, %49 : vector<1x128xf32>
    %51 = arith.mulf %45, %45 : vector<1x128xf32>
    %52 = arith.subf %50, %51 : vector<1x128xf32>
    %cst_27 = arith.constant 0.000000e+00 : f32
    %53 = vector.broadcast %cst_27 : f32 to vector<1x128xf32>
    %54 = arith.maximumf %52, %53 : vector<1x128xf32>
    %cst_28 = arith.constant 9.99999974E-6 : f32
    %55 = vector.broadcast %cst_28 : f32 to vector<1x128xf32>
    %56 = arith.addf %54, %55 : vector<1x128xf32>
    %57 = math.rsqrt %56 : vector<1x128xf32>
    %58 = vector.broadcast %45 : vector<1x128xf32> to vector<32x128xf32>
    %59 = arith.subf %18, %58 : vector<32x128xf32>
    %60 = vector.broadcast %57 : vector<1x128xf32> to vector<32x128xf32>
    %61 = arith.mulf %59, %60 : vector<32x128xf32>
    %cst_29 = arith.constant 0.000000e+00 : f32
    %62 = vector.shape_cast %37 : vector<32x1xi1> to vector<32x1xi1>
    %63 = vector.broadcast %62 : vector<32x1xi1> to vector<32x128xi1>
    %64 = vector.broadcast %cst_29 : f32 to vector<32x128xf32>
    %65 = arith.select %63, %61, %64 : vector<32x128xi1>, vector<32x128xf32>
    %cst_30 = arith.constant 0.000000e+00 : f32
    %66 = vector.broadcast %cst_30 : f32 to vector<32x128xf32>
    %67 = arith.maximumf %65, %66 : vector<32x128xf32>
    %68 = arith.truncf %67 : vector<32x128xf32> to vector<32x128xbf16>
    %c0_31 = arith.constant 0 : index
    %c0_32 = arith.constant 0 : index
    %c0_33 = arith.constant 0 : index
    %69 = vector.load %arg3[%c0_31, %c0_32, %c0_33] : memref<1x32x128xbf16, #tpu.memory_space<vmem>>, vector<1x32x128xbf16>
    %70 = vector.shape_cast %69 : vector<1x32x128xbf16> to vector<32x128xbf16>
    %71 = vector.shape_cast %68 : vector<32x128xbf16> to vector<1x32x128xbf16>
    tpu.vector_store %arg3[%c0_31, %c0_32, %c0_33], %71 {strides = array<i32>} : memref<1x32x128xbf16, #tpu.memory_space<vmem>>, vector<1x32x128xbf16>,
    return
  }
  func.func @transform_0(%arg0: i32) -> (i32, i32, i32, i32) {
    %c0_i32 = arith.constant 0 : i32
    %c0_i32_0 = arith.constant 0 : i32
    %c0_i32_1 = arith.constant 0 : i32
    %c0_i32_2 = arith.constant 0 : i32
    return %arg0, %c0_i32, %c0_i32_0, %c0_i32_1 : i32, i32, i32, i32
  }
  func.func @transform_1(%arg0: i32) -> (i32, i32, i32) {
    %c0_i32 = arith.constant 0 : i32
    %c0_i32_0 = arith.constant 0 : i32
    %c0_i32_1 = arith.constant 0 : i32
    %c0_i32_2 = arith.constant 0 : i32
    return %c0_i32, %c0_i32_0, %c0_i32_1 : i32, i32, i32
  }
  func.func @transform_2(%arg0: i32) -> (i32, i32, i32) {
    %c0_i32 = arith.constant 0 : i32
    %c0_i32_0 = arith.constant 0 : i32
    %c0_i32_1 = arith.constant 0 : i32
    return %arg0, %c0_i32, %c0_i32_0 : i32, i32, i32
  }
}

</mosaic_0001>

<bundles_post_ra>
// kernel: content_encoder_forward.9
= control target key start
LH: loop header
LB: loop body
LE: loop exit
PB: predicated region body
PF: predicated region fallthrough
CT: control target
= control target key end

     0   :  { %s4096_s9 = smov 0   ;;  %s4898_s0 = inlined_call_operand.vmem [shape: bf16[2,1,352,128], index: 0, kind: input, shape index: {}]   ;;  %s4899_s1 = inlined_call_operand.vmem [shape: bf16[7,128,128], index: 1, kind: input, shape index: {}]   ;;  %s4900_s2 = inlined_call_operand.vmem [shape: bf16[2,256,128], index: 2, kind: output, shape index: {}]  }
   0x1 LB: > { %s3071_s10 = sadd.s32 4294967295, %s4079_s9   ;;  %p3075_p0 = scmp.ge.s32.totalorder %s4079_s9, 1  ;;  %s4079_s9 = sphi %s4096_s9, %s12_s9  }
   0x2   : > { %p112_p1 = scmp.lt.s32.totalorder %s4079_s9, 3 }
   0x4   : > { %p113_p2 = pnand %p3075_p0, %p112_p1 }
   0x5   : > { %p134_p3 = scmp.lt.s32.totalorder (!%p113_p2), %s3071_s10, 1 }
   0x6   : > { %116 = sbr.rel (%p113_p2) target bundleno = 699 (0x2bb), region = 28 }
   0xb   : > { %v3822_v0 = vld [vmem:[%s4899_s1 + $0x78] sm:$0xff]  ;;  %v3821_v3 = vld [vmem:[%s4899_s1 + $0x70] sm:$0xff]  ;;  %v3820_v6 = vld [vmem:[%s4899_s1 + $0x68] sm:$0xff]  ;;  %s4902_s10 = smov (!%p134_p3, %s3071_s10), 1 }
   0xc   : > { %v4110_v1 = vld [vmem:[%s4899_s1 + $0x38] sm:$0xff]  ;;  %355 = vmatpush.bf16.msra.mxu0 %v3822_v0  ;;  %4038 = vmatpush.bf16.msra.mxu3 %v3822_v0  ;;  %v4125_v4 = vld [vmem:[%s4899_s1 + $0x30] sm:$0xff]  ;;  %v4140_v7 = vld [vmem:[%s4899_s1 + $0x28] sm:$0xff]  ;;  %s4062_s23 = smul.u32 176, %s4902_s10 }
   0xd   : > { %v4115_v2 = vld [vmem:[%s4899_s1 + $0xb8] sm:$0xff]  ;;  %498 = vmatpush.bf16.msra.mxu1 %v4110_v1  ;;  %v4130_v5 = vld [vmem:[%s4899_s1 + $0xb0] sm:$0xff]  ;;  %v4145_v8 = vld [vmem:[%s4899_s1 + $0xa8] sm:$0xff] }
   0xe   : > { %780 = vmatpush.bf16.msra.mxu2 %v4115_v2  ;;  %v3819_v9 = vld [vmem:[%s4899_s1 + $0x60] sm:$0xff]  ;;  %v3818_v12 = vld [vmem:[%s4899_s1 + $0x58] sm:$0xff]  ;;  %v3817_v15 = vld [vmem:[%s4899_s1 + $0x50] sm:$0xff]  ;;  %s4209_s4 = scalar_lea.vmem %s4898_s0, %s4062_s23 }
   0xf   : > { %v3810_v10 = vld [vmem:[%s4899_s1 + $0x20] sm:$0xff]  ;;  %v3809_v13 = vld [vmem:[%s4899_s1 + $0x18] sm:$0xff]  ;;  %v3808_v16 = vld [vmem:[%s4899_s1 + $0x10] sm:$0xff] }
  0x10   : > { %356 = vmatpush.bf16.msra.mxu0 %v3821_v3  ;;  %4039 = vmatpush.bf16.msra.mxu3 %v3821_v3  ;;  %v4158_v11 = vld [vmem:[%s4899_s1 + $0xa0] sm:$0xff]  ;;  %v4172_v14 = vld [vmem:[%s4899_s1 + $0x98] sm:$0xff]  ;;  %v4188_v17 = vld [vmem:[%s4899_s1 + $0x90] sm:$0xff] }
  0x11   : > { %499 = vmatpush.bf16.msra.mxu1 %v4125_v4  ;;  %v3816_v18 = vld [vmem:[%s4899_s1 + $0x48] sm:$0xff]  ;;  %v3815_v21 = vld [vmem:[%s4899_s1 + $0x40] sm:$0xff]  ;;  %v3942_v24 = vld [vmem:[%s4899_s1 + $0x1b8] sm:$0xff] }
  0x12   : > { %781 = vmatpush.bf16.msra.mxu2 %v4130_v5  ;;  %v3807_v19 = vld [vmem:[%s4899_s1 + $0x8] sm:$0xff]  ;;  %v3806_v22 = vld [vmem:[%s4899_s1] sm:$0xff]  ;;  %v3823_v28 = vld [vmem:[%s4209_s4 + $0x10] sm:$0xff] }
  0x13   : > { %v4201_v20 = vld [vmem:[%s4899_s1 + $0x88] sm:$0xff]  ;;  %v4218_v23 = vld [vmem:[%s4899_s1 + $0x80] sm:$0xff]  ;;  %v3894_v29 = vld [vmem:[%s4899_s1 + $0x138] sm:$0xff] }
  0x14   : > { %357 = vmatpush.bf16.msra.mxu0 %v3820_v6  ;;  %4040 = vmatpush.bf16.msra.mxu3 %v3820_v6  ;;  %v3791_v25 = vld [vmem:[%s4209_s4 + $0x8] sm:$0xff]  ;;  %v3790_v27 = vld [vmem:[%s4209_s4] sm:$0xff]  ;;  %v3918_v30 = vld [vmem:[%s4899_s1 + $0x178] sm:$0xff] }
  0x15   : > { %500 = vmatpush.bf16.msra.mxu1 %v4140_v7  ;;  %v4225_v26 = vld [vmem:[%s4209_s4 + $0x68] sm:$0xff]  ;;  %v3941_v31 = vld [vmem:[%s4899_s1 + $0x1b0] sm:$0xff]  ;;  %v3824_v36 = vld [vmem:[%s4209_s4 + $0x18] sm:$0xff] }
  0x16   : > { %782 = vmatpush.bf16.msra.mxu2 %v4145_v8  ;;  %v3893_v32 = vld [vmem:[%s4899_s1 + $0x130] sm:$0xff]  ;;  %v3940_v37 = vld [vmem:[%s4899_s1 + $0x1a8] sm:$0xff]  ;;  %v3793_v40 = vld [vmem:[%s4209_s4 + $0x18] sm:$0xff] }
  0x17   : > { %v3917_v33 = vld [vmem:[%s4899_s1 + $0x170] sm:$0xff]  ;;  %v3892_v38 = vld [vmem:[%s4899_s1 + $0x128] sm:$0xff]  ;;  %v4266_v41 = vld [vmem:[%s4209_s4 + $0x78] sm:$0xff] }
  0x18   : > { %358 = vmatpush.bf16.msra.mxu0 %v3819_v9  ;;  %4041 = vmatpush.bf16.msra.mxu3 %v3819_v9  ;;  %v3792_v34 = vld [vmem:[%s4209_s4 + $0x10] sm:$0xff]  ;;  %v3916_v39 = vld [vmem:[%s4899_s1 + $0x168] sm:$0xff]  ;;  %v3825_v42 = vld [vmem:[%s4209_s4 + $0x20] sm:$0xff] }
  0x19   : > { %501 = vmatpush.bf16.msra.mxu1 %v3810_v10  ;;  %v4251_v35 = vld [vmem:[%s4209_s4 + $0x70] sm:$0xff]  ;;  %v3939_v43 = vld [vmem:[%s4899_s1 + $0x1a0] sm:$0xff]  ;;  %v3826_v46 = vld [vmem:[%s4209_s4 + $0x28] sm:$0xff] }
  0x1a   : > { %783 = vmatpush.bf16.msra.mxu2 %v4158_v11  ;;  %v3794_v44 = vld [vmem:[%s4209_s4 + $0x20] sm:$0xff]  ;;  %v3795_v49 = vld [vmem:[%s4209_s4 + $0x28] sm:$0xff]  ;;  %v3827_v51 = vld [vmem:[%s4209_s4 + $0x30] sm:$0xff] }
  0x1b   : > { %v3814_v45 = vld [vmem:[%s4209_s4 + $0x80] sm:$0xff]  ;;  %v3938_v52 = vld [vmem:[%s4899_s1 + $0x198] sm:$0xff]  ;;  %v3796_v55 = vld [vmem:[%s4209_s4 + $0x30] sm:$0xff] }
  0x1c   : > { %359 = vmatpush.bf16.msra.mxu0 %v3818_v12  ;;  %4042 = vmatpush.bf16.msra.mxu3 %v3818_v12  ;;  %v3891_v47 = vld [vmem:[%s4899_s1 + $0x120] sm:$0xff]  ;;  %v3890_v53 = vld [vmem:[%s4899_s1 + $0x118] sm:$0xff]  ;;  %v3937_v59 = vld [vmem:[%s4899_s1 + $0x190] sm:$0xff] }
  0x1d   : > { %502 = vmatpush.bf16.msra.mxu1 %v3809_v13  ;;  %v3915_v48 = vld [vmem:[%s4899_s1 + $0x160] sm:$0xff]  ;;  %v3914_v54 = vld [vmem:[%s4899_s1 + $0x158] sm:$0xff]  ;;  %v3889_v61 = vld [vmem:[%s4899_s1 + $0x110] sm:$0xff] }
  0x1e   : > { %784 = vmatpush.bf16.msra.mxu2 %v4172_v14  ;;  %v4292_v50 = vld [vmem:[%s4209_s4 + $0x60] sm:$0xff]  ;;  %v3828_v56 = vld [vmem:[%s4209_s4 + $0x38] sm:$0xff]  ;;  %v3913_v62 = vld [vmem:[%s4899_s1 + $0x150] sm:$0xff] }
  0x1f   : > { %v3797_v57 = vld [vmem:[%s4209_s4 + $0x38] sm:$0xff]  ;;  %v3829_v58 = vld [vmem:[%s4209_s4 + $0x40] sm:$0xff]  ;;  %v3869_v63 = vld [vmem:[%s4899_s1 + $0xf0] sm:$0xff] }
  0x20   : > { %360 = vmatpush.bf16.msra.mxu0 %v3817_v15  ;;  %4043 = vmatpush.bf16.msra.mxu3 %v3817_v15  ;;  %v3870_v60 = vld [vmem:[%s4899_s1 + $0xf8] sm:$0xff]  ;;  %v3798_v0 = vld [vmem:[%s4209_s4 + $0x40] sm:$0xff]  ;;  %v3936_v3 = vld [vmem:[%s4899_s1 + $0x188] sm:$0xff] }
  0x21   : > { %503 = vmatpush.bf16.msra.mxu1 %v3808_v16  ;;  %v3912_v6 = vld [vmem:[%s4899_s1 + $0x148] sm:$0xff] }
  0x22   : > { %785 = vmatpush.bf16.msra.mxu2 %v4188_v17 }
  0x24   : > { %361 = vmatpush.bf16.msra.mxu0 %v3816_v18  ;;  %4044 = vmatpush.bf16.msra.mxu3 %v3816_v18 }
  0x25   : > { %504 = vmatpush.bf16.msra.mxu1 %v3807_v19 }
  0x26   : > { %786 = vmatpush.bf16.msra.mxu2 %v4201_v20 }
  0x28   : > { %362 = vmatpush.bf16.msra.mxu0 %v3815_v21  ;;  %4045 = vmatpush.bf16.msra.mxu3 %v3815_v21 }
  0x29   : > { %505 = vmatpush.bf16.msra.mxu1 %v3806_v22 }
  0x2a   : > { %787 = vmatpush.bf16.msra.mxu2 %v4218_v23 }
  0x2b   : > { %363 = vmatmul.bf16.vlgmr.msra.gmra.mxu0 %v3791_v25  ;;  %423 = vmatmul.bf16.vlgmr.msra.gmra.mxu3 %v4225_v26 }
  0x2c   : > { %4046 = vmatpush.bf16.msrb.mxu3 %v4110_v1  ;;  %506 = vmatmul.bf16.vlgmr.msra.gmra.mxu1 %v3790_v27  ;;  %v3830_v1 = vld [vmem:[%s4209_s4 + $0x48] sm:$0xff]  ;;  %v3832_v27 = vld [vmem:[%s4209_s4 + $0x58] sm:$0xff] }
  0x2d   : > { %788 = vmatmul.bf16.vlgmr.msra.gmra.mxu2 %v3823_v28  ;;  %1408 = vmatpush.bf16.msrb.mxu0 %v3894_v29 }
  0x2e   : > { %2036 = vmatpush.bf16.msrb.mxu2 %v3942_v24  ;;  %1722 = vmatpush.bf16.msrb.mxu1 %v3918_v30  ;;  %v3836_v24 = vld [vmem:[%s4209_s4 + $0x78] sm:$0xff]  ;;  %v3935_v30 = vld [vmem:[%s4899_s1 + $0x180] sm:$0xff] }
  0x30   : > { %4047 = vmatpush.bf16.msrb.mxu3 %v4125_v4  ;;  %v3867_v4 = vld [vmem:[%s4899_s1 + $0xe0] sm:$0xff] }
  0x31   : > { %1409 = vmatpush.bf16.msrb.mxu0 %v3893_v32  ;;  %v3887_v32 = vld [vmem:[%s4899_s1 + $0x100] sm:$0xff] }
  0x32   : > { %2037 = vmatpush.bf16.msrb.mxu2 %v3941_v31  ;;  %1723 = vmatpush.bf16.msrb.mxu1 %v3917_v33  ;;  %v3864_v31 = vld [vmem:[%s4899_s1 + $0xc8] sm:$0xff]  ;;  %v3911_v33 = vld [vmem:[%s4899_s1 + $0x140] sm:$0xff] }
  0x34   : > { %4048 = vmatpush.bf16.msrb.mxu3 %v4140_v7  ;;  %v3799_v7 = vld [vmem:[%s4209_s4 + $0x48] sm:$0xff] }
  0x35   : > { %1410 = vmatpush.bf16.msrb.mxu0 %v3892_v38 }
  0x36   : > { %2038 = vmatpush.bf16.msrb.mxu2 %v3940_v37  ;;  %1724 = vmatpush.bf16.msrb.mxu1 %v3916_v39 }
  0x38   : > { %4049 = vmatpush.bf16.msrb.mxu3 %v3810_v10  ;;  %v3831_v10 = vld [vmem:[%s4209_s4 + $0x50] sm:$0xff] }
  0x39   : > { %1411 = vmatpush.bf16.msrb.mxu0 %v3891_v47  ;;  %v3833_v47 = vld [vmem:[%s4209_s4 + $0x60] sm:$0xff] }
  0x3a   : > { %2039 = vmatpush.bf16.msrb.mxu2 %v3939_v43  ;;  %1725 = vmatpush.bf16.msrb.mxu1 %v3915_v48  ;;  %v3801_v43 = vld [vmem:[%s4209_s4 + $0x58] sm:$0xff] }
  0x3b   : > { %368 = vmatmul.bf16.gmra.mxu0 %v3792_v34  ;;  %428 = vmatmul.bf16.gmra.mxu3 %v4251_v35 }
  0x3c   : > { %4050 = vmatpush.bf16.msrb.mxu3 %v3809_v13  ;;  %511 = vmatmul.bf16.gmra.mxu1 %v3791_v25  ;;  %v3866_v13 = vld [vmem:[%s4899_s1 + $0xd8] sm:$0xff] }
  0x3d   : > { %793 = vmatmul.bf16.gmra.mxu2 %v3824_v36  ;;  %1412 = vmatpush.bf16.msrb.mxu0 %v3890_v53 }
  0x3e   : > { %2040 = vmatpush.bf16.msrb.mxu2 %v3938_v52  ;;  %1726 = vmatpush.bf16.msrb.mxu1 %v3914_v54 }
  0x40   : > { %4051 = vmatpush.bf16.msrb.mxu3 %v3808_v16 }
  0x41   : > { %1413 = vmatpush.bf16.msrb.mxu0 %v3889_v61 }
  0x42   : > { %2041 = vmatpush.bf16.msrb.mxu2 %v3937_v59  ;;  %1727 = vmatpush.bf16.msrb.mxu1 %v3913_v62  ;;  %v3838_v59 = vld [vmem:[%s4209_s4 + $0x88] sm:$0xff] }
  0x43   : > { %v3834_v62 = vld [vmem:[%s4209_s4 + $0x68] sm:$0xff] }
  0x44   : > { %4052 = vmatpush.bf16.msrb.mxu3 %v3807_v19 }
  0x46   : > { %2042 = vmatpush.bf16.msrb.mxu2 %v3936_v3  ;;  %1728 = vmatpush.bf16.msrb.mxu1 %v3912_v6 }
  0x48   : > { %4053 = vmatpush.bf16.msrb.mxu3 %v3806_v22 }
  0x4a   : > { %2043 = vmatpush.bf16.msrb.mxu2 %v3935_v30  ;;  %1729 = vmatpush.bf16.msrb.mxu1 %v3911_v33  ;;  %v3848_v30 = vld [vmem:[%s4209_s4 + $0x20] sm:$0xff] }
  0x4b   : > { %373 = vmatmul.bf16.gmra.mxu0 %v3793_v40  ;;  %433 = vmatmul.bf16.gmra.mxu3 %v4266_v41 }
  0x4c   : > { %4054 = vmatpush.bf16.msra.mxu3 %v4115_v2  ;;  %516 = vmatmul.bf16.gmra.mxu1 %v3792_v34  ;;  %v3868_v2 = vld [vmem:[%s4899_s1 + $0xe8] sm:$0xff] }
  0x4d   : > { %798 = vmatmul.bf16.gmra.mxu2 %v3825_v42 }
  0x50   : > { %4055 = vmatpush.bf16.msra.mxu3 %v4130_v5  ;;  %v3888_v5 = vld [vmem:[%s4899_s1 + $0x108] sm:$0xff] }
  0x51   : > { %1414 = vmatpush.bf16.msrb.mxu0 %v3888_v5 }
  0x54   : > { %4056 = vmatpush.bf16.msra.mxu3 %v4145_v8  ;;  %v3835_v8 = vld [vmem:[%s4209_s4 + $0x70] sm:$0xff] }
  0x55   : > { %1415 = vmatpush.bf16.msrb.mxu0 %v3887_v32 }
  0x58   : > { %4057 = vmatpush.bf16.msra.mxu3 %v4158_v11 }
  0x5b   : > { %378 = vmatmul.bf16.gmra.mxu0 %v3794_v44  ;;  %438 = vmatmul.bf16.gmra.mxu3 %v3814_v45 }
  0x5c   : > { %4058 = vmatpush.bf16.msra.mxu3 %v4172_v14  ;;  %521 = vmatmul.bf16.gmra.mxu1 %v3793_v40  ;;  %v3863_v40 = vld [vmem:[%s4899_s1 + $0xc0] sm:$0xff] }
  0x5d   : > { %803 = vmatmul.bf16.gmra.mxu2 %v3826_v46 }
  0x60   : > { %4059 = vmatpush.bf16.msra.mxu3 %v4188_v17 }
  0x64   : > { %4060 = vmatpush.bf16.msra.mxu3 %v4201_v20  ;;  %v3865_v20 = vld [vmem:[%s4899_s1 + $0xd0] sm:$0xff] }
  0x68   : > { %4061 = vmatpush.bf16.msra.mxu3 %v4218_v23  ;;  %v3800_v23 = vld [vmem:[%s4209_s4 + $0x50] sm:$0xff] }
  0x6b   : > { %383 = vmatmul.bf16.gmra.mxu0 %v3795_v49  ;;  %566 = vmatmul.bf16.vlgmr.msrb.gmra.mxu3 %v4292_v50 }
  0x6c   : > { %526 = vmatmul.bf16.gmra.mxu1 %v3794_v44  ;;  %1094 = vmatpush.bf16.msrb.mxu3 %v3870_v60  ;;  %v3837_v44 = vld [vmem:[%s4209_s4 + $0x80] sm:$0xff] }
  0x6d   : > { %808 = vmatmul.bf16.gmra.mxu2 %v3827_v51 }
  0x70   : > { %1095 = vmatpush.bf16.msrb.mxu3 %v3869_v63 }
  0x74   : > { %1096 = vmatpush.bf16.msrb.mxu3 %v3868_v2 }
  0x78   : > { %1097 = vmatpush.bf16.msrb.mxu3 %v3867_v4 }
  0x7b   : > { %388 = vmatmul.bf16.gmra.mxu0 %v3796_v55  ;;  %571 = vmatmul.bf16.gmra.mxu3 %v4225_v26 }
  0x7c   : > { %531 = vmatmul.bf16.gmra.mxu1 %v3795_v49  ;;  %1098 = vmatpush.bf16.msrb.mxu3 %v3866_v13  ;;  %v3895_v13 = vld [vmem:[%s4209_s4 + $0x28] sm:$0xff] }
  0x7d   : > { %813 = vmatmul.bf16.gmra.mxu2 %v3828_v56 }
  0x80   : > { %1099 = vmatpush.bf16.msrb.mxu3 %v3865_v20 }
  0x84   : > { %1100 = vmatpush.bf16.msrb.mxu3 %v3864_v31  ;;  %v3872_v31 = vld [vmem:[%s4209_s4 + $0x28] sm:$0xff] }
  0x88   : > { %1101 = vmatpush.bf16.msrb.mxu3 %v3863_v40 }
  0x8b   : > { %393 = vmatmul.bf16.gmra.mxu0 %v3797_v57  ;;  %576 = vmatmul.bf16.gmra.mxu3 %v4251_v35 }
  0x8c   : > { %536 = vmatmul.bf16.gmra.mxu1 %v3796_v55 }
  0x8d   : > { %818 = vmatmul.bf16.gmra.mxu2 %v3829_v58 }
  0x9b   : > { %398 = vmatmul.bf16.gmra.mxu0 %v3798_v0  ;;  %581 = vmatmul.bf16.gmra.mxu3 %v4266_v41 }
  0x9c   : > { %541 = vmatmul.bf16.gmra.mxu1 %v3797_v57 }
  0x9d   : > { %823 = vmatmul.bf16.gmra.mxu2 %v3830_v1 }
  0xa8   : > { %v364_v9 = vpop.f32.mrf.mxu0 }
  0xa9   : > { %v507_v11 = vpop.f32.mrf.mxu1 }
  0xaa   : > { %v508_v12 = vadd.f32 %v507_v11, %v364_v9  ;;  %v3847_v9 = vld [vmem:[%s4209_s4 + $0x18] sm:$0xff] }
  0xab   : > { %403 = vmatmul.bf16.gmra.mxu0 %v3799_v7  ;;  %848 = vmatmul.bf16.vlgmr.msra.gmra.mxu3 %v3835_v8 }
  0xac   : > { %546 = vmatmul.bf16.gmra.mxu1 %v3798_v0 }
  0xad   : > { %828 = vmatmul.bf16.gmra.mxu2 %v3831_v10  ;;  %v3871_v10 = vld [vmem:[%s4209_s4 + $0x20] sm:$0xff] }
  0xae   : > { %v4350_v14 = vpop.f32.mrf.mxu3 }
  0xb0   : > { %v789_v15 = vpop.f32.mrf.mxu2  ;;  %v366_v17 = vpop.f32.mrf.mxu0 }
  0xb1   : > { %v4352_v16 = vadd.f32 %v789_v15, %v508_v12  ;;  %v509_v18 = vpop.f32.mrf.mxu1  ;;  %v3919_v12 = vld [vmem:[%s4209_s4 + $0x30] sm:$0xff] }
  0xb2   : > { %v510_v19 = vadd.f32 %v509_v18, %v366_v17 }
  0xb6   : > { %v4357_v21 = vpop.f32.mrf.mxu3 }
  0xb8   : > { %v791_v22 = vpop.f32.mrf.mxu2  ;;  %v369_v26 = vpop.f32.mrf.mxu0 }
  0xb9   : > { %v4361_v25 = vadd.f32 %v791_v22, %v510_v19  ;;  %v512_v28 = vpop.f32.mrf.mxu1 }
  0xba   : > { %v513_v29 = vadd.f32 %v512_v28, %v369_v26 }
  0xbb   : > { %408 = vmatmul.bf16.gmra.mxu0 %v3800_v23  ;;  %853 = vmatmul.bf16.gmra.mxu3 %v3836_v24 }
  0xbc   : > { %551 = vmatmul.bf16.gmra.mxu1 %v3799_v7 }
  0xbd   : > { %833 = vmatmul.bf16.gmra.mxu2 %v3832_v27 }
  0xbe   : > { %v4376_v34 = vpop.f32.mrf.mxu3 }
  0xc0   : > { %v794_v35 = vpop.f32.mrf.mxu2  ;;  %v371_v37 = vpop.f32.mrf.mxu0 }
  0xc1   : > { %v4378_v36 = vadd.f32 %v794_v35, %v513_v29  ;;  %v514_v38 = vpop.f32.mrf.mxu1  ;;  %v3920_v35 = vld [vmem:[%s4209_s4 + $0x38] sm:$0xff] }
  0xc2   : > { %v515_v39 = vadd.f32 %v514_v38, %v371_v37  ;;  %v3896_v37 = vld [vmem:[%s4209_s4 + $0x30] sm:$0xff] }
  0xc6   : > { %v4383_v41 = vpop.f32.mrf.mxu3 }
  0xc8   : > { %v796_v42 = vpop.f32.mrf.mxu2  ;;  %v374_v46 = vpop.f32.mrf.mxu0 }
  0xc9   : > { %v4387_v45 = vadd.f32 %v796_v42, %v515_v39  ;;  %v517_v48 = vpop.f32.mrf.mxu1 }
  0xca   : > { %v518_v49 = vadd.f32 %v517_v48, %v374_v46 }
  0xcb   : > { %413 = vmatmul.bf16.gmra.mxu0 %v3801_v43  ;;  %858 = vmatmul.bf16.gmra.mxu3 %v3837_v44 }
  0xcc   : > { %556 = vmatmul.bf16.gmra.mxu1 %v3800_v23 }
  0xcd   : > { %838 = vmatmul.bf16.gmra.mxu2 %v3833_v47 }
  0xce   : > { %v4390_v51 = vpop.f32.mrf.mxu3 }
  0xd0   : > { %v799_v52 = vpop.f32.mrf.mxu2  ;;  %v376_v54 = vpop.f32.mrf.mxu0 }
  0xd1   : > { %v4392_v53 = vadd.f32 %v799_v52, %v518_v49  ;;  %v519_v55 = vpop.f32.mrf.mxu1  ;;  %v3849_v52 = vld [vmem:[%s4209_s4 + $0x28] sm:$0xff] }
  0xd2   : > { %v520_v56 = vadd.f32 %v519_v55, %v376_v54  ;;  %v3873_v54 = vld [vmem:[%s4209_s4 + $0x30] sm:$0xff] }
  0xd6   : > { %v4394_v57 = vpop.f32.mrf.mxu3 }
  0xd8   : > { %v801_v58 = vpop.f32.mrf.mxu2  ;;  %v379_v61 = vpop.f32.mrf.mxu0 }
  0xd9   : > { %v4397_v60 = vadd.f32 %v801_v58, %v520_v56  ;;  %v522_v63 = vpop.f32.mrf.mxu1  ;;  %v3921_v58 = vld [vmem:[%s4209_s4 + $0x40] sm:$0xff] }
  0xda   : > { %v523_v0 = vadd.f32 %v522_v63, %v379_v61 }
  0xdb   : > { %418 = vmatmul.bf16.gmra.mxu0 %v4292_v50  ;;  %863 = vmatmul.bf16.gmra.mxu3 %v3838_v59  ;;  %v3897_v59 = vld [vmem:[%s4209_s4 + $0x38] sm:$0xff] }
  0xdc   : > { %561 = vmatmul.bf16.gmra.mxu1 %v3801_v43 }
  0xdd   : > { %843 = vmatmul.bf16.gmra.mxu2 %v3834_v62 }
  0xde   : > { %v4401_v1 = vpop.f32.mrf.mxu3 }
  0xe0   : > { %v804_v2 = vpop.f32.mrf.mxu2  ;;  %v381_v4 = vpop.f32.mrf.mxu0 }
  0xe1   : > { %v4403_v3 = vadd.f32 %v804_v2, %v523_v0  ;;  %v524_v5 = vpop.f32.mrf.mxu1 }
  0xe2   : > { %v525_v6 = vadd.f32 %v524_v5, %v381_v4 }
  0xe6   : > { %v4405_v7 = vpop.f32.mrf.mxu3 }
  0xe8   : > { %v806_v8 = vpop.f32.mrf.mxu2  ;;  %v384_v50 = vpop.f32.mrf.mxu0 }
  0xe9   : > { %v4409_v11 = vadd.f32 %v806_v8, %v525_v6  ;;  %v527_v15 = vpop.f32.mrf.mxu1 }
  0xea   : > { %v528_v17 = vadd.f32 %v527_v15, %v384_v50  ;;  %v3874_v50 = vld [vmem:[%s4209_s4 + $0x38] sm:$0xff]  ;;  %v3922_v15 = vld [vmem:[%s4209_s4 + $0x48] sm:$0xff] }
  0xeb   : > { %1102 = vmatmul.bf16.vlgmr.msrb.gmra.mxu3 %v3847_v9  ;;  %1416 = vmatmul.bf16.vlgmr.msrb.gmra.mxu0 %v3871_v10  ;;  %v3850_v10 = vld [vmem:[%s4209_s4 + $0x30] sm:$0xff] }
  0xec   : > { %1730 = vmatmul.bf16.vlgmr.msrb.gmra.mxu1 %v3895_v13 }
  0xed   : > { %2044 = vmatmul.bf16.vlgmr.msrb.gmra.mxu2 %v3919_v12 }
  0xee   : > { %v567_v18 = vpop.f32.mrf.mxu3 }
  0xef   : > { %v4414_v19 = vadd.f32 %v567_v18, %v4350_v14 }
  0xf0   : > { %v809_v20 = vpop.f32.mrf.mxu2  ;;  %v386_v23 = vpop.f32.mrf.mxu0 }
  0xf1   : > { %v4416_v22 = vadd.f32 %v809_v20, %v528_v17  ;;  %v529_v24 = vpop.f32.mrf.mxu1  ;;  %v3898_v17 = vld [vmem:[%s4209_s4 + $0x40] sm:$0xff] }
  0xf2   : > { %v530_v26 = vadd.f32 %v529_v24, %v386_v23 }
  0xf6   : > { %v569_v27 = vpop.f32.mrf.mxu3 }
  0xf7   : > { %v4419_v28 = vadd.f32 %v569_v27, %v4357_v21 }
  0xf8   : > { %v811_v29 = vpop.f32.mrf.mxu2  ;;  %v389_v33 = vpop.f32.mrf.mxu0 }
  0xf9   : > { %v4423_v32 = vadd.f32 %v811_v29, %v530_v26  ;;  %v532_v14 = vpop.f32.mrf.mxu1 }
  0xfa   : > { %v533_v38 = vadd.f32 %v532_v14, %v389_v33 }
  0xfb   : > { %1107 = vmatmul.bf16.gmra.mxu3 %v3848_v30  ;;  %1421 = vmatmul.bf16.gmra.mxu0 %v3872_v31 }
  0xfc   : > { %1735 = vmatmul.bf16.gmra.mxu1 %v3896_v37  ;;  %v3875_v37 = vld [vmem:[%s4209_s4 + $0x40] sm:$0xff] }
  0xfd   : > { %2049 = vmatmul.bf16.gmra.mxu2 %v3920_v35  ;;  %v3851_v35 = vld [vmem:[%s4209_s4 + $0x38] sm:$0xff] }
  0xfe   : > { %v572_v21 = vpop.f32.mrf.mxu3 }
  0xff   : > { %v4428_v39 = vadd.f32 %v572_v21, %v4376_v34  ;;  %v3923_v21 = vld [vmem:[%s4209_s4 + $0x50] sm:$0xff] }
 0x100   : > { %v814_v40 = vpop.f32.mrf.mxu2  ;;  %v391_v43 = vpop.f32.mrf.mxu0 }
 0x101   : > { %v4430_v42 = vadd.f32 %v814_v40, %v533_v38  ;;  %v534_v44 = vpop.f32.mrf.mxu1  ;;  %v3899_v40 = vld [vmem:[%s4209_s4 + $0x48] sm:$0xff] }
 0x102   : > { %v535_v46 = vadd.f32 %v534_v44, %v391_v43 }
 0x106   : > { %v574_v47 = vpop.f32.mrf.mxu3 }
 0x107   : > { %v4433_v48 = vadd.f32 %v574_v47, %v4383_v41 }
 0x108   : > { %v816_v49 = vpop.f32.mrf.mxu2  ;;  %v394_v56 = vpop.f32.mrf.mxu0 }
 0x109   : > { %v4437_v55 = vadd.f32 %v816_v49, %v535_v46  ;;  %v537_v34 = vpop.f32.mrf.mxu1 }
 0x10a   : > { %v538_v61 = vadd.f32 %v537_v34, %v394_v56  ;;  %v3852_v34 = vld [vmem:[%s4209_s4 + $0x40] sm:$0xff] }
 0x10b   : > { %1112 = vmatmul.bf16.gmra.mxu3 %v3849_v52  ;;  %1426 = vmatmul.bf16.gmra.mxu0 %v3873_v54 }
 0x10c   : > { %1740 = vmatmul.bf16.gmra.mxu1 %v3897_v59 }
 0x10d   : > { %2054 = vmatmul.bf16.gmra.mxu2 %v3921_v58 }
 0x10e   : > { %v577_v41 = vpop.f32.mrf.mxu3 }
 0x10f   : > { %v4442_v62 = vadd.f32 %v577_v41, %v4390_v51 }
 0x110   : > { %v819_v63 = vpop.f32.mrf.mxu2  ;;  %v396_v2 = vpop.f32.mrf.mxu0 }
 0x111   : > { %v4444_v0 = vadd.f32 %v819_v63, %v538_v61  ;;  %v539_v4 = vpop.f32.mrf.mxu1  ;;  %v3876_v61 = vld [vmem:[%s4209_s4 + $0x48] sm:$0xff] }
 0x112   : > { %v540_v5 = vadd.f32 %v539_v4, %v396_v2  ;;  %v3924_v2 = vld [vmem:[%s4209_s4 + $0x58] sm:$0xff]  ;;  %v3900_v4 = vld [vmem:[%s4209_s4 + $0x50] sm:$0xff] }
 0x116   : > { %v579_v6 = vpop.f32.mrf.mxu3 }
 0x117   : > { %v4447_v8 = vadd.f32 %v579_v6, %v4394_v57 }
 0x118   : > { %v821_v9 = vpop.f32.mrf.mxu2  ;;  %v399_v13 = vpop.f32.mrf.mxu0 }
 0x119   : > { %v4451_v12 = vadd.f32 %v821_v9, %v540_v5  ;;  %v542_v51 = vpop.f32.mrf.mxu1 }
 0x11a   : > { %v543_v18 = vadd.f32 %v542_v51, %v399_v13 }
 0x11b   : > { %1117 = vmatmul.bf16.gmra.mxu3 %v3850_v10  ;;  %1431 = vmatmul.bf16.gmra.mxu0 %v3874_v50 }
 0x11c   : > { %1745 = vmatmul.bf16.gmra.mxu1 %v3898_v17 }
 0x11d   : > { %2059 = vmatmul.bf16.gmra.mxu2 %v3922_v15 }
 0x11e   : > { %v582_v57 = vpop.f32.mrf.mxu3 }
 0x11f   : > { %v4456_v20 = vadd.f32 %v582_v57, %v4401_v1  ;;  %v3853_v57 = vld [vmem:[%s4209_s4 + $0x48] sm:$0xff] }
 0x120   : > { %v824_v23 = vpop.f32.mrf.mxu2  ;;  %v401_v26 = vpop.f32.mrf.mxu0 }
 0x121   : > { %v4458_v24 = vadd.f32 %v824_v23, %v543_v18  ;;  %v544_v27 = vpop.f32.mrf.mxu1  ;;  %v3877_v23 = vld [vmem:[%s4209_s4 + $0x50] sm:$0xff] }
 0x122   : > { %v545_v29 = vadd.f32 %v544_v27, %v401_v26 }
 0x126   : > { %v584_v30 = vpop.f32.mrf.mxu3 }
 0x127   : > { %v4461_v31 = vadd.f32 %v584_v30, %v4405_v7  ;;  %v3901_v30 = vld [vmem:[%s4209_s4 + $0x58] sm:$0xff] }
 0x128   : > { %v826_v33 = vpop.f32.mrf.mxu2  ;;  %v404_v38 = vpop.f32.mrf.mxu0 }
 0x129   : > { %v4465_v14 = vadd.f32 %v826_v33, %v545_v29  ;;  %v547_v1 = vpop.f32.mrf.mxu1  ;;  %v3925_v29 = vld [vmem:[%s4209_s4 + $0x60] sm:$0xff] }
 0x12a   : > { %v548_v43 = vadd.f32 %v547_v1, %v404_v38 }
 0x12b   : > { %1122 = vmatmul.bf16.gmra.mxu3 %v3851_v35  ;;  %1436 = vmatmul.bf16.gmra.mxu0 %v3875_v37 }
 0x12c   : > { %1750 = vmatmul.bf16.gmra.mxu1 %v3899_v40 }
 0x12d   : > { %2064 = vmatmul.bf16.gmra.mxu2 %v3923_v21 }
 0x12e   : > { %v849_v7 = vpop.f32.mrf.mxu3 }
 0x12f   : > { %v4470_v46 = vadd.f32 %v849_v7, %v4414_v19 }
 0x130   : > { %v829_v44 = vpop.f32.mrf.mxu2  ;;  %v406_v49 = vpop.f32.mrf.mxu0 }
 0x131   : > { %v4472_v47 = vadd.f32 %v829_v44, %v548_v43  ;;  %v549_v52 = vpop.f32.mrf.mxu1 }
 0x132   : > { %v550_v54 = vadd.f32 %v549_v52, %v406_v49  ;;  %v3854_v49 = vld [vmem:[%s4209_s4 + $0x50] sm:$0xff]  ;;  %v3878_v52 = vld [vmem:[%s4209_s4 + $0x58] sm:$0xff] }
 0x136   : > { %v851_v56 = vpop.f32.mrf.mxu3 }
 0x137   : > { %v4475_v59 = vadd.f32 %v851_v56, %v4419_v28 }
 0x138   : > { %v831_v58 = vpop.f32.mrf.mxu2  ;;  %v409_v63 = vpop.f32.mrf.mxu0 }
 0x139   : > { %v4479_v41 = vadd.f32 %v831_v58, %v550_v54  ;;  %v552_v5 = vpop.f32.mrf.mxu1  ;;  %v3926_v58 = vld [vmem:[%s4209_s4 + $0x68] sm:$0xff] }
 0x13a   : > { %v553_v19 = vadd.f32 %v552_v5, %v409_v63 }
 0x13b   : > { %1127 = vmatmul.bf16.gmra.mxu3 %v3852_v34  ;;  %1441 = vmatmul.bf16.gmra.mxu0 %v3876_v61  ;;  %v3902_v34 = vld [vmem:[%s4209_s4 + $0x60] sm:$0xff] }
 0x13c   : > { %1755 = vmatmul.bf16.gmra.mxu1 %v3900_v4 }
 0x13d   : > { %2069 = vmatmul.bf16.gmra.mxu2 %v3924_v2 }
 0x13e   : > { %v854_v6 = vpop.f32.mrf.mxu3 }
 0x13f   : > { %v4484_v9 = vadd.f32 %v854_v6, %v4428_v39 }
 0x140   : > { %v834_v28 = vpop.f32.mrf.mxu2  ;;  %v411_v50 = vpop.f32.mrf.mxu0 }
 0x141   : > { %v4486_v10 = vadd.f32 %v834_v28, %v553_v19  ;;  %v554_v13 = vpop.f32.mrf.mxu1 }
 0x142   : > { %v555_v15 = vadd.f32 %v554_v13, %v411_v50 }
 0x146   : > { %v856_v17 = vpop.f32.mrf.mxu3 }
 0x147   : > { %v4489_v18 = vadd.f32 %v856_v17, %v4433_v48  ;;  %v3879_v17 = vld [vmem:[%s4209_s4 + $0x60] sm:$0xff] }
 0x148   : > { %v836_v51 = vpop.f32.mrf.mxu2  ;;  %v414_v27 = vpop.f32.mrf.mxu0 }
 0x149   : > { %v4493_v26 = vadd.f32 %v836_v51, %v555_v15  ;;  %v557_v33 = vpop.f32.mrf.mxu1  ;;  %v3855_v15 = vld [vmem:[%s4209_s4 + $0x58] sm:$0xff] }
 0x14a   : > { %v558_v39 = vadd.f32 %v557_v33, %v414_v27  ;;  %v3903_v27 = vld [vmem:[%s4209_s4 + $0x68] sm:$0xff] }
 0x14b   : > { %1132 = vmatmul.bf16.gmra.mxu3 %v3853_v57  ;;  %1446 = vmatmul.bf16.gmra.mxu0 %v3877_v23  ;;  %v3927_v23 = vld [vmem:[%s4209_s4 + $0x70] sm:$0xff] }
 0x14c   : > { %1760 = vmatmul.bf16.gmra.mxu1 %v3901_v30 }
 0x14d   : > { %2074 = vmatmul.bf16.gmra.mxu2 %v3925_v29 }
 0x14e   : > { %v859_v35 = vpop.f32.mrf.mxu3 }
 0x14f   : > { %v4498_v37 = vadd.f32 %v859_v35, %v4442_v62 }
 0x150   : > { %v839_v48 = vpop.f32.mrf.mxu2  ;;  %v416_v21 = vpop.f32.mrf.mxu0 }
 0x151   : > { %v4500_v38 = vadd.f32 %v839_v48, %v558_v39  ;;  %v559_v40 = vpop.f32.mrf.mxu1 }
 0x152   : > { %v560_v1 = vadd.f32 %v559_v40, %v416_v21 }
 0x156   : > { %v861_v43 = vpop.f32.mrf.mxu3 }
 0x157   : > { %v4503_v44 = vadd.f32 %v861_v43, %v4447_v8 }
 0x158   : > { %v841_v7 = vpop.f32.mrf.mxu2  ;;  %v419_v56 = vpop.f32.mrf.mxu0 }
 0x159   : > { %v4507_v54 = vadd.f32 %v841_v7, %v560_v1  ;;  %v562_v61 = vpop.f32.mrf.mxu1  ;;  %v3856_v7 = vld [vmem:[%s4209_s4 + $0x60] sm:$0xff] }
 0x15a   : > { %v563_v62 = vadd.f32 %v562_v61, %v419_v56  ;;  %v3928_v56 = vld [vmem:[%s4209_s4 + $0x78] sm:$0xff] }
 0x15b   : > { %1137 = vmatmul.bf16.gmra.mxu3 %v3854_v49  ;;  %1451 = vmatmul.bf16.gmra.mxu0 %v3878_v52  ;;  %v3880_v49 = vld [vmem:[%s4209_s4 + $0x68] sm:$0xff] }
 0x15c   : > { %1765 = vmatmul.bf16.gmra.mxu1 %v3902_v34 }
 0x15d   : > { %2079 = vmatmul.bf16.gmra.mxu2 %v3926_v58  ;;  %v3904_v58 = vld [vmem:[%s4209_s4 + $0x70] sm:$0xff] }
 0x15e   : > { %v864_v63 = vpop.f32.mrf.mxu3 }
 0x15f   : > { %v4512_v2 = vadd.f32 %v864_v63, %v4456_v20 }
 0x160   : > { %v844_v8 = vpop.f32.mrf.mxu2  ;;  %v421_v5 = vpop.f32.mrf.mxu0 }
 0x161   : > { %v4514_v4 = vadd.f32 %v844_v8, %v563_v62  ;;  %v564_v19 = vpop.f32.mrf.mxu1 }
 0x162   : > { %v565_v6 = vadd.f32 %v564_v19, %v421_v5 }
 0x166   : > { %v866_v28 = vpop.f32.mrf.mxu3 }
 0x167   : > { %v4517_v13 = vadd.f32 %v866_v28, %v4461_v31 }
 0x168   : > { %v846_v50 = vpop.f32.mrf.mxu2  ;;  %v1417_v57 = vpop.f32.mrf.mxu0 }
 0x169   : > { %v4521_v51 = vadd.f32 %v846_v50, %v565_v6  ;;  %v1731_v29 = vpop.f32.mrf.mxu1 }
 0x16b   : > { %1142 = vmatmul.bf16.gmra.mxu3 %v3855_v15  ;;  %1456 = vmatmul.bf16.gmra.mxu0 %v3879_v17 }
 0x16c   : > { %1770 = vmatmul.bf16.gmra.mxu1 %v3903_v27  ;;  %v3881_v27 = vld [vmem:[%s4209_s4 + $0x70] sm:$0xff] }
 0x16d   : > { %2084 = vmatmul.bf16.gmra.mxu2 %v3927_v23  ;;  %v3857_v23 = vld [vmem:[%s4209_s4 + $0x68] sm:$0xff] }
 0x16e   : > { %v1103_v20 = vpop.f32.mrf.mxu3 }
 0x16f   : > { %v1183_v31 = vadd.f32 %v1103_v20, %v4352_v16  ;;  %v3929_v20 = vld [vmem:[%s4209_s4 + $0x80] sm:$0xff] }
 0x170   : > { %v2045_v30 = vpop.f32.mrf.mxu2  ;;  %v1419_v33 = vpop.f32.mrf.mxu0 }
 0x171   : > { %v1497_v39 = vadd.f32 %v1417_v57, %v1183_v31  ;;  %v1733_v35 = vpop.f32.mrf.mxu1  ;;  %v3905_v31 = vld [vmem:[%s4209_s4 + $0x78] sm:$0xff] }
 0x173   : > { %v1811_v48 = vadd.f32 %v1731_v29, %v1497_v39 }
 0x175   : > { %v4526_v21 = vadd.f32 %v2045_v30, %v1811_v48 }
 0x176   : > { %v1105_v40 = vpop.f32.mrf.mxu3 }
 0x177   : > { %v1184_v1 = vadd.f32 %v1105_v40, %v4361_v25 }
 0x178   : > { %v2047_v43 = vpop.f32.mrf.mxu2  ;;  %v1422_v52 = vpop.f32.mrf.mxu0 }
 0x179   : > { %v1498_v34 = vadd.f32 %v1419_v33, %v1184_v1  ;;  %v1736_v61 = vpop.f32.mrf.mxu1 }
 0x17b   : > { %v1812_v62 = vadd.f32 %v1733_v35, %v1498_v34  ;;  %1147 = vmatmul.bf16.gmra.mxu3 %v3856_v7  ;;  %1461 = vmatmul.bf16.gmra.mxu0 %v3880_v49  ;;  %v3858_v34 = vld [vmem:[%s4209_s4 + $0x70] sm:$0xff] }
 0x17c   : > { %1775 = vmatmul.bf16.gmra.mxu1 %v3904_v58 }
 0x17d   : > { %2089 = vmatmul.bf16.gmra.mxu2 %v3928_v56  ;;  %v4533_v16 = vadd.f32 %v2047_v43, %v1812_v62 }
 0x17e   : > { %v1108_v25 = vpop.f32.mrf.mxu3 }
 0x17f   : > { %v1185_v63 = vadd.f32 %v1108_v25, %v4378_v36  ;;  %v3930_v25 = vld [vmem:[%s4209_s4 + $0x88] sm:$0xff] }
 0x180   : > { %v2050_v8 = vpop.f32.mrf.mxu2  ;;  %v1424_v5 = vpop.f32.mrf.mxu0 }
 0x181   : > { %v1499_v19 = vadd.f32 %v1422_v52, %v1185_v63  ;;  %v1738_v6 = vpop.f32.mrf.mxu1  ;;  %v3906_v63 = vld [vmem:[%s4209_s4 + $0x80] sm:$0xff] }
 0x183   : > { %v1813_v28 = vadd.f32 %v1736_v61, %v1499_v19  ;;  %v3882_v61 = vld [vmem:[%s4209_s4 + $0x78] sm:$0xff] }
 0x185   : > { %v4536_v50 = vadd.f32 %v2050_v8, %v1813_v28 }
 0x186   : > { %v1110_v15 = vpop.f32.mrf.mxu3 }
 0x187   : > { %v1186_v17 = vadd.f32 %v1110_v15, %v4387_v45 }
 0x188   : > { %v2052_v57 = vpop.f32.mrf.mxu2  ;;  %v1427_v29 = vpop.f32.mrf.mxu0 }
 0x189   : > { %v1500_v30 = vadd.f32 %v1424_v5, %v1186_v17  ;;  %v1741_v33 = vpop.f32.mrf.mxu1 }
 0x18b   : > { %v1814_v39 = vadd.f32 %v1738_v6, %v1500_v30  ;;  %1152 = vmatmul.bf16.gmra.mxu3 %v3857_v23  ;;  %1466 = vmatmul.bf16.gmra.mxu0 %v3881_v27  ;;  %v3859_v30 = vld [vmem:[%s4209_s4 + $0x78] sm:$0xff] }
 0x18c   : > { %1780 = vmatmul.bf16.gmra.mxu1 %v3905_v31 }
 0x18d   : > { %2094 = vmatmul.bf16.gmra.mxu2 %v3929_v20  ;;  %v4543_v36 = vadd.f32 %v2052_v57, %v1814_v39 }
 0x18e   : > { %v1113_v45 = vpop.f32.mrf.mxu3 }
 0x18f   : > { %v1187_v35 = vadd.f32 %v1113_v45, %v4392_v53  ;;  %v3931_v45 = vld [vmem:[%s4209_s4 + $0x90] sm:$0xff] }
 0x190   : > { %v2055_v48 = vpop.f32.mrf.mxu2  ;;  %v1429_v40 = vpop.f32.mrf.mxu0 }
 0x191   : > { %v1501_v1 = vadd.f32 %v1427_v29, %v1187_v35  ;;  %v1743_v43 = vpop.f32.mrf.mxu1  ;;  %v3907_v35 = vld [vmem:[%s4209_s4 + $0x88] sm:$0xff] }
 0x193   : > { %v1815_v7 = vadd.f32 %v1741_v33, %v1501_v1  ;;  %v3883_v33 = vld [vmem:[%s4209_s4 + $0x80] sm:$0xff] }
 0x195   : > { %v4546_v49 = vadd.f32 %v2055_v48, %v1815_v7 }
 0x196   : > { %v1115_v52 = vpop.f32.mrf.mxu3 }
 0x197   : > { %v1188_v56 = vadd.f32 %v1115_v52, %v4397_v60 }
 0x198   : > { %v2057_v58 = vpop.f32.mrf.mxu2  ;;  %v1432_v62 = vpop.f32.mrf.mxu0 }
 0x199   : > { %v1502_v8 = vadd.f32 %v1429_v40, %v1188_v56  ;;  %v1746_v5 = vpop.f32.mrf.mxu1 }
 0x19b   : > { %v1816_v19 = vadd.f32 %v1743_v43, %v1502_v8  ;;  %1157 = vmatmul.bf16.gmra.mxu3 %v3858_v34  ;;  %1471 = vmatmul.bf16.gmra.mxu0 %v3882_v61  ;;  %v3860_v8 = vld [vmem:[%s4209_s4 + $0x80] sm:$0xff] }
 0x19c   : > { %1785 = vmatmul.bf16.gmra.mxu1 %v3906_v63 }
 0x19d   : > { %2099 = vmatmul.bf16.gmra.mxu2 %v3930_v25  ;;  %v4553_v53 = vadd.f32 %v2057_v58, %v1816_v19 }
 0x19e   : > { %v1118_v60 = vpop.f32.mrf.mxu3 }
 0x19f   : > { %v1189_v6 = vadd.f32 %v1118_v60, %v4403_v3  ;;  %v3932_v60 = vld [vmem:[%s4209_s4 + $0x98] sm:$0xff] }
 0x1a0   : > { %v2060_v28 = vpop.f32.mrf.mxu2  ;;  %v1434_v15 = vpop.f32.mrf.mxu0 }
 0x1a1   : > { %v1503_v17 = vadd.f32 %v1432_v62, %v1189_v6  ;;  %v1748_v57 = vpop.f32.mrf.mxu1  ;;  %v3908_v6 = vld [vmem:[%s4209_s4 + $0x90] sm:$0xff] }
 0x1a3   : > { %v1817_v23 = vadd.f32 %v1746_v5, %v1503_v17  ;;  %v3884_v5 = vld [vmem:[%s4209_s4 + $0x88] sm:$0xff] }
 0x1a5   : > { %v4556_v27 = vadd.f32 %v2060_v28, %v1817_v23 }
 0x1a6   : > { %v1120_v29 = vpop.f32.mrf.mxu3 }
 0x1a7   : > { %v1190_v20 = vadd.f32 %v1120_v29, %v4409_v11 }
 0x1a8   : > { %v2062_v31 = vpop.f32.mrf.mxu2  ;;  %v1437_v39 = vpop.f32.mrf.mxu0 }
 0x1a9   : > { %v1504_v48 = vadd.f32 %v1434_v15, %v1190_v20  ;;  %v1751_v40 = vpop.f32.mrf.mxu1 }
 0x1ab   : > { %v1818_v1 = vadd.f32 %v1748_v57, %v1504_v48  ;;  %1162 = vmatmul.bf16.gmra.mxu3 %v3859_v30  ;;  %1476 = vmatmul.bf16.gmra.mxu0 %v3883_v33  ;;  %v3861_v48 = vld [vmem:[%s4209_s4 + $0x88] sm:$0xff] }
 0x1ac   : > { %1790 = vmatmul.bf16.gmra.mxu1 %v3907_v35 }
 0x1ad   : > { %2104 = vmatmul.bf16.gmra.mxu2 %v3931_v45  ;;  %v4563_v3 = vadd.f32 %v2062_v31, %v1818_v1 }
 0x1ae   : > { %v1123_v11 = vpop.f32.mrf.mxu3 }
 0x1af   : > { %v1191_v43 = vadd.f32 %v1123_v11, %v4416_v22  ;;  %v3933_v11 = vld [vmem:[%s4209_s4 + $0xa0] sm:$0xff] }
 0x1b0   : > { %v2065_v7 = vpop.f32.mrf.mxu2  ;;  %v1439_v52 = vpop.f32.mrf.mxu0 }
 0x1b1   : > { %v1505_v56 = vadd.f32 %v1437_v39, %v1191_v43  ;;  %v1753_v58 = vpop.f32.mrf.mxu1  ;;  %v3909_v43 = vld [vmem:[%s4209_s4 + $0x98] sm:$0xff] }
 0x1b3   : > { %v1819_v34 = vadd.f32 %v1751_v40, %v1505_v56  ;;  %v3885_v40 = vld [vmem:[%s4209_s4 + $0x90] sm:$0xff] }
 0x1b5   : > { %v4566_v61 = vadd.f32 %v2065_v7, %v1819_v34 }
 0x1b6   : > { %v1125_v62 = vpop.f32.mrf.mxu3 }
 0x1b7   : > { %v1192_v25 = vadd.f32 %v1125_v62, %v4423_v32 }
 0x1b8   : > { %v2067_v63 = vpop.f32.mrf.mxu2  ;;  %v1442_v19 = vpop.f32.mrf.mxu0 }
 0x1b9   : > { %v1506_v28 = vadd.f32 %v1439_v52, %v1192_v25  ;;  %v1756_v15 = vpop.f32.mrf.mxu1 }
 0x1bb   : > { %v1820_v17 = vadd.f32 %v1753_v58, %v1506_v28  ;;  %1167 = vmatmul.bf16.gmra.mxu3 %v3860_v8  ;;  %1481 = vmatmul.bf16.gmra.mxu0 %v3884_v5  ;;  %v3862_v28 = vld [vmem:[%s4209_s4 + $0x90] sm:$0xff] }
 0x1bc   : > { %1795 = vmatmul.bf16.gmra.mxu1 %v3908_v6 }
 0x1bd   : > { %2109 = vmatmul.bf16.gmra.mxu2 %v3932_v60  ;;  %v4573_v22 = vadd.f32 %v2067_v63, %v1820_v17 }
 0x1be   : > { %v1128_v32 = vpop.f32.mrf.mxu3 }
 0x1bf   : > { %v1193_v57 = vadd.f32 %v1128_v32, %v4430_v42  ;;  %v3934_v32 = vld [vmem:[%s4209_s4 + $0xa8] sm:$0xff] }
 0x1c0   : > { %v2070_v23 = vpop.f32.mrf.mxu2  ;;  %v1444_v29 = vpop.f32.mrf.mxu0 }
 0x1c1   : > { %v1507_v20 = vadd.f32 %v1442_v19, %v1193_v57  ;;  %v1758_v31 = vpop.f32.mrf.mxu1  ;;  %v3910_v57 = vld [vmem:[%s4209_s4 + $0xa0] sm:$0xff] }
 0x1c3   : > { %v1821_v30 = vadd.f32 %v1756_v15, %v1507_v20  ;;  %v3886_v15 = vld [vmem:[%s4209_s4 + $0x98] sm:$0xff]  ;;  %s3789_s4 = sshll.u32 %s4902_s10, 7 }
 0x1c4   : > { %s4877_s27 = scalar_lea.vmem %s4900_s2, %s3789_s4 }
 0x1c5   : > { %v4576_v33 = vadd.f32 %v2070_v23, %v1821_v30 }
 0x1c6   : > { %v1130_v39 = vpop.f32.mrf.mxu3 }
 0x1c7   : > { %v1194_v45 = vadd.f32 %v1130_v39, %v4437_v55 }
 0x1c8   : > { %v2072_v35 = vpop.f32.mrf.mxu2  ;;  %v1447_v1 = vpop.f32.mrf.mxu0 }
 0x1c9   : > { %v1508_v7 = vadd.f32 %v1444_v29, %v1194_v45  ;;  %v1761_v52 = vpop.f32.mrf.mxu1 }
 0x1cb   : > { %v1822_v56 = vadd.f32 %v1758_v31, %v1508_v7  ;;  %1172 = vmatmul.bf16.gmra.mxu3 %v3861_v48  ;;  %1486 = vmatmul.bf16.gmra.mxu0 %v3885_v40 }
 0x1cc   : > { %1800 = vmatmul.bf16.gmra.mxu1 %v3909_v43 }
 0x1cd   : > { %2114 = vmatmul.bf16.gmra.mxu2 %v3933_v11  ;;  %v4583_v42 = vadd.f32 %v2072_v35, %v1822_v56 }
 0x1ce   : > { %v1133_v55 = vpop.f32.mrf.mxu3 }
 0x1cf   : > { %v1195_v58 = vadd.f32 %v1133_v55, %v4444_v0 }
 0x1d0   : > { %v2075_v34 = vpop.f32.mrf.mxu2  ;;  %v1449_v62 = vpop.f32.mrf.mxu0 }
 0x1d1   : > { %v1509_v25 = vadd.f32 %v1447_v1, %v1195_v58  ;;  %v1763_v63 = vpop.f32.mrf.mxu1 }
 0x1d3   : > { %v1823_v8 = vadd.f32 %v1761_v52, %v1509_v25 }
 0x1d5   : > { %v4586_v5 = vadd.f32 %v2075_v34, %v1823_v8 }
 0x1d6   : > { %v1135_v19 = vpop.f32.mrf.mxu3 }
 0x1d7   : > { %v1196_v60 = vadd.f32 %v1135_v19, %v4451_v12 }
 0x1d8   : > { %v2077_v6 = vpop.f32.mrf.mxu2  ;;  %v1452_v17 = vpop.f32.mrf.mxu0 }
 0x1d9   : > { %v1510_v23 = vadd.f32 %v1449_v62, %v1196_v60  ;;  %v1766_v29 = vpop.f32.mrf.mxu1 }
 0x1db   : > { %v1824_v20 = vadd.f32 %v1763_v63, %v1510_v23  ;;  %1177 = vmatmul.bf16.gmra.mxu3 %v3862_v28  ;;  %1491 = vmatmul.bf16.gmra.mxu0 %v3886_v15 }
 0x1dc   : > { %1805 = vmatmul.bf16.gmra.mxu1 %v3910_v57 }
 0x1dd   : > { %2119 = vmatmul.bf16.gmra.mxu2 %v3934_v32  ;;  %v4593_v0 = vadd.f32 %v2077_v6, %v1824_v20 }
 0x1de   : > { %v1138_v31 = vpop.f32.mrf.mxu3 }
 0x1df   : > { %v1197_v30 = vadd.f32 %v1138_v31, %v4458_v24 }
 0x1e0   : > { %v2080_v39 = vpop.f32.mrf.mxu2  ;;  %v1454_v12 = vpop.f32.mrf.mxu0 }
 0x1e1   : > { %v1511_v45 = vadd.f32 %v1452_v17, %v1197_v30  ;;  %v1768_v35 = vpop.f32.mrf.mxu1 }
 0x1e3   : > { %v1825_v48 = vadd.f32 %v1766_v29, %v1511_v45 }
 0x1e5   : > { %v4596_v40 = vadd.f32 %v2080_v39, %v1825_v48 }
 0x1e6   : > { %v1140_v1 = vpop.f32.mrf.mxu3 }
 0x1e7   : > { %v1198_v11 = vadd.f32 %v1140_v1, %v4465_v14 }
 0x1e8   : > { %v2082_v43 = vpop.f32.mrf.mxu2  ;;  %v1457_v7 = vpop.f32.mrf.mxu0 }
 0x1e9   : > { %v1512_v52 = vadd.f32 %v1454_v12, %v1198_v11  ;;  %v1771_v56 = vpop.f32.mrf.mxu1 }
 0x1eb   : > { %v1826_v55 = vadd.f32 %v1768_v35, %v1512_v52 }
 0x1ed   : > { %v4599_v58 = vadd.f32 %v2082_v43, %v1826_v55 }
 0x1ee   : > { %v1143_v34 = vpop.f32.mrf.mxu3 }
 0x1ef   : > { %v1199_v24 = vadd.f32 %v1143_v34, %v4472_v47 }
 0x1f0   : > { %v2085_v62 = vpop.f32.mrf.mxu2  ;;  %v1459_v25 = vpop.f32.mrf.mxu0 }
 0x1f1   : > { %v1513_v63 = vadd.f32 %v1457_v7, %v1199_v24  ;;  %v1773_v8 = vpop.f32.mrf.mxu1 }
 0x1f3   : > { %v1827_v19 = vadd.f32 %v1771_v56, %v1513_v63 }
 0x1f5   : > { %v4602_v60 = vadd.f32 %v2085_v62, %v1827_v19  ;;  %v2702_v19 = vadd.f32 %v4533_v16, %v4526_v21 }
 0x1f6   : > { %v1145_v6 = vpop.f32.mrf.mxu3 }
 0x1f7   : > { %v1200_v14 = vadd.f32 %v1145_v6, %v4479_v41 }
 0x1f8   : > { %v2087_v28 = vpop.f32.mrf.mxu2  ;;  %v1462_v15 = vpop.f32.mrf.mxu0 }
 0x1f9   : > { %v1514_v17 = vadd.f32 %v1459_v25, %v1200_v14  ;;  %v1776_v32 = vpop.f32.mrf.mxu1  ;;  %v2741_v25 = vmul.f32 %v4533_v16, %v4533_v16  ;;  %v2743_v14 = vmul.f32 %v4543_v36, %v4543_v36 }
 0x1fb   : > { %v1828_v57 = vadd.f32 %v1773_v8, %v1514_v17  ;;  %v2742_v8 = vmul.f32 %v4536_v50, %v4536_v50 }
 0x1fd   : > { %v4605_v23 = vadd.f32 %v2087_v28, %v1828_v57  ;;  %v2744_v57 = vmul.f32 %v4546_v49, %v4546_v49 }
 0x1fe   : > { %v1148_v29 = vpop.f32.mrf.mxu3 }
 0x1ff   : > { %v1201_v47 = vadd.f32 %v1148_v29, %v4486_v10 }
 0x200   : > { %v2090_v20 = vpop.f32.mrf.mxu2  ;;  %v1464_v31 = vpop.f32.mrf.mxu0 }
 0x201   : > { %v1515_v30 = vadd.f32 %v1462_v15, %v1201_v47  ;;  %v1778_v39 = vpop.f32.mrf.mxu1  ;;  %v2703_v15 = vadd.f32 %v2702_v19, %v4536_v50 }
 0x203   : > { %v1829_v12 = vadd.f32 %v1776_v32, %v1515_v30  ;;  %v2704_v47 = vadd.f32 %v2703_v15, %v4543_v36  ;;  %v2745_v30 = vmul.f32 %v4553_v53, %v4553_v53 }
 0x205   : > { %v4608_v45 = vadd.f32 %v2090_v20, %v1829_v12 }
 0x206   : > { %v1150_v35 = vpop.f32.mrf.mxu3 }
 0x207   : > { %v1202_v41 = vadd.f32 %v1150_v35, %v4493_v26  ;;  %v2740_v26 = vmul.f32 %v4526_v21, %v4526_v21  ;;  %v2746_v35 = vmul.f32 %v4556_v27, %v4556_v27 }
 0x208   : > { %v2092_v48 = vpop.f32.mrf.mxu2  ;;  %v1467_v1 = vpop.f32.mrf.mxu0 }
 0x209   : > { %v1516_v11 = vadd.f32 %v1464_v31, %v1202_v41  ;;  %v1781_v43 = vpop.f32.mrf.mxu1 }
 0x20b   : > { %v1830_v7 = vadd.f32 %v1778_v39, %v1516_v11  ;;  %v2705_v39 = vadd.f32 %v2704_v47, %v4546_v49 }
 0x20d   : > { %v4611_v52 = vadd.f32 %v2092_v48, %v1830_v7  ;;  %v2706_v41 = vadd.f32 %v2705_v39, %v4553_v53  ;;  %v2752_v39 = vmul.f32 %v4586_v5, %v4586_v5 }
 0x20e   : > { %v1153_v56 = vpop.f32.mrf.mxu3 }
 0x20f   : > { %v1203_v10 = vadd.f32 %v1153_v56, %v4500_v38  ;;  %v2772_v38 = vadd.f32 %v2741_v25, %v2740_v26  ;;  %v2749_v26 = vmul.f32 %v4573_v22, %v4573_v22 }
 0x210   : > { %v2095_v55 = vpop.f32.mrf.mxu2  ;;  %v1469_v34 = vpop.f32.mrf.mxu0 }
 0x211   : > { %v1517_v24 = vadd.f32 %v1467_v1, %v1203_v10  ;;  %v4614_v62 = vpop.f32.mrf.mxu1  ;;  %v2773_v32 = vadd.f32 %v2772_v38, %v2742_v8  ;;  %v2747_v1 = vmul.f32 %v4563_v3, %v4563_v3  ;;  %v2748_v10 = vmul.f32 %v4566_v61, %v4566_v61 }
 0x212   : > { %v2750_v38 = vmul.f32 %v4576_v33, %v4576_v33 }
 0x213   : > { %v1831_v63 = vadd.f32 %v1781_v43, %v1517_v24  ;;  %v2774_v31 = vadd.f32 %v2773_v32, %v2743_v14  ;;  %v2707_v43 = vadd.f32 %v2706_v41, %v4556_v27  ;;  %v2751_v32 = vmul.f32 %v4583_v42, %v4583_v42 }
 0x215   : > { %v4624_v6 = vadd.f32 %v2095_v55, %v1831_v63  ;;  %v2775_v12 = vadd.f32 %v2774_v31, %v2744_v57  ;;  %v2708_v24 = vadd.f32 %v2707_v43, %v4563_v3 }
 0x216   : > { %v1155_v28 = vpop.f32.mrf.mxu3 }
 0x217   : > { %v2776_v48 = vadd.f32 %v2775_v12, %v2745_v30  ;;  %v2709_v8 = vadd.f32 %v2708_v24, %v4566_v61  ;;  %v1204_v43 = vadd.f32 %v1155_v28, %v4507_v54  ;;  %v2754_v24 = vmul.f32 %v4596_v40, %v4596_v40 }
 0x218   : > { %v4629_v17 = vpop.f32.mrf.mxu2  ;;  %v1472_v29 = vpop.f32.mrf.mxu0 }
 0x219   : > { %v4634_v20 = vpop.f32.mrf.mxu1  ;;  %v2777_v56 = vadd.f32 %v2776_v48, %v2746_v35  ;;  %v2710_v14 = vadd.f32 %v2709_v8, %v4573_v22 }
 0x21b   : > { %v2778_v63 = vadd.f32 %v2777_v56, %v2747_v1  ;;  %v2711_v47 = vadd.f32 %v2710_v14, %v4576_v33  ;;  %v2753_v1 = vmul.f32 %v4593_v0, %v4593_v0 }
 0x21d   : > { %v2779_v19 = vadd.f32 %v2778_v63, %v2748_v10  ;;  %v2712_v35 = vadd.f32 %v2711_v47, %v4583_v42  ;;  %v2756_v47 = vmul.f32 %v4602_v60, %v4602_v60 }
 0x21e   : > { %v1158_v11 = vpop.f32.mrf.mxu3 }
 0x21f   : > { %v2780_v15 = vadd.f32 %v2779_v19, %v2749_v26  ;;  %v2713_v56 = vadd.f32 %v2712_v35, %v4586_v5  ;;  %v1205_v26 = vadd.f32 %v1158_v11, %v4514_v4  ;;  %v2755_v19 = vmul.f32 %v4599_v58, %v4599_v58 }
 0x220   : > { %v4645_v7 = vpop.f32.mrf.mxu2  ;;  %v1474_v55 = vpop.f32.mrf.mxu0 }
 0x221   : > { %v1788_v25 = vpop.f32.mrf.mxu1  ;;  %v2781_v30 = vadd.f32 %v2780_v15, %v2750_v38  ;;  %v2714_v63 = vadd.f32 %v2713_v56, %v4593_v0  ;;  %v1518_v38 = vadd.f32 %v1469_v34, %v1204_v43  ;;  %v1519_v35 = vadd.f32 %v1472_v29, %v1205_v26 }
 0x222   : > { %v2757_v34 = vmul.f32 %v4605_v23, %v4605_v23  ;;  %v2758_v56 = vmul.f32 %v4608_v45, %v4608_v45 }
 0x223   : > { %v2782_v48 = vadd.f32 %v2781_v30, %v2751_v32  ;;  %v2715_v15 = vadd.f32 %v2714_v63, %v4596_v40  ;;  %v1833_v29 = vadd.f32 %v4634_v20, %v1519_v35  ;;  %v2759_v63 = vmul.f32 %v4611_v52, %v4611_v52 }
 0x225   : > { %v2783_v10 = vadd.f32 %v2782_v48, %v2752_v39  ;;  %v2716_v39 = vadd.f32 %v2715_v15, %v4599_v58  ;;  %v2760_v15 = vmul.f32 %v4624_v6, %v4624_v6 }
 0x226   : > { %v1160_v57 = vpop.f32.mrf.mxu3 }
 0x227   : > { %v2784_v8 = vadd.f32 %v2783_v10, %v2753_v1  ;;  %v1206_v54 = vadd.f32 %v1160_v57, %v4521_v51  ;;  %v1832_v1 = vadd.f32 %v4614_v62, %v1518_v38  ;;  %v2717_v51 = vadd.f32 %v2716_v39, %v4602_v60 }
 0x228   : > { %v2102_v31 = vpop.f32.mrf.mxu2  ;;  %v1477_v12 = vpop.f32.mrf.mxu0 }
 0x229   : > { %v1791_v41 = vpop.f32.mrf.mxu1  ;;  %v2785_v32 = vadd.f32 %v2784_v8, %v2754_v24  ;;  %v1520_v57 = vadd.f32 %v1474_v55, %v1206_v54  ;;  %v2718_v10 = vadd.f32 %v2717_v51, %v4605_v23  ;;  %v4689_v26 = vadd.f32 %v4629_v17, %v1832_v1 }
 0x22a   : > { %v4697_v54 = vadd.f32 %v4645_v7, %v1833_v29 }
 0x22b   : > { %v2786_v48 = vadd.f32 %v2785_v32, %v2755_v19  ;;  %v2719_v8 = vadd.f32 %v2718_v10, %v4608_v45  ;;  %v1834_v55 = vadd.f32 %v1788_v25, %v1520_v57  ;;  %v2761_v25 = vmul.f32 %v4689_v26, %v4689_v26 }
 0x22c   : > { %v2762_v1 = vmul.f32 %v4697_v54, %v4697_v54 }
 0x22d   : > { %v2787_v43 = vadd.f32 %v2786_v48, %v2756_v47  ;;  %v4702_v35 = vadd.f32 %v2102_v31, %v1834_v55 }
 0x22e   : > { %v1163_v14 = vpop.f32.mrf.mxu3 }
 0x22f   : > { %v1207_v4 = vadd.f32 %v1163_v14, %v4470_v46  ;;  %v2788_v46 = vadd.f32 %v2787_v43, %v2757_v34  ;;  %v2763_v57 = vmul.f32 %v4702_v35, %v4702_v35 }
 0x230   : > { %v2105_v28 = vpop.f32.mrf.mxu2  ;;  %v1479_v30 = vpop.f32.mrf.mxu0 }
 0x231   : > { %v1793_v11 = vpop.f32.mrf.mxu1  ;;  %v1521_v24 = vadd.f32 %v1477_v12, %v1207_v4  ;;  %v2789_v14 = vadd.f32 %v2788_v46, %v2758_v56  ;;  %v2720_v12 = vadd.f32 %v2719_v8, %v4611_v52 }
 0x233   : > { %v1835_v32 = vadd.f32 %v1791_v41, %v1521_v24  ;;  %v2790_v39 = vadd.f32 %v2789_v14, %v2759_v63 }
 0x235   : > { %v2791_v48 = vadd.f32 %v2790_v39, %v2760_v15  ;;  %v4707_v7 = vadd.f32 %v2105_v28, %v1835_v32 }
 0x236   : > { %v1165_v62 = vpop.f32.mrf.mxu3 }
 0x237   : > { %v1208_v19 = vadd.f32 %v1165_v62, %v4475_v59  ;;  %v2721_v59 = vadd.f32 %v2720_v12, %v4624_v6  ;;  %v2792_v41 = vadd.f32 %v2791_v48, %v2761_v25  ;;  %v2764_v28 = vmul.f32 %v4707_v7, %v4707_v7 }
 0x238   : > { %v2107_v38 = vpop.f32.mrf.mxu2  ;;  %v1482_v20 = vpop.f32.mrf.mxu0 }
 0x239   : > { %v1522_v17 = vadd.f32 %v1479_v30, %v1208_v19  ;;  %v1796_v47 = vpop.f32.mrf.mxu1  ;;  %v2722_v34 = vadd.f32 %v2721_v59, %v4689_v26  ;;  %v2793_v10 = vadd.f32 %v2792_v41, %v2762_v1 }
 0x23b   : > { %v1836_v4 = vadd.f32 %v1793_v11, %v1522_v17  ;;  %v2723_v51 = vadd.f32 %v2722_v34, %v4697_v54  ;;  %v2794_v63 = vadd.f32 %v2793_v10, %v2763_v57 }
 0x23d   : > { %v4712_v43 = vadd.f32 %v2107_v38, %v1836_v4  ;;  %v2724_v29 = vadd.f32 %v2723_v51, %v4702_v35  ;;  %v2795_v19 = vadd.f32 %v2794_v63, %v2764_v28 }
 0x23e   : > { %v1168_v30 = vpop.f32.mrf.mxu3 }
 0x23f   : > { %v1209_v31 = vadd.f32 %v1168_v30, %v4484_v9  ;;  %v2725_v62 = vadd.f32 %v2724_v29, %v4707_v7  ;;  %v2765_v8 = vmul.f32 %v4712_v43, %v4712_v43 }
 0x240   : > { %v2110_v11 = vpop.f32.mrf.mxu2  ;;  %v1484_v56 = vpop.f32.mrf.mxu0 }
 0x241   : > { %v1523_v24 = vadd.f32 %v1482_v20, %v1209_v31  ;;  %v1798_v46 = vpop.f32.mrf.mxu1  ;;  %v2726_v9 = vadd.f32 %v2725_v62, %v4712_v43  ;;  %v2796_v15 = vadd.f32 %v2795_v19, %v2765_v8 }
 0x243   : > { %v1837_v55 = vadd.f32 %v1796_v47, %v1523_v24 }
 0x245   : > { %v4722_v38 = vadd.f32 %v2110_v11, %v1837_v55 }
 0x246   : > { %v1170_v14 = vpop.f32.mrf.mxu3 }
 0x247   : > { %v2727_v12 = vadd.f32 %v2726_v9, %v4722_v38  ;;  %v2766_v20 = vmul.f32 %v4722_v38, %v4722_v38  ;;  %v1210_v32 = vadd.f32 %v1170_v14, %v4489_v18 }
 0x248   : > { %v2112_v17 = vpop.f32.mrf.mxu2  ;;  %v1487_v59 = vpop.f32.mrf.mxu0 }
 0x249   : > { %v2797_v39 = vadd.f32 %v2796_v15, %v2766_v20  ;;  %v1524_v25 = vadd.f32 %v1484_v56, %v1210_v32  ;;  %v1801_v47 = vpop.f32.mrf.mxu1 }
 0x24b   : > { %v1838_v4 = vadd.f32 %v1798_v46, %v1524_v25 }
 0x24d   : > { %v4728_v48 = vadd.f32 %v2112_v17, %v1838_v4 }
 0x24e   : > { %v1173_v34 = vpop.f32.mrf.mxu3 }
 0x24f   : > { %v2728_v1 = vadd.f32 %v2727_v12, %v4728_v48  ;;  %v2767_v41 = vmul.f32 %v4728_v48, %v4728_v48  ;;  %v1211_v30 = vadd.f32 %v1173_v34, %v4498_v37 }
 0x250   : > { %v2115_v51 = vpop.f32.mrf.mxu2  ;;  %v1489_v11 = vpop.f32.mrf.mxu0 }
 0x251   : > { %v2798_v57 = vadd.f32 %v2797_v39, %v2767_v41  ;;  %v1525_v31 = vadd.f32 %v1487_v59, %v1211_v30  ;;  %v1803_v56 = vpop.f32.mrf.mxu1 }
 0x253   : > { %v1839_v18 = vadd.f32 %v1801_v47, %v1525_v31 }
 0x255   : > { %v4734_v10 = vadd.f32 %v2115_v51, %v1839_v18 }
 0x256   : > { %v1175_v29 = vpop.f32.mrf.mxu3 }
 0x257   : > { %v2729_v28 = vadd.f32 %v2728_v1, %v4734_v10  ;;  %v2768_v24 = vmul.f32 %v4734_v10, %v4734_v10  ;;  %v1212_v46 = vadd.f32 %v1175_v29, %v4503_v44 }
 0x258   : > { %v2117_v63 = vpop.f32.mrf.mxu2  ;;  %v1492_v19 = vpop.f32.mrf.mxu0 }
 0x259   : > { %v2799_v62 = vadd.f32 %v2798_v57, %v2768_v24  ;;  %v1526_v8 = vadd.f32 %v1489_v11, %v1212_v46  ;;  %v1806_v20 = vpop.f32.mrf.mxu1 }
 0x25b   : > { %v1840_v37 = vadd.f32 %v1803_v56, %v1526_v8 }
 0x25d   : > { %v4740_v55 = vadd.f32 %v2117_v63, %v1840_v37 }
 0x25e   : > { %v1178_v9 = vpop.f32.mrf.mxu3 }
 0x25f   : > { %v2730_v14 = vadd.f32 %v2729_v28, %v4740_v55  ;;  %v2769_v15 = vmul.f32 %v4740_v55, %v4740_v55  ;;  %v1213_v12 = vadd.f32 %v1178_v9, %v4512_v2 }
 0x260   : > { %v2120_v39 = vpop.f32.mrf.mxu2  ;;  %v1494_v1 = vpop.f32.mrf.mxu0 }
 0x261   : > { %v2800_v32 = vadd.f32 %v2799_v62, %v2769_v15  ;;  %v1527_v17 = vadd.f32 %v1492_v19, %v1213_v12  ;;  %v1808_v51 = vpop.f32.mrf.mxu1 }
 0x263   : > { %v1841_v44 = vadd.f32 %v1806_v20, %v1527_v17 }
 0x265   : > { %v4746_v25 = vadd.f32 %v2120_v39, %v1841_v44 }
 0x266   : > { %v1180_v59 = vpop.f32.mrf.mxu3 }
 0x267   : > { %v2731_v4 = vadd.f32 %v2730_v14, %v4746_v25  ;;  %v2770_v47 = vmul.f32 %v4746_v25, %v4746_v25  ;;  %v1214_v34 = vadd.f32 %v1180_v59, %v4517_v13 }
 0x268   : > { %v2122_v57 = vpop.f32.mrf.mxu2 }
 0x269   : > { %v2801_v41 = vadd.f32 %v2800_v32, %v2770_v47  ;;  %v1528_v30 = vadd.f32 %v1494_v1, %v1214_v34 }
 0x26b   : > { %v1842_v2 = vadd.f32 %v1808_v51, %v1528_v30 }
 0x26d   : > { %v4752_v31 = vadd.f32 %v2122_v57, %v1842_v2 }
 0x26f   : > { %v2732_v18 = vadd.f32 %v2731_v4, %v4752_v31  ;;  %v2771_v11 = vmul.f32 %v4752_v31, %v4752_v31 }
 0x271   : > { %v2733_v56 = vrot.slane %v2732_v18, 4  ;;  %v2802_v29 = vadd.f32 %v2801_v41, %v2771_v11 }
 0x273   : > { %v2734_v28 = vadd.f32 %v2733_v56, %v2732_v18  ;;  %v2803_v24 = vrot.slane %v2802_v29, 4 }
 0x275   : > { %v2735_v46 = vrot.slane %v2734_v28, 2  ;;  %v2804_v63 = vadd.f32 %v2803_v24, %v2802_v29 }
 0x277   : > { %v2736_v13 = vadd.f32 %v2735_v46, %v2734_v28  ;;  %v2805_v62 = vrot.slane %v2804_v63, 2 }
 0x279   : > { %v2737_v8 = vrot.slane %v2736_v13, 1  ;;  %v2806_v37 = vadd.f32 %v2805_v62, %v2804_v63 }
 0x27b   : > { %v2738_v19 = vadd.f32 %v2737_v8, %v2736_v13  ;;  %v2807_v9 = vrot.slane %v2806_v37, 1 }
 0x27d   : > { %v4757_v14 = vmul.f32 0.00390625, %v2738_v19  ;;  %v2808_v15 = vadd.f32 %v2807_v9, %v2806_v37 }
 0x27f   : > { %v2809_v12 = vmul.f32 0.00390625, %v2808_v15  ;;  %v2810_v20 = vmul.f32 %v4757_v14, %v4757_v14  ;;  %v2849_v44 = vsub.f32 %v4712_v43, %v4757_v14  ;;  %v2850_v59 = vsub.f32 %v4722_v38, %v4757_v14 }
 0x280   : > { %v2851_v4 = vsub.f32 %v4728_v48, %v4757_v14  ;;  %v2852_v47 = vsub.f32 %v4734_v10, %v4757_v14  ;;  %v2853_v34 = vsub.f32 %v4740_v55, %v4757_v14  ;;  %v2854_v1 = vsub.f32 %v4746_v25, %v4757_v14 }
 0x281   : > { %v2811_v32 = vsub.f32 %v2809_v12, %v2810_v20  ;;  %v2855_v41 = vsub.f32 %v4752_v31, %v4757_v14  ;;  %v2824_v57 = vsub.f32 %v4526_v21, %v4757_v14  ;;  %v2825_v18 = vsub.f32 %v4533_v16, %v4757_v14 }
 0x282   : > { %v2826_v11 = vsub.f32 %v4536_v50, %v4757_v14  ;;  %v2827_v29 = vsub.f32 %v4543_v36, %v4757_v14  ;;  %v2828_v28 = vsub.f32 %v4546_v49, %v4757_v14  ;;  %v2829_v24 = vsub.f32 %v4553_v53, %v4757_v14 }
 0x283   : > { %v2812_v17 = vmax.f32 %v2811_v32, 0.0  ;;  %v2830_v46 = vsub.f32 %v4556_v27, %v4757_v14  ;;  %v2831_v21 = vsub.f32 %v4563_v3, %v4757_v14  ;;  %v2832_v16 = vsub.f32 %v4566_v61, %v4757_v14 }
 0x284   : > { %v2833_v50 = vsub.f32 %v4573_v22, %v4757_v14  ;;  %v2834_v36 = vsub.f32 %v4576_v33, %v4757_v14  ;;  %v2835_v49 = vsub.f32 %v4583_v42, %v4757_v14  ;;  %v2836_v53 = vsub.f32 %v4586_v5, %v4757_v14 }
 0x285   : > { %v2813_v39 = vadd.f32 1e-05, %v2812_v17  ;;  %v2837_v27 = vsub.f32 %v4593_v0, %v4757_v14  ;;  %v2838_v3 = vsub.f32 %v4596_v40, %v4757_v14  ;;  %v2839_v61 = vsub.f32 %v4599_v58, %v4757_v14 }
 0x286   : > { %v2840_v33 = vsub.f32 %v4602_v60, %v4757_v14  ;;  %v2841_v42 = vsub.f32 %v4605_v23, %v4757_v14  ;;  %v2842_v5 = vsub.f32 %v4608_v45, %v4757_v14  ;;  %v2843_v0 = vsub.f32 %v4611_v52, %v4757_v14 }
 0x287   : > { %4071 = vrsqrt.f32 %v2813_v39  ;;  %vm2820_vm1 = vweird.f32 %v2813_v39  ;;  %v2844_v40 = vsub.f32 %v4624_v6, %v4757_v14  ;;  %v2845_v58 = vsub.f32 %v4689_v26, %v4757_v14 }
 0x288   : > { %v2846_v60 = vsub.f32 %v4697_v54, %v4757_v14  ;;  %v2847_v23 = vsub.f32 %v4702_v35, %v4757_v14  ;;  %v2848_v62 = vsub.f32 %v4707_v7, %v4757_v14 }
 0x28d   : > { %v4072_v30 = vpop.eup %4071 }
 0x28e   : > { %v2815_v51 = vmul.f32 %v4072_v30, %v2813_v39  ;;  %vm2821_vm0 = vweird.f32 %v4072_v30 }
 0x28f   : > { %vm2822_vm2 = vmor %vm2820_vm1, %vm2821_vm0 }
 0x290   : > { %v2816_v2 = vmul.f32 %v4072_v30, %v2815_v51 }
 0x292   : > { %v2817_v56 = vmul.f32 0.5, %v2816_v2 }
 0x294   : > { %v2818_v63 = vsub.f32 1.5, %v2817_v56 }
 0x296   : > { %v2819_v22 = vmul.f32 %v4072_v30, %v2818_v63 }
 0x298   : > { %v2823_v13 = vsel %vm2822_vm2, %v4072_v30, %v2819_v22 }
 0x299   : > { %v4825_v45 = vmul.f32 %v2824_v57, %v2823_v13  ;;  %v4827_v8 = vmul.f32 %v2825_v18, %v2823_v13  ;;  %v4829_v52 = vmul.f32 %v2826_v11, %v2823_v13  ;;  %v4831_v6 = vmul.f32 %v2827_v29, %v2823_v13 }
 0x29a   : > { %v4833_v37 = vmul.f32 %v2828_v28, %v2823_v13  ;;  %v4835_v26 = vmul.f32 %v2829_v24, %v2823_v13  ;;  %v4837_v19 = vmul.f32 %v2830_v46, %v2823_v13  ;;  %v4839_v54 = vmul.f32 %v2831_v21, %v2823_v13 }
 0x29b   : > { %v4841_v35 = vmul.f32 %v2832_v16, %v2823_v13  ;;  %v2865_v9 = vmul.f32 %v2833_v50, %v2823_v13  ;;  %v2866_v7 = vmul.f32 %v2834_v36, %v2823_v13  ;;  %v2867_v15 = vmul.f32 %v2835_v49, %v2823_v13 }
 0x29c   : > { %v2868_v12 = vmul.f32 %v2836_v53, %v2823_v13  ;;  %v2869_v20 = vmul.f32 %v2837_v27, %v2823_v13  ;;  %v2870_v32 = vmul.f32 %v2838_v3, %v2823_v13  ;;  %v2871_v17 = vmul.f32 %v2839_v61, %v2823_v13 }
 0x29d   : > { %v2872_v39 = vmul.f32 %v2840_v33, %v2823_v13  ;;  %v2873_v30 = vmul.f32 %v2841_v42, %v2823_v13  ;;  %v2874_v51 = vmul.f32 %v2842_v5, %v2823_v13  ;;  %v2875_v2 = vmul.f32 %v2843_v0, %v2823_v13 }
 0x29e   : > { %v2876_v57 = vmul.f32 %v2844_v40, %v2823_v13  ;;  %v2877_v18 = vmul.f32 %v2845_v58, %v2823_v13  ;;  %v2878_v11 = vmul.f32 %v2846_v60, %v2823_v13  ;;  %v2879_v56 = vmul.f32 %v2847_v23, %v2823_v13 }
 0x29f   : > { %v2880_v29 = vmul.f32 %v2848_v62, %v2823_v13  ;;  %v2881_v28 = vmul.f32 %v2849_v44, %v2823_v13  ;;  %v2882_v24 = vmul.f32 %v2850_v59, %v2823_v13  ;;  %v2883_v46 = vmul.f32 %v2851_v4, %v2823_v13 }
 0x2a0   : > { %v2884_v21 = vmul.f32 %v2852_v47, %v2823_v13  ;;  %v2885_v16 = vmul.f32 %v2853_v34, %v2823_v13  ;;  %v2886_v43 = vmul.f32 %v2854_v1, %v2823_v13  ;;  %v2887_v38 = vmul.f32 %v2855_v41, %v2823_v13 }
 0x2a1   : > { %v2920_v44 = vmax.f32 %v4825_v45, 0.0  ;;  %v2921_v48 = vmax.f32 %v4827_v8, 0.0  ;;  %v2922_v10 = vmax.f32 %v4829_v52, 0.0  ;;  %v2923_v59 = vmax.f32 %v4831_v6, 0.0 }
 0x2a2   : > { %v2924_v55 = vmax.f32 %v4833_v37, 0.0  ;;  %v2925_v4 = vmax.f32 %v4835_v26, 0.0  ;;  %v2926_v25 = vmax.f32 %v4837_v19, 0.0  ;;  %v2927_v47 = vmax.f32 %v4839_v54, 0.0 }
 0x2a3   : > { %v2928_v31 = vmax.f32 %v4841_v35, 0.0  ;;  %v2929_v14 = vmax.f32 %v2865_v9, 0.0  ;;  %v2930_v34 = vmax.f32 %v2866_v7, 0.0  ;;  %v2931_v1 = vmax.f32 %v2867_v15, 0.0 }
 0x2a4   : > { %v2932_v41 = vmax.f32 %v2868_v12, 0.0  ;;  %v2933_v50 = vmax.f32 %v2869_v20, 0.0  ;;  %v2934_v63 = vmax.f32 %v2870_v32, 0.0  ;;  %v2935_v36 = vmax.f32 %v2871_v17, 0.0 }
 0x2a5   : > { %v2936_v49 = vmax.f32 %v2872_v39, 0.0  ;;  %v2937_v53 = vmax.f32 %v2873_v30, 0.0  ;;  %v2938_v27 = vmax.f32 %v2874_v51, 0.0  ;;  %v2939_v3 = vmax.f32 %v2875_v2, 0.0 }
 0x2a6   : > { %v2940_v61 = vmax.f32 %v2876_v57, 0.0  ;;  %v2941_v22 = vmax.f32 %v2877_v18, 0.0  ;;  %v2942_v33 = vmax.f32 %v2878_v11, 0.0  ;;  %v2943_v42 = vmax.f32 %v2879_v56, 0.0 }
 0x2a7   : > { %v2944_v5 = vmax.f32 %v2880_v29, 0.0  ;;  %v2945_v0 = vmax.f32 %v2881_v28, 0.0  ;;  %v2946_v40 = vmax.f32 %v2882_v24, 0.0  ;;  %v2947_v58 = vmax.f32 %v2883_v46, 0.0 }
 0x2a8   : > { %v2948_v13 = vmax.f32 %v2884_v21, 0.0  ;;  %v2949_v60 = vmax.f32 %v2885_v16, 0.0  ;;  %v2950_v23 = vmax.f32 %v2886_v43, 0.0  ;;  %v2951_v62 = vmax.f32 %v2887_v38, 0.0 }
 0x2a9   : > { %v3946_v45 = vpack.c.bf16 %v2921_v48, %v2920_v44  ;;  %v3951_v8 = vpack.c.bf16 %v2923_v59, %v2922_v10  ;;  %v3956_v52 = vpack.c.bf16 %v2925_v4, %v2924_v55  ;;  %v3961_v6 = vpack.c.bf16 %v2927_v47, %v2926_v25 }
 0x2aa   : > { %v3966_v37 = vpack.c.bf16 %v2929_v14, %v2928_v31  ;;  %v3971_v26 = vpack.c.bf16 %v2931_v1, %v2930_v34  ;;  %v3976_v19 = vpack.c.bf16 %v2933_v50, %v2932_v41  ;;  %v3981_v54 = vpack.c.bf16 %v2935_v36, %v2934_v63 }
 0x2ab   : > { %3947 = vst [vmem:[%s4877_s27] sm:$0xff] %v3946_v45   ;;  %v3986_v35 = vpack.c.bf16 %v2937_v53, %v2936_v49  ;;  %v3991_v9 = vpack.c.bf16 %v2939_v3, %v2938_v27  ;;  %v3996_v7 = vpack.c.bf16 %v2941_v22, %v2940_v61  ;;  %v4001_v15 = vpack.c.bf16 %v2943_v42, %v2942_v33 }
 0x2ac   : > { %4023 = vst [vmem:[%s4877_s27 + $0x8] sm:$0xff] %v3951_v8   ;;  %v4006_v12 = vpack.c.bf16 %v2945_v0, %v2944_v5  ;;  %v4011_v20 = vpack.c.bf16 %v2947_v58, %v2946_v40  ;;  %v4016_v32 = vpack.c.bf16 %v2949_v60, %v2948_v13  ;;  %v4021_v17 = vpack.c.bf16 %v2951_v62, %v2950_v23 }
 0x2ad   : > { %4024 = vst [vmem:[%s4877_s27 + $0x10] sm:$0xff] %v3956_v52  }
 0x2ae   : > { %4025 = vst [vmem:[%s4877_s27 + $0x18] sm:$0xff] %v3961_v6  }
 0x2af   : > { %4026 = vst [vmem:[%s4877_s27 + $0x20] sm:$0xff] %v3966_v37  }
 0x2b0   : > { %4027 = vst [vmem:[%s4877_s27 + $0x28] sm:$0xff] %v3971_v26  }
 0x2b1   : > { %4028 = vst [vmem:[%s4877_s27 + $0x30] sm:$0xff] %v3976_v19  }
 0x2b2   : > { %4029 = vst [vmem:[%s4877_s27 + $0x38] sm:$0xff] %v3981_v54  }
 0x2b3   : > { %4030 = vst [vmem:[%s4877_s27 + $0x40] sm:$0xff] %v3986_v35  }
 0x2b4   : > { %4031 = vst [vmem:[%s4877_s27 + $0x48] sm:$0xff] %v3991_v9  }
 0x2b5   : > { %4032 = vst [vmem:[%s4877_s27 + $0x50] sm:$0xff] %v3996_v7  }
 0x2b6   : > { %4033 = vst [vmem:[%s4877_s27 + $0x58] sm:$0xff] %v4001_v15  }
 0x2b7   : > { %4034 = vst [vmem:[%s4877_s27 + $0x60] sm:$0xff] %v4006_v12  }
 0x2b8   : > { %4035 = vst [vmem:[%s4877_s27 + $0x68] sm:$0xff] %v4011_v20  }
 0x2b9   : > { %4036 = vst [vmem:[%s4877_s27 + $0x70] sm:$0xff] %v4016_v32  }
 0x2ba   : > { %4037 = vst [vmem:[%s4877_s27 + $0x78] sm:$0xff] %v4021_v17  }
 0x2bb PF: > { %s12_s9 = sadd.s32 1, %s4079_s9  }
 0x2bc   : > { %p9_p4 = scmp.ge.s32.totalorder %s12_s9, 4  }
 0x2be   :  { %11 = sbr.rel (!%p9_p4) target bundleno = 1 (0x1), region = 64 }

// kernel: content_encoder_forward.11
= control target key start
LH: loop header
LB: loop body
LE: loop exit
PB: predicated region body
PF: predicated region fallthrough
CT: control target
= control target key end

     0   :  { %s3301_s9 = smov 0   ;;  %s3828_s0 = inlined_call_operand.vmem [shape: bf16[2,4,48,128], index: 0, kind: input, shape index: {}]   ;;  %s3829_s1 = inlined_call_operand.vmem [shape: bf16[16,128,128], index: 1, kind: input, shape index: {}]   ;;  %s3830_s2 = inlined_call_operand.vmem [shape: bf16[2,32,128], index: 2, kind: output, shape index: {}]  }
   0x1 LB: > { %s2145_s10 = sadd.s32 4294967295, %s3284_s9   ;;  %p2149_p0 = scmp.ge.s32.totalorder %s3284_s9, 1  ;;  %s3284_s9 = sphi %s3301_s9, %s12_s9  }
   0x2   : > { %p112_p1 = scmp.lt.s32.totalorder %s3284_s9, 3 }
   0x4   : > { %p113_p2 = pnand %p2149_p0, %p112_p1 }
   0x5   : > { %p134_p3 = scmp.lt.s32.totalorder (!%p113_p2), %s2145_s10, 1 }
   0x6   : > { %116 = sbr.rel (%p113_p2) target bundleno = 353 (0x161), region = 28 }
   0xb   : > { %v3036_v0 = vld [vmem:[%s3829_s1 + $0x78] sm:$0xff]  ;;  %v3035_v4 = vld [vmem:[%s3829_s1 + $0x70] sm:$0xff]  ;;  %s3840_s10 = smov (!%p134_p3, %s2145_s10), 1  ;;  %v3034_v8 = vld [vmem:[%s3829_s1 + $0x68] sm:$0xff]  ;;  %vm379_vm0 = vsmask.f32 7424 }
   0xc   : > { %v3026_v1 = vld [vmem:[%s3829_s1 + $0x38] sm:$0xff]  ;;  %246 = vmatpush.bf16.msra.mxu0 %v3036_v0  ;;  %v3025_v5 = vld [vmem:[%s3829_s1 + $0x30] sm:$0xff]  ;;  %v3024_v9 = vld [vmem:[%s3829_s1 + $0x28] sm:$0xff]  ;;  %s3267_s7 = smul.u32 96, %s3840_s10 }
   0xd   : > { %v3044_v2 = vld [vmem:[%s3829_s1 + $0xb8] sm:$0xff]  ;;  %325 = vmatpush.bf16.msra.mxu1 %v3026_v1  ;;  %v3043_v6 = vld [vmem:[%s3829_s1 + $0xb0] sm:$0xff]  ;;  %v3042_v10 = vld [vmem:[%s3829_s1 + $0xa8] sm:$0xff] }
   0xe   : > { %v3052_v3 = vld [vmem:[%s3829_s1 + $0xf8] sm:$0xff]  ;;  %450 = vmatpush.bf16.msra.mxu2 %v3044_v2  ;;  %v3051_v7 = vld [vmem:[%s3829_s1 + $0xf0] sm:$0xff]  ;;  %v3050_v11 = vld [vmem:[%s3829_s1 + $0xe8] sm:$0xff]  ;;  %s3363_s20 = scalar_lea.vmem %s3828_s0, %s3267_s7 }
   0xf   : > { %578 = vmatpush.bf16.msra.mxu3 %v3052_v3  ;;  %v3033_v12 = vld [vmem:[%s3829_s1 + $0x60] sm:$0xff]  ;;  %v3032_v16 = vld [vmem:[%s3829_s1 + $0x58] sm:$0xff]  ;;  %v3031_v22 = vld [vmem:[%s3829_s1 + $0x50] sm:$0xff] }
  0x10   : > { %247 = vmatpush.bf16.msra.mxu0 %v3035_v4  ;;  %v3023_v13 = vld [vmem:[%s3829_s1 + $0x20] sm:$0xff]  ;;  %v3022_v17 = vld [vmem:[%s3829_s1 + $0x18] sm:$0xff]  ;;  %v3021_v23 = vld [vmem:[%s3829_s1 + $0x10] sm:$0xff] }
  0x11   : > { %326 = vmatpush.bf16.msra.mxu1 %v3025_v5  ;;  %v3041_v14 = vld [vmem:[%s3829_s1 + $0xa0] sm:$0xff]  ;;  %v3040_v18 = vld [vmem:[%s3829_s1 + $0x98] sm:$0xff]  ;;  %v3039_v24 = vld [vmem:[%s3829_s1 + $0x90] sm:$0xff] }
  0x12   : > { %451 = vmatpush.bf16.msra.mxu2 %v3043_v6  ;;  %v3049_v15 = vld [vmem:[%s3829_s1 + $0xe0] sm:$0xff]  ;;  %v3048_v19 = vld [vmem:[%s3829_s1 + $0xd8] sm:$0xff]  ;;  %v3047_v25 = vld [vmem:[%s3829_s1 + $0xd0] sm:$0xff] }
  0x13   : > { %579 = vmatpush.bf16.msra.mxu3 %v3051_v7  ;;  %v3162_v20 = vld [vmem:[%s3363_s20] sm:$0xff]   ;;  %v3204_v21 = vld [vmem:[%s3363_s20 + $0x18] sm:$0xff]   ;;  %v3392_v26 = vld [vmem:[%s3363_s20 + $0x8] sm:$0xff]  }
  0x14   : > { %248 = vmatpush.bf16.msra.mxu0 %v3034_v8  ;;  %v383_v27 = vshll.u32 %v3162_v20, 16  ;;  %v511_v28 = vshll.u32 %v3204_v21, 16  ;;  %v3395_v29 = vld [vmem:[%s3363_s20 + $0x20] sm:$0xff]   ;;  %v3030_v30 = vld [vmem:[%s3829_s1 + $0x48] sm:$0xff]  ;;  %v381_v32 = vshrl.u32 %v3162_v20, 16  ;;  %v388_v33 = vshll.u32 %v3392_v26, 16 }
  0x15   : > { %327 = vmatpush.bf16.msra.mxu1 %v3024_v9  ;;  %v3020_v31 = vld [vmem:[%s3829_s1 + $0x8] sm:$0xff]  ;;  %v509_v37 = vshrl.u32 %v3204_v21, 16  ;;  %v516_v39 = vshll.u32 %v3395_v29, 16  ;;  %v3029_v40 = vld [vmem:[%s3829_s1 + $0x40] sm:$0xff]  ;;  %v3080_v48 = vld [vmem:[%s3829_s1 + $0x1b8] sm:$0xff]  ;;  %v392_v6 = vshrl.u32 %v3392_v26, 16 }
  0x16   : > { %452 = vmatpush.bf16.msra.mxu2 %v3042_v10  ;;  %v3038_v34 = vld [vmem:[%s3829_s1 + $0x88] sm:$0xff]  ;;  %v385_v36 = vrot.slane %v383_v27, 1  ;;  %v513_v38 = vrot.slane %v511_v28, 1  ;;  %v3019_v41 = vld [vmem:[%s3829_s1] sm:$0xff]  ;;  %v390_v45 = vrot.slane %v388_v33, 1  ;;  %v3062_v49 = vld [vmem:[%s3829_s1 + $0x138] sm:$0xff] }
  0x17   : > { %580 = vmatpush.bf16.msra.mxu3 %v3050_v11  ;;  %v3046_v35 = vld [vmem:[%s3829_s1 + $0xc8] sm:$0xff]  ;;  %v3037_v42 = vld [vmem:[%s3829_s1 + $0x80] sm:$0xff]  ;;  %v518_v47 = vrot.slane %v516_v39, 1  ;;  %v348_v50 = vld [vmem:[%s3363_s20 + $0x10] sm:$0x1]  ;;  %v520_v8 = vshrl.u32 %v3395_v29, 16 }
  0x18   : > { %249 = vmatpush.bf16.msra.mxu0 %v3033_v12  ;;  %v3045_v43 = vld [vmem:[%s3829_s1 + $0xc0] sm:$0xff]  ;;  %v386_v44 = vor.u32 %v385_v36, %v381_v32  ;;  %v514_v46 = vor.u32 %v513_v38, %v509_v37  ;;  %v2305_v51 = vld [vmem:[%s3363_s20 + $0x28] sm:$0x1]  ;;  %v3027_v52 = vld [vmem:[%s3363_s20 + $0x18] sm:$0xff]  ;;  %v375_v58 = vunpack.c.l.b16 %v348_v50 }
  0x19   : > { %328 = vmatpush.bf16.msra.mxu1 %v3023_v13  ;;  %v3017_v53 = vld [vmem:[%s3363_s20] sm:$0xff]  ;;  %v3072_v56 = vld [vmem:[%s3829_s1 + $0x178] sm:$0xff]  ;;  %v504_v59 = vunpack.c.l.b16 %v2305_v51  ;;  %v3079_v60 = vld [vmem:[%s3829_s1 + $0x1b0] sm:$0xff] }
  0x1a   : > { %453 = vmatpush.bf16.msra.mxu2 %v3041_v14  ;;  %v391_v54 = vsel %vm379_vm0, %v386_v44, %v390_v45  ;;  %v519_v55 = vsel %vm379_vm0, %v514_v46, %v518_v47  ;;  %v3088_v57 = vld [vmem:[%s3829_s1 + $0x1f8] sm:$0xff]  ;;  %v3061_v61 = vld [vmem:[%s3829_s1 + $0x130] sm:$0xff]  ;;  %v378_v0 = vpack.c.b16 %v375_v58, %v375_v58  ;;  %v3078_v2 = vld [vmem:[%s3829_s1 + $0x1a8] sm:$0xff]  ;;  %v394_v14 = vor.u32 %v392_v6, %v390_v45 }
  0x1b   : > { %581 = vmatpush.bf16.msra.mxu3 %v3049_v15  ;;  %v3071_v62 = vld [vmem:[%s3829_s1 + $0x170] sm:$0xff]  ;;  %v507_v1 = vpack.c.b16 %v504_v59, %v504_v59  ;;  %v3060_v3 = vld [vmem:[%s3829_s1 + $0x128] sm:$0xff]  ;;  %v3077_v10 = vld [vmem:[%s3829_s1 + $0x1a0] sm:$0xff] }
  0x1c   : > { %250 = vmatpush.bf16.msra.mxu0 %v3032_v16  ;;  %v3087_v63 = vld [vmem:[%s3829_s1 + $0x1f0] sm:$0xff]  ;;  %v3070_v4 = vld [vmem:[%s3829_s1 + $0x168] sm:$0xff]  ;;  %v396_v7 = vshll.u32 %v378_v0, 16  ;;  %v3059_v11 = vld [vmem:[%s3829_s1 + $0x120] sm:$0xff]  ;;  %v522_v16 = vor.u32 %v520_v8, %v518_v47 }
  0x1d   : > { %329 = vmatpush.bf16.msra.mxu1 %v3022_v17  ;;  %v3086_v5 = vld [vmem:[%s3829_s1 + $0x1e8] sm:$0xff]  ;;  %v524_v9 = vshll.u32 %v507_v1, 16  ;;  %v3069_v12 = vld [vmem:[%s3829_s1 + $0x160] sm:$0xff]  ;;  %v3075_v26 = vld [vmem:[%s3829_s1 + $0x190] sm:$0xff] }
  0x1e   : > { %454 = vmatpush.bf16.msra.mxu2 %v3040_v18  ;;  %v3085_v13 = vld [vmem:[%s3829_s1 + $0x1e0] sm:$0xff]  ;;  %v398_v15 = vrot.slane %v396_v7, 1  ;;  %v3076_v18 = vld [vmem:[%s3829_s1 + $0x198] sm:$0xff]  ;;  %v3018_v21 = vld [vmem:[%s3363_s20 + $0x8] sm:$0xff] }
  0x1f   : > { %582 = vmatpush.bf16.msra.mxu3 %v3048_v19  ;;  %v526_v17 = vrot.slane %v524_v9, 1  ;;  %v3058_v19 = vld [vmem:[%s3829_s1 + $0x118] sm:$0xff]  ;;  %v3028_v20 = vld [vmem:[%s3363_s20 + $0x20] sm:$0xff]  ;;  %v3057_v27 = vld [vmem:[%s3829_s1 + $0x110] sm:$0xff] }
  0x20   : > { %251 = vmatpush.bf16.msra.mxu0 %v3031_v22  ;;  %v399_v22 = vsel %vm379_vm0, %v394_v14, %v398_v15  ;;  %v3206_v28 = vld [vmem:[%s3363_s20 + $0x30] sm:$0xff]   ;;  %v3208_v29 = vld [vmem:[%s3363_s20 + $0x48] sm:$0xff]   ;;  %v3055_v44 = vld [vmem:[%s3829_s1 + $0x100] sm:$0xff] }
  0x21   : > { %330 = vmatpush.bf16.msra.mxu1 %v3021_v23  ;;  %v527_v23 = vsel %vm379_vm0, %v522_v16, %v526_v17  ;;  %v849_v32 = vshll.u32 %v3206_v28, 16  ;;  %v3074_v33 = vld [vmem:[%s3829_s1 + $0x188] sm:$0xff]  ;;  %v977_v36 = vshll.u32 %v3208_v29, 16  ;;  %v3519_v37 = vld [vmem:[%s3363_s20 + $0x50] sm:$0xff]   ;;  %v975_v45 = vshrl.u32 %v3208_v29, 16  ;;  %v3065_v50 = vld [vmem:[%s3829_s1 + $0x140] sm:$0xff] }
  0x22   : > { %455 = vmatpush.bf16.msra.mxu2 %v3039_v24  ;;  %v3068_v24 = vld [vmem:[%s3829_s1 + $0x158] sm:$0xff]  ;;  %v3066_v38 = vld [vmem:[%s3829_s1 + $0x148] sm:$0xff]  ;;  %v982_v47 = vshll.u32 %v3519_v37, 16  ;;  %v3081_v51 = vld [vmem:[%s3829_s1 + $0x1c0] sm:$0xff] }
  0x23   : > { %583 = vmatpush.bf16.msra.mxu3 %v3047_v25  ;;  %v3084_v25 = vld [vmem:[%s3829_s1 + $0x1d8] sm:$0xff]  ;;  %v3082_v39 = vld [vmem:[%s3829_s1 + $0x1c8] sm:$0xff]  ;;  %v979_v46 = vrot.slane %v977_v36, 1  ;;  %v2478_v58 = vld [vmem:[%s3363_s20 + $0x40] sm:$0x1] }
  0x24   : > { %252 = vmatpush.bf16.msra.mxu0 %v3030_v30  ;;  %v3067_v30 = vld [vmem:[%s3829_s1 + $0x150] sm:$0xff]  ;;  %v842_v1 = vunpack.c.l.b16 %v2478_v58  ;;  %v3112_v6 = vld [vmem:[%s3829_s1 + $0x2a8] sm:$0xff]  ;;  %v3101_v16 = vld [vmem:[%s3829_s1 + $0x260] sm:$0xff] }
  0x25   : > { %331 = vmatpush.bf16.msra.mxu1 %v3020_v31  ;;  %v3083_v31 = vld [vmem:[%s3829_s1 + $0x1d0] sm:$0xff]  ;;  %v3094_v7 = vld [vmem:[%s3829_s1 + $0x228] sm:$0xff]  ;;  %v3121_v17 = vld [vmem:[%s3829_s1 + $0x2e0] sm:$0xff] }
  0x26   : > { %456 = vmatpush.bf16.msra.mxu2 %v3038_v34  ;;  %v3056_v34 = vld [vmem:[%s3829_s1 + $0x108] sm:$0xff]  ;;  %v3053_v59 = vld [vmem:[%s3363_s20 + $0x30] sm:$0xff]  ;;  %v845_v8 = vpack.c.b16 %v842_v1, %v842_v1  ;;  %v3140_v58 = vld [vmem:[%s3829_s1 + $0x378] sm:$0xff] }
  0x27   : > { %584 = vmatpush.bf16.msra.mxu3 %v3046_v35  ;;  %v3516_v35 = vld [vmem:[%s3363_s20 + $0x38] sm:$0xff]   ;;  %v3095_v0 = vld [vmem:[%s3829_s1 + $0x230] sm:$0xff]  ;;  %v3102_v9 = vld [vmem:[%s3829_s1 + $0x268] sm:$0xff] }
  0x28   : > { %253 = vmatpush.bf16.msra.mxu0 %v3029_v40  ;;  %v847_v40 = vshrl.u32 %v3206_v28, 16  ;;  %v858_v14 = vshrl.u32 %v3516_v35, 16  ;;  %v862_v15 = vshll.u32 %v845_v8, 16  ;;  %v3054_v28 = vld [vmem:[%s3363_s20 + $0x38] sm:$0xff]  ;;  %v3109_v29 = vld [vmem:[%s3829_s1 + $0x290] sm:$0xff] }
  0x29   : > { %332 = vmatpush.bf16.msra.mxu1 %v3019_v41  ;;  %v851_v41 = vrot.slane %v849_v32, 1  ;;  %v3091_v32 = vld [vmem:[%s3829_s1 + $0x210] sm:$0xff] }
  0x2a   : > { %457 = vmatpush.bf16.msra.mxu2 %v3037_v42  ;;  %v854_v42 = vshll.u32 %v3516_v35, 16  ;;  %v3099_v35 = vld [vmem:[%s3829_s1 + $0x250] sm:$0xff] }
  0x2b   : > { %585 = vmatpush.bf16.msra.mxu3 %v3045_v43  ;;  %254 = vmatmul.bf16.vlgmr.msra.gmra.mxu0 %v3027_v52  ;;  %v3073_v43 = vld [vmem:[%s3829_s1 + $0x180] sm:$0xff]  ;;  %v852_v52 = vor.u32 %v851_v41, %v847_v40  ;;  %v3119_v36 = vld [vmem:[%s3829_s1 + $0x2d0] sm:$0xff] }
  0x2c   : > { %683 = vmatpush.bf16.msrb.mxu0 %v3062_v49  ;;  %333 = vmatmul.bf16.vlgmr.msra.gmra.mxu1 %v3017_v53  ;;  %v3096_v49 = vld [vmem:[%s3829_s1 + $0x238] sm:$0xff]  ;;  %v856_v53 = vrot.slane %v854_v42, 1  ;;  %v3634_v40 = vld [vmem:[%s3363_s20 + $0xc] sm:$0xff]  ;;  %v1261_v1 = vld [vmem:[%s3363_s20 + $0x14] sm:$0x1] }
  0x2d   : > { %458 = vmatmul.bf16.vlgmr.msra.gmra.mxu2 %v391_v54  ;;  %788 = vmatpush.bf16.msrb.mxu1 %v3072_v56  ;;  %v980_v54 = vor.u32 %v979_v46, %v975_v45  ;;  %v3104_v56 = vld [vmem:[%s3829_s1 + $0x278] sm:$0xff]  ;;  %v3098_v42 = vld [vmem:[%s3829_s1 + $0x248] sm:$0xff]  ;;  %v3107_v46 = vld [vmem:[%s3829_s1 + $0x280] sm:$0xff]  ;;  %v1288_v8 = vunpack.c.l.b16 %v1261_v1 }
  0x2e   : > { %916 = vmatpush.bf16.msrb.mxu2 %v3080_v48  ;;  %586 = vmatmul.bf16.vlgmr.msra.gmra.mxu3 %v519_v55  ;;  %v3114_v48 = vld [vmem:[%s3829_s1 + $0x2b8] sm:$0xff]  ;;  %v984_v55 = vrot.slane %v982_v47, 1 }
  0x2f   : > { %1044 = vmatpush.bf16.msrb.mxu3 %v3088_v57  ;;  %v3124_v57 = vld [vmem:[%s3829_s1 + $0x2f8] sm:$0xff] }
  0x30   : > { %684 = vmatpush.bf16.msrb.mxu0 %v3061_v61  ;;  %v2531_v61 = vld [vmem:[%s3363_s20 + $0x58] sm:$0x1] }
  0x31   : > { %789 = vmatpush.bf16.msrb.mxu1 %v3071_v62  ;;  %v3063_v62 = vld [vmem:[%s3363_s20 + $0x48] sm:$0xff]  ;;  %v3150_v47 = vld [vmem:[%s3829_s1 + $0x3b8] sm:$0xff] }
  0x32   : > { %917 = vmatpush.bf16.msrb.mxu2 %v3079_v60  ;;  %v3113_v60 = vld [vmem:[%s3829_s1 + $0x2b0] sm:$0xff] }
  0x33   : > { %1045 = vmatpush.bf16.msrb.mxu3 %v3087_v63  ;;  %v857_v63 = vsel %vm379_vm0, %v852_v52, %v856_v53  ;;  %v3097_v52 = vld [vmem:[%s3829_s1 + $0x240] sm:$0xff] }
  0x34   : > { %685 = vmatpush.bf16.msrb.mxu0 %v3060_v3  ;;  %v3103_v3 = vld [vmem:[%s3829_s1 + $0x270] sm:$0xff] }
  0x35   : > { %790 = vmatpush.bf16.msrb.mxu1 %v3070_v4  ;;  %v3123_v4 = vld [vmem:[%s3829_s1 + $0x2f0] sm:$0xff] }
  0x36   : > { %918 = vmatpush.bf16.msrb.mxu2 %v3078_v2  ;;  %v985_v2 = vsel %vm379_vm0, %v980_v54, %v984_v55 }
  0x37   : > { %1046 = vmatpush.bf16.msrb.mxu3 %v3086_v5  ;;  %v970_v5 = vunpack.c.l.b16 %v2531_v61 }
  0x38   : > { %686 = vmatpush.bf16.msrb.mxu0 %v3059_v11 }
  0x39   : > { %791 = vmatpush.bf16.msrb.mxu1 %v3069_v12  ;;  %v973_v11 = vpack.c.b16 %v970_v5, %v970_v5  ;;  %v3111_v12 = vld [vmem:[%s3829_s1 + $0x2a0] sm:$0xff] }
  0x3a   : > { %919 = vmatpush.bf16.msrb.mxu2 %v3077_v10  ;;  %v3122_v10 = vld [vmem:[%s3829_s1 + $0x2e8] sm:$0xff]  ;;  %v3256_v5 = vld [vmem:[%s3363_s20 + $0x1c] sm:$0xff]  }
  0x3b   : > { %1047 = vmatpush.bf16.msrb.mxu3 %v3085_v13  ;;  %259 = vmatmul.bf16.gmra.mxu0 %v3028_v20  ;;  %v3093_v13 = vld [vmem:[%s3829_s1 + $0x220] sm:$0xff]  ;;  %v3110_v20 = vld [vmem:[%s3829_s1 + $0x298] sm:$0xff] }
  0x3c   : > { %687 = vmatpush.bf16.msrb.mxu0 %v3058_v19  ;;  %338 = vmatmul.bf16.gmra.mxu1 %v3018_v21  ;;  %v990_v19 = vshll.u32 %v973_v11, 16  ;;  %v860_v21 = vor.u32 %v858_v14, %v856_v53  ;;  %v3117_v53 = vld [vmem:[%s3829_s1 + $0x2c0] sm:$0xff]  ;;  %v3148_v11 = vld [vmem:[%s3829_s1 + $0x3a8] sm:$0xff] }
  0x3d   : > { %463 = vmatmul.bf16.gmra.mxu2 %v399_v22  ;;  %792 = vmatpush.bf16.msrb.mxu1 %v3068_v24  ;;  %v864_v22 = vrot.slane %v862_v15, 1  ;;  %v3130_v14 = vld [vmem:[%s3829_s1 + $0x328] sm:$0xff]  ;;  %v1291_v15 = vpack.c.b16 %v1288_v8, %v1288_v8 }
  0x3e   : > { %920 = vmatpush.bf16.msrb.mxu2 %v3076_v18  ;;  %591 = vmatmul.bf16.gmra.mxu3 %v527_v23  ;;  %v986_v18 = vshrl.u32 %v3519_v37, 16  ;;  %v3092_v23 = vld [vmem:[%s3829_s1 + $0x218] sm:$0xff] }
  0x3f   : > { %1048 = vmatpush.bf16.msrb.mxu3 %v3084_v25  ;;  %v992_v25 = vrot.slane %v990_v19, 1  ;;  %v3115_v37 = vld [vmem:[%s3363_s20 + $0x1c] sm:$0xff] }
  0x40   : > { %688 = vmatpush.bf16.msrb.mxu0 %v3057_v27  ;;  %v988_v24 = vor.u32 %v986_v18, %v984_v55  ;;  %v3120_v27 = vld [vmem:[%s3829_s1 + $0x2d8] sm:$0xff]  ;;  %v1423_v45 = vshll.u32 %v3115_v37, 16  ;;  %v1421_v54 = vshrl.u32 %v3115_v37, 16  ;;  %v3137_v19 = vld [vmem:[%s3829_s1 + $0x360] sm:$0xff] }
  0x41   : > { %793 = vmatpush.bf16.msrb.mxu1 %v3067_v30  ;;  %v3064_v30 = vld [vmem:[%s3363_s20 + $0x50] sm:$0xff]  ;;  %v3264_v37 = vld [vmem:[%s3363_s20 + $0x24] sm:$0xff] }
  0x42   : > { %921 = vmatpush.bf16.msrb.mxu2 %v3075_v26  ;;  %v3100_v26 = vld [vmem:[%s3829_s1 + $0x258] sm:$0xff]  ;;  %v1425_v55 = vrot.slane %v1423_v45, 1  ;;  %v3134_v45 = vld [vmem:[%s3829_s1 + $0x348] sm:$0xff] }
  0x43   : > { %1049 = vmatpush.bf16.msrb.mxu3 %v3083_v31  ;;  %v865_v31 = vsel %vm379_vm0, %v860_v21, %v864_v22  ;;  %v1304_v21 = vshrl.u32 %v3634_v40, 16  ;;  %v1308_v22 = vshll.u32 %v1291_v15, 16 }
  0x44   : > { %689 = vmatpush.bf16.msrb.mxu0 %v3056_v34  ;;  %v993_v34 = vsel %vm379_vm0, %v988_v24, %v992_v25 }
  0x45   : > { %794 = vmatpush.bf16.msrb.mxu1 %v3066_v38  ;;  %v3108_v38 = vld [vmem:[%s3829_s1 + $0x288] sm:$0xff] }
  0x46   : > { %922 = vmatpush.bf16.msrb.mxu2 %v3074_v33  ;;  %v3105_v33 = vld [vmem:[%s3363_s20 + $0x4] sm:$0xff] }
  0x47   : > { %1050 = vmatpush.bf16.msrb.mxu3 %v3082_v39  ;;  %v3090_v39 = vld [vmem:[%s3829_s1 + $0x208] sm:$0xff]  ;;  %v1295_v41 = vshll.u32 %v3105_v33, 16 }
  0x48   : > { %690 = vmatpush.bf16.msrb.mxu0 %v3055_v44  ;;  %v3643_v44 = vld [vmem:[%s3363_s20 + $0x24] sm:$0xff] }
  0x49   : > { %795 = vmatpush.bf16.msrb.mxu1 %v3065_v50  ;;  %v1297_v50 = vrot.slane %v1295_v41, 1  ;;  %v1432_v24 = vshrl.u32 %v3643_v44, 16 }
  0x4a   : > { %923 = vmatpush.bf16.msrb.mxu2 %v3073_v43  ;;  %v3118_v43 = vld [vmem:[%s3829_s1 + $0x2c8] sm:$0xff] }
  0x4b   : > { %1051 = vmatpush.bf16.msrb.mxu3 %v3081_v51  ;;  %691 = vmatmul.bf16.vlgmr.msrb.gmra.mxu0 %v3053_v59  ;;  %v1300_v51 = vshll.u32 %v3634_v40, 16  ;;  %v3160_v59 = vld [vmem:[%s3829_s1 + $0x3f8] sm:$0xff] }
  0x4c   : > { %1139 = vmatpush.bf16.msra.mxu0 %v3096_v49  ;;  %796 = vmatmul.bf16.vlgmr.msrb.gmra.mxu1 %v3063_v62  ;;  %v1293_v49 = vshrl.u32 %v3105_v33, 16  ;;  %v3156_v33 = vld [vmem:[%s3829_s1 + $0x3d8] sm:$0xff] }
  0x4d   : > { %1234 = vmatpush.bf16.msra.mxu1 %v3104_v56  ;;  %924 = vmatmul.bf16.vlgmr.msrb.gmra.mxu2 %v857_v63  ;;  %v1428_v56 = vshll.u32 %v3643_v44, 16  ;;  %v1302_v62 = vrot.slane %v1300_v51, 1  ;;  %v1426_v63 = vor.u32 %v1425_v55, %v1421_v54  ;;  %v3141_v40 = vld [vmem:[%s3363_s20 + $0x34] sm:$0xff]  ;;  %v3151_v44 = vld [vmem:[%s3363_s20 + $0x4c] sm:$0xff]  ;;  %v3125_v54 = vld [vmem:[%s3829_s1 + $0x300] sm:$0xff] }
  0x4e   : > { %1362 = vmatpush.bf16.msra.mxu2 %v3114_v48  ;;  %1052 = vmatmul.bf16.vlgmr.msrb.gmra.mxu3 %v985_v2  ;;  %v3089_v48 = vld [vmem:[%s3829_s1 + $0x200] sm:$0xff]  ;;  %v1298_v61 = vor.u32 %v1297_v50, %v1293_v49  ;;  %v3154_v49 = vld [vmem:[%s3829_s1 + $0x3c8] sm:$0xff]  ;;  %v3152_v51 = vld [vmem:[%s3363_s20 + $0x54] sm:$0xff]  ;;  %v1739_v55 = vshrl.u32 %v3141_v40, 16 }
  0x4f   : > { %1490 = vmatpush.bf16.msra.mxu3 %v3124_v57  ;;  %v3132_v57 = vld [vmem:[%s3829_s1 + $0x338] sm:$0xff]  ;;  %v3253_v2 = vld [vmem:[%s3363_s20 + $0x4] sm:$0xff]  }
  0x50   : > { %1140 = vmatpush.bf16.msra.mxu0 %v3095_v0  ;;  %v1430_v0 = vrot.slane %v1428_v56, 1  ;;  %v3143_v50 = vld [vmem:[%s3829_s1 + $0x380] sm:$0xff] }
  0x51   : > { %1235 = vmatpush.bf16.msra.mxu1 %v3103_v3  ;;  %v3139_v3 = vld [vmem:[%s3829_s1 + $0x370] sm:$0xff] }
  0x52   : > { %1363 = vmatpush.bf16.msra.mxu2 %v3113_v60  ;;  %v3149_v60 = vld [vmem:[%s3829_s1 + $0x3b0] sm:$0xff] }
  0x53   : > { %1491 = vmatpush.bf16.msra.mxu3 %v3123_v4  ;;  %v2737_v4 = vld [vmem:[%s3363_s20 + $0x2c] sm:$0x1] }
  0x54   : > { %1141 = vmatpush.bf16.msra.mxu0 %v3094_v7  ;;  %v3131_v7 = vld [vmem:[%s3829_s1 + $0x330] sm:$0xff] }
  0x55   : > { %1236 = vmatpush.bf16.msra.mxu1 %v3102_v9  ;;  %v1431_v9 = vsel %vm379_vm0, %v1426_v63, %v1430_v0 }
  0x56   : > { %1364 = vmatpush.bf16.msra.mxu2 %v3112_v6  ;;  %v1303_v6 = vsel %vm379_vm0, %v1298_v61, %v1302_v62  ;;  %v1874_v61 = vshll.u32 %v3152_v51, 16 }
  0x57   : > { %1492 = vmatpush.bf16.msra.mxu3 %v3122_v10  ;;  %v3159_v10 = vld [vmem:[%s3829_s1 + $0x3f0] sm:$0xff] }
  0x58   : > { %1142 = vmatpush.bf16.msra.mxu0 %v3093_v13  ;;  %v3138_v13 = vld [vmem:[%s3829_s1 + $0x368] sm:$0xff]  ;;  %v1876_v1 = vrot.slane %v1874_v61, 1 }
  0x59   : > { %1237 = vmatpush.bf16.msra.mxu1 %v3101_v16  ;;  %v3158_v16 = vld [vmem:[%s3829_s1 + $0x3e8] sm:$0xff] }
  0x5a   : > { %1365 = vmatpush.bf16.msra.mxu2 %v3111_v12  ;;  %v1416_v12 = vunpack.c.l.b16 %v2737_v4  ;;  %v2957_v4 = vld [vmem:[%s3363_s20 + $0x5c] sm:$0x1] }
  0x5b   : > { %1493 = vmatpush.bf16.msra.mxu3 %v3121_v17  ;;  %696 = vmatmul.bf16.gmra.mxu0 %v3054_v28  ;;  %v3147_v17 = vld [vmem:[%s3829_s1 + $0x3a0] sm:$0xff]  ;;  %v1306_v28 = vor.u32 %v1304_v21, %v1302_v62  ;;  %v3266_v21 = vld [vmem:[%s3363_s20 + $0x54] sm:$0xff] }
  0x5c   : > { %1143 = vmatpush.bf16.msra.mxu0 %v3092_v23  ;;  %801 = vmatmul.bf16.gmra.mxu1 %v3064_v30  ;;  %v1419_v18 = vpack.c.b16 %v1416_v12, %v1416_v12  ;;  %v3157_v23 = vld [vmem:[%s3829_s1 + $0x3e0] sm:$0xff]  ;;  %v3128_v30 = vld [vmem:[%s3829_s1 + $0x318] sm:$0xff] }
  0x5d   : > { %1238 = vmatpush.bf16.msra.mxu1 %v3100_v26  ;;  %929 = vmatmul.bf16.gmra.mxu2 %v865_v31  ;;  %v3146_v26 = vld [vmem:[%s3829_s1 + $0x398] sm:$0xff]  ;;  %v1434_v31 = vor.u32 %v1432_v24, %v1430_v0 }
  0x5e   : > { %1366 = vmatpush.bf16.msra.mxu2 %v3110_v20  ;;  %1057 = vmatmul.bf16.gmra.mxu3 %v993_v34  ;;  %v3129_v20 = vld [vmem:[%s3829_s1 + $0x320] sm:$0xff]  ;;  %v1436_v25 = vshll.u32 %v1419_v18, 16  ;;  %v3145_v34 = vld [vmem:[%s3829_s1 + $0x390] sm:$0xff] }
  0x5f   : > { %1494 = vmatpush.bf16.msra.mxu3 %v3120_v27  ;;  %v3136_v27 = vld [vmem:[%s3829_s1 + $0x358] sm:$0xff] }
  0x60   : > { %1144 = vmatpush.bf16.msra.mxu0 %v3091_v32  ;;  %v1438_v32 = vrot.slane %v1436_v25, 1 }
  0x61   : > { %1239 = vmatpush.bf16.msra.mxu1 %v3099_v35  ;;  %v3263_v35 = vld [vmem:[%s3363_s20 + $0xc] sm:$0xff] }
  0x62   : > { %1367 = vmatpush.bf16.msra.mxu2 %v3109_v29  ;;  %v1310_v29 = vrot.slane %v1308_v22, 1  ;;  %v1439_v41 = vsel %vm379_vm0, %v1434_v31, %v1438_v32 }
  0x63   : > { %1495 = vmatpush.bf16.msra.mxu3 %v3119_v36  ;;  %v3135_v36 = vld [vmem:[%s3829_s1 + $0x350] sm:$0xff] }
  0x64   : > { %1145 = vmatpush.bf16.msra.mxu0 %v3090_v39  ;;  %v3127_v39 = vld [vmem:[%s3829_s1 + $0x310] sm:$0xff] }
  0x65   : > { %1240 = vmatpush.bf16.msra.mxu1 %v3098_v42  ;;  %v3155_v42 = vld [vmem:[%s3829_s1 + $0x3d0] sm:$0xff] }
  0x66   : > { %1368 = vmatpush.bf16.msra.mxu2 %v3108_v38  ;;  %v1311_v38 = vsel %vm379_vm0, %v1306_v28, %v1310_v29 }
  0x67   : > { %1496 = vmatpush.bf16.msra.mxu3 %v3118_v43  ;;  %v3144_v43 = vld [vmem:[%s3829_s1 + $0x388] sm:$0xff] }
  0x68   : > { %1146 = vmatpush.bf16.msra.mxu0 %v3089_v48  ;;  %v1741_v48 = vshll.u32 %v3141_v40, 16 }
  0x69   : > { %1241 = vmatpush.bf16.msra.mxu1 %v3097_v52  ;;  %v1869_v52 = vshll.u32 %v3151_v44, 16 }
  0x6a   : > { %1369 = vmatpush.bf16.msra.mxu2 %v3107_v46  ;;  %v3126_v46 = vld [vmem:[%s3829_s1 + $0x308] sm:$0xff]  ;;  %v1743_v56 = vrot.slane %v1741_v48, 1 }
  0x6b   : > { %1497 = vmatpush.bf16.msra.mxu3 %v3117_v53  ;;  %1147 = vmatmul.bf16.vlgmr.msra.gmra.mxu0 %v3253_v2  ;;  %v3133_v53 = vld [vmem:[%s3829_s1 + $0x340] sm:$0xff] }
  0x6c   : > { %1585 = vmatpush.bf16.msrb.mxu0 %v3132_v57  ;;  %1242 = vmatmul.bf16.vlgmr.msra.gmra.mxu1 %v3256_v5  ;;  %v1744_v62 = vor.u32 %v1743_v56, %v1739_v55  ;;  %v2896_v2 = vld [vmem:[%s3363_s20 + $0x44] sm:$0x1]  ;;  %v3262_v5 = vld [vmem:[%s3363_s20 + $0x4c] sm:$0xff]  }
  0x6d   : > { %1680 = vmatpush.bf16.msrb.mxu1 %v3140_v58  ;;  %1370 = vmatmul.bf16.vlgmr.msra.gmra.mxu2 %v1303_v6  ;;  %v3153_v58 = vld [vmem:[%s3829_s1 + $0x3c0] sm:$0xff] }
  0x6e   : > { %1808 = vmatpush.bf16.msrb.mxu2 %v3150_v47  ;;  %1498 = vmatmul.bf16.vlgmr.msra.gmra.mxu3 %v1431_v9  ;;  %v3142_v47 = vld [vmem:[%s3363_s20 + $0x3c] sm:$0xff]  ;;  %v1862_v9 = vunpack.c.l.b16 %v2957_v4 }
  0x6f   : > { %1936 = vmatpush.bf16.msrb.mxu3 %v3160_v59  ;;  %v1746_v57 = vshll.u32 %v3142_v47, 16  ;;  %v1867_v59 = vshrl.u32 %v3151_v44, 16  ;;  %v1750_v12 = vshrl.u32 %v3142_v47, 16 }
  0x70   : > { %1586 = vmatpush.bf16.msrb.mxu0 %v3131_v7  ;;  %v1734_v7 = vunpack.c.l.b16 %v2896_v2 }
  0x71   : > { %1681 = vmatpush.bf16.msrb.mxu1 %v3139_v3  ;;  %v1748_v63 = vrot.slane %v1746_v57, 1  ;;  %v3259_v3 = vld [vmem:[%s3363_s20 + $0x34] sm:$0xff]  }
  0x72   : > { %1809 = vmatpush.bf16.msrb.mxu2 %v3149_v60  ;;  %v1871_v60 = vrot.slane %v1869_v52, 1 }
  0x73   : > { %1937 = vmatpush.bf16.msrb.mxu3 %v3159_v10  ;;  %v1749_v6 = vsel %vm379_vm0, %v1744_v62, %v1748_v63  ;;  %v1737_v10 = vpack.c.b16 %v1734_v7, %v1734_v7 }
  0x74   : > { %1587 = vmatpush.bf16.msrb.mxu0 %v3130_v14  ;;  %v1872_v0 = vor.u32 %v1871_v60, %v1867_v59  ;;  %v1878_v14 = vshrl.u32 %v3152_v51, 16 }
  0x75   : > { %1682 = vmatpush.bf16.msrb.mxu1 %v3138_v13  ;;  %v1754_v13 = vshll.u32 %v1737_v10, 16 }
  0x76   : > { %1810 = vmatpush.bf16.msrb.mxu2 %v3148_v11  ;;  %v1877_v8 = vsel %vm379_vm0, %v1872_v0, %v1876_v1  ;;  %v1865_v11 = vpack.c.b16 %v1862_v9, %v1862_v9  ;;  %v1880_v18 = vor.u32 %v1878_v14, %v1876_v1 }
  0x77   : > { %1938 = vmatpush.bf16.msrb.mxu3 %v3158_v16  ;;  %v1752_v16 = vor.u32 %v1750_v12, %v1748_v63 }
  0x78   : > { %1588 = vmatpush.bf16.msrb.mxu0 %v3129_v20  ;;  %v1882_v15 = vshll.u32 %v1865_v11, 16  ;;  %v3265_v20 = vld [vmem:[%s3363_s20 + $0x3c] sm:$0xff]  ;;  %s3016_s20 = sshll.u32 %s3840_s10, 4 }
  0x79   : > { %1683 = vmatpush.bf16.msrb.mxu1 %v3137_v19  ;;  %s143_s10 = scalar_lea.vmem %s3830_s2, %s3016_s20 }
  0x7a   : > { %1811 = vmatpush.bf16.msrb.mxu2 %v3147_v17  ;;  %v1756_v17 = vrot.slane %v1754_v13, 1  ;;  %v1884_v19 = vrot.slane %v1882_v15, 1 }
  0x7b   : > { %1939 = vmatpush.bf16.msrb.mxu3 %v3157_v23  ;;  %1152 = vmatmul.bf16.gmra.mxu0 %v3263_v35 }
  0x7c   : > { %1589 = vmatpush.bf16.msrb.mxu0 %v3128_v30  ;;  %1247 = vmatmul.bf16.gmra.mxu1 %v3264_v37  ;;  %v1757_v22 = vsel %vm379_vm0, %v1752_v16, %v1756_v17  ;;  %v1885_v23 = vsel %vm379_vm0, %v1880_v18, %v1884_v19 }
  0x7d   : > { %1684 = vmatpush.bf16.msrb.mxu1 %v3136_v27  ;;  %1375 = vmatmul.bf16.gmra.mxu2 %v1311_v38 }
  0x7e   : > { %1812 = vmatpush.bf16.msrb.mxu2 %v3146_v26  ;;  %1503 = vmatmul.bf16.gmra.mxu3 %v1439_v41 }
  0x7f   : > { %1940 = vmatpush.bf16.msrb.mxu3 %v3156_v33 }
  0x80   : > { %1590 = vmatpush.bf16.msrb.mxu0 %v3127_v39 }
  0x81   : > { %1685 = vmatpush.bf16.msrb.mxu1 %v3135_v36 }
  0x82   : > { %1813 = vmatpush.bf16.msrb.mxu2 %v3145_v34 }
  0x83   : > { %1941 = vmatpush.bf16.msrb.mxu3 %v3155_v42 }
  0x84   : > { %1591 = vmatpush.bf16.msrb.mxu0 %v3126_v46 }
  0x85   : > { %1686 = vmatpush.bf16.msrb.mxu1 %v3134_v45 }
  0x86   : > { %1814 = vmatpush.bf16.msrb.mxu2 %v3144_v43 }
  0x87   : > { %1942 = vmatpush.bf16.msrb.mxu3 %v3154_v49 }
  0x88   : > { %1592 = vmatpush.bf16.msrb.mxu0 %v3125_v54 }
  0x89   : > { %1687 = vmatpush.bf16.msrb.mxu1 %v3133_v53 }
  0x8a   : > { %1815 = vmatpush.bf16.msrb.mxu2 %v3143_v50 }
  0x8b   : > { %1943 = vmatpush.bf16.msrb.mxu3 %v3153_v58  ;;  %1593 = vmatmul.bf16.vlgmr.msrb.gmra.mxu0 %v3259_v3 }
  0x8c   : > { %1688 = vmatmul.bf16.vlgmr.msrb.gmra.mxu1 %v3262_v5 }
  0x8d   : > { %1816 = vmatmul.bf16.vlgmr.msrb.gmra.mxu2 %v1749_v6 }
  0x8e   : > { %1944 = vmatmul.bf16.vlgmr.msrb.gmra.mxu3 %v1877_v8 }
  0x9b   : > { %1598 = vmatmul.bf16.gmra.mxu0 %v3265_v20 }
  0x9c   : > { %1693 = vmatmul.bf16.gmra.mxu1 %v3266_v21 }
  0x9d   : > { %1821 = vmatmul.bf16.gmra.mxu2 %v1757_v22 }
  0x9e   : > { %1949 = vmatmul.bf16.gmra.mxu3 %v1885_v23 }
  0xa8   : > { %v255_v24 = vpop.f32.mrf.mxu0 }
  0xa9   : > { %v334_v25 = vpop.f32.mrf.mxu1 }
  0xaa   : > { %v335_v26 = vadd.f32 %v334_v25, %v255_v24 }
  0xb0   : > { %v459_v27 = vpop.f32.mrf.mxu2  ;;  %v257_v30 = vpop.f32.mrf.mxu0 }
  0xb1   : > { %v587_v28 = vpop.f32.mrf.mxu3  ;;  %v469_v29 = vadd.f32 %v459_v27, %v335_v26  ;;  %v336_v31 = vpop.f32.mrf.mxu1 }
  0xb2   : > { %v337_v32 = vadd.f32 %v336_v31, %v257_v30 }
  0xb3   : > { %v597_v33 = vadd.f32 %v587_v28, %v469_v29 }
  0xb8   : > { %v461_v34 = vpop.f32.mrf.mxu2  ;;  %v260_v37 = vpop.f32.mrf.mxu0 }
  0xb9   : > { %v589_v35 = vpop.f32.mrf.mxu3  ;;  %v470_v36 = vadd.f32 %v461_v34, %v337_v32  ;;  %v339_v38 = vpop.f32.mrf.mxu1 }
  0xba   : > { %v340_v39 = vadd.f32 %v339_v38, %v260_v37 }
  0xbb   : > { %v598_v40 = vadd.f32 %v589_v35, %v470_v36 }
  0xc0   : > { %v464_v41 = vpop.f32.mrf.mxu2  ;;  %v262_v44 = vpop.f32.mrf.mxu0 }
  0xc1   : > { %v592_v42 = vpop.f32.mrf.mxu3  ;;  %v471_v43 = vadd.f32 %v464_v41, %v340_v39  ;;  %v341_v45 = vpop.f32.mrf.mxu1 }
  0xc2   : > { %v342_v46 = vadd.f32 %v341_v45, %v262_v44 }
  0xc3   : > { %v599_v47 = vadd.f32 %v592_v42, %v471_v43 }
  0xc8   : > { %v466_v48 = vpop.f32.mrf.mxu2  ;;  %v692_v51 = vpop.f32.mrf.mxu0 }
  0xc9   : > { %v594_v49 = vpop.f32.mrf.mxu3  ;;  %v472_v50 = vadd.f32 %v466_v48, %v342_v46  ;;  %v702_v52 = vadd.f32 %v692_v51, %v597_v33  ;;  %v797_v53 = vpop.f32.mrf.mxu1 }
  0xcb   : > { %v600_v54 = vadd.f32 %v594_v49, %v472_v50  ;;  %v807_v55 = vadd.f32 %v797_v53, %v702_v52 }
  0xd0   : > { %v925_v56 = vpop.f32.mrf.mxu2  ;;  %v694_v59 = vpop.f32.mrf.mxu0 }
  0xd1   : > { %v935_v57 = vadd.f32 %v925_v56, %v807_v55  ;;  %v1053_v58 = vpop.f32.mrf.mxu3  ;;  %v799_v60 = vpop.f32.mrf.mxu1  ;;  %v703_v18 = vadd.f32 %v694_v59, %v598_v40  ;;  %v1959_v40 = vlaneseq }
  0xd3   : > { %v1063_v61 = vadd.f32 %v1053_v58, %v935_v57  ;;  %v808_v19 = vadd.f32 %v799_v60, %v703_v18 }
  0xd8   : > { %v927_v62 = vpop.f32.mrf.mxu2  ;;  %v697_v0 = vpop.f32.mrf.mxu0 }
  0xd9   : > { %v1055_v63 = vpop.f32.mrf.mxu3  ;;  %v802_v1 = vpop.f32.mrf.mxu1  ;;  %v936_v21 = vadd.f32 %v927_v62, %v808_v19  ;;  %v704_v26 = vadd.f32 %v697_v0, %v599_v47  ;;  %v1960_v47 = vshrl.u32 %v1959_v40, 7 }
  0xdb   : > { %v1064_v27 = vadd.f32 %v1055_v63, %v936_v21  ;;  %v809_v29 = vadd.f32 %v802_v1, %v704_v26  ;;  %v1961_v55 = vadd.s32 8, %v1960_v47  ;;  %v1968_v58 = vand.u32 7, %v1960_v47 }
  0xdd   : > { %vm3783_vm1 = vcmp.lt.s32.totalorder %v1968_v58, 4 }
  0xe0   : > { %v930_v2 = vpop.f32.mrf.mxu2  ;;  %v699_v4 = vpop.f32.mrf.mxu0 }
  0xe1   : > { %v1058_v3 = vpop.f32.mrf.mxu3  ;;  %v804_v5 = vpop.f32.mrf.mxu1  ;;  %v937_v33 = vadd.f32 %v930_v2, %v809_v29  ;;  %v705_v37 = vadd.f32 %v699_v4, %v600_v54 }
  0xe3   : > { %v1065_v41 = vadd.f32 %v1058_v3, %v937_v33  ;;  %v810_v44 = vadd.f32 %v804_v5, %v705_v37 }
  0xe8   : > { %v932_v6 = vpop.f32.mrf.mxu2  ;;  %v1148_v8 = vpop.f32.mrf.mxu0 }
  0xe9   : > { %v1060_v7 = vpop.f32.mrf.mxu3  ;;  %v1243_v9 = vpop.f32.mrf.mxu1  ;;  %v1158_v22 = vadd.f32 %v1148_v8, %v1063_v61  ;;  %v938_v48 = vadd.f32 %v932_v6, %v810_v44  ;;  %v1975_v61 = vand.u32 7, %v1961_v55 }
  0xeb   : > { %v1253_v28 = vadd.f32 %v1243_v9, %v1158_v22  ;;  %v1066_v59 = vadd.f32 %v1060_v7, %v938_v48  ;;  %vm3787_vm2 = vcmp.lt.s32.totalorder %v1975_v61, 4  ;;  %v1962_v7 = vadd.s32 16, %v1960_v47 }
  0xed   : > { %v1982_v19 = vand.u32 7, %v1962_v7 }
  0xef   : > { %vm3799_vm3 = vcmp.lt.s32.totalorder %v1982_v19, 4 }
  0xf0   : > { %v1371_v10 = vpop.f32.mrf.mxu2  ;;  %v1150_v12 = vpop.f32.mrf.mxu0 }
  0xf1   : > { %v1499_v11 = vpop.f32.mrf.mxu3  ;;  %v1245_v13 = vpop.f32.mrf.mxu1  ;;  %v1381_v30 = vadd.f32 %v1371_v10, %v1253_v28  ;;  %v1159_v31 = vadd.f32 %v1150_v12, %v1064_v27  ;;  %v1963_v28 = vadd.s32 24, %v1960_v47 }
  0xf3   : > { %v1509_v38 = vadd.f32 %v1499_v11, %v1381_v30  ;;  %v1254_v39 = vadd.f32 %v1245_v13, %v1159_v31 }
  0xf8   : > { %v1373_v14 = vpop.f32.mrf.mxu2  ;;  %v1153_v16 = vpop.f32.mrf.mxu0 }
  0xf9   : > { %v1501_v15 = vpop.f32.mrf.mxu3  ;;  %v1248_v17 = vpop.f32.mrf.mxu1  ;;  %v1382_v42 = vadd.f32 %v1373_v14, %v1254_v39  ;;  %v1160_v45 = vadd.f32 %v1153_v16, %v1065_v41 }
  0xfb   : > { %v1510_v49 = vadd.f32 %v1501_v15, %v1382_v42  ;;  %v1255_v56 = vadd.f32 %v1248_v17, %v1160_v45 }
 0x100   : > { %v1376_v20 = vpop.f32.mrf.mxu2  ;;  %v1155_v24 = vpop.f32.mrf.mxu0 }
 0x101   : > { %v1504_v23 = vpop.f32.mrf.mxu3  ;;  %v1250_v25 = vpop.f32.mrf.mxu1  ;;  %v1383_v60 = vadd.f32 %v1376_v20, %v1255_v56  ;;  %v1161_v62 = vadd.f32 %v1155_v24, %v1066_v59 }
 0x103   : > { %v1511_v3 = vadd.f32 %v1504_v23, %v1383_v60  ;;  %v1256_v9 = vadd.f32 %v1250_v25, %v1161_v62 }
 0x108   : > { %v1378_v32 = vpop.f32.mrf.mxu2  ;;  %v1594_v35 = vpop.f32.mrf.mxu0 }
 0x109   : > { %v1506_v34 = vpop.f32.mrf.mxu3  ;;  %v1689_v36 = vpop.f32.mrf.mxu1  ;;  %v1604_v43 = vadd.f32 %v1594_v35, %v1509_v38  ;;  %v1384_v14 = vadd.f32 %v1378_v32, %v1256_v9 }
 0x10b   : > { %v1699_v50 = vadd.f32 %v1689_v36, %v1604_v43  ;;  %v1512_v23 = vadd.f32 %v1506_v34, %v1384_v14  ;;  %v1989_v36 = vand.u32 7, %v1963_v28 }
 0x10d   : > { %vm3805_vm4 = vcmp.lt.s32.totalorder %v1989_v36, 4 }
 0x110   : > { %v1817_v46 = vpop.f32.mrf.mxu2  ;;  %v1596_v52 = vpop.f32.mrf.mxu0 }
 0x111   : > { %v1945_v51 = vpop.f32.mrf.mxu3  ;;  %v1691_v53 = vpop.f32.mrf.mxu1  ;;  %v1827_v57 = vadd.f32 %v1817_v46, %v1699_v50  ;;  %v1605_v54 = vadd.f32 %v1596_v52, %v1510_v49 }
 0x113   : > { %v3781_v63 = vadd.f32 %v1945_v51, %v1827_v57  ;;  %v1700_v0 = vadd.f32 %v1691_v53, %v1605_v54 }
 0x115   : > { %v2024_v10 = vsel %vm3783_vm1, %v3781_v63, 0.0 }
 0x116   : > { %v2038_v16 = vmul.f32 %v2024_v10, %v2024_v10 }
 0x118   : > { %v1819_v2 = vpop.f32.mrf.mxu2  ;;  %v1599_v6 = vpop.f32.mrf.mxu0 }
 0x119   : > { %v1828_v4 = vadd.f32 %v1819_v2, %v1700_v0  ;;  %v1947_v5 = vpop.f32.mrf.mxu3  ;;  %v1606_v12 = vadd.f32 %v1599_v6, %v1511_v3  ;;  %v1694_v13 = vpop.f32.mrf.mxu1 }
 0x11b   : > { %v3794_v11 = vadd.f32 %v1947_v5, %v1828_v4  ;;  %v1701_v20 = vadd.f32 %v1694_v13, %v1606_v12 }
 0x11d   : > { %v2025_v15 = vsel %vm3787_vm2, %v3794_v11, 0.0 }
 0x11e   : > { %v2028_v17 = vadd.f32 %v2025_v15, %v2024_v10  ;;  %v2039_v18 = vmul.f32 %v2025_v15, %v2025_v15 }
 0x120   : > { %v2042_v21 = vadd.f32 %v2039_v18, %v2038_v16  ;;  %v1822_v22 = vpop.f32.mrf.mxu2  ;;  %v1601_v26 = vpop.f32.mrf.mxu0 }
 0x121   : > { %v1829_v24 = vadd.f32 %v1822_v22, %v1701_v20  ;;  %v1950_v25 = vpop.f32.mrf.mxu3  ;;  %v1607_v30 = vadd.f32 %v1601_v26, %v1512_v23  ;;  %v1696_v35 = vpop.f32.mrf.mxu1 }
 0x123   : > { %v1957_v29 = vadd.f32 %v1950_v25, %v1829_v24  ;;  %v1702_v37 = vadd.f32 %v1696_v35, %v1607_v30 }
 0x125   : > { %v2026_v31 = vsel %vm3799_vm3, %v1957_v29, 0.0 }
 0x126   : > { %v2029_v32 = vadd.f32 %v2028_v17, %v2026_v31  ;;  %v2040_v33 = vmul.f32 %v2026_v31, %v2026_v31 }
 0x128   : > { %v2043_v38 = vadd.f32 %v2042_v21, %v2040_v33  ;;  %v1824_v34 = vpop.f32.mrf.mxu2 }
 0x129   : > { %v1830_v39 = vadd.f32 %v1824_v34, %v1702_v37  ;;  %v1952_v40 = vpop.f32.mrf.mxu3 }
 0x12b   : > { %v1958_v42 = vadd.f32 %v1952_v40, %v1830_v39 }
 0x12d   : > { %v2027_v43 = vsel %vm3805_vm4, %v1958_v42, 0.0 }
 0x12e   : > { %v2030_v44 = vadd.f32 %v2029_v32, %v2027_v43  ;;  %v2041_v45 = vmul.f32 %v2027_v43, %v2027_v43 }
 0x130   : > { %v2031_v46 = vrot.slane %v2030_v44, 4  ;;  %v2044_v47 = vadd.f32 %v2043_v38, %v2041_v45 }
 0x132   : > { %v2032_v48 = vadd.f32 %v2031_v46, %v2030_v44  ;;  %v2045_v49 = vrot.slane %v2044_v47, 4 }
 0x134   : > { %v2033_v50 = vrot.slane %v2032_v48, 2  ;;  %v2046_v51 = vadd.f32 %v2045_v49, %v2044_v47 }
 0x136   : > { %v2034_v52 = vadd.f32 %v2033_v50, %v2032_v48  ;;  %v2047_v53 = vrot.slane %v2046_v51, 2 }
 0x138   : > { %v2035_v55 = vrot.slane %v2034_v52, 1  ;;  %v2048_v56 = vadd.f32 %v2047_v53, %v2046_v51 }
 0x13a   : > { %v2036_v57 = vadd.f32 %v2035_v55, %v2034_v52  ;;  %v2049_v54 = vrot.slane %v2048_v56, 1 }
 0x13c   : > { %v2037_v58 = vmul.f32 0.0625, %v2036_v57  ;;  %v2050_v59 = vadd.f32 %v2049_v54, %v2048_v56 }
 0x13e   : > { %v2051_v60 = vmul.f32 0.0625, %v2050_v59  ;;  %v2052_v61 = vmul.f32 %v2037_v58, %v2037_v58  ;;  %v2066_v62 = vsub.f32 %v3781_v63, %v2037_v58  ;;  %v2067_v0 = vsub.f32 %v3794_v11, %v2037_v58 }
 0x13f   : > { %v2068_v2 = vsub.f32 %v1957_v29, %v2037_v58  ;;  %v2069_v3 = vsub.f32 %v1958_v42, %v2037_v58 }
 0x140   : > { %v2053_v4 = vsub.f32 %v2051_v60, %v2052_v61 }
 0x142   : > { %v2054_v5 = vmax.f32 %v2053_v4, 0.0 }
 0x144   : > { %v2055_v6 = vadd.f32 1e-05, %v2054_v5 }
 0x146   : > { %3276 = vrsqrt.f32 %v2055_v6  ;;  %vm2062_vm6 = vweird.f32 %v2055_v6 }
 0x14c   : > { %v3277_v7 = vpop.eup %3276 }
 0x14d   : > { %v2057_v9 = vmul.f32 %v3277_v7, %v2055_v6  ;;  %vm2063_vm5 = vweird.f32 %v3277_v7 }
 0x14e   : > { %vm2064_vm7 = vmor %vm2062_vm6, %vm2063_vm5 }
 0x14f   : > { %v2058_v10 = vmul.f32 %v3277_v7, %v2057_v9 }
 0x151   : > { %v2059_v12 = vmul.f32 0.5, %v2058_v10 }
 0x153   : > { %v2060_v13 = vsub.f32 1.5, %v2059_v12 }
 0x155   : > { %v2061_v14 = vmul.f32 %v3277_v7, %v2060_v13 }
 0x157   : > { %v2065_v15 = vsel %vm2064_vm7, %v3277_v7, %v2061_v14 }
 0x158   : > { %v2070_v63 = vmul.f32 %v2066_v62, %v2065_v15  ;;  %v2071_v16 = vmul.f32 %v2067_v0, %v2065_v15  ;;  %v2072_v11 = vmul.f32 %v2068_v2, %v2065_v15  ;;  %v2073_v17 = vmul.f32 %v2069_v3, %v2065_v15 }
 0x15a   : > { %v2074_v18 = vsel %vm3783_vm1, %v2070_v63, 0.0  ;;  %v2075_v19 = vsel %vm3787_vm2, %v2071_v16, 0.0  ;;  %v2076_v20 = vsel %vm3799_vm3, %v2072_v11, 0.0  ;;  %v2077_v21 = vsel %vm3805_vm4, %v2073_v17, 0.0 }
 0x15b   : > { %v2078_v22 = vmax.f32 %v2074_v18, 0.0  ;;  %v2079_v23 = vmax.f32 %v2075_v19, 0.0  ;;  %v2080_v24 = vmax.f32 %v2076_v20, 0.0  ;;  %v2081_v25 = vmax.f32 %v2077_v21, 0.0 }
 0x15d   : > { %v3196_v26 = vpack.c.bf16 %v2079_v23, %v2078_v22  ;;  %v3201_v1 = vpack.c.bf16 %v2081_v25, %v2080_v24 }
 0x15f   : > { %3197 = vst [vmem:[%s143_s10] sm:$0xff] %v3196_v26  }
 0x160   : > { %3250 = vst [vmem:[%s143_s10 + $0x8] sm:$0xff] %v3201_v1  }
 0x161 PF: > { %s12_s9 = sadd.s32 1, %s3284_s9  }
 0x162   : > { %p9_p4 = scmp.ge.s32.totalorder %s12_s9, 4  }
 0x164   :  { %11 = sbr.rel (!%p9_p4) target bundleno = 1 (0x1), region = 76 }

// kernel: content_encoder_forward.12
= control target key start
LH: loop header
LB: loop body
LE: loop exit
PB: predicated region body
PF: predicated region fallthrough
CT: control target
= control target key end

     0   :  { %s873_s9 = smov 0   ;;  %s1006_s0 = inlined_call_operand.vmem [shape: bf16[2,1,48,128], index: 0, kind: input, shape index: {}]   ;;  %s1007_s1 = inlined_call_operand.vmem [shape: bf16[3,128,128], index: 1, kind: input, shape index: {}]   ;;  %s1008_s2 = inlined_call_operand.vmem [shape: bf16[2,32,128], index: 2, kind: output, shape index: {}]  }
   0x1 LB: > { %s624_s10 = sadd.s32 4294967295, %s856_s9   ;;  %p628_p0 = scmp.ge.s32.totalorder %s856_s9, 1  ;;  %s856_s9 = sphi %s873_s9, %s12_s9  }
   0x2   : > { %p112_p1 = scmp.lt.s32.totalorder %s856_s9, 3 }
   0x4   : > { %p113_p2 = pnand %p628_p0, %p112_p1 }
   0x5   : > { %p134_p3 = scmp.lt.s32.totalorder (!%p113_p2), %s624_s10, 1 }
   0x6   : > { %116 = sbr.rel (%p113_p2) target bundleno = 255 (0xff), region = 28 }
   0xb   : > { %v786_v0 = vld [vmem:[%s1007_s1 + $0x78] sm:$0xff]  ;;  %v785_v3 = vld [vmem:[%s1007_s1 + $0x70] sm:$0xff]  ;;  %v784_v6 = vld [vmem:[%s1007_s1 + $0x68] sm:$0xff]  ;;  %s1018_s10 = smov (!%p134_p3, %s624_s10), 1  ;;  %v438_v34 = vlaneseq }
   0xc   : > { %v778_v1 = vld [vmem:[%s1007_s1 + $0x38] sm:$0xff]  ;;  %242 = vmatpush.bf16.msra.mxu0 %v786_v0  ;;  %v777_v4 = vld [vmem:[%s1007_s1 + $0x30] sm:$0xff]  ;;  %827 = vmatpush.bf16.msra.mxu3 %v786_v0  ;;  %v776_v7 = vld [vmem:[%s1007_s1 + $0x28] sm:$0xff]  ;;  %s839_s25 = smul.u32 24, %s1018_s10  ;;  %s770_s11 = sshll.u32 %s1018_s10, 4 }
   0xd   : > { %v796_v2 = vld [vmem:[%s1007_s1 + $0xb8] sm:$0xff]  ;;  %315 = vmatpush.bf16.msra.mxu1 %v778_v1  ;;  %v795_v5 = vld [vmem:[%s1007_s1 + $0xb0] sm:$0xff]  ;;  %v794_v8 = vld [vmem:[%s1007_s1 + $0xa8] sm:$0xff]  ;;  %v439_v35 = vshrl.u32 %v438_v34, 7  ;;  %s143_s10 = scalar_lea.vmem %s1008_s2, %s770_s11 }
   0xe   : > { %415 = vmatpush.bf16.msra.mxu2 %v796_v2  ;;  %v783_v9 = vld [vmem:[%s1007_s1 + $0x60] sm:$0xff]  ;;  %v782_v12 = vld [vmem:[%s1007_s1 + $0x58] sm:$0xff]  ;;  %v781_v15 = vld [vmem:[%s1007_s1 + $0x50] sm:$0xff]  ;;  %s138_s6 = scalar_lea.vmem %s1006_s0, %s839_s25 }
   0xf   : > { %v775_v10 = vld [vmem:[%s1007_s1 + $0x20] sm:$0xff]  ;;  %v774_v13 = vld [vmem:[%s1007_s1 + $0x18] sm:$0xff]  ;;  %v773_v16 = vld [vmem:[%s1007_s1 + $0x10] sm:$0xff]  ;;  %v440_v37 = vadd.s32 8, %v439_v35  ;;  %v441_v40 = vadd.s32 16, %v439_v35  ;;  %v447_v46 = vand.u32 7, %v439_v35 }
  0x10   : > { %243 = vmatpush.bf16.msra.mxu0 %v785_v3  ;;  %828 = vmatpush.bf16.msra.mxu3 %v785_v3  ;;  %v793_v11 = vld [vmem:[%s1007_s1 + $0xa0] sm:$0xff]  ;;  %v792_v14 = vld [vmem:[%s1007_s1 + $0x98] sm:$0xff]  ;;  %v791_v17 = vld [vmem:[%s1007_s1 + $0x90] sm:$0xff]  ;;  %v442_v51 = vadd.s32 24, %v439_v35 }
  0x11   : > { %316 = vmatpush.bf16.msra.mxu1 %v777_v4  ;;  %v780_v18 = vld [vmem:[%s1007_s1 + $0x48] sm:$0xff]  ;;  %v779_v21 = vld [vmem:[%s1007_s1 + $0x40] sm:$0xff]  ;;  %v788_v29 = vld [vmem:[%s138_s6 + $0x10] sm:$0xff]  ;;  %v454_v42 = vand.u32 7, %v440_v37  ;;  %v461_v47 = vand.u32 7, %v441_v40  ;;  %vm969_vm1 = vcmp.lt.s32.totalorder %v447_v46, 4 }
  0x12   : > { %416 = vmatpush.bf16.msra.mxu2 %v795_v5  ;;  %v772_v19 = vld [vmem:[%s1007_s1 + $0x8] sm:$0xff]  ;;  %v771_v22 = vld [vmem:[%s1007_s1] sm:$0xff]  ;;  %v468_v58 = vand.u32 7, %v442_v51 }
  0x13   : > { %v790_v20 = vld [vmem:[%s1007_s1 + $0x88] sm:$0xff]  ;;  %v789_v23 = vld [vmem:[%s1007_s1 + $0x80] sm:$0xff]  ;;  %vm965_vm0 = vcmp.lt.s32.totalorder %v454_v42, 4  ;;  %vm973_vm2 = vcmp.lt.s32.totalorder %v461_v47, 4 }
  0x14   : > { %244 = vmatpush.bf16.msra.mxu0 %v784_v6  ;;  %829 = vmatpush.bf16.msra.mxu3 %v784_v6  ;;  %v837_v24 = vld [vmem:[%s138_s6 + $0x4] sm:$0xff]   ;;  %v838_v27 = vld [vmem:[%s138_s6 + $0xc] sm:$0xff]  ;;  %vm984_vm3 = vcmp.lt.s32.totalorder %v468_v58, 4 }
  0x15   : > { %317 = vmatpush.bf16.msra.mxu1 %v776_v7  ;;  %v798_v25 = vld [vmem:[%s138_s6] sm:$0xff]   ;;  %v787_v26 = vld [vmem:[%s138_s6 + $0x8] sm:$0xff] }
  0x16   : > { %417 = vmatpush.bf16.msra.mxu2 %v794_v8  ;;  %v815_v28 = vld [vmem:[%s138_s6 + $0x8] sm:$0xff]  }
  0x18   : > { %245 = vmatpush.bf16.msra.mxu0 %v783_v9  ;;  %830 = vmatpush.bf16.msra.mxu3 %v783_v9 }
  0x19   : > { %318 = vmatpush.bf16.msra.mxu1 %v775_v10 }
  0x1a   : > { %418 = vmatpush.bf16.msra.mxu2 %v793_v11 }
  0x1c   : > { %246 = vmatpush.bf16.msra.mxu0 %v782_v12  ;;  %831 = vmatpush.bf16.msra.mxu3 %v782_v12 }
  0x1d   : > { %319 = vmatpush.bf16.msra.mxu1 %v774_v13 }
  0x1e   : > { %419 = vmatpush.bf16.msra.mxu2 %v792_v14 }
  0x20   : > { %247 = vmatpush.bf16.msra.mxu0 %v781_v15  ;;  %832 = vmatpush.bf16.msra.mxu3 %v781_v15 }
  0x21   : > { %320 = vmatpush.bf16.msra.mxu1 %v773_v16 }
  0x22   : > { %420 = vmatpush.bf16.msra.mxu2 %v791_v17 }
  0x24   : > { %248 = vmatpush.bf16.msra.mxu0 %v780_v18  ;;  %833 = vmatpush.bf16.msra.mxu3 %v780_v18 }
  0x25   : > { %321 = vmatpush.bf16.msra.mxu1 %v772_v19 }
  0x26   : > { %421 = vmatpush.bf16.msra.mxu2 %v790_v20 }
  0x28   : > { %249 = vmatpush.bf16.msra.mxu0 %v779_v21  ;;  %834 = vmatpush.bf16.msra.mxu3 %v779_v21 }
  0x29   : > { %322 = vmatpush.bf16.msra.mxu1 %v771_v22 }
  0x2a   : > { %422 = vmatpush.bf16.msra.mxu2 %v789_v23 }
  0x2b   : > { %250 = vmatmul.bf16.vlgmr.msra.gmra.mxu0 %v837_v24  ;;  %255 = vmatmul.bf16.vlgmr.msra.gmra.mxu3 %v838_v27 }
  0x2c   : > { %323 = vmatmul.bf16.vlgmr.msra.gmra.mxu1 %v798_v25 }
  0x2d   : > { %423 = vmatmul.bf16.vlgmr.msra.gmra.mxu2 %v787_v26 }
  0x3c   : > { %328 = vmatmul.bf16.gmra.mxu1 %v815_v28 }
  0x3d   : > { %428 = vmatmul.bf16.gmra.mxu2 %v788_v29 }
  0xa8   : > { %v251_v31 = vpop.f32.mrf.mxu0 }
  0xa9   : > { %v324_v30 = vpop.f32.mrf.mxu1 }
  0xaa   : > { %v325_v43 = vadd.f32 %v324_v30, %v251_v31 }
  0xae   : > { %v256_v41 = vpop.f32.mrf.mxu3 }
  0xb0   : > { %v424_v32 = vpop.f32.mrf.mxu2  ;;  %v253_v38 = vpop.f32.mrf.mxu0 }
  0xb1   : > { %v326_v33 = vpop.f32.mrf.mxu1  ;;  %v434_v52 = vadd.f32 %v424_v32, %v325_v43 }
  0xb2   : > { %v327_v44 = vadd.f32 %v326_v33, %v253_v38 }
  0xb3   : > { %v503_v59 = vsel %vm969_vm1, %v434_v52, 0.0 }
  0xb4   : > { %v517_v0 = vmul.f32 %v503_v59, %v503_v59 }
  0xb6   : > { %v258_v62 = vpop.f32.mrf.mxu3 }
  0xb8   : > { %v426_v36 = vpop.f32.mrf.mxu2 }
  0xb9   : > { %v329_v39 = vpop.f32.mrf.mxu1  ;;  %v963_v48 = vadd.f32 %v426_v36, %v327_v44 }
  0xba   : > { %v330_v45 = vadd.f32 %v329_v39, %v256_v41 }
  0xbb   : > { %v504_v56 = vsel %vm965_vm0, %v963_v48, 0.0 }
  0xbc   : > { %v518_v61 = vmul.f32 %v504_v56, %v504_v56  ;;  %v507_v1 = vadd.f32 %v504_v56, %v503_v59 }
  0xbe   : > { %v521_v6 = vadd.f32 %v518_v61, %v517_v0 }
  0xc0   : > { %v429_v50 = vpop.f32.mrf.mxu2 }
  0xc1   : > { %v436_v53 = vadd.f32 %v429_v50, %v330_v45  ;;  %v331_v57 = vpop.f32.mrf.mxu1 }
  0xc2   : > { %v332_v63 = vadd.f32 %v331_v57, %v258_v62 }
  0xc3   : > { %v505_v60 = vsel %vm973_vm2, %v436_v53, 0.0 }
  0xc4   : > { %v519_v2 = vmul.f32 %v505_v60, %v505_v60  ;;  %v508_v7 = vadd.f32 %v507_v1, %v505_v60 }
  0xc6   : > { %v522_v9 = vadd.f32 %v521_v6, %v519_v2 }
  0xc8   : > { %v431_v3 = vpop.f32.mrf.mxu2 }
  0xc9   : > { %v437_v5 = vadd.f32 %v431_v3, %v332_v63 }
  0xcb   : > { %v506_v8 = vsel %vm984_vm3, %v437_v5, 0.0 }
  0xcc   : > { %v509_v10 = vadd.f32 %v508_v7, %v506_v8  ;;  %v520_v11 = vmul.f32 %v506_v8, %v506_v8 }
  0xce   : > { %v510_v12 = vrot.slane %v509_v10, 4  ;;  %v523_v13 = vadd.f32 %v522_v9, %v520_v11 }
  0xd0   : > { %v511_v14 = vadd.f32 %v510_v12, %v509_v10  ;;  %v524_v15 = vrot.slane %v523_v13, 4 }
  0xd2   : > { %v512_v16 = vrot.slane %v511_v14, 2  ;;  %v525_v17 = vadd.f32 %v524_v15, %v523_v13 }
  0xd4   : > { %v513_v18 = vadd.f32 %v512_v16, %v511_v14  ;;  %v526_v19 = vrot.slane %v525_v17, 2 }
  0xd6   : > { %v514_v20 = vrot.slane %v513_v18, 1  ;;  %v527_v21 = vadd.f32 %v526_v19, %v525_v17 }
  0xd8   : > { %v515_v22 = vadd.f32 %v514_v20, %v513_v18  ;;  %v528_v23 = vrot.slane %v527_v21, 1 }
  0xda   : > { %v516_v24 = vmul.f32 0.0625, %v515_v22  ;;  %v529_v25 = vadd.f32 %v528_v23, %v527_v21 }
  0xdc   : > { %v530_v26 = vmul.f32 0.0625, %v529_v25  ;;  %v531_v27 = vmul.f32 %v516_v24, %v516_v24  ;;  %v545_v37 = vsub.f32 %v434_v52, %v516_v24  ;;  %v546_v38 = vsub.f32 %v963_v48, %v516_v24 }
  0xdd   : > { %v547_v39 = vsub.f32 %v436_v53, %v516_v24  ;;  %v548_v40 = vsub.f32 %v437_v5, %v516_v24 }
  0xde   : > { %v532_v28 = vsub.f32 %v530_v26, %v531_v27 }
  0xe0   : > { %v533_v29 = vmax.f32 %v532_v28, 0.0 }
  0xe2   : > { %v534_v30 = vadd.f32 1e-05, %v533_v29 }
  0xe4   : > { %848 = vrsqrt.f32 %v534_v30  ;;  %vm541_vm5 = vweird.f32 %v534_v30 }
  0xea   : > { %v849_v31 = vpop.eup %848 }
  0xeb   : > { %v536_v32 = vmul.f32 %v849_v31, %v534_v30  ;;  %vm542_vm4 = vweird.f32 %v849_v31 }
  0xec   : > { %vm543_vm6 = vmor %vm541_vm5, %vm542_vm4 }
  0xed   : > { %v537_v33 = vmul.f32 %v849_v31, %v536_v32 }
  0xef   : > { %v538_v34 = vmul.f32 0.5, %v537_v33 }
  0xf1   : > { %v539_v35 = vsub.f32 1.5, %v538_v34 }
  0xf3   : > { %v540_v36 = vmul.f32 %v849_v31, %v539_v35 }
  0xf5   : > { %v544_v41 = vsel %vm543_vm6, %v849_v31, %v540_v36 }
  0xf6   : > { %v549_v42 = vmul.f32 %v545_v37, %v544_v41  ;;  %v550_v43 = vmul.f32 %v546_v38, %v544_v41  ;;  %v551_v44 = vmul.f32 %v547_v39, %v544_v41  ;;  %v552_v45 = vmul.f32 %v548_v40, %v544_v41 }
  0xf8   : > { %v553_v46 = vsel %vm969_vm1, %v549_v42, 0.0  ;;  %v554_v47 = vsel %vm965_vm0, %v550_v43, 0.0  ;;  %v555_v50 = vsel %vm973_vm2, %v551_v44, 0.0  ;;  %v556_v48 = vsel %vm984_vm3, %v552_v45, 0.0 }
  0xf9   : > { %v557_v51 = vmax.f32 %v553_v46, 0.0  ;;  %v558_v52 = vmax.f32 %v554_v47, 0.0  ;;  %v559_v53 = vmax.f32 %v555_v50, 0.0  ;;  %v560_v56 = vmax.f32 %v556_v48, 0.0 }
  0xfb   : > { %v808_v57 = vpack.c.bf16 %v558_v52, %v557_v51  ;;  %v813_v54 = vpack.c.bf16 %v560_v56, %v559_v53 }
  0xfd   : > { %809 = vst [vmem:[%s143_s10] sm:$0xff] %v808_v57  }
  0xfe   : > { %816 = vst [vmem:[%s143_s10 + $0x8] sm:$0xff] %v813_v54  }
  0xff PF: > { %s12_s9 = sadd.s32 1, %s856_s9  }
 0x100   : > { %p9_p4 = scmp.ge.s32.totalorder %s12_s9, 4  }
 0x102   :  { %11 = sbr.rel (!%p9_p4) target bundleno = 1 (0x1), region = 60 }

// kernel: content_encoder_forward.13
= control target key start
LH: loop header
LB: loop body
LE: loop exit
PB: predicated region body
PF: predicated region fallthrough
CT: control target
= control target key end

     0   :  { %s957_s12 = smov 0   ;;  %s1105_s0 = inlined_call_operand.vmem [shape: bf16[2,1,48,128], index: 0, kind: input, shape index: {}]   ;;  %s1106_s1 = inlined_call_operand.vmem [shape: bf16[3,128,128], index: 1, kind: input, shape index: {}]   ;;  %s1107_s2 = inlined_call_operand.vmem [shape: bf16[2,32,128], index: 2, kind: input, shape index: {}]   ;;  %s1108_s3 = inlined_call_operand.vmem [shape: bf16[2,32,128], index: 3, kind: output, shape index: {}]  }
   0x1 LB: > { %s691_s13 = sadd.s32 4294967295, %s935_s12   ;;  %p695_p0 = scmp.ge.s32.totalorder %s935_s12, 1  ;;  %s935_s12 = sphi %s957_s12, %s13_s12  }
   0x2   : > { %p147_p1 = scmp.lt.s32.totalorder %s935_s12, 3 }
   0x4   : > { %p148_p2 = pnand %p695_p0, %p147_p1 }
   0x5   : > { %p176_p3 = scmp.lt.s32.totalorder (!%p148_p2), %s691_s13, 1 }
   0x6   : > { %151 = sbr.rel (%p148_p2) target bundleno = 255 (0xff), region = 32 }
   0xb   : > { %v856_v0 = vld [vmem:[%s1106_s1 + $0x78] sm:$0xff]  ;;  %v855_v3 = vld [vmem:[%s1106_s1 + $0x70] sm:$0xff]  ;;  %v854_v6 = vld [vmem:[%s1106_s1 + $0x68] sm:$0xff]  ;;  %s1118_s13 = smov (!%p176_p3, %s691_s13), 1  ;;  %v485_v34 = vlaneseq }
   0xc   : > { %v848_v1 = vld [vmem:[%s1106_s1 + $0x38] sm:$0xff]  ;;  %289 = vmatpush.bf16.msra.mxu0 %v856_v0  ;;  %v847_v4 = vld [vmem:[%s1106_s1 + $0x30] sm:$0xff]  ;;  %906 = vmatpush.bf16.msra.mxu3 %v856_v0  ;;  %v846_v7 = vld [vmem:[%s1106_s1 + $0x28] sm:$0xff]  ;;  %s918_s29 = smul.u32 24, %s1118_s13  ;;  %s839_s16 = sshll.u32 %s1118_s13, 4 }
   0xd   : > { %v866_v2 = vld [vmem:[%s1106_s1 + $0xb8] sm:$0xff]  ;;  %362 = vmatpush.bf16.msra.mxu1 %v848_v1  ;;  %v865_v5 = vld [vmem:[%s1106_s1 + $0xb0] sm:$0xff]  ;;  %v864_v8 = vld [vmem:[%s1106_s1 + $0xa8] sm:$0xff]  ;;  %v486_v35 = vshrl.u32 %v485_v34, 7  ;;  %s185_s19 = scalar_lea.vmem %s1107_s2, %s839_s16  ;;  %s190_s22 = scalar_lea.vmem %s1108_s3, %s839_s16 }
   0xe   : > { %462 = vmatpush.bf16.msra.mxu2 %v866_v2  ;;  %v853_v9 = vld [vmem:[%s1106_s1 + $0x60] sm:$0xff]  ;;  %v852_v12 = vld [vmem:[%s1106_s1 + $0x58] sm:$0xff]  ;;  %v851_v15 = vld [vmem:[%s1106_s1 + $0x50] sm:$0xff]  ;;  %s180_s11 = scalar_lea.vmem %s1105_s0, %s918_s29 }
   0xf   : > { %v845_v10 = vld [vmem:[%s1106_s1 + $0x20] sm:$0xff]  ;;  %v844_v13 = vld [vmem:[%s1106_s1 + $0x18] sm:$0xff]  ;;  %v843_v16 = vld [vmem:[%s1106_s1 + $0x10] sm:$0xff]  ;;  %v487_v37 = vadd.s32 8, %v486_v35  ;;  %v488_v40 = vadd.s32 16, %v486_v35  ;;  %v494_v46 = vand.u32 7, %v486_v35 }
  0x10   : > { %290 = vmatpush.bf16.msra.mxu0 %v855_v3  ;;  %907 = vmatpush.bf16.msra.mxu3 %v855_v3  ;;  %v863_v11 = vld [vmem:[%s1106_s1 + $0xa0] sm:$0xff]  ;;  %v862_v14 = vld [vmem:[%s1106_s1 + $0x98] sm:$0xff]  ;;  %v861_v17 = vld [vmem:[%s1106_s1 + $0x90] sm:$0xff]  ;;  %v489_v51 = vadd.s32 24, %v486_v35 }
  0x11   : > { %363 = vmatpush.bf16.msra.mxu1 %v847_v4  ;;  %v850_v18 = vld [vmem:[%s1106_s1 + $0x48] sm:$0xff]  ;;  %v849_v21 = vld [vmem:[%s1106_s1 + $0x40] sm:$0xff]  ;;  %v858_v29 = vld [vmem:[%s180_s11 + $0x10] sm:$0xff]  ;;  %v501_v42 = vand.u32 7, %v487_v37  ;;  %v508_v47 = vand.u32 7, %v488_v40  ;;  %vm1057_vm1 = vcmp.lt.s32.totalorder %v494_v46, 4 }
  0x12   : > { %463 = vmatpush.bf16.msra.mxu2 %v865_v5  ;;  %v842_v19 = vld [vmem:[%s1106_s1 + $0x8] sm:$0xff]  ;;  %v841_v22 = vld [vmem:[%s1106_s1] sm:$0xff]  ;;  %v515_v58 = vand.u32 7, %v489_v51 }
  0x13   : > { %v860_v20 = vld [vmem:[%s1106_s1 + $0x88] sm:$0xff]  ;;  %v859_v23 = vld [vmem:[%s1106_s1 + $0x80] sm:$0xff]  ;;  %vm1049_vm0 = vcmp.lt.s32.totalorder %v501_v42, 4  ;;  %vm1061_vm2 = vcmp.lt.s32.totalorder %v508_v47, 4 }
  0x14   : > { %291 = vmatpush.bf16.msra.mxu0 %v854_v6  ;;  %908 = vmatpush.bf16.msra.mxu3 %v854_v6  ;;  %v916_v24 = vld [vmem:[%s180_s11 + $0x4] sm:$0xff]   ;;  %v917_v27 = vld [vmem:[%s180_s11 + $0xc] sm:$0xff]  ;;  %vm1074_vm3 = vcmp.lt.s32.totalorder %v515_v58, 4 }
  0x15   : > { %364 = vmatpush.bf16.msra.mxu1 %v846_v7  ;;  %v868_v25 = vld [vmem:[%s180_s11] sm:$0xff]   ;;  %v857_v26 = vld [vmem:[%s180_s11 + $0x8] sm:$0xff] }
  0x16   : > { %464 = vmatpush.bf16.msra.mxu2 %v864_v8  ;;  %v893_v28 = vld [vmem:[%s180_s11 + $0x8] sm:$0xff]   ;;  %v876_v35 = vld [vmem:[%s185_s19] sm:$0xff]  }
  0x17   : > { %v894_v37 = vld [vmem:[%s185_s19 + $0x8] sm:$0xff]  }
  0x18   : > { %292 = vmatpush.bf16.msra.mxu0 %v853_v9  ;;  %909 = vmatpush.bf16.msra.mxu3 %v853_v9  ;;  %v881_v46 = vunpack.c.l.bf16 %v894_v37  ;;  %v882_v47 = vunpack.c.h.bf16 %v894_v37 }
  0x19   : > { %365 = vmatpush.bf16.msra.mxu1 %v845_v10 }
  0x1a   : > { %465 = vmatpush.bf16.msra.mxu2 %v863_v11 }
  0x1c   : > { %293 = vmatpush.bf16.msra.mxu0 %v852_v12  ;;  %910 = vmatpush.bf16.msra.mxu3 %v852_v12 }
  0x1d   : > { %366 = vmatpush.bf16.msra.mxu1 %v844_v13 }
  0x1e   : > { %466 = vmatpush.bf16.msra.mxu2 %v862_v14 }
  0x20   : > { %294 = vmatpush.bf16.msra.mxu0 %v851_v15  ;;  %911 = vmatpush.bf16.msra.mxu3 %v851_v15 }
  0x21   : > { %367 = vmatpush.bf16.msra.mxu1 %v843_v16 }
  0x22   : > { %467 = vmatpush.bf16.msra.mxu2 %v861_v17 }
  0x24   : > { %295 = vmatpush.bf16.msra.mxu0 %v850_v18  ;;  %912 = vmatpush.bf16.msra.mxu3 %v850_v18 }
  0x25   : > { %368 = vmatpush.bf16.msra.mxu1 %v842_v19 }
  0x26   : > { %468 = vmatpush.bf16.msra.mxu2 %v860_v20 }
  0x28   : > { %296 = vmatpush.bf16.msra.mxu0 %v849_v21  ;;  %913 = vmatpush.bf16.msra.mxu3 %v849_v21 }
  0x29   : > { %369 = vmatpush.bf16.msra.mxu1 %v841_v22 }
  0x2a   : > { %469 = vmatpush.bf16.msra.mxu2 %v859_v23 }
  0x2b   : > { %297 = vmatmul.bf16.vlgmr.msra.gmra.mxu0 %v916_v24  ;;  %302 = vmatmul.bf16.vlgmr.msra.gmra.mxu3 %v917_v27 }
  0x2c   : > { %370 = vmatmul.bf16.vlgmr.msra.gmra.mxu1 %v868_v25 }
  0x2d   : > { %470 = vmatmul.bf16.vlgmr.msra.gmra.mxu2 %v857_v26 }
  0x3c   : > { %375 = vmatmul.bf16.gmra.mxu1 %v893_v28 }
  0x3d   : > { %475 = vmatmul.bf16.gmra.mxu2 %v858_v29 }
  0xa8   : > { %v298_v31 = vpop.f32.mrf.mxu0 }
  0xa9   : > { %v371_v30 = vpop.f32.mrf.mxu1 }
  0xaa   : > { %v372_v43 = vadd.f32 %v371_v30, %v298_v31 }
  0xae   : > { %v303_v41 = vpop.f32.mrf.mxu3 }
  0xb0   : > { %v471_v32 = vpop.f32.mrf.mxu2  ;;  %v300_v38 = vpop.f32.mrf.mxu0 }
  0xb1   : > { %v373_v33 = vpop.f32.mrf.mxu1  ;;  %v1053_v52 = vadd.f32 %v471_v32, %v372_v43 }
  0xb2   : > { %v374_v44 = vadd.f32 %v373_v33, %v300_v38 }
  0xb3   : > { %v550_v59 = vsel %vm1057_vm1, %v1053_v52, 0.0 }
  0xb4   : > { %v564_v0 = vmul.f32 %v550_v59, %v550_v59 }
  0xb6   : > { %v305_v62 = vpop.f32.mrf.mxu3 }
  0xb8   : > { %v473_v36 = vpop.f32.mrf.mxu2 }
  0xb9   : > { %v376_v39 = vpop.f32.mrf.mxu1  ;;  %v1047_v48 = vadd.f32 %v473_v36, %v374_v44 }
  0xba   : > { %v377_v45 = vadd.f32 %v376_v39, %v303_v41  ;;  %v877_v39 = vunpack.c.l.bf16 %v876_v35 }
  0xbb   : > { %v551_v56 = vsel %vm1049_vm0, %v1047_v48, 0.0 }
  0xbc   : > { %v565_v61 = vmul.f32 %v551_v56, %v551_v56  ;;  %v554_v1 = vadd.f32 %v551_v56, %v550_v59 }
  0xbe   : > { %v568_v6 = vadd.f32 %v565_v61, %v564_v0 }
  0xc0   : > { %v476_v50 = vpop.f32.mrf.mxu2 }
  0xc1   : > { %v1055_v53 = vadd.f32 %v476_v50, %v377_v45  ;;  %v378_v57 = vpop.f32.mrf.mxu1  ;;  %v878_v45 = vunpack.c.h.bf16 %v876_v35 }
  0xc2   : > { %v379_v63 = vadd.f32 %v378_v57, %v305_v62 }
  0xc3   : > { %v552_v60 = vsel %vm1061_vm2, %v1055_v53, 0.0 }
  0xc4   : > { %v566_v2 = vmul.f32 %v552_v60, %v552_v60  ;;  %v555_v7 = vadd.f32 %v554_v1, %v552_v60 }
  0xc6   : > { %v569_v9 = vadd.f32 %v568_v6, %v566_v2 }
  0xc8   : > { %v478_v3 = vpop.f32.mrf.mxu2 }
  0xc9   : > { %v484_v5 = vadd.f32 %v478_v3, %v379_v63 }
  0xcb   : > { %v553_v8 = vsel %vm1074_vm3, %v484_v5, 0.0 }
  0xcc   : > { %v556_v10 = vadd.f32 %v555_v7, %v553_v8  ;;  %v567_v11 = vmul.f32 %v553_v8, %v553_v8 }
  0xce   : > { %v557_v12 = vrot.slane %v556_v10, 4  ;;  %v570_v13 = vadd.f32 %v569_v9, %v567_v11 }
  0xd0   : > { %v558_v14 = vadd.f32 %v557_v12, %v556_v10  ;;  %v571_v15 = vrot.slane %v570_v13, 4 }
  0xd2   : > { %v559_v16 = vrot.slane %v558_v14, 2  ;;  %v572_v17 = vadd.f32 %v571_v15, %v570_v13 }
  0xd4   : > { %v560_v18 = vadd.f32 %v559_v16, %v558_v14  ;;  %v573_v19 = vrot.slane %v572_v17, 2 }
  0xd6   : > { %v561_v20 = vrot.slane %v560_v18, 1  ;;  %v574_v21 = vadd.f32 %v573_v19, %v572_v17 }
  0xd8   : > { %v562_v22 = vadd.f32 %v561_v20, %v560_v18  ;;  %v575_v23 = vrot.slane %v574_v21, 1 }
  0xda   : > { %v563_v24 = vmul.f32 0.0625, %v562_v22  ;;  %v576_v25 = vadd.f32 %v575_v23, %v574_v21 }
  0xdc   : > { %v577_v26 = vmul.f32 0.0625, %v576_v25  ;;  %v578_v27 = vmul.f32 %v563_v24, %v563_v24  ;;  %v592_v40 = vsub.f32 %v1053_v52, %v563_v24  ;;  %v593_v41 = vsub.f32 %v1047_v48, %v563_v24 }
  0xdd   : > { %v594_v42 = vsub.f32 %v1055_v53, %v563_v24  ;;  %v595_v43 = vsub.f32 %v484_v5, %v563_v24 }
  0xde   : > { %v579_v28 = vsub.f32 %v577_v26, %v578_v27 }
  0xe0   : > { %v580_v29 = vmax.f32 %v579_v28, 0.0 }
  0xe2   : > { %v581_v30 = vadd.f32 1e-05, %v580_v29 }
  0xe4   : > { %927 = vrsqrt.f32 %v581_v30  ;;  %vm588_vm5 = vweird.f32 %v581_v30 }
  0xea   : > { %v928_v31 = vpop.eup %927 }
  0xeb   : > { %v583_v32 = vmul.f32 %v928_v31, %v581_v30  ;;  %vm589_vm4 = vweird.f32 %v928_v31 }
  0xec   : > { %vm590_vm6 = vmor %vm588_vm5, %vm589_vm4 }
  0xed   : > { %v584_v33 = vmul.f32 %v928_v31, %v583_v32 }
  0xef   : > { %v585_v34 = vmul.f32 0.5, %v584_v33 }
  0xf1   : > { %v586_v36 = vsub.f32 1.5, %v585_v34 }
  0xf3   : > { %v587_v38 = vmul.f32 %v928_v31, %v586_v36 }
  0xf5   : > { %v591_v44 = vsel %vm590_vm6, %v928_v31, %v587_v38 }
  0xf6   : > { %v596_v50 = vmul.f32 %v592_v40, %v591_v44  ;;  %v597_v51 = vmul.f32 %v593_v41, %v591_v44  ;;  %v598_v56 = vmul.f32 %v594_v42, %v591_v44  ;;  %v599_v57 = vmul.f32 %v595_v43, %v591_v44 }
  0xf8   : > { %v600_v58 = vsel %vm1057_vm1, %v596_v50, 0.0  ;;  %v601_v52 = vsel %vm1049_vm0, %v597_v51, 0.0  ;;  %v602_v48 = vsel %vm1061_vm2, %v598_v56, 0.0  ;;  %v603_v53 = vsel %vm1074_vm3, %v599_v57, 0.0 }
  0xf9   : > { %v612_v59 = vadd.f32 %v877_v39, %v600_v58  ;;  %v613_v60 = vadd.f32 %v878_v45, %v601_v52  ;;  %v614_v61 = vadd.f32 %v881_v46, %v602_v48  ;;  %v615_v62 = vadd.f32 %v882_v47, %v603_v53 }
  0xfb   : > { %v886_v54 = vpack.c.bf16 %v613_v60, %v612_v59  ;;  %v891_v63 = vpack.c.bf16 %v615_v62, %v614_v61 }
  0xfd   : > { %887 = vst [vmem:[%s190_s22] sm:$0xff] %v886_v54  }
  0xfe   : > { %895 = vst [vmem:[%s190_s22 + $0x8] sm:$0xff] %v891_v63  }
  0xff PF: > { %s13_s12 = sadd.s32 1, %s935_s12  }
 0x100   : > { %p10_p4 = scmp.ge.s32.totalorder %s13_s12, 4  }
 0x102   :  { %12 = sbr.rel (!%p10_p4) target bundleno = 1 (0x1), region = 67 }

// kernel: content_encoder_forward.10
= control target key start
LH: loop header
LB: loop body
LE: loop exit
PB: predicated region body
PF: predicated region fallthrough
CT: control target
= control target key end

     0   :  { %s6105_s9 = smov 0   ;;  %s6838_s0 = inlined_call_operand.vmem [shape: bf16[2,4,160,128], index: 0, kind: input, shape index: {}]   ;;  %s6839_s1 = inlined_call_operand.vmem [shape: bf16[16,128,128], index: 1, kind: input, shape index: {}]   ;;  %s6840_s2 = inlined_call_operand.vmem [shape: bf16[2,128,128], index: 2, kind: output, shape index: {}]  }
   0x1 LB: > { %s4293_s10 = sadd.s32 4294967295, %s6087_s9   ;;  %p4297_p0 = scmp.ge.s32.totalorder %s6087_s9, 1  ;;  %s6087_s9 = sphi %s6105_s9, %s12_s9  }
   0x2   : > { %p112_p1 = scmp.lt.s32.totalorder %s6087_s9, 3 }
   0x4   : > { %p113_p2 = pnand %p4297_p0, %p112_p1 }
   0x5   : > { %p134_p3 = scmp.lt.s32.totalorder (!%p113_p2), %s4293_s10, 1 }
   0x6   : > { %116 = sbr.rel (%p113_p2) target bundleno = 733 (0x2dd), region = 28 }
   0xb   : > { %v5797_v0 = vld [vmem:[%s6839_s1 + $0x78] sm:$0xff]  ;;  %v5796_v4 = vld [vmem:[%s6839_s1 + $0x70] sm:$0xff]  ;;  %s6842_s10 = smov (!%p134_p3, %s4293_s10), 1  ;;  %v5795_v8 = vld [vmem:[%s6839_s1 + $0x68] sm:$0xff]  ;;  %vm577_vm0 = vsmask.f32 7424 }
   0xc   : > { %v5781_v1 = vld [vmem:[%s6839_s1 + $0x38] sm:$0xff]  ;;  %306 = vmatpush.bf16.msra.mxu0 %v5797_v0  ;;  %v5780_v5 = vld [vmem:[%s6839_s1 + $0x30] sm:$0xff]  ;;  %v5779_v9 = vld [vmem:[%s6839_s1 + $0x28] sm:$0xff]  ;;  %s6069_s7 = smul.u32 320, %s6842_s10 }
   0xd   : > { %v5813_v2 = vld [vmem:[%s6839_s1 + $0xb8] sm:$0xff]  ;;  %451 = vmatpush.bf16.msra.mxu1 %v5781_v1  ;;  %v5812_v6 = vld [vmem:[%s6839_s1 + $0xb0] sm:$0xff]  ;;  %v5811_v10 = vld [vmem:[%s6839_s1 + $0xa8] sm:$0xff] }
   0xe   : > { %v5829_v3 = vld [vmem:[%s6839_s1 + $0xf8] sm:$0xff]  ;;  %702 = vmatpush.bf16.msra.mxu2 %v5813_v2  ;;  %v5828_v7 = vld [vmem:[%s6839_s1 + $0xf0] sm:$0xff]  ;;  %v5827_v11 = vld [vmem:[%s6839_s1 + $0xe8] sm:$0xff]  ;;  %s6167_s20 = scalar_lea.vmem %s6838_s0, %s6069_s7 }
   0xf   : > { %968 = vmatpush.bf16.msra.mxu3 %v5829_v3  ;;  %v5794_v12 = vld [vmem:[%s6839_s1 + $0x60] sm:$0xff]  ;;  %v5793_v16 = vld [vmem:[%s6839_s1 + $0x58] sm:$0xff]  ;;  %v5814_v21 = vld [vmem:[%s6167_s20 + $0x50] sm:$0xff] }
  0x10   : > { %307 = vmatpush.bf16.msra.mxu0 %v5796_v4  ;;  %v5778_v13 = vld [vmem:[%s6839_s1 + $0x20] sm:$0xff]  ;;  %v5777_v17 = vld [vmem:[%s6839_s1 + $0x18] sm:$0xff]  ;;  %v5792_v22 = vld [vmem:[%s6839_s1 + $0x50] sm:$0xff]  ;;  %v847_v29 = vshll.u32 %v5814_v21, 16  ;;  %v845_v37 = vshrl.u32 %v5814_v21, 16 }
  0x11   : > { %452 = vmatpush.bf16.msra.mxu1 %v5780_v5  ;;  %v5810_v14 = vld [vmem:[%s6839_s1 + $0xa0] sm:$0xff]  ;;  %v5809_v18 = vld [vmem:[%s6839_s1 + $0x98] sm:$0xff]  ;;  %v5776_v23 = vld [vmem:[%s6839_s1 + $0x10] sm:$0xff] }
  0x12   : > { %703 = vmatpush.bf16.msra.mxu2 %v5812_v6  ;;  %v5826_v15 = vld [vmem:[%s6839_s1 + $0xe0] sm:$0xff]  ;;  %v5825_v19 = vld [vmem:[%s6839_s1 + $0xd8] sm:$0xff]  ;;  %v6190_v24 = vld [vmem:[%s6167_s20 + $0x8] sm:$0xff]  ;;  %v849_v38 = vrot.slane %v847_v29, 1 }
  0x13   : > { %969 = vmatpush.bf16.msra.mxu3 %v5828_v7  ;;  %v5798_v20 = vld [vmem:[%s6167_s20] sm:$0xff]  ;;  %v5808_v25 = vld [vmem:[%s6839_s1 + $0x90] sm:$0xff]  ;;  %v6199_v28 = vld [vmem:[%s6167_s20 + $0x58] sm:$0xff]  ;;  %v586_v33 = vshll.u32 %v6190_v24, 16  ;;  %v590_v0 = vshrl.u32 %v6190_v24, 16 }
  0x14   : > { %308 = vmatpush.bf16.msra.mxu0 %v5795_v8  ;;  %v5824_v26 = vld [vmem:[%s6839_s1 + $0xd0] sm:$0xff]  ;;  %v581_v27 = vshll.u32 %v5798_v20, 16  ;;  %v5791_v30 = vld [vmem:[%s6839_s1 + $0x48] sm:$0xff]  ;;  %v579_v32 = vshrl.u32 %v5798_v20, 16  ;;  %v852_v39 = vshll.u32 %v6199_v28, 16  ;;  %v5790_v40 = vld [vmem:[%s6839_s1 + $0x40] sm:$0xff]  ;;  %v850_v46 = vor.u32 %v849_v38, %v845_v37 }
  0x15   : > { %453 = vmatpush.bf16.msra.mxu1 %v5779_v9  ;;  %v5775_v31 = vld [vmem:[%s6839_s1 + $0x8] sm:$0xff]  ;;  %v5774_v41 = vld [vmem:[%s6839_s1] sm:$0xff]  ;;  %v588_v45 = vrot.slane %v586_v33, 1  ;;  %v5877_v48 = vld [vmem:[%s6839_s1 + $0x1b8] sm:$0xff]  ;;  %v856_v2 = vshrl.u32 %v6199_v28, 16 }
  0x16   : > { %704 = vmatpush.bf16.msra.mxu2 %v5811_v10  ;;  %v5807_v34 = vld [vmem:[%s6839_s1 + $0x88] sm:$0xff]  ;;  %v583_v36 = vrot.slane %v581_v27, 1  ;;  %v5806_v42 = vld [vmem:[%s6839_s1 + $0x80] sm:$0xff]  ;;  %v854_v47 = vrot.slane %v852_v39, 1  ;;  %v5845_v49 = vld [vmem:[%s6839_s1 + $0x138] sm:$0xff] }
  0x17   : > { %970 = vmatpush.bf16.msra.mxu3 %v5827_v11  ;;  %v5823_v35 = vld [vmem:[%s6839_s1 + $0xc8] sm:$0xff]  ;;  %v5822_v43 = vld [vmem:[%s6839_s1 + $0xc0] sm:$0xff]  ;;  %v5782_v50 = vld [vmem:[%s6167_s20 + $0x50] sm:$0xff]  ;;  %v592_v6 = vor.u32 %v590_v0, %v588_v45 }
  0x18   : > { %309 = vmatpush.bf16.msra.mxu0 %v5794_v12  ;;  %v584_v44 = vor.u32 %v583_v36, %v579_v32  ;;  %v5766_v51 = vld [vmem:[%s6167_s20] sm:$0xff]  ;;  %v855_v53 = vsel %vm577_vm0, %v850_v46, %v854_v47  ;;  %v5893_v54 = vld [vmem:[%s6839_s1 + $0x1f8] sm:$0xff]  ;;  %v5876_v56 = vld [vmem:[%s6839_s1 + $0x1b0] sm:$0xff]  ;;  %v858_v8 = vor.u32 %v856_v2, %v854_v47 }
  0x19   : > { %454 = vmatpush.bf16.msra.mxu1 %v5778_v13  ;;  %v5861_v55 = vld [vmem:[%s6839_s1 + $0x178] sm:$0xff]  ;;  %v5844_v57 = vld [vmem:[%s6839_s1 + $0x130] sm:$0xff]  ;;  %v5816_v59 = vld [vmem:[%s6167_s20 + $0x60] sm:$0xff] }
  0x1a   : > { %705 = vmatpush.bf16.msra.mxu2 %v5810_v14  ;;  %v589_v52 = vsel %vm577_vm0, %v584_v44, %v588_v45  ;;  %v5800_v58 = vld [vmem:[%s6167_s20 + $0x10] sm:$0xff]  ;;  %v5875_v62 = vld [vmem:[%s6839_s1 + $0x1a8] sm:$0xff]  ;;  %v860_v3 = vshll.u32 %v5816_v59, 16  ;;  %v5783_v10 = vld [vmem:[%s6167_s20 + $0x58] sm:$0xff] }
  0x1b   : > { %971 = vmatpush.bf16.msra.mxu3 %v5826_v15  ;;  %v5892_v60 = vld [vmem:[%s6839_s1 + $0x1f0] sm:$0xff]  ;;  %v5843_v63 = vld [vmem:[%s6839_s1 + $0x128] sm:$0xff]  ;;  %v594_v1 = vshll.u32 %v5800_v58, 16  ;;  %v5874_v14 = vld [vmem:[%s6839_s1 + $0x1a0] sm:$0xff]  ;;  %v598_v20 = vshrl.u32 %v5800_v58, 16 }
  0x1c   : > { %310 = vmatpush.bf16.msra.mxu0 %v5793_v16  ;;  %v5860_v61 = vld [vmem:[%s6839_s1 + $0x170] sm:$0xff]  ;;  %v5891_v4 = vld [vmem:[%s6839_s1 + $0x1e8] sm:$0xff]  ;;  %v862_v9 = vrot.slane %v860_v3, 1  ;;  %v5842_v15 = vld [vmem:[%s6839_s1 + $0x120] sm:$0xff] }
  0x1d   : > { %455 = vmatpush.bf16.msra.mxu1 %v5777_v17  ;;  %v5859_v5 = vld [vmem:[%s6839_s1 + $0x168] sm:$0xff]  ;;  %v596_v7 = vrot.slane %v594_v1, 1  ;;  %v5890_v16 = vld [vmem:[%s6839_s1 + $0x1e0] sm:$0xff]  ;;  %v5801_v17 = vld [vmem:[%s6167_s20 + $0x18] sm:$0xff] }
  0x1e   : > { %706 = vmatpush.bf16.msra.mxu2 %v5809_v18  ;;  %v5767_v11 = vld [vmem:[%s6167_s20 + $0x8] sm:$0xff]  ;;  %v863_v13 = vsel %vm577_vm0, %v858_v8, %v862_v9  ;;  %v602_v21 = vshll.u32 %v5801_v17, 16  ;;  %v5784_v28 = vld [vmem:[%s6167_s20 + $0x60] sm:$0xff]  ;;  %v5768_v29 = vld [vmem:[%s6167_s20 + $0x10] sm:$0xff]  ;;  %v606_v38 = vshrl.u32 %v5801_v17, 16 }
  0x1f   : > { %972 = vmatpush.bf16.msra.mxu3 %v5825_v19  ;;  %v597_v12 = vsel %vm577_vm0, %v592_v6, %v596_v7  ;;  %v5817_v18 = vld [vmem:[%s6167_s20 + $0x68] sm:$0xff]  ;;  %v5858_v19 = vld [vmem:[%s6839_s1 + $0x160] sm:$0xff]  ;;  %v600_v24 = vor.u32 %v598_v20, %v596_v7  ;;  %v5873_v32 = vld [vmem:[%s6839_s1 + $0x198] sm:$0xff] }
  0x20   : > { %311 = vmatpush.bf16.msra.mxu0 %v5792_v22  ;;  %v864_v22 = vshrl.u32 %v5816_v59, 16  ;;  %v5841_v33 = vld [vmem:[%s6839_s1 + $0x118] sm:$0xff]  ;;  %v5818_v36 = vld [vmem:[%s6167_s20 + $0x70] sm:$0xff]  ;;  %v5785_v46 = vld [vmem:[%s6167_s20 + $0x68] sm:$0xff] }
  0x21   : > { %456 = vmatpush.bf16.msra.mxu1 %v5776_v23  ;;  %v868_v23 = vshll.u32 %v5817_v18, 16  ;;  %v5857_v37 = vld [vmem:[%s6839_s1 + $0x158] sm:$0xff]  ;;  %v880_v58 = vshrl.u32 %v5818_v36, 16  ;;  %v5786_v0 = vld [vmem:[%s6167_s20 + $0x70] sm:$0xff]  ;;  %v5770_v1 = vld [vmem:[%s6167_s20 + $0x20] sm:$0xff] }
  0x22   : > { %707 = vmatpush.bf16.msra.mxu2 %v5808_v25  ;;  %v604_v25 = vrot.slane %v602_v21, 1  ;;  %v5769_v47 = vld [vmem:[%s6167_s20 + $0x18] sm:$0xff]  ;;  %v5887_v6 = vld [vmem:[%s6839_s1 + $0x1c8] sm:$0xff]  ;;  %v5804_v7 = vld [vmem:[%s6167_s20 + $0x30] sm:$0xff] }
  0x23   : > { %973 = vmatpush.bf16.msra.mxu3 %v5824_v26  ;;  %v866_v26 = vor.u32 %v864_v22, %v862_v9  ;;  %v870_v27 = vrot.slane %v868_v23, 1  ;;  %v5820_v8 = vld [vmem:[%s6167_s20 + $0x80] sm:$0xff]  ;;  %v5855_v9 = vld [vmem:[%s6839_s1 + $0x148] sm:$0xff] }
  0x24   : > { %312 = vmatpush.bf16.msra.mxu0 %v5791_v30  ;;  %v605_v30 = vsel %vm577_vm0, %v600_v24, %v604_v25  ;;  %v5870_v22 = vld [vmem:[%s6839_s1 + $0x180] sm:$0xff] }
  0x25   : > { %457 = vmatpush.bf16.msra.mxu1 %v5775_v31  ;;  %v871_v31 = vsel %vm577_vm0, %v866_v26, %v870_v27  ;;  %v5838_v23 = vld [vmem:[%s6839_s1 + $0x100] sm:$0xff]  ;;  %v5821_v26 = vld [vmem:[%s6167_s20 + $0x88] sm:$0xff] }
  0x26   : > { %708 = vmatpush.bf16.msra.mxu2 %v5807_v34  ;;  %v5889_v34 = vld [vmem:[%s6839_s1 + $0x1d8] sm:$0xff]  ;;  %v5886_v24 = vld [vmem:[%s6839_s1 + $0x1c0] sm:$0xff] }
  0x27   : > { %974 = vmatpush.bf16.msra.mxu3 %v5823_v35  ;;  %v5802_v35 = vld [vmem:[%s6167_s20 + $0x20] sm:$0xff] }
  0x28   : > { %313 = vmatpush.bf16.msra.mxu0 %v5790_v40  ;;  %v610_v39 = vshll.u32 %v5802_v35, 16  ;;  %v872_v40 = vshrl.u32 %v5817_v18, 16  ;;  %v5787_v18 = vld [vmem:[%s6167_s20 + $0x78] sm:$0xff] }
  0x29   : > { %458 = vmatpush.bf16.msra.mxu1 %v5774_v41  ;;  %v876_v41 = vshll.u32 %v5818_v36, 16  ;;  %v516_v36 = vld [vmem:[%s6167_s20 + $0x40] sm:$0x1] }
  0x2a   : > { %709 = vmatpush.bf16.msra.mxu2 %v5806_v42  ;;  %v608_v42 = vor.u32 %v606_v38, %v604_v25  ;;  %v874_v44 = vor.u32 %v872_v40, %v870_v27  ;;  %v5805_v25 = vld [vmem:[%s6167_s20 + $0x38] sm:$0xff]  ;;  %v5854_v27 = vld [vmem:[%s6839_s1 + $0x140] sm:$0xff] }
  0x2b   : > { %975 = vmatpush.bf16.msra.mxu3 %v5822_v43  ;;  %314 = vmatmul.bf16.vlgmr.msra.gmra.mxu0 %v5782_v50  ;;  %v612_v43 = vrot.slane %v610_v39, 1  ;;  %v878_v45 = vrot.slane %v876_v41, 1  ;;  %v5872_v50 = vld [vmem:[%s6839_s1 + $0x190] sm:$0xff]  ;;  %v5788_v38 = vld [vmem:[%s6167_s20 + $0x80] sm:$0xff] }
  0x2c   : > { %1163 = vmatpush.bf16.msrb.mxu0 %v5845_v49  ;;  %459 = vmatmul.bf16.vlgmr.msra.gmra.mxu1 %v5766_v51  ;;  %v5840_v51 = vld [vmem:[%s6839_s1 + $0x110] sm:$0xff] }
  0x2d   : > { %710 = vmatmul.bf16.vlgmr.msra.gmra.mxu2 %v589_v52  ;;  %1358 = vmatpush.bf16.msrb.mxu1 %v5861_v55  ;;  %v879_v49 = vsel %vm577_vm0, %v874_v44, %v878_v45  ;;  %v5888_v52 = vld [vmem:[%s6839_s1 + $0x1d0] sm:$0xff]  ;;  %v5941_v44 = vld [vmem:[%s6839_s1 + $0x2b8] sm:$0xff] }
  0x2e   : > { %1624 = vmatpush.bf16.msrb.mxu2 %v5877_v48  ;;  %976 = vmatmul.bf16.vlgmr.msra.gmra.mxu3 %v855_v53  ;;  %v613_v48 = vsel %vm577_vm0, %v608_v42, %v612_v43  ;;  %v5803_v53 = vld [vmem:[%s6167_s20 + $0x28] sm:$0xff]  ;;  %v5856_v55 = vld [vmem:[%s6839_s1 + $0x150] sm:$0xff]  ;;  %v567_v42 = vunpack.c.l.b16 %v516_v36 }
  0x2f   : > { %1890 = vmatpush.bf16.msrb.mxu3 %v5893_v54  ;;  %v5819_v54 = vld [vmem:[%s6167_s20 + $0x78] sm:$0xff]  ;;  %v5772_v39 = vld [vmem:[%s6167_s20 + $0x30] sm:$0xff] }
  0x30   : > { %1164 = vmatpush.bf16.msrb.mxu0 %v5844_v57  ;;  %v618_v57 = vshll.u32 %v5803_v53, 16  ;;  %v884_v59 = vshll.u32 %v5819_v54, 16 }
  0x31   : > { %1359 = vmatpush.bf16.msrb.mxu1 %v5860_v61 }
  0x32   : > { %1625 = vmatpush.bf16.msrb.mxu2 %v5876_v56  ;;  %v614_v56 = vshrl.u32 %v5802_v35, 16  ;;  %v620_v61 = vrot.slane %v618_v57, 1 }
  0x33   : > { %1891 = vmatpush.bf16.msrb.mxu3 %v5892_v60 }
  0x34   : > { %1165 = vmatpush.bf16.msrb.mxu0 %v5843_v63  ;;  %v616_v60 = vor.u32 %v614_v56, %v612_v43  ;;  %v886_v63 = vrot.slane %v884_v59, 1  ;;  %v5773_v59 = vld [vmem:[%s6167_s20 + $0x38] sm:$0xff] }
  0x35   : > { %1360 = vmatpush.bf16.msrb.mxu1 %v5859_v5  ;;  %v5839_v5 = vld [vmem:[%s6839_s1 + $0x108] sm:$0xff] }
  0x36   : > { %1626 = vmatpush.bf16.msrb.mxu2 %v5875_v62  ;;  %v882_v62 = vor.u32 %v880_v58, %v878_v45  ;;  %v621_v2 = vsel %vm577_vm0, %v616_v60, %v620_v61  ;;  %v5909_v45 = vld [vmem:[%s6839_s1 + $0x238] sm:$0xff]  ;;  %v5789_v58 = vld [vmem:[%s6167_s20 + $0x88] sm:$0xff]  ;;  %v5862_v60 = vld [vmem:[%s6167_s20 + $0xa0] sm:$0xff] }
  0x37   : > { %1892 = vmatpush.bf16.msrb.mxu3 %v5891_v4  ;;  %v5871_v4 = vld [vmem:[%s6839_s1 + $0x188] sm:$0xff] }
  0x38   : > { %1166 = vmatpush.bf16.msrb.mxu0 %v5842_v15  ;;  %v887_v3 = vsel %vm577_vm0, %v882_v62, %v886_v63 }
  0x39   : > { %1361 = vmatpush.bf16.msrb.mxu1 %v5858_v19  ;;  %v5771_v19 = vld [vmem:[%s6167_s20 + $0x28] sm:$0xff] }
  0x3a   : > { %1627 = vmatpush.bf16.msrb.mxu2 %v5874_v14 }
  0x3b   : > { %319 = vmatmul.bf16.gmra.mxu0 %v5783_v10  ;;  %1893 = vmatpush.bf16.msrb.mxu3 %v5890_v16  ;;  %v622_v10 = vshrl.u32 %v5803_v53, 16  ;;  %v5925_v53 = vld [vmem:[%s6839_s1 + $0x278] sm:$0xff] }
  0x3c   : > { %464 = vmatmul.bf16.gmra.mxu1 %v5767_v11  ;;  %1167 = vmatpush.bf16.msrb.mxu0 %v5841_v33  ;;  %v626_v11 = vshll.u32 %v5804_v7, 16 }
  0x3d   : > { %715 = vmatmul.bf16.gmra.mxu2 %v597_v12  ;;  %1362 = vmatpush.bf16.msrb.mxu1 %v5857_v37  ;;  %v888_v12 = vshrl.u32 %v5819_v54, 16  ;;  %v624_v14 = vor.u32 %v622_v10, %v620_v61  ;;  %v4557_v37 = vld [vmem:[%s6167_s20 + $0x90] sm:$0x1] }
  0x3e   : > { %981 = vmatmul.bf16.gmra.mxu3 %v863_v13  ;;  %1628 = vmatpush.bf16.msrb.mxu2 %v5873_v32  ;;  %v892_v13 = vshll.u32 %v5820_v8, 16  ;;  %v628_v15 = vrot.slane %v626_v11, 1  ;;  %v834_v43 = vunpack.c.l.b16 %v4557_v37 }
  0x3f   : > { %1894 = vmatpush.bf16.msrb.mxu3 %v5889_v34  ;;  %v890_v16 = vor.u32 %v888_v12, %v886_v63  ;;  %v5878_v63 = vld [vmem:[%s6167_s20 + $0xf0] sm:$0xff] }
  0x40   : > { %1168 = vmatpush.bf16.msrb.mxu0 %v5840_v51  ;;  %v894_v17 = vrot.slane %v892_v13, 1  ;;  %v629_v20 = vsel %vm577_vm0, %v624_v14, %v628_v15  ;;  %v904_v51 = vshrl.u32 %v5821_v26, 16  ;;  %v1767_v10 = vshrl.u32 %v5878_v63, 16  ;;  %v5924_v13 = vld [vmem:[%s6839_s1 + $0x270] sm:$0xff] }
  0x41   : > { %1363 = vmatpush.bf16.msrb.mxu1 %v5856_v55 }
  0x42   : > { %1629 = vmatpush.bf16.msrb.mxu2 %v5872_v50  ;;  %v895_v21 = vsel %vm577_vm0, %v890_v16, %v894_v17 }
  0x43   : > { %1895 = vmatpush.bf16.msrb.mxu3 %v5888_v52 }
  0x44   : > { %1169 = vmatpush.bf16.msrb.mxu0 %v5839_v5  ;;  %v5879_v5 = vld [vmem:[%s6167_s20 + $0xf8] sm:$0xff] }
  0x45   : > { %1364 = vmatpush.bf16.msrb.mxu1 %v5855_v9  ;;  %v1774_v12 = vshll.u32 %v5879_v5, 16  ;;  %v1778_v37 = vshrl.u32 %v5879_v5, 16  ;;  %v5922_v5 = vld [vmem:[%s6839_s1 + $0x260] sm:$0xff] }
  0x46   : > { %1630 = vmatpush.bf16.msrb.mxu2 %v5871_v4  ;;  %v5863_v4 = vld [vmem:[%s6167_s20 + $0xa8] sm:$0xff] }
  0x47   : > { %1896 = vmatpush.bf16.msrb.mxu3 %v5887_v6  ;;  %v1769_v6 = vshll.u32 %v5878_v63, 16  ;;  %v1508_v9 = vshll.u32 %v5863_v4, 16 }
  0x48   : > { %1170 = vmatpush.bf16.msrb.mxu0 %v5838_v23 }
  0x49   : > { %1365 = vmatpush.bf16.msrb.mxu1 %v5854_v27  ;;  %v1771_v11 = vrot.slane %v1769_v6, 1  ;;  %v5955_v27 = vld [vmem:[%s6839_s1 + $0x2e8] sm:$0xff] }
  0x4a   : > { %1631 = vmatpush.bf16.msrb.mxu2 %v5870_v22 }
  0x4b   : > { %324 = vmatmul.bf16.gmra.mxu0 %v5784_v28  ;;  %1897 = vmatpush.bf16.msrb.mxu3 %v5886_v24  ;;  %v630_v28 = vshrl.u32 %v5804_v7, 16  ;;  %v1501_v7 = vshrl.u32 %v5862_v60, 16  ;;  %v1772_v16 = vor.u32 %v1771_v11, %v1767_v10 }
  0x4c   : > { %469 = vmatmul.bf16.gmra.mxu1 %v5768_v29  ;;  %v634_v29 = vshll.u32 %v5805_v25, 16  ;;  %2084 = vmatpush.bf16.msra.mxu0 %v5909_v45 }
  0x4d   : > { %720 = vmatmul.bf16.gmra.mxu2 %v605_v30  ;;  %v896_v30 = vshrl.u32 %v5820_v8, 16  ;;  %v632_v32 = vor.u32 %v630_v28, %v628_v15  ;;  %2278 = vmatpush.bf16.msra.mxu1 %v5925_v53  ;;  %v1510_v15 = vrot.slane %v1508_v9, 1  ;;  %v5864_v28 = vld [vmem:[%s6167_s20 + $0xb0] sm:$0xff] }
  0x4e   : > { %986 = vmatmul.bf16.gmra.mxu3 %v871_v31  ;;  %v900_v31 = vshll.u32 %v5821_v26, 16  ;;  %v636_v33 = vrot.slane %v634_v29, 1  ;;  %2544 = vmatpush.bf16.msra.mxu2 %v5941_v44  ;;  %v5907_v26 = vld [vmem:[%s6839_s1 + $0x228] sm:$0xff]  ;;  %v5880_v29 = vld [vmem:[%s6167_s20 + $0x100] sm:$0xff]  ;;  %v1516_v36 = vshll.u32 %v5864_v28, 16 }
  0x4f   : > { %v898_v34 = vor.u32 %v896_v30, %v894_v17  ;;  %v1776_v17 = vrot.slane %v1774_v12, 1  ;;  %v5832_v12 = vld [vmem:[%s6167_s20 + $0xb0] sm:$0xff] }
  0x50   : > { %v902_v35 = vrot.slane %v900_v31, 1  ;;  %v637_v40 = vsel %vm577_vm0, %v632_v32, %v636_v33 }
  0x51   : > { %2279 = vmatpush.bf16.msra.mxu1 %v5924_v13  ;;  %v1777_v24 = vsel %vm577_vm0, %v1772_v16, %v1776_v17  ;;  %v5848_v13 = vld [vmem:[%s6167_s20 + $0x100] sm:$0xff] }
  0x52   : > { %v903_v41 = vsel %vm577_vm0, %v898_v34, %v902_v35  ;;  %v906_v56 = vor.u32 %v904_v51, %v902_v35  ;;  %v1512_v35 = vshrl.u32 %v5863_v4, 16 }
  0x5b   : > { %329 = vmatmul.bf16.gmra.mxu0 %v5785_v46  ;;  %v5957_v46 = vld [vmem:[%s6839_s1 + $0x2f8] sm:$0xff] }
  0x5c   : > { %474 = vmatmul.bf16.gmra.mxu1 %v5769_v47  ;;  %v576_v47 = vpack.c.b16 %v567_v42, %v567_v42  ;;  %2810 = vmatpush.bf16.msra.mxu3 %v5957_v46  ;;  %v1518_v42 = vrot.slane %v1516_v36, 1 }
  0x5d   : > { %725 = vmatmul.bf16.gmra.mxu2 %v613_v48  ;;  %v843_v48 = vpack.c.b16 %v834_v43, %v834_v43  ;;  %v1780_v43 = vor.u32 %v1778_v37, %v1776_v17 }
  0x5e   : > { %991 = vmatmul.bf16.gmra.mxu3 %v879_v49  ;;  %v638_v49 = vshrl.u32 %v5805_v25, 16  ;;  %v642_v50 = vshll.u32 %v576_v47, 16  ;;  %v5939_v25 = vld [vmem:[%s6839_s1 + $0x2a8] sm:$0xff] }
  0x5f   : > { %v908_v52 = vshll.u32 %v843_v48, 16  ;;  %v5831_v47 = vld [vmem:[%s6167_s20 + $0xa8] sm:$0xff]  ;;  %v5847_v48 = vld [vmem:[%s6167_s20 + $0xf8] sm:$0xff] }
  0x60   : > { %v640_v54 = vor.u32 %v638_v49, %v636_v33  ;;  %v644_v55 = vrot.slane %v642_v50, 1 }
  0x61   : > { %v910_v57 = vrot.slane %v908_v52, 1 }
  0x62   : > { %v645_v61 = vsel %vm577_vm0, %v640_v54, %v644_v55  ;;  %v5938_v54 = vld [vmem:[%s6839_s1 + $0x2a0] sm:$0xff] }
  0x63   : > { %v911_v62 = vsel %vm577_vm0, %v906_v56, %v910_v57  ;;  %v5906_v55 = vld [vmem:[%s6839_s1 + $0x220] sm:$0xff]  ;;  %v5865_v57 = vld [vmem:[%s6167_s20 + $0xb8] sm:$0xff] }
  0x64   : > { %v5954_v56 = vld [vmem:[%s6839_s1 + $0x2e0] sm:$0xff] }
  0x6b   : > { %334 = vmatmul.bf16.gmra.mxu0 %v5786_v0  ;;  %v1503_v0 = vshll.u32 %v5862_v60, 16 }
  0x6c   : > { %479 = vmatmul.bf16.gmra.mxu1 %v5770_v1  ;;  %v5940_v1 = vld [vmem:[%s6839_s1 + $0x2b0] sm:$0xff] }
  0x6d   : > { %730 = vmatmul.bf16.gmra.mxu2 %v621_v2  ;;  %v5908_v2 = vld [vmem:[%s6839_s1 + $0x230] sm:$0xff]  ;;  %v1505_v8 = vrot.slane %v1503_v0, 1  ;;  %v1520_v0 = vshrl.u32 %v5864_v28, 16 }
  0x6e   : > { %996 = vmatmul.bf16.gmra.mxu3 %v887_v3  ;;  %v5956_v3 = vld [vmem:[%s6839_s1 + $0x2f0] sm:$0xff]  ;;  %2545 = vmatpush.bf16.msra.mxu2 %v5940_v1  ;;  %v1524_v1 = vshll.u32 %v5865_v57, 16 }
  0x6f   : > { %2085 = vmatpush.bf16.msra.mxu0 %v5908_v2  ;;  %2811 = vmatpush.bf16.msra.mxu3 %v5956_v3  ;;  %v1506_v14 = vor.u32 %v1505_v8, %v1501_v7  ;;  %v1786_v2 = vshrl.u32 %v5880_v29, 16  ;;  %v1522_v6 = vor.u32 %v1520_v0, %v1518_v42  ;;  %v5920_v0 = vld [vmem:[%s6839_s1 + $0x250] sm:$0xff] }
  0x70   : > { %v1526_v7 = vrot.slane %v1524_v1, 1 }
  0x71   : > { %v1511_v23 = vsel %vm577_vm0, %v1506_v14, %v1510_v15 }
  0x72   : > { %2546 = vmatpush.bf16.msra.mxu2 %v5939_v25  ;;  %v1527_v17 = vsel %vm577_vm0, %v1522_v6, %v1526_v7 }
  0x73   : > { %2086 = vmatpush.bf16.msra.mxu0 %v5907_v26  ;;  %2812 = vmatpush.bf16.msra.mxu3 %v5955_v27 }
  0x76   : > { %2547 = vmatpush.bf16.msra.mxu2 %v5938_v54 }
  0x77   : > { %2087 = vmatpush.bf16.msra.mxu0 %v5906_v55  ;;  %2813 = vmatpush.bf16.msra.mxu3 %v5954_v56 }
  0x7b   : > { %339 = vmatmul.bf16.gmra.mxu0 %v5787_v18  ;;  %v5830_v18 = vld [vmem:[%s6167_s20 + $0xa0] sm:$0xff] }
  0x7c   : > { %484 = vmatmul.bf16.gmra.mxu1 %v5771_v19  ;;  %v5846_v19 = vld [vmem:[%s6167_s20 + $0xf0] sm:$0xff] }
  0x7d   : > { %735 = vmatmul.bf16.gmra.mxu2 %v629_v20 }
  0x7e   : > { %1001 = vmatmul.bf16.gmra.mxu3 %v895_v21 }
  0x8b   : > { %344 = vmatmul.bf16.gmra.mxu0 %v5788_v38  ;;  %v1782_v38 = vshll.u32 %v5880_v29, 16  ;;  %v1528_v29 = vshrl.u32 %v5865_v57, 16 }
  0x8c   : > { %489 = vmatmul.bf16.gmra.mxu1 %v5772_v39 }
  0x8d   : > { %740 = vmatmul.bf16.gmra.mxu2 %v637_v40  ;;  %v5923_v40 = vld [vmem:[%s6839_s1 + $0x268] sm:$0xff]  ;;  %v1784_v44 = vrot.slane %v1782_v38, 1 }
  0x8e   : > { %1006 = vmatmul.bf16.gmra.mxu3 %v903_v41  ;;  %2280 = vmatpush.bf16.msra.mxu1 %v5923_v40  ;;  %v1514_v41 = vor.u32 %v1512_v35, %v1510_v15  ;;  %v1530_v35 = vor.u32 %v1528_v29, %v1526_v7 }
  0x8f   : > { %v1785_v53 = vsel %vm577_vm0, %v1780_v43, %v1784_v44  ;;  %v1788_v8 = vor.u32 %v1786_v2, %v1784_v44  ;;  %v5849_v43 = vld [vmem:[%s6167_s20 + $0x108] sm:$0xff] }
  0x90   : > { %v1519_v52 = vsel %vm577_vm0, %v1514_v41, %v1518_v42  ;;  %v5833_v42 = vld [vmem:[%s6167_s20 + $0xb8] sm:$0xff] }
  0x92   : > { %2281 = vmatpush.bf16.msra.mxu1 %v5922_v5 }
  0x9b   : > { %349 = vmatmul.bf16.gmra.mxu0 %v5789_v58  ;;  %v5881_v58 = vld [vmem:[%s6167_s20 + $0x108] sm:$0xff] }
  0x9c   : > { %494 = vmatmul.bf16.gmra.mxu1 %v5773_v59  ;;  %v1790_v3 = vshll.u32 %v5881_v58, 16 }
  0x9d   : > { %745 = vmatmul.bf16.gmra.mxu2 %v645_v61 }
  0x9e   : > { %1011 = vmatmul.bf16.gmra.mxu3 %v911_v62  ;;  %v1792_v9 = vrot.slane %v1790_v3, 1 }
  0xa8   : > { %v315_v20 = vpop.f32.mrf.mxu0 }
  0xa9   : > { %v460_v21 = vpop.f32.mrf.mxu1 }
  0xaa   : > { %v461_v22 = vadd.f32 %v460_v21, %v315_v20  ;;  %v5905_v20 = vld [vmem:[%s6839_s1 + $0x218] sm:$0xff] }
  0xab   : > { %1171 = vmatmul.bf16.vlgmr.msrb.gmra.mxu0 %v5830_v18  ;;  %v1793_v18 = vsel %vm577_vm0, %v1788_v8, %v1792_v9  ;;  %v5953_v21 = vld [vmem:[%s6839_s1 + $0x2d8] sm:$0xff]  ;;  %v5834_v8 = vld [vmem:[%s6167_s20 + $0xc0] sm:$0xff] }
  0xac   : > { %1366 = vmatmul.bf16.vlgmr.msrb.gmra.mxu1 %v5846_v19  ;;  %v5937_v19 = vld [vmem:[%s6839_s1 + $0x298] sm:$0xff]  ;;  %2088 = vmatpush.bf16.msra.mxu0 %v5905_v20 }
  0xad   : > { %1632 = vmatmul.bf16.vlgmr.msrb.gmra.mxu2 %v1511_v23  ;;  %v5882_v23 = vld [vmem:[%s6167_s20 + $0x110] sm:$0xff]  ;;  %2814 = vmatpush.bf16.msra.mxu3 %v5953_v21 }
  0xae   : > { %1898 = vmatmul.bf16.vlgmr.msrb.gmra.mxu3 %v1777_v24  ;;  %2548 = vmatpush.bf16.msra.mxu2 %v5937_v19  ;;  %v5884_v19 = vld [vmem:[%s6167_s20 + $0x120] sm:$0xff] }
  0xb0   : > { %v711_v30 = vpop.f32.mrf.mxu2  ;;  %v317_v33 = vpop.f32.mrf.mxu0 }
  0xb1   : > { %v977_v31 = vpop.f32.mrf.mxu3  ;;  %v751_v32 = vadd.f32 %v711_v30, %v461_v22  ;;  %v462_v34 = vpop.f32.mrf.mxu1  ;;  %v5866_v22 = vld [vmem:[%s6167_s20 + $0xc0] sm:$0xff] }
  0xb2   : > { %v1532_v30 = vshll.u32 %v5866_v22, 16  ;;  %v5921_v34 = vld [vmem:[%s6839_s1 + $0x258] sm:$0xff] }
  0xb3   : > { %v6414_v39 = vadd.f32 %v977_v31, %v751_v32  ;;  %v1794_v31 = vshrl.u32 %v5881_v58, 16  ;;  %v1798_v32 = vshll.u32 %v5882_v23, 16  ;;  %2282 = vmatpush.bf16.msra.mxu1 %v5921_v34 }
  0xb4   : > { %v1534_v36 = vrot.slane %v1532_v30, 1  ;;  %v5919_v30 = vld [vmem:[%s6839_s1 + $0x248] sm:$0xff] }
  0xb5   : > { %v1796_v37 = vor.u32 %v1794_v31, %v1792_v9  ;;  %v1800_v38 = vrot.slane %v1798_v32, 1  ;;  %v5850_v9 = vld [vmem:[%s6167_s20 + $0x110] sm:$0xff] }
  0xb7   : > { %2283 = vmatpush.bf16.msra.mxu1 %v5920_v0 }
  0xb8   : > { %v713_v45 = vpop.f32.mrf.mxu2  ;;  %v320_v49 = vpop.f32.mrf.mxu0 }
  0xb9   : > { %v979_v46 = vpop.f32.mrf.mxu3  ;;  %v465_v50 = vpop.f32.mrf.mxu1 }
  0xba   : > { %v466_v51 = vadd.f32 %v465_v50, %v320_v49  ;;  %v5936_v49 = vld [vmem:[%s6839_s1 + $0x290] sm:$0xff] }
  0xbb   : > { %1176 = vmatmul.bf16.gmra.mxu0 %v5831_v47  ;;  %v1535_v47 = vsel %vm577_vm0, %v1530_v35, %v1534_v36  ;;  %v5904_v50 = vld [vmem:[%s6839_s1 + $0x210] sm:$0xff]  ;;  %2549 = vmatpush.bf16.msra.mxu2 %v5936_v49  ;;  %v5950_v49 = vld [vmem:[%s6839_s1 + $0x2c0] sm:$0xff] }
  0xbc   : > { %1371 = vmatmul.bf16.gmra.mxu1 %v5847_v48  ;;  %v1801_v48 = vsel %vm577_vm0, %v1796_v37, %v1800_v38  ;;  %2089 = vmatpush.bf16.msra.mxu0 %v5904_v50  ;;  %v5885_v50 = vld [vmem:[%s6167_s20 + $0x128] sm:$0xff] }
  0xbd   : > { %1637 = vmatmul.bf16.gmra.mxu2 %v1519_v52  ;;  %v5867_v52 = vld [vmem:[%s6167_s20 + $0xc8] sm:$0xff]  ;;  %2284 = vmatpush.bf16.msra.mxu1 %v5919_v30  ;;  %v1826_v30 = vshrl.u32 %v5885_v50, 16 }
  0xbe   : > { %1903 = vmatmul.bf16.gmra.mxu3 %v1785_v53  ;;  %v5883_v53 = vld [vmem:[%s6167_s20 + $0x118] sm:$0xff] }
  0xc0   : > { %v716_v59 = vpop.f32.mrf.mxu2  ;;  %v322_v62 = vpop.f32.mrf.mxu0 }
  0xc1   : > { %v982_v60 = vpop.f32.mrf.mxu3  ;;  %v753_v61 = vadd.f32 %v716_v59, %v466_v51  ;;  %v467_v63 = vpop.f32.mrf.mxu1  ;;  %v5952_v51 = vld [vmem:[%s6839_s1 + $0x2d0] sm:$0xff]  ;;  %v1536_v59 = vshrl.u32 %v5866_v22, 16  ;;  %v1806_v62 = vshll.u32 %v5883_v53, 16 }
  0xc2   : > { %2815 = vmatpush.bf16.msra.mxu3 %v5952_v51 }
  0xc3   : > { %v6434_v4 = vadd.f32 %v982_v60, %v753_v61  ;;  %v1540_v60 = vshll.u32 %v5867_v52, 16  ;;  %v1802_v61 = vshrl.u32 %v5882_v23, 16  ;;  %v1538_v1 = vor.u32 %v1536_v59, %v1534_v36 }
  0xc4   : > { %v1808_v5 = vrot.slane %v1806_v62, 1  ;;  %v1822_v59 = vshll.u32 %v5885_v50, 16  ;;  %v5942_v50 = vld [vmem:[%s6167_s20 + $0x58] sm:$0xff] }
  0xc5   : > { %v1542_v2 = vrot.slane %v1540_v60, 1  ;;  %v1804_v3 = vor.u32 %v1802_v61, %v1800_v38  ;;  %v5835_v38 = vld [vmem:[%s6167_s20 + $0xc8] sm:$0xff]  ;;  %v5918_v61 = vld [vmem:[%s6839_s1 + $0x240] sm:$0xff] }
  0xc6   : > { %2285 = vmatpush.bf16.msra.mxu1 %v5918_v61 }
  0xc8   : > { %v718_v10 = vpop.f32.mrf.mxu2  ;;  %v325_v14 = vpop.f32.mrf.mxu0 }
  0xc9   : > { %v984_v11 = vpop.f32.mrf.mxu3  ;;  %v470_v15 = vpop.f32.mrf.mxu1 }
  0xca   : > { %v471_v16 = vadd.f32 %v470_v15, %v325_v14  ;;  %v1809_v14 = vsel %vm577_vm0, %v1804_v3, %v1808_v5  ;;  %v5935_v15 = vld [vmem:[%s6839_s1 + $0x288] sm:$0xff]  ;;  %v4846_v3 = vld [vmem:[%s6167_s20 + $0xe0] sm:$0x1] }
  0xcb   : > { %1181 = vmatmul.bf16.gmra.mxu0 %v5832_v12  ;;  %2550 = vmatpush.bf16.msra.mxu2 %v5935_v15  ;;  %v1490_v15 = vunpack.c.l.b16 %v4846_v3 }
  0xcc   : > { %1376 = vmatmul.bf16.gmra.mxu1 %v5848_v13  ;;  %v1543_v13 = vsel %vm577_vm0, %v1538_v1, %v1542_v2 }
  0xcd   : > { %1642 = vmatmul.bf16.gmra.mxu2 %v1527_v17  ;;  %v5951_v17 = vld [vmem:[%s6839_s1 + $0x2c8] sm:$0xff] }
  0xce   : > { %1908 = vmatmul.bf16.gmra.mxu3 %v1793_v18  ;;  %v5868_v18 = vld [vmem:[%s6167_s20 + $0xd0] sm:$0xff] }
  0xcf   : > { %2816 = vmatpush.bf16.msra.mxu3 %v5951_v17  ;;  %v6005_v17 = vld [vmem:[%s6839_s1 + $0x3b8] sm:$0xff] }
  0xd0   : > { %v721_v24 = vpop.f32.mrf.mxu2  ;;  %v327_v27 = vpop.f32.mrf.mxu0 }
  0xd1   : > { %v987_v25 = vpop.f32.mrf.mxu3  ;;  %v755_v26 = vadd.f32 %v721_v24, %v471_v16  ;;  %v472_v28 = vpop.f32.mrf.mxu1  ;;  %v5903_v16 = vld [vmem:[%s6839_s1 + $0x208] sm:$0xff]  ;;  %v1810_v27 = vshrl.u32 %v5883_v53, 16 }
  0xd2   : > { %2090 = vmatpush.bf16.msra.mxu0 %v5903_v16  ;;  %v1814_v28 = vshll.u32 %v5884_v19, 16 }
  0xd3   : > { %v6454_v33 = vadd.f32 %v987_v25, %v755_v26  ;;  %v1544_v25 = vshrl.u32 %v5867_v52, 16  ;;  %v1548_v26 = vshll.u32 %v5868_v18, 16  ;;  %v1812_v34 = vor.u32 %v1810_v27, %v1808_v5  ;;  %2817 = vmatpush.bf16.msra.mxu3 %v5950_v49  ;;  %v4943_v5 = vld [vmem:[%s6167_s20 + $0x130] sm:$0x1] }
  0xd4   : > { %v1816_v35 = vrot.slane %v1814_v28, 1  ;;  %v1756_v16 = vunpack.c.l.b16 %v4943_v5  ;;  %v2687_v5 = vshrl.u32 %v5942_v50, 16 }
  0xd5   : > { %v1546_v31 = vor.u32 %v1544_v25, %v1542_v2  ;;  %v1550_v32 = vrot.slane %v1548_v26, 1  ;;  %v1824_v2 = vrot.slane %v1822_v59, 1 }
  0xd8   : > { %v723_v40 = vpop.f32.mrf.mxu2  ;;  %v330_v44 = vpop.f32.mrf.mxu0 }
  0xd9   : > { %v989_v41 = vpop.f32.mrf.mxu3  ;;  %v475_v45 = vpop.f32.mrf.mxu1  ;;  %v5851_v40 = vld [vmem:[%s6167_s20 + $0x118] sm:$0xff] }
  0xda   : > { %v476_v46 = vadd.f32 %v475_v45, %v330_v44  ;;  %v1551_v44 = vsel %vm577_vm0, %v1546_v31, %v1550_v32  ;;  %v1817_v45 = vsel %vm577_vm0, %v1812_v34, %v1816_v35  ;;  %v5989_v34 = vld [vmem:[%s6839_s1 + $0x378] sm:$0xff] }
  0xdb   : > { %1186 = vmatmul.bf16.gmra.mxu0 %v5833_v42  ;;  %3198 = vmatpush.bf16.msrb.mxu1 %v5989_v34 }
  0xdc   : > { %1381 = vmatmul.bf16.gmra.mxu1 %v5849_v43 }
  0xdd   : > { %1647 = vmatmul.bf16.gmra.mxu2 %v1535_v47  ;;  %v5934_v47 = vld [vmem:[%s6839_s1 + $0x280] sm:$0xff] }
  0xde   : > { %1913 = vmatmul.bf16.gmra.mxu3 %v1801_v48  ;;  %v5902_v48 = vld [vmem:[%s6839_s1 + $0x200] sm:$0xff]  ;;  %2551 = vmatpush.bf16.msra.mxu2 %v5934_v47 }
  0xdf   : > { %2091 = vmatpush.bf16.msra.mxu0 %v5902_v48 }
  0xe0   : > { %v726_v54 = vpop.f32.mrf.mxu2  ;;  %v332_v57 = vpop.f32.mrf.mxu0 }
  0xe1   : > { %v992_v55 = vpop.f32.mrf.mxu3  ;;  %v757_v56 = vadd.f32 %v726_v54, %v476_v46  ;;  %v477_v58 = vpop.f32.mrf.mxu1  ;;  %v6504_v46 = vld [vmem:[%s6167_s20 + $0xd8] sm:$0xff] }
  0xe2   : > { %v1556_v57 = vshll.u32 %v6504_v46, 16  ;;  %v1818_v58 = vshrl.u32 %v5884_v19, 16  ;;  %v6021_v19 = vld [vmem:[%s6839_s1 + $0x3f8] sm:$0xff]  ;;  %3464 = vmatpush.bf16.msrb.mxu2 %v6005_v17  ;;  %v1560_v27 = vshrl.u32 %v6504_v46, 16  ;;  %v5926_v46 = vld [vmem:[%s6167_s20 + $0x8] sm:$0xff] }
  0xe3   : > { %v6474_v63 = vadd.f32 %v992_v55, %v757_v56  ;;  %v1552_v56 = vshrl.u32 %v5868_v18, 16  ;;  %v5973_v18 = vld [vmem:[%s6839_s1 + $0x338] sm:$0xff]  ;;  %3730 = vmatpush.bf16.msrb.mxu3 %v6021_v19 }
  0xe4   : > { %v1558_v0 = vrot.slane %v1556_v57, 1  ;;  %v1820_v1 = vor.u32 %v1818_v58, %v1816_v35  ;;  %3004 = vmatpush.bf16.msrb.mxu0 %v5973_v18  ;;  %v2689_v57 = vshll.u32 %v5942_v50, 16  ;;  %v5910_v17 = vld [vmem:[%s6167_s20 + $0x58] sm:$0xff]  ;;  %v5911_v50 = vld [vmem:[%s6167_s20 + $0x60] sm:$0xff] }
  0xe5   : > { %v1554_v62 = vor.u32 %v1552_v56, %v1550_v32  ;;  %v5943_v56 = vld [vmem:[%s6167_s20 + $0x60] sm:$0xff] }
  0xe6   : > { %v1562_v35 = vor.u32 %v1560_v27, %v1558_v0  ;;  %v5944_v27 = vld [vmem:[%s6167_s20 + $0x68] sm:$0xff] }
  0xe8   : > { %v728_v6 = vpop.f32.mrf.mxu2  ;;  %v335_v10 = vpop.f32.mrf.mxu0 }
  0xe9   : > { %v994_v7 = vpop.f32.mrf.mxu3  ;;  %v480_v11 = vpop.f32.mrf.mxu1 }
  0xea   : > { %v481_v12 = vadd.f32 %v480_v11, %v335_v10 }
  0xeb   : > { %1191 = vmatmul.bf16.gmra.mxu0 %v5834_v8  ;;  %v5836_v8 = vld [vmem:[%s6167_s20 + $0xd0] sm:$0xff] }
  0xec   : > { %1386 = vmatmul.bf16.gmra.mxu1 %v5850_v9  ;;  %v5852_v9 = vld [vmem:[%s6167_s20 + $0x120] sm:$0xff] }
  0xed   : > { %1652 = vmatmul.bf16.gmra.mxu2 %v1543_v13 }
  0xee   : > { %1918 = vmatmul.bf16.gmra.mxu3 %v1809_v14  ;;  %v1825_v14 = vsel %vm577_vm0, %v1820_v1, %v1824_v2  ;;  %v2421_v1 = vshrl.u32 %v5926_v46, 16 }
  0xf0   : > { %v731_v20 = vpop.f32.mrf.mxu2  ;;  %v337_v23 = vpop.f32.mrf.mxu0 }
  0xf1   : > { %v997_v21 = vpop.f32.mrf.mxu3  ;;  %v759_v22 = vadd.f32 %v731_v20, %v481_v12  ;;  %v482_v24 = vpop.f32.mrf.mxu1  ;;  %v1559_v12 = vsel %vm577_vm0, %v1554_v62, %v1558_v0  ;;  %v1499_v20 = vpack.c.b16 %v1490_v15, %v1490_v15 }
  0xf3   : > { %v6494_v29 = vadd.f32 %v997_v21, %v759_v22  ;;  %v1765_v21 = vpack.c.b16 %v1756_v16, %v1756_v16  ;;  %v1564_v28 = vshll.u32 %v1499_v20, 16  ;;  %v5894_v16 = vld [vmem:[%s6167_s20 + $0x8] sm:$0xff] }
  0xf5   : > { %v1830_v31 = vshll.u32 %v1765_v21, 16 }
  0xf8   : > { %v733_v36 = vpop.f32.mrf.mxu2  ;;  %v340_v41 = vpop.f32.mrf.mxu0 }
  0xf9   : > { %v999_v37 = vpop.f32.mrf.mxu3  ;;  %v485_v42 = vpop.f32.mrf.mxu1  ;;  %v1566_v36 = vrot.slane %v1564_v28, 1 }
  0xfa   : > { %v486_v43 = vadd.f32 %v485_v42, %v340_v41  ;;  %v1828_v37 = vor.u32 %v1826_v30, %v1824_v2  ;;  %v5837_v42 = vld [vmem:[%s6167_s20 + $0xd8] sm:$0xff] }
  0xfb   : > { %1196 = vmatmul.bf16.gmra.mxu0 %v5835_v38  ;;  %v1832_v38 = vrot.slane %v1830_v31, 1  ;;  %v1567_v48 = vsel %vm577_vm0, %v1562_v35, %v1566_v36 }
  0xfc   : > { %1391 = vmatmul.bf16.gmra.mxu1 %v5851_v40 }
  0xfd   : > { %1657 = vmatmul.bf16.gmra.mxu2 %v1551_v44  ;;  %v1833_v49 = vsel %vm577_vm0, %v1828_v37, %v1832_v38  ;;  %v2698_v38 = vshrl.u32 %v5943_v56, 16 }
  0xfe   : > { %1923 = vmatmul.bf16.gmra.mxu3 %v1817_v45 }
 0x100   : > { %v736_v51 = vpop.f32.mrf.mxu2  ;;  %v342_v54 = vpop.f32.mrf.mxu0 }
 0x101   : > { %v1002_v52 = vpop.f32.mrf.mxu3  ;;  %v761_v53 = vadd.f32 %v736_v51, %v486_v43  ;;  %v487_v55 = vpop.f32.mrf.mxu1  ;;  %v5853_v43 = vld [vmem:[%s6167_s20 + $0x128] sm:$0xff]  ;;  %v2423_v51 = vshll.u32 %v5926_v46, 16  ;;  %v6020_v54 = vld [vmem:[%s6839_s1 + $0x3f0] sm:$0xff] }
 0x102   : > { %v5927_v55 = vld [vmem:[%s6167_s20 + $0x10] sm:$0xff]  ;;  %3731 = vmatpush.bf16.msrb.mxu3 %v6020_v54 }
 0x103   : > { %v6517_v60 = vadd.f32 %v1002_v52, %v761_v53  ;;  %v6004_v52 = vld [vmem:[%s6839_s1 + $0x3b0] sm:$0xff]  ;;  %v2425_v2 = vrot.slane %v2423_v51, 1  ;;  %v2428_v3 = vshll.u32 %v5927_v55, 16  ;;  %v2432_v36 = vshrl.u32 %v5927_v55, 16 }
 0x104   : > { %v5972_v53 = vld [vmem:[%s6839_s1 + $0x330] sm:$0xff]  ;;  %3465 = vmatpush.bf16.msrb.mxu2 %v6004_v52 }
 0x105   : > { %3005 = vmatpush.bf16.msrb.mxu0 %v5972_v53 }
 0x108   : > { %v738_v6 = vpop.f32.mrf.mxu2  ;;  %v345_v10 = vpop.f32.mrf.mxu0 }
 0x109   : > { %v1004_v7 = vpop.f32.mrf.mxu3  ;;  %v490_v11 = vpop.f32.mrf.mxu1  ;;  %v2691_v6 = vrot.slane %v2689_v57, 1  ;;  %v6002_v57 = vld [vmem:[%s6839_s1 + $0x3a0] sm:$0xff] }
 0x10a   : > { %v491_v13 = vadd.f32 %v490_v11, %v345_v10  ;;  %v2694_v7 = vshll.u32 %v5943_v56, 16  ;;  %v2426_v10 = vor.u32 %v2425_v2, %v2421_v1  ;;  %v2430_v11 = vrot.slane %v2428_v3, 1 }
 0x10b   : > { %1201 = vmatmul.bf16.gmra.mxu0 %v5836_v8 }
 0x10c   : > { %1396 = vmatmul.bf16.gmra.mxu1 %v5852_v9  ;;  %v5988_v9 = vld [vmem:[%s6839_s1 + $0x370] sm:$0xff]  ;;  %v2431_v21 = vsel %vm577_vm0, %v2426_v10, %v2430_v11 }
 0x10d   : > { %1662 = vmatmul.bf16.gmra.mxu2 %v1559_v12  ;;  %3199 = vmatpush.bf16.msrb.mxu1 %v5988_v9  ;;  %v2692_v12 = vor.u32 %v2691_v6, %v2687_v5 }
 0x10e   : > { %1928 = vmatmul.bf16.gmra.mxu3 %v1825_v14 }
 0x110   : > { %v741_v22 = vpop.f32.mrf.mxu2  ;;  %v347_v25 = vpop.f32.mrf.mxu0 }
 0x111   : > { %v1007_v23 = vpop.f32.mrf.mxu3  ;;  %v763_v24 = vadd.f32 %v741_v22, %v491_v13  ;;  %v492_v26 = vpop.f32.mrf.mxu1  ;;  %v2696_v13 = vrot.slane %v2694_v7, 1  ;;  %v5971_v25 = vld [vmem:[%s6839_s1 + $0x328] sm:$0xff]  ;;  %v2706_v7 = vshrl.u32 %v5944_v27, 16 }
 0x112   : > { %v5928_v26 = vld [vmem:[%s6167_s20 + $0x18] sm:$0xff]  ;;  %3006 = vmatpush.bf16.msrb.mxu0 %v5971_v25 }
 0x113   : > { %v6538_v32 = vadd.f32 %v1007_v23, %v763_v24  ;;  %v2697_v22 = vsel %vm577_vm0, %v2692_v12, %v2696_v13  ;;  %v6003_v24 = vld [vmem:[%s6839_s1 + $0x3a8] sm:$0xff]  ;;  %v2436_v37 = vshll.u32 %v5928_v26, 16  ;;  %v2440_v5 = vshrl.u32 %v5928_v26, 16  ;;  %v5969_v26 = vld [vmem:[%s6839_s1 + $0x318] sm:$0xff] }
 0x114   : > { %3466 = vmatpush.bf16.msrb.mxu2 %v6003_v24 }
 0x118   : > { %v743_v40 = vpop.f32.mrf.mxu2  ;;  %v350_v44 = vpop.f32.mrf.mxu0  ;;  %3467 = vmatpush.bf16.msrb.mxu2 %v6002_v57 }
 0x119   : > { %v1009_v41 = vpop.f32.mrf.mxu3  ;;  %v495_v45 = vpop.f32.mrf.mxu1  ;;  %v2702_v40 = vshll.u32 %v5944_v27, 16  ;;  %v5930_v27 = vld [vmem:[%s6167_s20 + $0x28] sm:$0xff] }
 0x11a   : > { %v496_v47 = vadd.f32 %v495_v45, %v350_v44  ;;  %v2438_v44 = vrot.slane %v2436_v37, 1  ;;  %v2700_v45 = vor.u32 %v2698_v38, %v2696_v13  ;;  %v2452_v38 = vshll.u32 %v5930_v27, 16 }
 0x11b   : > { %1206 = vmatmul.bf16.gmra.mxu0 %v5837_v42  ;;  %v5987_v42 = vld [vmem:[%s6839_s1 + $0x368] sm:$0xff]  ;;  %v2704_v46 = vrot.slane %v2702_v40, 1 }
 0x11c   : > { %1401 = vmatmul.bf16.gmra.mxu1 %v5853_v43  ;;  %v2434_v43 = vor.u32 %v2432_v36, %v2430_v11  ;;  %v5986_v11 = vld [vmem:[%s6839_s1 + $0x360] sm:$0xff]  ;;  %v2442_v12 = vor.u32 %v2440_v5, %v2438_v44 }
 0x11d   : > { %1667 = vmatmul.bf16.gmra.mxu2 %v1567_v48  ;;  %3200 = vmatpush.bf16.msrb.mxu1 %v5987_v42  ;;  %v2705_v55 = vsel %vm577_vm0, %v2700_v45, %v2704_v46 }
 0x11e   : > { %1933 = vmatmul.bf16.gmra.mxu3 %v1833_v49  ;;  %v5895_v49 = vld [vmem:[%s6167_s20 + $0x10] sm:$0xff]  ;;  %v2439_v54 = vsel %vm577_vm0, %v2434_v43, %v2438_v44  ;;  %v5985_v44 = vld [vmem:[%s6839_s1 + $0x358] sm:$0xff] }
 0x120   : > { %v746_v58 = vpop.f32.mrf.mxu2  ;;  %v352_v62 = vpop.f32.mrf.mxu0 }
 0x121   : > { %v1012_v59 = vpop.f32.mrf.mxu3  ;;  %v765_v61 = vadd.f32 %v746_v58, %v496_v47  ;;  %v497_v0 = vpop.f32.mrf.mxu1  ;;  %v5970_v58 = vld [vmem:[%s6839_s1 + $0x320] sm:$0xff]  ;;  %3201 = vmatpush.bf16.msrb.mxu1 %v5986_v11 }
 0x122   : > { %3007 = vmatpush.bf16.msrb.mxu0 %v5970_v58 }
 0x123   : > { %v6560_v8 = vadd.f32 %v1012_v59, %v765_v61  ;;  %v5929_v59 = vld [vmem:[%s6167_s20 + $0x20] sm:$0xff]  ;;  %v5945_v61 = vld [vmem:[%s6167_s20 + $0x70] sm:$0xff] }
 0x124   : > { %v2444_v6 = vshll.u32 %v5929_v59, 16  ;;  %v2710_v9 = vshll.u32 %v5945_v61, 16  ;;  %v2448_v37 = vshrl.u32 %v5929_v59, 16  ;;  %v2714_v40 = vshrl.u32 %v5945_v61, 16  ;;  %v5968_v59 = vld [vmem:[%s6839_s1 + $0x310] sm:$0xff] }
 0x125   : > { %3202 = vmatpush.bf16.msrb.mxu1 %v5985_v44  ;;  %v5931_v61 = vld [vmem:[%s6167_s20 + $0x30] sm:$0xff] }
 0x126   : > { %v2446_v13 = vrot.slane %v2444_v6, 1  ;;  %3008 = vmatpush.bf16.msrb.mxu0 %v5969_v26  ;;  %v2456_v6 = vshrl.u32 %v5930_v27, 16  ;;  %v5967_v27 = vld [vmem:[%s6839_s1 + $0x308] sm:$0xff] }
 0x128   : > { %v748_v14 = vpop.f32.mrf.mxu2  ;;  %v1172_v18 = vpop.f32.mrf.mxu0  ;;  %v2450_v45 = vor.u32 %v2448_v37, %v2446_v13 }
 0x129   : > { %v1014_v15 = vpop.f32.mrf.mxu3  ;;  %v1367_v19 = vpop.f32.mrf.mxu1  ;;  %v1212_v20 = vadd.f32 %v1172_v18, %v6414_v39  ;;  %v6019_v39 = vld [vmem:[%s6839_s1 + $0x3e8] sm:$0xff]  ;;  %v2708_v14 = vor.u32 %v2706_v7, %v2704_v46  ;;  %v5896_v18 = vld [vmem:[%s6167_s20 + $0x18] sm:$0xff]  ;;  %v2454_v46 = vrot.slane %v2452_v38, 1  ;;  %v2460_v7 = vshll.u32 %v5931_v61, 16 }
 0x12a   : > { %3732 = vmatpush.bf16.msrb.mxu3 %v6019_v39  ;;  %v2712_v15 = vrot.slane %v2710_v9, 1  ;;  %v6001_v39 = vld [vmem:[%s6839_s1 + $0x398] sm:$0xff]  ;;  %3009 = vmatpush.bf16.msrb.mxu0 %v5968_v59  ;;  %v2464_v38 = vshrl.u32 %v5931_v61, 16  ;;  %v5998_v61 = vld [vmem:[%s6839_s1 + $0x380] sm:$0xff] }
 0x12b   : > { %v1407_v23 = vadd.f32 %v1367_v19, %v1212_v20  ;;  %2092 = vmatmul.bf16.vlgmr.msra.gmra.mxu0 %v5894_v16  ;;  %v5912_v19 = vld [vmem:[%s6167_s20 + $0x68] sm:$0xff]  ;;  %3468 = vmatpush.bf16.msrb.mxu2 %v6001_v39 }
 0x12c   : > { %2286 = vmatmul.bf16.vlgmr.msra.gmra.mxu1 %v5910_v17  ;;  %v2713_v24 = vsel %vm577_vm0, %v2708_v14, %v2712_v15  ;;  %v2458_v14 = vor.u32 %v2456_v6, %v2454_v46 }
 0x12d   : > { %2552 = vmatmul.bf16.vlgmr.msra.gmra.mxu2 %v2431_v21 }
 0x12e   : > { %2818 = vmatmul.bf16.vlgmr.msra.gmra.mxu3 %v2697_v22  ;;  %3010 = vmatpush.bf16.msrb.mxu0 %v5967_v27 }
 0x130   : > { %v1633_v28 = vpop.f32.mrf.mxu2  ;;  %v1174_v34 = vpop.f32.mrf.mxu0 }
 0x131   : > { %v1899_v30 = vpop.f32.mrf.mxu3  ;;  %v1673_v31 = vadd.f32 %v1633_v28, %v1407_v23  ;;  %v1369_v35 = vpop.f32.mrf.mxu1  ;;  %v2447_v23 = vsel %vm577_vm0, %v2442_v12, %v2446_v13  ;;  %v5946_v28 = vld [vmem:[%s6167_s20 + $0x78] sm:$0xff]  ;;  %v5984_v13 = vld [vmem:[%s6839_s1 + $0x350] sm:$0xff] }
 0x132   : > { %v2718_v42 = vshll.u32 %v5946_v28, 16  ;;  %v2722_v9 = vshrl.u32 %v5946_v28, 16  ;;  %3203 = vmatpush.bf16.msrb.mxu1 %v5984_v13  ;;  %v5932_v28 = vld [vmem:[%s6167_s20 + $0x38] sm:$0xff] }
 0x133   : > { %v6581_v41 = vadd.f32 %v1899_v30, %v1673_v31 }
 0x138   : > { %v1635_v47 = vpop.f32.mrf.mxu2  ;;  %v1177_v51 = vpop.f32.mrf.mxu0 }
 0x139   : > { %v1901_v48 = vpop.f32.mrf.mxu3  ;;  %v1372_v52 = vpop.f32.mrf.mxu1  ;;  %v1214_v53 = vadd.f32 %v1177_v51, %v6434_v4  ;;  %v6018_v4 = vld [vmem:[%s6839_s1 + $0x3e0] sm:$0xff]  ;;  %v2716_v47 = vor.u32 %v2714_v40, %v2712_v15  ;;  %v2462_v15 = vrot.slane %v2460_v7, 1  ;;  %v2468_v40 = vshll.u32 %v5932_v28, 16 }
 0x13a   : > { %3733 = vmatpush.bf16.msrb.mxu3 %v6018_v4  ;;  %v2720_v48 = vrot.slane %v2718_v42, 1  ;;  %v5897_v51 = vld [vmem:[%s6167_s20 + $0x20] sm:$0xff]  ;;  %v6000_v4 = vld [vmem:[%s6839_s1 + $0x390] sm:$0xff]  ;;  %v2472_v7 = vshrl.u32 %v5932_v28, 16 }
 0x13b   : > { %v1409_v56 = vadd.f32 %v1372_v52, %v1214_v53  ;;  %2097 = vmatmul.bf16.gmra.mxu0 %v5895_v49  ;;  %v5913_v52 = vld [vmem:[%s6167_s20 + $0x70] sm:$0xff]  ;;  %3469 = vmatpush.bf16.msrb.mxu2 %v6000_v4 }
 0x13c   : > { %2291 = vmatmul.bf16.gmra.mxu1 %v5911_v50  ;;  %v2721_v57 = vsel %vm577_vm0, %v2716_v47, %v2720_v48  ;;  %v2466_v47 = vor.u32 %v2464_v38, %v2462_v15 }
 0x13d   : > { %2557 = vmatmul.bf16.gmra.mxu2 %v2439_v54 }
 0x13e   : > { %2823 = vmatmul.bf16.gmra.mxu3 %v2705_v55 }
 0x140   : > { %v1638_v62 = vpop.f32.mrf.mxu2  ;;  %v1179_v2 = vpop.f32.mrf.mxu0 }
 0x141   : > { %v1904_v0 = vpop.f32.mrf.mxu3  ;;  %v1675_v1 = vadd.f32 %v1638_v62, %v1409_v56  ;;  %v1374_v3 = vpop.f32.mrf.mxu1  ;;  %v2455_v56 = vsel %vm577_vm0, %v2450_v45, %v2454_v46  ;;  %v5947_v62 = vld [vmem:[%s6167_s20 + $0x80] sm:$0xff]  ;;  %v5983_v46 = vld [vmem:[%s6839_s1 + $0x348] sm:$0xff] }
 0x142   : > { %v2726_v11 = vshll.u32 %v5947_v62, 16  ;;  %v2730_v42 = vshrl.u32 %v5947_v62, 16  ;;  %3204 = vmatpush.bf16.msrb.mxu1 %v5983_v46  ;;  %v5966_v62 = vld [vmem:[%s6839_s1 + $0x300] sm:$0xff] }
 0x143   : > { %v6602_v10 = vadd.f32 %v1904_v0, %v1675_v1  ;;  %3011 = vmatpush.bf16.msrb.mxu0 %v5966_v62  ;;  %v6006_v62 = vld [vmem:[%s6167_s20 + $0xf8] sm:$0xff] }
 0x148   : > { %v1640_v16 = vpop.f32.mrf.mxu2  ;;  %v1182_v20 = vpop.f32.mrf.mxu0 }
 0x149   : > { %v1906_v17 = vpop.f32.mrf.mxu3  ;;  %v1377_v21 = vpop.f32.mrf.mxu1  ;;  %v1216_v22 = vadd.f32 %v1182_v20, %v6454_v33  ;;  %v6017_v33 = vld [vmem:[%s6839_s1 + $0x3d8] sm:$0xff]  ;;  %v2724_v16 = vor.u32 %v2722_v9, %v2720_v48  ;;  %v5898_v20 = vld [vmem:[%s6167_s20 + $0x28] sm:$0xff]  ;;  %v2470_v48 = vrot.slane %v2468_v40, 1 }
 0x14a   : > { %3734 = vmatpush.bf16.msrb.mxu3 %v6017_v33  ;;  %v2728_v17 = vrot.slane %v2726_v11, 1  ;;  %v5999_v33 = vld [vmem:[%s6839_s1 + $0x388] sm:$0xff] }
 0x14b   : > { %v1411_v25 = vadd.f32 %v1377_v21, %v1216_v22  ;;  %2102 = vmatmul.bf16.gmra.mxu0 %v5896_v18  ;;  %v5914_v21 = vld [vmem:[%s6167_s20 + $0x78] sm:$0xff]  ;;  %3470 = vmatpush.bf16.msrb.mxu2 %v5999_v33 }
 0x14c   : > { %2296 = vmatmul.bf16.gmra.mxu1 %v5912_v19  ;;  %v2729_v39 = vsel %vm577_vm0, %v2724_v16, %v2728_v17  ;;  %v2474_v16 = vor.u32 %v2472_v7, %v2470_v48 }
 0x14d   : > { %2562 = vmatmul.bf16.gmra.mxu2 %v2447_v23 }
 0x14e   : > { %2828 = vmatmul.bf16.gmra.mxu3 %v2713_v24 }
 0x14f   : > { %3471 = vmatpush.bf16.msrb.mxu2 %v5998_v61 }
 0x150   : > { %v1643_v30 = vpop.f32.mrf.mxu2  ;;  %v1184_v35 = vpop.f32.mrf.mxu0 }
 0x151   : > { %v1909_v31 = vpop.f32.mrf.mxu3  ;;  %v1677_v34 = vadd.f32 %v1643_v30, %v1411_v25  ;;  %v1379_v36 = vpop.f32.mrf.mxu1  ;;  %v2463_v25 = vsel %vm577_vm0, %v2458_v14, %v2462_v15  ;;  %v5948_v30 = vld [vmem:[%s6167_s20 + $0x88] sm:$0xff]  ;;  %v5982_v15 = vld [vmem:[%s6839_s1 + $0x340] sm:$0xff] }
 0x152   : > { %v2734_v44 = vshll.u32 %v5948_v30, 16  ;;  %v2738_v11 = vshrl.u32 %v5948_v30, 16  ;;  %3205 = vmatpush.bf16.msrb.mxu1 %v5982_v15 }
 0x153   : > { %v6623_v43 = vadd.f32 %v1909_v31, %v1677_v34 }
 0x158   : > { %v1645_v49 = vpop.f32.mrf.mxu2  ;;  %v1187_v53 = vpop.f32.mrf.mxu0 }
 0x159   : > { %v1911_v50 = vpop.f32.mrf.mxu3  ;;  %v1382_v54 = vpop.f32.mrf.mxu1  ;;  %v1218_v55 = vadd.f32 %v1187_v53, %v6474_v63  ;;  %v6016_v63 = vld [vmem:[%s6839_s1 + $0x3d0] sm:$0xff]  ;;  %v2732_v49 = vor.u32 %v2730_v42, %v2728_v17 }
 0x15a   : > { %3735 = vmatpush.bf16.msrb.mxu3 %v6016_v63  ;;  %v2736_v50 = vrot.slane %v2734_v44, 1  ;;  %v5899_v53 = vld [vmem:[%s6167_s20 + $0x30] sm:$0xff]  ;;  %v5933_v63 = vld [vmem:[%s6167_s20 + $0x40] sm:$0xff] }
 0x15b   : > { %v1413_v58 = vadd.f32 %v1382_v54, %v1218_v55  ;;  %2107 = vmatmul.bf16.gmra.mxu0 %v5897_v51  ;;  %v5915_v54 = vld [vmem:[%s6167_s20 + $0x80] sm:$0xff]  ;;  %v2476_v9 = vshll.u32 %v5933_v63, 16 }
 0x15c   : > { %2301 = vmatmul.bf16.gmra.mxu1 %v5913_v52  ;;  %v2737_v4 = vsel %vm577_vm0, %v2732_v49, %v2736_v50 }
 0x15d   : > { %2567 = vmatmul.bf16.gmra.mxu2 %v2455_v56  ;;  %v2478_v17 = vrot.slane %v2476_v9, 1 }
 0x15e   : > { %2833 = vmatmul.bf16.gmra.mxu3 %v2721_v57 }
 0x15f   : > { %v2479_v33 = vsel %vm577_vm0, %v2474_v16, %v2478_v17  ;;  %v3607_v16 = vshrl.u32 %v6006_v62, 16 }
 0x160   : > { %v1648_v0 = vpop.f32.mrf.mxu2  ;;  %v1189_v3 = vpop.f32.mrf.mxu0 }
 0x161   : > { %v1914_v1 = vpop.f32.mrf.mxu3  ;;  %v1679_v2 = vadd.f32 %v1648_v0, %v1413_v58  ;;  %v1384_v5 = vpop.f32.mrf.mxu1  ;;  %v2471_v58 = vsel %vm577_vm0, %v2466_v47, %v2470_v48  ;;  %v5949_v0 = vld [vmem:[%s6167_s20 + $0x90] sm:$0xff] }
 0x162   : > { %v2742_v13 = vshll.u32 %v5949_v0, 16  ;;  %v2746_v46 = vshrl.u32 %v5949_v0, 16 }
 0x163   : > { %v6644_v12 = vadd.f32 %v1914_v1, %v1679_v2 }
 0x168   : > { %v1650_v18 = vpop.f32.mrf.mxu2  ;;  %v1192_v22 = vpop.f32.mrf.mxu0 }
 0x169   : > { %v1916_v19 = vpop.f32.mrf.mxu3  ;;  %v1387_v23 = vpop.f32.mrf.mxu1  ;;  %v1220_v24 = vadd.f32 %v1192_v22, %v6494_v29  ;;  %v6015_v29 = vld [vmem:[%s6839_s1 + $0x3c8] sm:$0xff]  ;;  %v2740_v18 = vor.u32 %v2738_v11, %v2736_v50 }
 0x16a   : > { %3736 = vmatpush.bf16.msrb.mxu3 %v6015_v29  ;;  %v2744_v19 = vrot.slane %v2742_v13, 1 }
 0x16b   : > { %v1415_v26 = vadd.f32 %v1387_v23, %v1220_v24  ;;  %2112 = vmatmul.bf16.gmra.mxu0 %v5898_v20  ;;  %v2359_v20 = vld [vmem:[%s6167_s20 + $0x48] sm:$0x1]  ;;  %v5900_v24 = vld [vmem:[%s6167_s20 + $0x38] sm:$0xff] }
 0x16c   : > { %2306 = vmatmul.bf16.gmra.mxu1 %v5914_v21  ;;  %v5296_v21 = vld [vmem:[%s6167_s20 + $0x98] sm:$0x1]  ;;  %v2745_v29 = vsel %vm577_vm0, %v2740_v18, %v2744_v19  ;;  %v2410_v28 = vunpack.c.l.b16 %v2359_v20 }
 0x16d   : > { %2572 = vmatmul.bf16.gmra.mxu2 %v2463_v25  ;;  %v5916_v25 = vld [vmem:[%s6167_s20 + $0x88] sm:$0xff]  ;;  %v2676_v30 = vunpack.c.l.b16 %v5296_v21 }
 0x16e   : > { %2838 = vmatmul.bf16.gmra.mxu3 %v2729_v39 }
 0x170   : > { %v1653_v31 = vpop.f32.mrf.mxu2  ;;  %v1194_v36 = vpop.f32.mrf.mxu0 }
 0x171   : > { %v1919_v34 = vpop.f32.mrf.mxu3  ;;  %v1681_v35 = vadd.f32 %v1653_v31, %v1415_v26  ;;  %v1389_v37 = vpop.f32.mrf.mxu1 }
 0x173   : > { %v6665_v45 = vadd.f32 %v1919_v34, %v1681_v35  ;;  %v2419_v34 = vpack.c.b16 %v2410_v28, %v2410_v28  ;;  %v2685_v35 = vpack.c.b16 %v2676_v30, %v2676_v30 }
 0x175   : > { %v2484_v44 = vshll.u32 %v2419_v34, 16  ;;  %v2750_v47 = vshll.u32 %v2685_v35, 16  ;;  %v5992_v34 = vld [vmem:[%s6167_s20 + $0xb8] sm:$0xff]  ;;  %v6008_v35 = vld [vmem:[%s6167_s20 + $0x108] sm:$0xff] }
 0x177   : > { %v2486_v50 = vrot.slane %v2484_v44, 1 }
 0x178   : > { %v1655_v51 = vpop.f32.mrf.mxu2  ;;  %v1197_v55 = vpop.f32.mrf.mxu0 }
 0x179   : > { %v1921_v52 = vpop.f32.mrf.mxu3  ;;  %v1392_v56 = vpop.f32.mrf.mxu1  ;;  %v1222_v57 = vadd.f32 %v1197_v55, %v6517_v60  ;;  %v6014_v60 = vld [vmem:[%s6839_s1 + $0x3c0] sm:$0xff]  ;;  %v2748_v51 = vor.u32 %v2746_v46, %v2744_v19  ;;  %v3622_v46 = vshll.u32 %v6008_v35, 16 }
 0x17a   : > { %3737 = vmatpush.bf16.msrb.mxu3 %v6014_v60  ;;  %v2752_v52 = vrot.slane %v2750_v47, 1  ;;  %v5901_v55 = vld [vmem:[%s6167_s20 + $0x40] sm:$0xff] }
 0x17b   : > { %v1417_v59 = vadd.f32 %v1392_v56, %v1222_v57  ;;  %2117 = vmatmul.bf16.gmra.mxu0 %v5899_v53  ;;  %v5917_v56 = vld [vmem:[%s6167_s20 + $0x90] sm:$0xff] }
 0x17c   : > { %2311 = vmatmul.bf16.gmra.mxu1 %v5915_v54  ;;  %v2753_v61 = vsel %vm577_vm0, %v2748_v51, %v2752_v52  ;;  %v3624_v52 = vrot.slane %v3622_v46, 1 }
 0x17d   : > { %2577 = vmatmul.bf16.gmra.mxu2 %v2471_v58 }
 0x17e   : > { %2843 = vmatmul.bf16.gmra.mxu3 %v2737_v4  ;;  %v5990_v4 = vld [vmem:[%s6167_s20 + $0xa8] sm:$0xff] }
 0x17f   : > { %v3343_v0 = vshll.u32 %v5990_v4, 16  ;;  %v3341_v11 = vshrl.u32 %v5990_v4, 16 }
 0x180   : > { %v1658_v1 = vpop.f32.mrf.mxu2  ;;  %v1199_v5 = vpop.f32.mrf.mxu0 }
 0x181   : > { %v1924_v2 = vpop.f32.mrf.mxu3  ;;  %v1683_v3 = vadd.f32 %v1658_v1, %v1417_v59  ;;  %v1394_v6 = vpop.f32.mrf.mxu1  ;;  %v5991_v1 = vld [vmem:[%s6167_s20 + $0xb0] sm:$0xff]  ;;  %v3345_v13 = vrot.slane %v3343_v0, 1 }
 0x182   : > { %v3348_v15 = vshll.u32 %v5991_v1, 16 }
 0x183   : > { %v6686_v14 = vadd.f32 %v1924_v2, %v1683_v3  ;;  %v6007_v2 = vld [vmem:[%s6167_s20 + $0x100] sm:$0xff]  ;;  %v3609_v3 = vshll.u32 %v6006_v62, 16  ;;  %v3346_v20 = vor.u32 %v3345_v13, %v3341_v11 }
 0x184   : > { %v3614_v18 = vshll.u32 %v6007_v2, 16  ;;  %v3350_v21 = vrot.slane %v3348_v15, 1  ;;  %v3618_v44 = vshrl.u32 %v6007_v2, 16  ;;  %v5993_v62 = vld [vmem:[%s6167_s20 + $0xc0] sm:$0xff] }
 0x186   : > { %v3351_v28 = vsel %vm577_vm0, %v3346_v20, %v3350_v21  ;;  %v5960_v20 = vld [vmem:[%s6167_s20 + $0xb8] sm:$0xff] }
 0x188   : > { %v1660_v22 = vpop.f32.mrf.mxu2  ;;  %v1202_v39 = vpop.f32.mrf.mxu0 }
 0x189   : > { %v1926_v23 = vpop.f32.mrf.mxu3  ;;  %v1397_v26 = vpop.f32.mrf.mxu1  ;;  %v1224_v27 = vadd.f32 %v1202_v39, %v6538_v32  ;;  %v2480_v32 = vshrl.u32 %v5933_v63, 16  ;;  %v5958_v39 = vld [vmem:[%s6167_s20 + $0xa8] sm:$0xff] }
 0x18a   : > { %v3616_v23 = vrot.slane %v3614_v18, 1 }
 0x18b   : > { %v1419_v31 = vadd.f32 %v1397_v26, %v1224_v27  ;;  %2122 = vmatmul.bf16.gmra.mxu0 %v5900_v24  ;;  %v2482_v49 = vor.u32 %v2480_v32, %v2478_v17  ;;  %v3611_v17 = vrot.slane %v3609_v3, 1  ;;  %v5974_v26 = vld [vmem:[%s6167_s20 + $0xf8] sm:$0xff]  ;;  %v3352_v32 = vshrl.u32 %v5991_v1, 16 }
 0x18c   : > { %2316 = vmatmul.bf16.gmra.mxu1 %v5916_v25  ;;  %v3620_v51 = vor.u32 %v3618_v44, %v3616_v23 }
 0x18d   : > { %2582 = vmatmul.bf16.gmra.mxu2 %v2479_v33  ;;  %v2487_v63 = vsel %vm577_vm0, %v2482_v49, %v2486_v50  ;;  %v3612_v22 = vor.u32 %v3611_v17, %v3607_v16  ;;  %v3354_v49 = vor.u32 %v3352_v32, %v3350_v21  ;;  %v5976_v21 = vld [vmem:[%s6167_s20 + $0x108] sm:$0xff] }
 0x18e   : > { %2848 = vmatmul.bf16.gmra.mxu3 %v2745_v29 }
 0x18f   : > { %v3617_v30 = vsel %vm577_vm0, %v3612_v22, %v3616_v23 }
 0x190   : > { %v1663_v36 = vpop.f32.mrf.mxu2  ;;  %v1204_v40 = vpop.f32.mrf.mxu0 }
 0x191   : > { %v1929_v37 = vpop.f32.mrf.mxu3  ;;  %v1685_v38 = vadd.f32 %v1663_v36, %v1419_v31  ;;  %v1399_v42 = vpop.f32.mrf.mxu1 }
 0x193   : > { %v6698_v48 = vadd.f32 %v1929_v37, %v1685_v38 }
 0x198   : > { %v1665_v53 = vpop.f32.mrf.mxu2  ;;  %v1207_v57 = vpop.f32.mrf.mxu0 }
 0x199   : > { %v1931_v54 = vpop.f32.mrf.mxu3  ;;  %v1402_v58 = vpop.f32.mrf.mxu1  ;;  %v1226_v59 = vadd.f32 %v1207_v57, %v6560_v8 }
 0x19b   : > { %v1421_v60 = vadd.f32 %v1402_v58, %v1226_v59  ;;  %2127 = vmatmul.bf16.gmra.mxu0 %v5901_v55  ;;  %v5959_v55 = vld [vmem:[%s6167_s20 + $0xb0] sm:$0xff] }
 0x19c   : > { %2321 = vmatmul.bf16.gmra.mxu1 %v5917_v56  ;;  %v5975_v56 = vld [vmem:[%s6167_s20 + $0x100] sm:$0xff] }
 0x19d   : > { %2587 = vmatmul.bf16.gmra.mxu2 %v2487_v63  ;;  %v3625_v63 = vsel %vm577_vm0, %v3620_v51, %v3624_v52 }
 0x19e   : > { %2853 = vmatmul.bf16.gmra.mxu3 %v2753_v61 }
 0x1a0   : > { %v1668_v5 = vpop.f32.mrf.mxu2  ;;  %v1209_v9 = vpop.f32.mrf.mxu0 }
 0x1a1   : > { %v1934_v6 = vpop.f32.mrf.mxu3  ;;  %v1687_v7 = vadd.f32 %v1668_v5, %v1421_v60  ;;  %v1404_v8 = vpop.f32.mrf.mxu1  ;;  %v6009_v60 = vld [vmem:[%s6167_s20 + $0x110] sm:$0xff] }
 0x1a2   : > { %v3630_v9 = vshll.u32 %v6009_v60, 16 }
 0x1a3   : > { %v6709_v19 = vadd.f32 %v1934_v6, %v1687_v7  ;;  %v3360_v6 = vshrl.u32 %v5992_v34, 16  ;;  %v3626_v7 = vshrl.u32 %v6008_v35, 16  ;;  %v3368_v35 = vshrl.u32 %v5993_v62, 16 }
 0x1a4   : > { %v3632_v16 = vrot.slane %v3630_v9, 1 }
 0x1a5   : > { %v3628_v15 = vor.u32 %v3626_v7, %v3624_v52 }
 0x1a8   : > { %v1670_v24 = vpop.f32.mrf.mxu2  ;;  %v2093_v33 = vpop.f32.mrf.mxu0 }
 0x1a9   : > { %v1936_v25 = vpop.f32.mrf.mxu3  ;;  %v2287_v27 = vpop.f32.mrf.mxu1  ;;  %v2133_v29 = vadd.f32 %v2093_v33, %v6581_v41  ;;  %v3356_v41 = vshll.u32 %v5992_v34, 16  ;;  %v5994_v33 = vld [vmem:[%s6167_s20 + $0xc8] sm:$0xff] }
 0x1ab   : > { %v2327_v31 = vadd.f32 %v2287_v27, %v2133_v29  ;;  %3012 = vmatmul.bf16.vlgmr.msrb.gmra.mxu0 %v5958_v39  ;;  %v3358_v50 = vrot.slane %v3356_v41, 1  ;;  %v3633_v39 = vsel %vm577_vm0, %v3628_v15, %v3632_v16  ;;  %v6010_v27 = vld [vmem:[%s6167_s20 + $0x118] sm:$0xff] }
 0x1ac   : > { %3206 = vmatmul.bf16.vlgmr.msrb.gmra.mxu1 %v5974_v26 }
 0x1ad   : > { %3472 = vmatmul.bf16.vlgmr.msrb.gmra.mxu2 %v3351_v28  ;;  %v3359_v59 = vsel %vm577_vm0, %v3354_v49, %v3358_v50  ;;  %v3362_v11 = vor.u32 %v3360_v6, %v3358_v50  ;;  %v5961_v49 = vld [vmem:[%s6167_s20 + $0xc0] sm:$0xff]  ;;  %v5977_v50 = vld [vmem:[%s6167_s20 + $0x110] sm:$0xff] }
 0x1ae   : > { %3738 = vmatmul.bf16.vlgmr.msrb.gmra.mxu3 %v3617_v30 }
 0x1b0   : > { %v2553_v36 = vpop.f32.mrf.mxu2  ;;  %v2095_v40 = vpop.f32.mrf.mxu0 }
 0x1b1   : > { %v2819_v37 = vpop.f32.mrf.mxu3  ;;  %v2593_v38 = vadd.f32 %v2553_v36, %v2327_v31  ;;  %v2289_v42 = vpop.f32.mrf.mxu1  ;;  %v3634_v36 = vshrl.u32 %v6009_v60, 16  ;;  %v3376_v60 = vshrl.u32 %v5994_v33, 16 }
 0x1b3   : > { %v6718_v47 = vadd.f32 %v2819_v37, %v2593_v38  ;;  %v3638_v37 = vshll.u32 %v6010_v27, 16  ;;  %v3636_v32 = vor.u32 %v3634_v36, %v3632_v16 }
 0x1b5   : > { %v3640_v41 = vrot.slane %v3638_v37, 1 }
 0x1b8   : > { %v2555_v53 = vpop.f32.mrf.mxu2  ;;  %v2098_v57 = vpop.f32.mrf.mxu0 }
 0x1b9   : > { %v2821_v54 = vpop.f32.mrf.mxu3  ;;  %v2292_v58 = vpop.f32.mrf.mxu1  ;;  %v2135_v4 = vadd.f32 %v2098_v57, %v6602_v10  ;;  %v3364_v10 = vshll.u32 %v5993_v62, 16  ;;  %v5995_v57 = vld [vmem:[%s6167_s20 + $0xd0] sm:$0xff] }
 0x1bb   : > { %v2329_v61 = vadd.f32 %v2292_v58, %v2135_v4  ;;  %3017 = vmatmul.bf16.gmra.mxu0 %v5959_v55  ;;  %v3366_v13 = vrot.slane %v3364_v10, 1  ;;  %v3641_v55 = vsel %vm577_vm0, %v3636_v32, %v3640_v41  ;;  %v6011_v58 = vld [vmem:[%s6167_s20 + $0x120] sm:$0xff] }
 0x1bc   : > { %3211 = vmatmul.bf16.gmra.mxu1 %v5975_v56 }
 0x1bd   : > { %3477 = vmatmul.bf16.gmra.mxu2 %v3359_v59  ;;  %v3367_v25 = vsel %vm577_vm0, %v3362_v11, %v3366_v13  ;;  %v3370_v40 = vor.u32 %v3368_v35, %v3366_v13  ;;  %v5962_v11 = vld [vmem:[%s6167_s20 + $0xc8] sm:$0xff]  ;;  %v5978_v13 = vld [vmem:[%s6167_s20 + $0x118] sm:$0xff] }
 0x1be   : > { %3743 = vmatmul.bf16.gmra.mxu3 %v3625_v63 }
 0x1c0   : > { %v2558_v0 = vpop.f32.mrf.mxu2  ;;  %v2100_v3 = vpop.f32.mrf.mxu0 }
 0x1c1   : > { %v2824_v1 = vpop.f32.mrf.mxu3  ;;  %v2595_v2 = vadd.f32 %v2558_v0, %v2329_v61  ;;  %v2294_v5 = vpop.f32.mrf.mxu1  ;;  %v3642_v0 = vshrl.u32 %v6010_v27, 16  ;;  %v3384_v27 = vshrl.u32 %v5995_v57, 16 }
 0x1c3   : > { %v6727_v8 = vadd.f32 %v2824_v1, %v2595_v2  ;;  %v3646_v1 = vshll.u32 %v6011_v58, 16  ;;  %v3644_v6 = vor.u32 %v3642_v0, %v3640_v41  ;;  %v5585_v0 = vld [vmem:[%s6167_s20 + $0xe8] sm:$0x1] }
 0x1c5   : > { %v3648_v10 = vrot.slane %v3646_v1, 1  ;;  %v5682_v1 = vld [vmem:[%s6167_s20 + $0x138] sm:$0x1] }
 0x1c8   : > { %v2560_v17 = vpop.f32.mrf.mxu2  ;;  %v2103_v22 = vpop.f32.mrf.mxu0 }
 0x1c9   : > { %v2826_v18 = vpop.f32.mrf.mxu3  ;;  %v2297_v23 = vpop.f32.mrf.mxu1  ;;  %v2137_v24 = vadd.f32 %v2103_v22, %v6623_v43  ;;  %v3372_v43 = vshll.u32 %v5994_v33, 16  ;;  %v5996_v22 = vld [vmem:[%s6167_s20 + $0xd8] sm:$0xff] }
 0x1cb   : > { %v2331_v26 = vadd.f32 %v2297_v23, %v2137_v24  ;;  %3022 = vmatmul.bf16.gmra.mxu0 %v5960_v20  ;;  %v3374_v42 = vrot.slane %v3372_v43, 1  ;;  %v3649_v20 = vsel %vm577_vm0, %v3644_v6, %v3648_v10  ;;  %v6012_v23 = vld [vmem:[%s6167_s20 + $0x128] sm:$0xff]  ;;  %v5964_v6 = vld [vmem:[%s6167_s20 + $0xd8] sm:$0xff] }
 0x1cc   : > { %3216 = vmatmul.bf16.gmra.mxu1 %v5976_v21 }
 0x1cd   : > { %3482 = vmatmul.bf16.gmra.mxu2 %v3367_v25  ;;  %v3375_v54 = vsel %vm577_vm0, %v3370_v40, %v3374_v42  ;;  %v3378_v3 = vor.u32 %v3376_v60, %v3374_v42  ;;  %v5963_v40 = vld [vmem:[%s6167_s20 + $0xd0] sm:$0xff]  ;;  %v5979_v42 = vld [vmem:[%s6167_s20 + $0x120] sm:$0xff] }
 0x1ce   : > { %3748 = vmatmul.bf16.gmra.mxu3 %v3633_v39 }
 0x1d0   : > { %v2563_v29 = vpop.f32.mrf.mxu2  ;;  %v2105_v31 = vpop.f32.mrf.mxu0 }
 0x1d1   : > { %v2829_v28 = vpop.f32.mrf.mxu3  ;;  %v2597_v30 = vadd.f32 %v2563_v29, %v2331_v26  ;;  %v2299_v34 = vpop.f32.mrf.mxu1  ;;  %v3650_v29 = vshrl.u32 %v6011_v58, 16 }
 0x1d3   : > { %v6736_v38 = vadd.f32 %v2829_v28, %v2597_v30  ;;  %v3654_v28 = vshll.u32 %v6012_v23, 16  ;;  %v3652_v35 = vor.u32 %v3650_v29, %v3648_v10  ;;  %v5980_v10 = vld [vmem:[%s6167_s20 + $0x128] sm:$0xff] }
 0x1d5   : > { %v3656_v43 = vrot.slane %v3654_v28, 1 }
 0x1d8   : > { %v2565_v44 = vpop.f32.mrf.mxu2  ;;  %v2108_v51 = vpop.f32.mrf.mxu0 }
 0x1d9   : > { %v2831_v46 = vpop.f32.mrf.mxu3  ;;  %v2302_v52 = vpop.f32.mrf.mxu1  ;;  %v2139_v53 = vadd.f32 %v2108_v51, %v6644_v12  ;;  %v3380_v12 = vshll.u32 %v5995_v57, 16  ;;  %v5997_v51 = vld [vmem:[%s6167_s20 + $0xe0] sm:$0xff]  ;;  %v3392_v57 = vshrl.u32 %v5996_v22, 16 }
 0x1da   : > { %v3396_v58 = vshll.u32 %v5997_v51, 16 }
 0x1db   : > { %v2333_v56 = vadd.f32 %v2302_v52, %v2139_v53  ;;  %3027 = vmatmul.bf16.gmra.mxu0 %v5961_v49  ;;  %v3382_v5 = vrot.slane %v3380_v12, 1  ;;  %v3657_v49 = vsel %vm577_vm0, %v3652_v35, %v3656_v43  ;;  %v6013_v52 = vld [vmem:[%s6167_s20 + $0x130] sm:$0xff] }
 0x1dc   : > { %3221 = vmatmul.bf16.gmra.mxu1 %v5977_v50 }
 0x1dd   : > { %3487 = vmatmul.bf16.gmra.mxu2 %v3375_v54  ;;  %v3383_v18 = vsel %vm577_vm0, %v3378_v3, %v3382_v5  ;;  %v3386_v31 = vor.u32 %v3384_v27, %v3382_v5 }
 0x1de   : > { %3753 = vmatmul.bf16.gmra.mxu3 %v3641_v55 }
 0x1e0   : > { %v2568_v4 = vpop.f32.mrf.mxu2  ;;  %v2110_v61 = vpop.f32.mrf.mxu0 }
 0x1e1   : > { %v2834_v59 = vpop.f32.mrf.mxu3  ;;  %v2599_v63 = vadd.f32 %v2568_v4, %v2333_v56  ;;  %v2304_v62 = vpop.f32.mrf.mxu1  ;;  %v3658_v4 = vshrl.u32 %v6012_v23, 16 }
 0x1e2   : > { %v3398_v62 = vrot.slane %v3396_v58, 1 }
 0x1e3   : > { %v6745_v2 = vadd.f32 %v2834_v59, %v2599_v63  ;;  %v3662_v59 = vshll.u32 %v6013_v52, 16  ;;  %v3660_v60 = vor.u32 %v3658_v4, %v3656_v43 }
 0x1e5   : > { %v3664_v12 = vrot.slane %v3662_v59, 1 }
 0x1e8   : > { %v2570_v7 = vpop.f32.mrf.mxu2  ;;  %v2113_v15 = vpop.f32.mrf.mxu0 }
 0x1e9   : > { %v2836_v9 = vpop.f32.mrf.mxu3  ;;  %v2307_v16 = vpop.f32.mrf.mxu1  ;;  %v2141_v17 = vadd.f32 %v2113_v15, %v6665_v45  ;;  %v3388_v45 = vshll.u32 %v5996_v22, 16  ;;  %v3665_v15 = vsel %vm577_vm0, %v3660_v60, %v3664_v12 }
 0x1eb   : > { %v2335_v21 = vadd.f32 %v2307_v16, %v2141_v17  ;;  %3032 = vmatmul.bf16.gmra.mxu0 %v5962_v11  ;;  %v3390_v34 = vrot.slane %v3388_v45, 1  ;;  %v3330_v16 = vunpack.c.l.b16 %v5585_v0  ;;  %v3596_v17 = vunpack.c.l.b16 %v5682_v1 }
 0x1ec   : > { %3226 = vmatmul.bf16.gmra.mxu1 %v5978_v13 }
 0x1ed   : > { %3492 = vmatmul.bf16.gmra.mxu2 %v3383_v18  ;;  %v3391_v46 = vsel %vm577_vm0, %v3386_v31, %v3390_v34  ;;  %v3394_v61 = vor.u32 %v3392_v57, %v3390_v34 }
 0x1ee   : > { %3758 = vmatmul.bf16.gmra.mxu3 %v3649_v20  ;;  %v3339_v20 = vpack.c.b16 %v3330_v16, %v3330_v16 }
 0x1ef   : > { %v3399_v11 = vsel %vm577_vm0, %v3394_v61, %v3398_v62 }
 0x1f0   : > { %v2573_v24 = vpop.f32.mrf.mxu2  ;;  %v2115_v26 = vpop.f32.mrf.mxu0 }
 0x1f1   : > { %v2839_v25 = vpop.f32.mrf.mxu3  ;;  %v2601_v39 = vadd.f32 %v2573_v24, %v2335_v21  ;;  %v2309_v33 = vpop.f32.mrf.mxu1  ;;  %v3605_v21 = vpack.c.b16 %v3596_v17, %v3596_v17  ;;  %v3400_v26 = vshrl.u32 %v5997_v51, 16 }
 0x1f2   : > { %v3666_v33 = vshrl.u32 %v6013_v52, 16 }
 0x1f3   : > { %v6754_v30 = vadd.f32 %v2839_v25, %v2601_v39  ;;  %v3670_v27 = vshll.u32 %v3605_v21, 16  ;;  %v3402_v29 = vor.u32 %v3400_v26, %v3398_v62 }
 0x1f4   : > { %v3668_v31 = vor.u32 %v3666_v33, %v3664_v12 }
 0x1f5   : > { %v3672_v34 = vrot.slane %v3670_v27, 1 }
 0x1f8   : > { %v2575_v36 = vpop.f32.mrf.mxu2  ;;  %v2118_v32 = vpop.f32.mrf.mxu0 }
 0x1f9   : > { %v2841_v37 = vpop.f32.mrf.mxu3  ;;  %v2312_v41 = vpop.f32.mrf.mxu1  ;;  %v2143_v44 = vadd.f32 %v2118_v32, %v6686_v14  ;;  %v5965_v36 = vld [vmem:[%s6167_s20 + $0xe0] sm:$0xff] }
 0x1fa   : > { %v5981_v37 = vld [vmem:[%s6167_s20 + $0x130] sm:$0xff]  ;;  %s5765_s20 = sshll.u32 %s6842_s10, 6 }
 0x1fb   : > { %v2337_v50 = vadd.f32 %v2312_v41, %v2143_v44  ;;  %3037 = vmatmul.bf16.gmra.mxu0 %v5963_v40  ;;  %v3673_v44 = vsel %vm577_vm0, %v3668_v31, %v3672_v34  ;;  %s143_s22 = scalar_lea.vmem %s6840_s2, %s5765_s20 }
 0x1fc   : > { %3231 = vmatmul.bf16.gmra.mxu1 %v5979_v42 }
 0x1fd   : > { %3497 = vmatmul.bf16.gmra.mxu2 %v3391_v46 }
 0x1fe   : > { %3763 = vmatmul.bf16.gmra.mxu3 %v3657_v49 }
 0x200   : > { %v2578_v53 = vpop.f32.mrf.mxu2  ;;  %v2120_v56 = vpop.f32.mrf.mxu0 }
 0x201   : > { %v2844_v54 = vpop.f32.mrf.mxu3  ;;  %v2603_v55 = vadd.f32 %v2578_v53, %v2337_v50  ;;  %v2314_v14 = vpop.f32.mrf.mxu1 }
 0x203   : > { %v6763_v63 = vadd.f32 %v2844_v54, %v2603_v55 }
 0x208   : > { %v2580_v3 = vpop.f32.mrf.mxu2  ;;  %v2123_v7 = vpop.f32.mrf.mxu0 }
 0x209   : > { %v2846_v5 = vpop.f32.mrf.mxu3  ;;  %v2317_v9 = vpop.f32.mrf.mxu1  ;;  %v2145_v13 = vadd.f32 %v2123_v7, %v6698_v48  ;;  %v3404_v48 = vshll.u32 %v3339_v20, 16 }
 0x20b   : > { %v2339_v18 = vadd.f32 %v2317_v9, %v2145_v13  ;;  %3042 = vmatmul.bf16.gmra.mxu0 %v5964_v6  ;;  %v3406_v28 = vrot.slane %v3404_v48, 1 }
 0x20c   : > { %3236 = vmatmul.bf16.gmra.mxu1 %v5980_v10 }
 0x20d   : > { %3502 = vmatmul.bf16.gmra.mxu2 %v3399_v11  ;;  %v3407_v41 = vsel %vm577_vm0, %v3402_v29, %v3406_v28 }
 0x20e   : > { %3768 = vmatmul.bf16.gmra.mxu3 %v3665_v15 }
 0x210   : > { %v2583_v22 = vpop.f32.mrf.mxu2  ;;  %v2125_v25 = vpop.f32.mrf.mxu0 }
 0x211   : > { %v2849_v23 = vpop.f32.mrf.mxu3  ;;  %v2605_v24 = vadd.f32 %v2583_v22, %v2339_v18  ;;  %v2319_v39 = vpop.f32.mrf.mxu1 }
 0x213   : > { %v6772_v45 = vadd.f32 %v2849_v23, %v2605_v24 }
 0x218   : > { %v2585_v35 = vpop.f32.mrf.mxu2  ;;  %v2128_v40 = vpop.f32.mrf.mxu0 }
 0x219   : > { %v2851_v43 = vpop.f32.mrf.mxu3  ;;  %v2322_v42 = vpop.f32.mrf.mxu1  ;;  %v2147_v32 = vadd.f32 %v2128_v40, %v6709_v19 }
 0x21b   : > { %v2341_v46 = vadd.f32 %v2322_v42, %v2147_v32  ;;  %3047 = vmatmul.bf16.gmra.mxu0 %v5965_v36 }
 0x21c   : > { %3241 = vmatmul.bf16.gmra.mxu1 %v5981_v37 }
 0x21d   : > { %3507 = vmatmul.bf16.gmra.mxu2 %v3407_v41 }
 0x21e   : > { %3773 = vmatmul.bf16.gmra.mxu3 %v3673_v44 }
 0x220   : > { %v2588_v49 = vpop.f32.mrf.mxu2  ;;  %v2130_v52 = vpop.f32.mrf.mxu0 }
 0x221   : > { %v2854_v50 = vpop.f32.mrf.mxu3  ;;  %v2607_v51 = vadd.f32 %v2588_v49, %v2341_v46  ;;  %v2324_v53 = vpop.f32.mrf.mxu1 }
 0x223   : > { %v6779_v54 = vadd.f32 %v2854_v50, %v2607_v51 }
 0x228   : > { %v2590_v55 = vpop.f32.mrf.mxu2  ;;  %v3013_v14 = vpop.f32.mrf.mxu0 }
 0x229   : > { %v2856_v56 = vpop.f32.mrf.mxu3  ;;  %v3207_v19 = vpop.f32.mrf.mxu1  ;;  %v3053_v57 = vadd.f32 %v3013_v14, %v6718_v47 }
 0x22b   : > { %v3247_v58 = vadd.f32 %v3207_v19, %v3053_v57 }
 0x230   : > { %v3473_v4 = vpop.f32.mrf.mxu2  ;;  %v3015_v62 = vpop.f32.mrf.mxu0 }
 0x231   : > { %v3739_v59 = vpop.f32.mrf.mxu3  ;;  %v3513_v61 = vadd.f32 %v3473_v4, %v3247_v58  ;;  %v3209_v60 = vpop.f32.mrf.mxu1 }
 0x233   : > { %v6782_v12 = vadd.f32 %v3739_v59, %v3513_v61 }
 0x235   : > { %v4090_v16 = vmul.f32 %v6782_v12, %v6782_v12 }
 0x238   : > { %v3475_v0 = vpop.f32.mrf.mxu2  ;;  %v3018_v3 = vpop.f32.mrf.mxu0 }
 0x239   : > { %v3741_v1 = vpop.f32.mrf.mxu3  ;;  %v3212_v5 = vpop.f32.mrf.mxu1  ;;  %v3055_v6 = vadd.f32 %v3018_v3, %v6727_v8 }
 0x23b   : > { %v3249_v10 = vadd.f32 %v3212_v5, %v3055_v6 }
 0x240   : > { %v3478_v7 = vpop.f32.mrf.mxu2  ;;  %v3020_v13 = vpop.f32.mrf.mxu0 }
 0x241   : > { %v3744_v9 = vpop.f32.mrf.mxu3  ;;  %v3515_v11 = vadd.f32 %v3478_v7, %v3249_v10  ;;  %v3214_v47 = vpop.f32.mrf.mxu1 }
 0x243   : > { %v6785_v15 = vadd.f32 %v3744_v9, %v3515_v11 }
 0x245   : > { %v4069_v17 = vadd.f32 %v6785_v15, %v6782_v12  ;;  %v4092_v18 = vmul.f32 %v6785_v15, %v6785_v15 }
 0x247   : > { %v4107_v20 = vadd.f32 %v4092_v18, %v4090_v16 }
 0x248   : > { %v3480_v21 = vpop.f32.mrf.mxu2  ;;  %v3023_v22 = vpop.f32.mrf.mxu0 }
 0x249   : > { %v3746_v8 = vpop.f32.mrf.mxu3  ;;  %v3217_v23 = vpop.f32.mrf.mxu1  ;;  %v3057_v24 = vadd.f32 %v3023_v22, %v6736_v38 }
 0x24b   : > { %v3251_v25 = vadd.f32 %v3217_v23, %v3057_v24 }
 0x250   : > { %v3483_v39 = vpop.f32.mrf.mxu2  ;;  %v3025_v33 = vpop.f32.mrf.mxu0 }
 0x251   : > { %v3749_v26 = vpop.f32.mrf.mxu3  ;;  %v3517_v48 = vadd.f32 %v3483_v39, %v3251_v25  ;;  %v3219_v27 = vpop.f32.mrf.mxu1 }
 0x253   : > { %v6794_v29 = vadd.f32 %v3749_v26, %v3517_v48 }
 0x255   : > { %v4071_v28 = vadd.f32 %v4069_v17, %v6794_v29  ;;  %v4094_v31 = vmul.f32 %v6794_v29, %v6794_v29 }
 0x257   : > { %v4109_v34 = vadd.f32 %v4107_v20, %v4094_v31 }
 0x258   : > { %v3485_v35 = vpop.f32.mrf.mxu2  ;;  %v3028_v36 = vpop.f32.mrf.mxu0 }
 0x259   : > { %v3751_v43 = vpop.f32.mrf.mxu3  ;;  %v3222_v37 = vpop.f32.mrf.mxu1  ;;  %v3059_v38 = vadd.f32 %v3028_v36, %v6745_v2 }
 0x25b   : > { %v3253_v40 = vadd.f32 %v3222_v37, %v3059_v38 }
 0x260   : > { %v3488_v42 = vpop.f32.mrf.mxu2  ;;  %v3030_v44 = vpop.f32.mrf.mxu0 }
 0x261   : > { %v3754_v32 = vpop.f32.mrf.mxu3  ;;  %v3519_v41 = vadd.f32 %v3488_v42, %v3253_v40  ;;  %v3224_v46 = vpop.f32.mrf.mxu1 }
 0x263   : > { %v6800_v49 = vadd.f32 %v3754_v32, %v3519_v41 }
 0x265   : > { %v4073_v50 = vadd.f32 %v4071_v28, %v6800_v49  ;;  %v4096_v51 = vmul.f32 %v6800_v49, %v6800_v49 }
 0x267   : > { %v4111_v52 = vadd.f32 %v4109_v34, %v4096_v51 }
 0x268   : > { %v3490_v53 = vpop.f32.mrf.mxu2  ;;  %v3033_v56 = vpop.f32.mrf.mxu0 }
 0x269   : > { %v3756_v55 = vpop.f32.mrf.mxu3  ;;  %v3227_v14 = vpop.f32.mrf.mxu1  ;;  %v3061_v2 = vadd.f32 %v3033_v56, %v6754_v30 }
 0x26b   : > { %v3255_v19 = vadd.f32 %v3227_v14, %v3061_v2 }
 0x270   : > { %v3493_v57 = vpop.f32.mrf.mxu2  ;;  %v3035_v59 = vpop.f32.mrf.mxu0 }
 0x271   : > { %v3759_v58 = vpop.f32.mrf.mxu3  ;;  %v3521_v4 = vadd.f32 %v3493_v57, %v3255_v19  ;;  %v3229_v61 = vpop.f32.mrf.mxu1 }
 0x273   : > { %v6806_v62 = vadd.f32 %v3759_v58, %v3521_v4 }
 0x275   : > { %v4075_v60 = vadd.f32 %v4073_v50, %v6806_v62  ;;  %v4098_v0 = vmul.f32 %v6806_v62, %v6806_v62 }
 0x277   : > { %v4113_v1 = vadd.f32 %v4111_v52, %v4098_v0 }
 0x278   : > { %v3495_v3 = vpop.f32.mrf.mxu2  ;;  %v3038_v6 = vpop.f32.mrf.mxu0 }
 0x279   : > { %v3761_v5 = vpop.f32.mrf.mxu3  ;;  %v3232_v10 = vpop.f32.mrf.mxu1  ;;  %v3063_v30 = vadd.f32 %v3038_v6, %v6763_v63 }
 0x27b   : > { %v3257_v7 = vadd.f32 %v3232_v10, %v3063_v30 }
 0x280   : > { %v3498_v9 = vpop.f32.mrf.mxu2  ;;  %v3040_v47 = vpop.f32.mrf.mxu0 }
 0x281   : > { %v3764_v11 = vpop.f32.mrf.mxu3  ;;  %v3523_v13 = vadd.f32 %v3498_v9, %v3257_v7  ;;  %v3234_v16 = vpop.f32.mrf.mxu1 }
 0x283   : > { %v6812_v17 = vadd.f32 %v3764_v11, %v3523_v13 }
 0x285   : > { %v4077_v18 = vadd.f32 %v4075_v60, %v6812_v17  ;;  %v4100_v20 = vmul.f32 %v6812_v17, %v6812_v17 }
 0x287   : > { %v4115_v21 = vadd.f32 %v4113_v1, %v4100_v20 }
 0x288   : > { %v3500_v8 = vpop.f32.mrf.mxu2  ;;  %v3043_v23 = vpop.f32.mrf.mxu0 }
 0x289   : > { %v3766_v22 = vpop.f32.mrf.mxu3  ;;  %v3237_v24 = vpop.f32.mrf.mxu1  ;;  %v3065_v63 = vadd.f32 %v3043_v23, %v6772_v45 }
 0x28b   : > { %v3259_v25 = vadd.f32 %v3237_v24, %v3065_v63 }
 0x290   : > { %v3503_v39 = vpop.f32.mrf.mxu2  ;;  %v3045_v33 = vpop.f32.mrf.mxu0 }
 0x291   : > { %v3769_v26 = vpop.f32.mrf.mxu3  ;;  %v3525_v48 = vadd.f32 %v3503_v39, %v3259_v25  ;;  %v3239_v27 = vpop.f32.mrf.mxu1 }
 0x293   : > { %v6818_v28 = vadd.f32 %v3769_v26, %v3525_v48 }
 0x295   : > { %v4079_v31 = vadd.f32 %v4077_v18, %v6818_v28  ;;  %v4102_v34 = vmul.f32 %v6818_v28, %v6818_v28 }
 0x297   : > { %v4117_v35 = vadd.f32 %v4115_v21, %v4102_v34 }
 0x298   : > { %v3505_v43 = vpop.f32.mrf.mxu2  ;;  %v3048_v37 = vpop.f32.mrf.mxu0 }
 0x299   : > { %v3771_v36 = vpop.f32.mrf.mxu3  ;;  %v3242_v38 = vpop.f32.mrf.mxu1  ;;  %v3067_v45 = vadd.f32 %v3048_v37, %v6779_v54 }
 0x29b   : > { %v3261_v40 = vadd.f32 %v3242_v38, %v3067_v45 }
 0x2a0   : > { %v3508_v42 = vpop.f32.mrf.mxu2  ;;  %v3050_v44 = vpop.f32.mrf.mxu0 }
 0x2a1   : > { %v3774_v32 = vpop.f32.mrf.mxu3  ;;  %v3527_v41 = vadd.f32 %v3508_v42, %v3261_v40  ;;  %v3244_v46 = vpop.f32.mrf.mxu1 }
 0x2a3   : > { %v3793_v50 = vadd.f32 %v3774_v32, %v3527_v41 }
 0x2a5   : > { %v4081_v51 = vadd.f32 %v4079_v31, %v3793_v50  ;;  %v4104_v52 = vmul.f32 %v3793_v50, %v3793_v50 }
 0x2a7   : > { %v4083_v53 = vrot.slane %v4081_v51, 4  ;;  %v4119_v55 = vadd.f32 %v4117_v35, %v4104_v52 }
 0x2a8   : > { %v3510_v56 = vpop.f32.mrf.mxu2 }
 0x2a9   : > { %v3776_v14 = vpop.f32.mrf.mxu3  ;;  %v4084_v2 = vadd.f32 %v4083_v53, %v4081_v51  ;;  %v4121_v19 = vrot.slane %v4119_v55, 4 }
 0x2ab   : > { %v4085_v57 = vrot.slane %v4084_v2, 2  ;;  %v4122_v58 = vadd.f32 %v4121_v19, %v4119_v55 }
 0x2ad   : > { %v4086_v4 = vadd.f32 %v4085_v57, %v4084_v2  ;;  %v4123_v59 = vrot.slane %v4122_v58, 2 }
 0x2af   : > { %v4087_v54 = vrot.slane %v4086_v4, 1  ;;  %v4124_v61 = vadd.f32 %v4123_v59, %v4122_v58 }
 0x2b1   : > { %v4088_v60 = vadd.f32 %v4087_v54, %v4086_v4  ;;  %v4125_v0 = vrot.slane %v4124_v61, 1 }
 0x2b3   : > { %v4089_v1 = vmul.f32 0.015625, %v4088_v60  ;;  %v4126_v3 = vadd.f32 %v4125_v0, %v4124_v61 }
 0x2b5   : > { %v4127_v5 = vmul.f32 0.015625, %v4126_v3  ;;  %v4128_v6 = vmul.f32 %v4089_v1, %v4089_v1  ;;  %v4142_v10 = vsub.f32 %v6782_v12, %v4089_v1  ;;  %v4144_v30 = vsub.f32 %v6785_v15, %v4089_v1 }
 0x2b6   : > { %v4146_v7 = vsub.f32 %v6794_v29, %v4089_v1  ;;  %v4148_v9 = vsub.f32 %v6800_v49, %v4089_v1  ;;  %v4150_v11 = vsub.f32 %v6806_v62, %v4089_v1  ;;  %v4152_v13 = vsub.f32 %v6812_v17, %v4089_v1 }
 0x2b7   : > { %v4129_v47 = vsub.f32 %v4127_v5, %v4128_v6  ;;  %v4154_v16 = vsub.f32 %v6818_v28, %v4089_v1  ;;  %v4156_v18 = vsub.f32 %v3793_v50, %v4089_v1  ;;  %v6089_v62 = vmov 0.0|0.0  }
 0x2b8   : > { %v6024_v17 = vunpack.c.l.bf16 %v6089_v62 }
 0x2b9   : > { %v4130_v20 = vmax.f32 %v4129_v47, 0.0 }
 0x2bb   : > { %v4131_v21 = vadd.f32 1e-05, %v4130_v20 }
 0x2bd   : > { %6079 = vrsqrt.f32 %v4131_v21  ;;  %vm4138_vm2 = vweird.f32 %v4131_v21 }
 0x2c3   : > { %v6080_v8 = vpop.eup %6079 }
 0x2c4   : > { %v4133_v12 = vmul.f32 %v6080_v8, %v4131_v21  ;;  %vm4139_vm1 = vweird.f32 %v6080_v8 }
 0x2c5   : > { %vm4140_vm3 = vmor %vm4138_vm2, %vm4139_vm1 }
 0x2c6   : > { %v4134_v22 = vmul.f32 %v6080_v8, %v4133_v12 }
 0x2c8   : > { %v4135_v15 = vmul.f32 0.5, %v4134_v22 }
 0x2ca   : > { %v4136_v23 = vsub.f32 1.5, %v4135_v15 }
 0x2cc   : > { %v4137_v29 = vmul.f32 %v6080_v8, %v4136_v23 }
 0x2ce   : > { %v4141_v49 = vsel %vm4140_vm3, %v6080_v8, %v4137_v29 }
 0x2cf   : > { %v4158_v24 = vmul.f32 %v4142_v10, %v4141_v49  ;;  %v4160_v63 = vmul.f32 %v4144_v30, %v4141_v49  ;;  %v4162_v25 = vmul.f32 %v4146_v7, %v4141_v49  ;;  %v4164_v39 = vmul.f32 %v4148_v9, %v4141_v49 }
 0x2d0   : > { %v4166_v26 = vmul.f32 %v4150_v11, %v4141_v49  ;;  %v4168_v48 = vmul.f32 %v4152_v13, %v4141_v49  ;;  %v4170_v33 = vmul.f32 %v4154_v16, %v4141_v49  ;;  %v4172_v27 = vmul.f32 %v4156_v18, %v4141_v49 }
 0x2d1   : > { %v4190_v28 = vmax.f32 %v4158_v24, 0.0  ;;  %v4192_v31 = vmax.f32 %v4160_v63, 0.0  ;;  %v4194_v34 = vmax.f32 %v4162_v25, 0.0  ;;  %v4196_v35 = vmax.f32 %v4164_v39, 0.0 }
 0x2d2   : > { %v4198_v43 = vmax.f32 %v4166_v26, 0.0  ;;  %v4200_v36 = vmax.f32 %v4168_v48, 0.0  ;;  %v4202_v37 = vmax.f32 %v4170_v33, 0.0  ;;  %v4204_v42 = vmax.f32 %v4172_v27, 0.0 }
 0x2d3   : > { %v6025_v38 = vpack.c.bf16 %v6024_v17, %v4190_v28  ;;  %v6030_v45 = vpack.c.bf16 %v6024_v17, %v4192_v31  ;;  %v6035_v40 = vpack.c.bf16 %v6024_v17, %v4194_v34  ;;  %v6040_v32 = vpack.c.bf16 %v6024_v17, %v4196_v35 }
 0x2d4   : > { %v6045_v41 = vpack.c.bf16 %v6024_v17, %v4198_v43  ;;  %v6050_v44 = vpack.c.bf16 %v6024_v17, %v4200_v36  ;;  %v6055_v46 = vpack.c.bf16 %v6024_v17, %v4202_v37  ;;  %v6060_v50 = vpack.c.bf16 %v6024_v17, %v4204_v42 }
 0x2d5   : > { %6026 = vst [vmem:[%s143_s22] sm:$0xff] %v6025_v38  }
 0x2d6   : > { %6062 = vst [vmem:[%s143_s22 + $0x8] sm:$0xff] %v6030_v45  }
 0x2d7   : > { %6063 = vst [vmem:[%s143_s22 + $0x10] sm:$0xff] %v6035_v40  }
 0x2d8   : > { %6064 = vst [vmem:[%s143_s22 + $0x18] sm:$0xff] %v6040_v32  }
 0x2d9   : > { %6065 = vst [vmem:[%s143_s22 + $0x20] sm:$0xff] %v6045_v41  }
 0x2da   : > { %6066 = vst [vmem:[%s143_s22 + $0x28] sm:$0xff] %v6050_v44  }
 0x2db   : > { %6067 = vst [vmem:[%s143_s22 + $0x30] sm:$0xff] %v6055_v46  }
 0x2dc   : > { %6068 = vst [vmem:[%s143_s22 + $0x38] sm:$0xff] %v6060_v50  }
 0x2dd PF: > { %s12_s9 = sadd.s32 1, %s6087_s9  }
 0x2de   : > { %p9_p4 = scmp.ge.s32.totalorder %s12_s9, 4  }
 0x2e0   :  { %11 = sbr.rel (!%p9_p4) target bundleno = 1 (0x1), region = 76 }

</bundles_post_ra>
